<compile_context>
chip_gen: v5e
topology: v5e:2x2
jax: 0.10.0
libtpu: 0.0.40
codegen_flags: <defaults>
</compile_context>

<pallas_src>
import functools
import math

import jax
import jax.numpy as jnp
from jax import lax
from jax.experimental import pallas as pl
from jax.experimental.pallas import tpu as pltpu


# ----------------------------- Pallas kernel --------------------------------
def _spectral_norm_kernel(w_ref, u_ref,
                          sigma_ref, u_out_ref, v_out_ref,
                          *, num_iters, scale, eps):
    """Power iteration + sigma, entirely in VMEM, VPU/XLU/EUP only (no MXU).

    w_ref : (M, N)  with M = out_ch*h, N = in_ch*w
    u_ref : (1, N)
    outputs: sigma (1,1), u (1,N), v (M,1)  [v reshaped to (1,M) by wrapper]
    """
    W = w_ref[...].astype(jnp.float32)     # (M, N), single VMEM->vreg read
    u = u_ref[...].astype(jnp.float32)     # (1, N)

    v = None
    sigma_sq = None
    # Fully unrolled at trace time (num_iters is static, body is tiny).
    for _ in range(num_iters):
        # v_raw[i] = sum_j W[i, j] * u[j]   (sublane-broadcast mul + lane reduce)
        v_raw = jnp.sum(W * u, axis=1, keepdims=True)                     # (M, 1)
        v_sumsq = jnp.maximum(
            jnp.sum(v_raw * v_raw, axis=0, keepdims=True), eps)           # (1, 1)
        v = v_raw * lax.rsqrt(v_sumsq)                                    # (M, 1)
        # u_raw[j] = sum_i v[i] * W[i, j]   (lane-broadcast mul + sublane reduce)
        u_raw = jnp.sum(W * v, axis=0, keepdims=True)                     # (1, N)
        sigma_sq = jnp.maximum(
            jnp.sum(u_raw * u_raw, axis=1, keepdims=True), eps)           # (1, 1)
        u = u_raw * lax.rsqrt(sigma_sq)                                   # (1, N)

    # sigma = v_n @ W @ u_n.T == ||v_n @ W|| == sqrt(sigma_sq)  (exact identity)
    sigma_ref[...] = (scale * jnp.sqrt(sigma_sq)).astype(sigma_ref.dtype)
    u_out_ref[...] = u.astype(u_out_ref.dtype)
    v_out_ref[...] = v.astype(v_out_ref.dtype)


@functools.partial(jax.jit, static_argnames=("num_iters", "scale", "eps"))
def _run_spectral_kernel(W, u, *, num_iters, scale, eps=1e-30):
    assert num_iters >= 1
    M, N = W.shape
    vmem = pl.BlockSpec(memory_space=pltpu.MemorySpace.VMEM)
    out_shapes = (
        jax.ShapeDtypeStruct((1, 1), jnp.float32),   # scaled sigma
        jax.ShapeDtypeStruct((1, N), jnp.float32),   # updated u
        jax.ShapeDtypeStruct((M, 1), jnp.float32),   # updated v (column layout)
    )
    sigma, u_n, v_col = pl.pallas_call(
        functools.partial(_spectral_norm_kernel,
                          num_iters=num_iters, scale=scale, eps=eps),
        out_shape=out_shapes,
        in_specs=[vmem, vmem],
        out_specs=(vmem, vmem, vmem),
    )(W, u)
    # Row-vector v for the module interface (cheap XLA reshape outside kernel).
    return sigma, u_n, v_col.reshape(1, M)


# ------------------------------ Module glue ---------------------------------
def _filter_to_matrix(conv_filter):
    """(out_ch, in_ch, h, w) -> permute (0,2,1,3) -> (out_ch*h, in_ch*w)."""
    out_ch, in_ch, h, w = conv_filter.shape
    return jnp.transpose(conv_filter, (0, 2, 1, 3)).reshape(out_ch * h, in_ch * w)


class ConvFilterNorm:
    """JAX/Pallas port of the PyTorch ConvFilterNorm module (forward pass)."""

    def __init__(self, conv_filter, key):
        out_ch, in_ch, h, w = conv_filter.shape
        W = _filter_to_matrix(conv_filter).astype(jnp.float32)
        M, N = W.shape
        # __init__ of the torch module: random normalized u, 50 power iterations.
        u0 = jax.random.normal(key, (1, N), dtype=jnp.float32)
        u0 = u0 / jnp.sqrt(jnp.sum(u0 * u0, axis=1, keepdims=True))
        sigma, u, v = _run_spectral_kernel(W, u0, num_iters=50, scale=1.0)
        self.sigma = sigma[0, 0]
        self.u = u
        self.v = v

    def __call__(self, conv_filter):
        out_ch, in_ch, h, w = conv_filter.shape
        W = _filter_to_matrix(conv_filter).astype(jnp.float32)
        scale = math.sqrt(h * w)
        sigma_scaled, u, v = _run_spectral_kernel(
            W, self.u, num_iters=10, scale=scale)
        self.u = u
        self.v = v
        return sigma_scaled  # (1, 1), == sqrt(h*w) * v @ W @ u.T


# ------------------------------ Reference -----------------------------------
def _reference_forward(conv_filter, u, v, num_iters=10):
    out_ch, in_ch, h, w = conv_filter.shape
    W = _filter_to_matrix(conv_filter).astype(jnp.float32)
    u_n, v_n = u, v
    for _ in range(num_iters):
        v_n = u_n @ W.T
        v_n = v_n / jnp.linalg.norm(v_n, axis=1, keepdims=True)
        u_n = v_n @ W
        u_n = u_n / jnp.linalg.norm(u_n, axis=1, keepdims=True)
    sigma = v_n @ W @ u_n.T
    return math.sqrt(h * w) * sigma, u_n, v_n


# --------------------------------- Main --------------------------------------
if __name__ == "__main__":
    key = jax.random.PRNGKey(0)
    k_filt, k_u = jax.random.split(key)

    # Small conv filter, OIHW: out_ch=8, in_ch=4, kernel 3x3 -> W is (24, 12).
    conv_filter = jax.random.normal(k_filt, (8, 4, 3, 3), dtype=jnp.float32)

    module = ConvFilterNorm(conv_filter, k_u)
    u_before, v_before = module.u, module.v

    out = module(conv_filter)
    out = jax.block_until_ready(out)

    ref, u_ref, v_ref = _reference_forward(conv_filter, u_before, v_before,
                                           num_iters=10)

    assert out.shape == (1, 1)
    assert jnp.allclose(out, ref, rtol=1e-5, atol=1e-5), (out, ref)
    assert jnp.allclose(module.u, u_ref, rtol=1e-5, atol=1e-5)
    assert jnp.allclose(module.v, v_ref, rtol=1e-5, atol=1e-5)

    # TODO(synk): when spectral-norming many conv layers, batch all layers' W
    # matrices into one gridded pallas_call (leading "parallel" layer axis) to
    # amortize dispatch overhead and split layers across v7x's two TensorCores.

    print("KERNEL_OK")
</pallas_src>

<mosaic_0001>
module attributes {stable_mosaic.version = 11 : i64} {
  func.func @_spectral_norm_kernel(%arg0: memref<24x12xf32, #tpu.memory_space<vmem>>, %arg1: memref<1x12xf32, #tpu.memory_space<vmem>>, %arg2: memref<1x1xf32, #tpu.memory_space<vmem>>, %arg3: memref<1x12xf32, #tpu.memory_space<vmem>>, %arg4: memref<24x1xf32, #tpu.memory_space<vmem>>) attributes {dimension_semantics = [], scalar_prefetch = 0 : i64, scratch_operands = 0 : i64, tpu.core_type = #tpu.core_type<tc>} {
    %c0 = arith.constant 0 : index
    %c0_0 = arith.constant 0 : index
    %0 = vector.load %arg0[%c0, %c0_0] : memref<24x12xf32, #tpu.memory_space<vmem>>, vector<24x12xf32>
    %c0_1 = arith.constant 0 : index
    %c0_2 = arith.constant 0 : index
    %1 = vector.load %arg1[%c0_1, %c0_2] : memref<1x12xf32, #tpu.memory_space<vmem>>, vector<1x12xf32>
    %2 = vector.broadcast %1 : vector<1x12xf32> to vector<24x12xf32>
    %3 = arith.mulf %0, %2 : vector<24x12xf32>
    %cst = arith.constant dense<0.000000e+00> : vector<24xf32>
    %4 = vector.multi_reduction <add>, %3, %cst [1] : vector<24x12xf32> to vector<24xf32>
    %5 = vector.shape_cast %4 : vector<24xf32> to vector<24x1xf32>
    %6 = arith.mulf %5, %5 : vector<24x1xf32>
    %cst_3 = arith.constant dense<0.000000e+00> : vector<1xf32>
    %7 = vector.multi_reduction <add>, %6, %cst_3 [0] : vector<24x1xf32> to vector<1xf32>
    %8 = vector.shape_cast %7 : vector<1xf32> to vector<1x1xf32>
    %cst_4 = arith.constant 1.000000e-30 : f32
    %9 = vector.broadcast %cst_4 : f32 to vector<1x1xf32>
    %10 = arith.maximumf %8, %9 : vector<1x1xf32>
    %11 = math.rsqrt %10 : vector<1x1xf32>
    %12 = vector.broadcast %11 : vector<1x1xf32> to vector<24x1xf32>
    %13 = arith.mulf %5, %12 : vector<24x1xf32>
    %14 = vector.broadcast %13 : vector<24x1xf32> to vector<24x12xf32>
    %15 = arith.mulf %0, %14 : vector<24x12xf32>
    %cst_5 = arith.constant dense<0.000000e+00> : vector<12xf32>
    %16 = vector.multi_reduction <add>, %15, %cst_5 [0] : vector<24x12xf32> to vector<12xf32>
    %17 = vector.shape_cast %16 : vector<12xf32> to vector<1x12xf32>
    %18 = arith.mulf %17, %17 : vector<1x12xf32>
    %cst_6 = arith.constant dense<0.000000e+00> : vector<1xf32>
    %19 = vector.multi_reduction <add>, %18, %cst_6 [1] : vector<1x12xf32> to vector<1xf32>
    %20 = vector.shape_cast %19 : vector<1xf32> to vector<1x1xf32>
    %cst_7 = arith.constant 1.000000e-30 : f32
    %21 = vector.broadcast %cst_7 : f32 to vector<1x1xf32>
    %22 = arith.maximumf %20, %21 : vector<1x1xf32>
    %23 = math.rsqrt %22 : vector<1x1xf32>
    %24 = vector.broadcast %23 : vector<1x1xf32> to vector<1x12xf32>
    %25 = arith.mulf %17, %24 : vector<1x12xf32>
    %26 = vector.broadcast %25 : vector<1x12xf32> to vector<24x12xf32>
    %27 = arith.mulf %0, %26 : vector<24x12xf32>
    %cst_8 = arith.constant dense<0.000000e+00> : vector<24xf32>
    %28 = vector.multi_reduction <add>, %27, %cst_8 [1] : vector<24x12xf32> to vector<24xf32>
    %29 = vector.shape_cast %28 : vector<24xf32> to vector<24x1xf32>
    %30 = arith.mulf %29, %29 : vector<24x1xf32>
    %cst_9 = arith.constant dense<0.000000e+00> : vector<1xf32>
    %31 = vector.multi_reduction <add>, %30, %cst_9 [0] : vector<24x1xf32> to vector<1xf32>
    %32 = vector.shape_cast %31 : vector<1xf32> to vector<1x1xf32>
    %cst_10 = arith.constant 1.000000e-30 : f32
    %33 = vector.broadcast %cst_10 : f32 to vector<1x1xf32>
    %34 = arith.maximumf %32, %33 : vector<1x1xf32>
    %35 = math.rsqrt %34 : vector<1x1xf32>
    %36 = vector.broadcast %35 : vector<1x1xf32> to vector<24x1xf32>
    %37 = arith.mulf %29, %36 : vector<24x1xf32>
    %38 = vector.broadcast %37 : vector<24x1xf32> to vector<24x12xf32>
    %39 = arith.mulf %0, %38 : vector<24x12xf32>
    %cst_11 = arith.constant dense<0.000000e+00> : vector<12xf32>
    %40 = vector.multi_reduction <add>, %39, %cst_11 [0] : vector<24x12xf32> to vector<12xf32>
    %41 = vector.shape_cast %40 : vector<12xf32> to vector<1x12xf32>
    %42 = arith.mulf %41, %41 : vector<1x12xf32>
    %cst_12 = arith.constant dense<0.000000e+00> : vector<1xf32>
    %43 = vector.multi_reduction <add>, %42, %cst_12 [1] : vector<1x12xf32> to vector<1xf32>
    %44 = vector.shape_cast %43 : vector<1xf32> to vector<1x1xf32>
    %cst_13 = arith.constant 1.000000e-30 : f32
    %45 = vector.broadcast %cst_13 : f32 to vector<1x1xf32>
    %46 = arith.maximumf %44, %45 : vector<1x1xf32>
    %47 = math.rsqrt %46 : vector<1x1xf32>
    %48 = vector.broadcast %47 : vector<1x1xf32> to vector<1x12xf32>
    %49 = arith.mulf %41, %48 : vector<1x12xf32>
    %50 = vector.broadcast %49 : vector<1x12xf32> to vector<24x12xf32>
    %51 = arith.mulf %0, %50 : vector<24x12xf32>
    %cst_14 = arith.constant dense<0.000000e+00> : vector<24xf32>
    %52 = vector.multi_reduction <add>, %51, %cst_14 [1] : vector<24x12xf32> to vector<24xf32>
    %53 = vector.shape_cast %52 : vector<24xf32> to vector<24x1xf32>
    %54 = arith.mulf %53, %53 : vector<24x1xf32>
    %cst_15 = arith.constant dense<0.000000e+00> : vector<1xf32>
    %55 = vector.multi_reduction <add>, %54, %cst_15 [0] : vector<24x1xf32> to vector<1xf32>
    %56 = vector.shape_cast %55 : vector<1xf32> to vector<1x1xf32>
    %cst_16 = arith.constant 1.000000e-30 : f32
    %57 = vector.broadcast %cst_16 : f32 to vector<1x1xf32>
    %58 = arith.maximumf %56, %57 : vector<1x1xf32>
    %59 = math.rsqrt %58 : vector<1x1xf32>
    %60 = vector.broadcast %59 : vector<1x1xf32> to vector<24x1xf32>
    %61 = arith.mulf %53, %60 : vector<24x1xf32>
    %62 = vector.broadcast %61 : vector<24x1xf32> to vector<24x12xf32>
    %63 = arith.mulf %0, %62 : vector<24x12xf32>
    %cst_17 = arith.constant dense<0.000000e+00> : vector<12xf32>
    %64 = vector.multi_reduction <add>, %63, %cst_17 [0] : vector<24x12xf32> to vector<12xf32>
    %65 = vector.shape_cast %64 : vector<12xf32> to vector<1x12xf32>
    %66 = arith.mulf %65, %65 : vector<1x12xf32>
    %cst_18 = arith.constant dense<0.000000e+00> : vector<1xf32>
    %67 = vector.multi_reduction <add>, %66, %cst_18 [1] : vector<1x12xf32> to vector<1xf32>
    %68 = vector.shape_cast %67 : vector<1xf32> to vector<1x1xf32>
    %cst_19 = arith.constant 1.000000e-30 : f32
    %69 = vector.broadcast %cst_19 : f32 to vector<1x1xf32>
    %70 = arith.maximumf %68, %69 : vector<1x1xf32>
    %71 = math.rsqrt %70 : vector<1x1xf32>
    %72 = vector.broadcast %71 : vector<1x1xf32> to vector<1x12xf32>
    %73 = arith.mulf %65, %72 : vector<1x12xf32>
    %74 = vector.broadcast %73 : vector<1x12xf32> to vector<24x12xf32>
    %75 = arith.mulf %0, %74 : vector<24x12xf32>
    %cst_20 = arith.constant dense<0.000000e+00> : vector<24xf32>
    %76 = vector.multi_reduction <add>, %75, %cst_20 [1] : vector<24x12xf32> to vector<24xf32>
    %77 = vector.shape_cast %76 : vector<24xf32> to vector<24x1xf32>
    %78 = arith.mulf %77, %77 : vector<24x1xf32>
    %cst_21 = arith.constant dense<0.000000e+00> : vector<1xf32>
    %79 = vector.multi_reduction <add>, %78, %cst_21 [0] : vector<24x1xf32> to vector<1xf32>
    %80 = vector.shape_cast %79 : vector<1xf32> to vector<1x1xf32>
    %cst_22 = arith.constant 1.000000e-30 : f32
    %81 = vector.broadcast %cst_22 : f32 to vector<1x1xf32>
    %82 = arith.maximumf %80, %81 : vector<1x1xf32>
    %83 = math.rsqrt %82 : vector<1x1xf32>
    %84 = vector.broadcast %83 : vector<1x1xf32> to vector<24x1xf32>
    %85 = arith.mulf %77, %84 : vector<24x1xf32>
    %86 = vector.broadcast %85 : vector<24x1xf32> to vector<24x12xf32>
    %87 = arith.mulf %0, %86 : vector<24x12xf32>
    %cst_23 = arith.constant dense<0.000000e+00> : vector<12xf32>
    %88 = vector.multi_reduction <add>, %87, %cst_23 [0] : vector<24x12xf32> to vector<12xf32>
    %89 = vector.shape_cast %88 : vector<12xf32> to vector<1x12xf32>
    %90 = arith.mulf %89, %89 : vector<1x12xf32>
    %cst_24 = arith.constant dense<0.000000e+00> : vector<1xf32>
    %91 = vector.multi_reduction <add>, %90, %cst_24 [1] : vector<1x12xf32> to vector<1xf32>
    %92 = vector.shape_cast %91 : vector<1xf32> to vector<1x1xf32>
    %cst_25 = arith.constant 1.000000e-30 : f32
    %93 = vector.broadcast %cst_25 : f32 to vector<1x1xf32>
    %94 = arith.maximumf %92, %93 : vector<1x1xf32>
    %95 = math.rsqrt %94 : vector<1x1xf32>
    %96 = vector.broadcast %95 : vector<1x1xf32> to vector<1x12xf32>
    %97 = arith.mulf %89, %96 : vector<1x12xf32>
    %98 = vector.broadcast %97 : vector<1x12xf32> to vector<24x12xf32>
    %99 = arith.mulf %0, %98 : vector<24x12xf32>
    %cst_26 = arith.constant dense<0.000000e+00> : vector<24xf32>
    %100 = vector.multi_reduction <add>, %99, %cst_26 [1] : vector<24x12xf32> to vector<24xf32>
    %101 = vector.shape_cast %100 : vector<24xf32> to vector<24x1xf32>
    %102 = arith.mulf %101, %101 : vector<24x1xf32>
    %cst_27 = arith.constant dense<0.000000e+00> : vector<1xf32>
    %103 = vector.multi_reduction <add>, %102, %cst_27 [0] : vector<24x1xf32> to vector<1xf32>
    %104 = vector.shape_cast %103 : vector<1xf32> to vector<1x1xf32>
    %cst_28 = arith.constant 1.000000e-30 : f32
    %105 = vector.broadcast %cst_28 : f32 to vector<1x1xf32>
    %106 = arith.maximumf %104, %105 : vector<1x1xf32>
    %107 = math.rsqrt %106 : vector<1x1xf32>
    %108 = vector.broadcast %107 : vector<1x1xf32> to vector<24x1xf32>
    %109 = arith.mulf %101, %108 : vector<24x1xf32>
    %110 = vector.broadcast %109 : vector<24x1xf32> to vector<24x12xf32>
    %111 = arith.mulf %0, %110 : vector<24x12xf32>
    %cst_29 = arith.constant dense<0.000000e+00> : vector<12xf32>
    %112 = vector.multi_reduction <add>, %111, %cst_29 [0] : vector<24x12xf32> to vector<12xf32>
    %113 = vector.shape_cast %112 : vector<12xf32> to vector<1x12xf32>
    %114 = arith.mulf %113, %113 : vector<1x12xf32>
    %cst_30 = arith.constant dense<0.000000e+00> : vector<1xf32>
    %115 = vector.multi_reduction <add>, %114, %cst_30 [1] : vector<1x12xf32> to vector<1xf32>
    %116 = vector.shape_cast %115 : vector<1xf32> to vector<1x1xf32>
    %cst_31 = arith.constant 1.000000e-30 : f32
    %117 = vector.broadcast %cst_31 : f32 to vector<1x1xf32>
    %118 = arith.maximumf %116, %117 : vector<1x1xf32>
    %119 = math.rsqrt %118 : vector<1x1xf32>
    %120 = vector.broadcast %119 : vector<1x1xf32> to vector<1x12xf32>
    %121 = arith.mulf %113, %120 : vector<1x12xf32>
    %122 = vector.broadcast %121 : vector<1x12xf32> to vector<24x12xf32>
    %123 = arith.mulf %0, %122 : vector<24x12xf32>
    %cst_32 = arith.constant dense<0.000000e+00> : vector<24xf32>
    %124 = vector.multi_reduction <add>, %123, %cst_32 [1] : vector<24x12xf32> to vector<24xf32>
    %125 = vector.shape_cast %124 : vector<24xf32> to vector<24x1xf32>
    %126 = arith.mulf %125, %125 : vector<24x1xf32>
    %cst_33 = arith.constant dense<0.000000e+00> : vector<1xf32>
    %127 = vector.multi_reduction <add>, %126, %cst_33 [0] : vector<24x1xf32> to vector<1xf32>
    %128 = vector.shape_cast %127 : vector<1xf32> to vector<1x1xf32>
    %cst_34 = arith.constant 1.000000e-30 : f32
    %129 = vector.broadcast %cst_34 : f32 to vector<1x1xf32>
    %130 = arith.maximumf %128, %129 : vector<1x1xf32>
    %131 = math.rsqrt %130 : vector<1x1xf32>
    %132 = vector.broadcast %131 : vector<1x1xf32> to vector<24x1xf32>
    %133 = arith.mulf %125, %132 : vector<24x1xf32>
    %134 = vector.broadcast %133 : vector<24x1xf32> to vector<24x12xf32>
    %135 = arith.mulf %0, %134 : vector<24x12xf32>
    %cst_35 = arith.constant dense<0.000000e+00> : vector<12xf32>
    %136 = vector.multi_reduction <add>, %135, %cst_35 [0] : vector<24x12xf32> to vector<12xf32>
    %137 = vector.shape_cast %136 : vector<12xf32> to vector<1x12xf32>
    %138 = arith.mulf %137, %137 : vector<1x12xf32>
    %cst_36 = arith.constant dense<0.000000e+00> : vector<1xf32>
    %139 = vector.multi_reduction <add>, %138, %cst_36 [1] : vector<1x12xf32> to vector<1xf32>
    %140 = vector.shape_cast %139 : vector<1xf32> to vector<1x1xf32>
    %cst_37 = arith.constant 1.000000e-30 : f32
    %141 = vector.broadcast %cst_37 : f32 to vector<1x1xf32>
    %142 = arith.maximumf %140, %141 : vector<1x1xf32>
    %143 = math.rsqrt %142 : vector<1x1xf32>
    %144 = vector.broadcast %143 : vector<1x1xf32> to vector<1x12xf32>
    %145 = arith.mulf %137, %144 : vector<1x12xf32>
    %146 = vector.broadcast %145 : vector<1x12xf32> to vector<24x12xf32>
    %147 = arith.mulf %0, %146 : vector<24x12xf32>
    %cst_38 = arith.constant dense<0.000000e+00> : vector<24xf32>
    %148 = vector.multi_reduction <add>, %147, %cst_38 [1] : vector<24x12xf32> to vector<24xf32>
    %149 = vector.shape_cast %148 : vector<24xf32> to vector<24x1xf32>
    %150 = arith.mulf %149, %149 : vector<24x1xf32>
    %cst_39 = arith.constant dense<0.000000e+00> : vector<1xf32>
    %151 = vector.multi_reduction <add>, %150, %cst_39 [0] : vector<24x1xf32> to vector<1xf32>
    %152 = vector.shape_cast %151 : vector<1xf32> to vector<1x1xf32>
    %cst_40 = arith.constant 1.000000e-30 : f32
    %153 = vector.broadcast %cst_40 : f32 to vector<1x1xf32>
    %154 = arith.maximumf %152, %153 : vector<1x1xf32>
    %155 = math.rsqrt %154 : vector<1x1xf32>
    %156 = vector.broadcast %155 : vector<1x1xf32> to vector<24x1xf32>
    %157 = arith.mulf %149, %156 : vector<24x1xf32>
    %158 = vector.broadcast %157 : vector<24x1xf32> to vector<24x12xf32>
    %159 = arith.mulf %0, %158 : vector<24x12xf32>
    %cst_41 = arith.constant dense<0.000000e+00> : vector<12xf32>
    %160 = vector.multi_reduction <add>, %159, %cst_41 [0] : vector<24x12xf32> to vector<12xf32>
    %161 = vector.shape_cast %160 : vector<12xf32> to vector<1x12xf32>
    %162 = arith.mulf %161, %161 : vector<1x12xf32>
    %cst_42 = arith.constant dense<0.000000e+00> : vector<1xf32>
    %163 = vector.multi_reduction <add>, %162, %cst_42 [1] : vector<1x12xf32> to vector<1xf32>
    %164 = vector.shape_cast %163 : vector<1xf32> to vector<1x1xf32>
    %cst_43 = arith.constant 1.000000e-30 : f32
    %165 = vector.broadcast %cst_43 : f32 to vector<1x1xf32>
    %166 = arith.maximumf %164, %165 : vector<1x1xf32>
    %167 = math.rsqrt %166 : vector<1x1xf32>
    %168 = vector.broadcast %167 : vector<1x1xf32> to vector<1x12xf32>
    %169 = arith.mulf %161, %168 : vector<1x12xf32>
    %170 = vector.broadcast %169 : vector<1x12xf32> to vector<24x12xf32>
    %171 = arith.mulf %0, %170 : vector<24x12xf32>
    %cst_44 = arith.constant dense<0.000000e+00> : vector<24xf32>
    %172 = vector.multi_reduction <add>, %171, %cst_44 [1] : vector<24x12xf32> to vector<24xf32>
    %173 = vector.shape_cast %172 : vector<24xf32> to vector<24x1xf32>
    %174 = arith.mulf %173, %173 : vector<24x1xf32>
    %cst_45 = arith.constant dense<0.000000e+00> : vector<1xf32>
    %175 = vector.multi_reduction <add>, %174, %cst_45 [0] : vector<24x1xf32> to vector<1xf32>
    %176 = vector.shape_cast %175 : vector<1xf32> to vector<1x1xf32>
    %cst_46 = arith.constant 1.000000e-30 : f32
    %177 = vector.broadcast %cst_46 : f32 to vector<1x1xf32>
    %178 = arith.maximumf %176, %177 : vector<1x1xf32>
    %179 = math.rsqrt %178 : vector<1x1xf32>
    %180 = vector.broadcast %179 : vector<1x1xf32> to vector<24x1xf32>
    %181 = arith.mulf %173, %180 : vector<24x1xf32>
    %182 = vector.broadcast %181 : vector<24x1xf32> to vector<24x12xf32>
    %183 = arith.mulf %0, %182 : vector<24x12xf32>
    %cst_47 = arith.constant dense<0.000000e+00> : vector<12xf32>
    %184 = vector.multi_reduction <add>, %183, %cst_47 [0] : vector<24x12xf32> to vector<12xf32>
    %185 = vector.shape_cast %184 : vector<12xf32> to vector<1x12xf32>
    %186 = arith.mulf %185, %185 : vector<1x12xf32>
    %cst_48 = arith.constant dense<0.000000e+00> : vector<1xf32>
    %187 = vector.multi_reduction <add>, %186, %cst_48 [1] : vector<1x12xf32> to vector<1xf32>
    %188 = vector.shape_cast %187 : vector<1xf32> to vector<1x1xf32>
    %cst_49 = arith.constant 1.000000e-30 : f32
    %189 = vector.broadcast %cst_49 : f32 to vector<1x1xf32>
    %190 = arith.maximumf %188, %189 : vector<1x1xf32>
    %191 = math.rsqrt %190 : vector<1x1xf32>
    %192 = vector.broadcast %191 : vector<1x1xf32> to vector<1x12xf32>
    %193 = arith.mulf %185, %192 : vector<1x12xf32>
    %194 = vector.broadcast %193 : vector<1x12xf32> to vector<24x12xf32>
    %195 = arith.mulf %0, %194 : vector<24x12xf32>
    %cst_50 = arith.constant dense<0.000000e+00> : vector<24xf32>
    %196 = vector.multi_reduction <add>, %195, %cst_50 [1] : vector<24x12xf32> to vector<24xf32>
    %197 = vector.shape_cast %196 : vector<24xf32> to vector<24x1xf32>
    %198 = arith.mulf %197, %197 : vector<24x1xf32>
    %cst_51 = arith.constant dense<0.000000e+00> : vector<1xf32>
    %199 = vector.multi_reduction <add>, %198, %cst_51 [0] : vector<24x1xf32> to vector<1xf32>
    %200 = vector.shape_cast %199 : vector<1xf32> to vector<1x1xf32>
    %cst_52 = arith.constant 1.000000e-30 : f32
    %201 = vector.broadcast %cst_52 : f32 to vector<1x1xf32>
    %202 = arith.maximumf %200, %201 : vector<1x1xf32>
    %203 = math.rsqrt %202 : vector<1x1xf32>
    %204 = vector.broadcast %203 : vector<1x1xf32> to vector<24x1xf32>
    %205 = arith.mulf %197, %204 : vector<24x1xf32>
    %206 = vector.broadcast %205 : vector<24x1xf32> to vector<24x12xf32>
    %207 = arith.mulf %0, %206 : vector<24x12xf32>
    %cst_53 = arith.constant dense<0.000000e+00> : vector<12xf32>
    %208 = vector.multi_reduction <add>, %207, %cst_53 [0] : vector<24x12xf32> to vector<12xf32>
    %209 = vector.shape_cast %208 : vector<12xf32> to vector<1x12xf32>
    %210 = arith.mulf %209, %209 : vector<1x12xf32>
    %cst_54 = arith.constant dense<0.000000e+00> : vector<1xf32>
    %211 = vector.multi_reduction <add>, %210, %cst_54 [1] : vector<1x12xf32> to vector<1xf32>
    %212 = vector.shape_cast %211 : vector<1xf32> to vector<1x1xf32>
    %cst_55 = arith.constant 1.000000e-30 : f32
    %213 = vector.broadcast %cst_55 : f32 to vector<1x1xf32>
    %214 = arith.maximumf %212, %213 : vector<1x1xf32>
    %215 = math.rsqrt %214 : vector<1x1xf32>
    %216 = vector.broadcast %215 : vector<1x1xf32> to vector<1x12xf32>
    %217 = arith.mulf %209, %216 : vector<1x12xf32>
    %218 = vector.broadcast %217 : vector<1x12xf32> to vector<24x12xf32>
    %219 = arith.mulf %0, %218 : vector<24x12xf32>
    %cst_56 = arith.constant dense<0.000000e+00> : vector<24xf32>
    %220 = vector.multi_reduction <add>, %219, %cst_56 [1] : vector<24x12xf32> to vector<24xf32>
    %221 = vector.shape_cast %220 : vector<24xf32> to vector<24x1xf32>
    %222 = arith.mulf %221, %221 : vector<24x1xf32>
    %cst_57 = arith.constant dense<0.000000e+00> : vector<1xf32>
    %223 = vector.multi_reduction <add>, %222, %cst_57 [0] : vector<24x1xf32> to vector<1xf32>
    %224 = vector.shape_cast %223 : vector<1xf32> to vector<1x1xf32>
    %cst_58 = arith.constant 1.000000e-30 : f32
    %225 = vector.broadcast %cst_58 : f32 to vector<1x1xf32>
    %226 = arith.maximumf %224, %225 : vector<1x1xf32>
    %227 = math.rsqrt %226 : vector<1x1xf32>
    %228 = vector.broadcast %227 : vector<1x1xf32> to vector<24x1xf32>
    %229 = arith.mulf %221, %228 : vector<24x1xf32>
    %230 = vector.broadcast %229 : vector<24x1xf32> to vector<24x12xf32>
    %231 = arith.mulf %0, %230 : vector<24x12xf32>
    %cst_59 = arith.constant dense<0.000000e+00> : vector<12xf32>
    %232 = vector.multi_reduction <add>, %231, %cst_59 [0] : vector<24x12xf32> to vector<12xf32>
    %233 = vector.shape_cast %232 : vector<12xf32> to vector<1x12xf32>
    %234 = arith.mulf %233, %233 : vector<1x12xf32>
    %cst_60 = arith.constant dense<0.000000e+00> : vector<1xf32>
    %235 = vector.multi_reduction <add>, %234, %cst_60 [1] : vector<1x12xf32> to vector<1xf32>
    %236 = vector.shape_cast %235 : vector<1xf32> to vector<1x1xf32>
    %cst_61 = arith.constant 1.000000e-30 : f32
    %237 = vector.broadcast %cst_61 : f32 to vector<1x1xf32>
    %238 = arith.maximumf %236, %237 : vector<1x1xf32>
    %239 = math.rsqrt %238 : vector<1x1xf32>
    %240 = vector.broadcast %239 : vector<1x1xf32> to vector<1x12xf32>
    %241 = arith.mulf %233, %240 : vector<1x12xf32>
    %242 = vector.broadcast %241 : vector<1x12xf32> to vector<24x12xf32>
    %243 = arith.mulf %0, %242 : vector<24x12xf32>
    %cst_62 = arith.constant dense<0.000000e+00> : vector<24xf32>
    %244 = vector.multi_reduction <add>, %243, %cst_62 [1] : vector<24x12xf32> to vector<24xf32>
    %245 = vector.shape_cast %244 : vector<24xf32> to vector<24x1xf32>
    %246 = arith.mulf %245, %245 : vector<24x1xf32>
    %cst_63 = arith.constant dense<0.000000e+00> : vector<1xf32>
    %247 = vector.multi_reduction <add>, %246, %cst_63 [0] : vector<24x1xf32> to vector<1xf32>
    %248 = vector.shape_cast %247 : vector<1xf32> to vector<1x1xf32>
    %cst_64 = arith.constant 1.000000e-30 : f32
    %249 = vector.broadcast %cst_64 : f32 to vector<1x1xf32>
    %250 = arith.maximumf %248, %249 : vector<1x1xf32>
    %251 = math.rsqrt %250 : vector<1x1xf32>
    %252 = vector.broadcast %251 : vector<1x1xf32> to vector<24x1xf32>
    %253 = arith.mulf %245, %252 : vector<24x1xf32>
    %254 = vector.broadcast %253 : vector<24x1xf32> to vector<24x12xf32>
    %255 = arith.mulf %0, %254 : vector<24x12xf32>
    %cst_65 = arith.constant dense<0.000000e+00> : vector<12xf32>
    %256 = vector.multi_reduction <add>, %255, %cst_65 [0] : vector<24x12xf32> to vector<12xf32>
    %257 = vector.shape_cast %256 : vector<12xf32> to vector<1x12xf32>
    %258 = arith.mulf %257, %257 : vector<1x12xf32>
    %cst_66 = arith.constant dense<0.000000e+00> : vector<1xf32>
    %259 = vector.multi_reduction <add>, %258, %cst_66 [1] : vector<1x12xf32> to vector<1xf32>
    %260 = vector.shape_cast %259 : vector<1xf32> to vector<1x1xf32>
    %cst_67 = arith.constant 1.000000e-30 : f32
    %261 = vector.broadcast %cst_67 : f32 to vector<1x1xf32>
    %262 = arith.maximumf %260, %261 : vector<1x1xf32>
    %263 = math.rsqrt %262 : vector<1x1xf32>
    %264 = vector.broadcast %263 : vector<1x1xf32> to vector<1x12xf32>
    %265 = arith.mulf %257, %264 : vector<1x12xf32>
    %266 = vector.broadcast %265 : vector<1x12xf32> to vector<24x12xf32>
    %267 = arith.mulf %0, %266 : vector<24x12xf32>
    %cst_68 = arith.constant dense<0.000000e+00> : vector<24xf32>
    %268 = vector.multi_reduction <add>, %267, %cst_68 [1] : vector<24x12xf32> to vector<24xf32>
    %269 = vector.shape_cast %268 : vector<24xf32> to vector<24x1xf32>
    %270 = arith.mulf %269, %269 : vector<24x1xf32>
    %cst_69 = arith.constant dense<0.000000e+00> : vector<1xf32>
    %271 = vector.multi_reduction <add>, %270, %cst_69 [0] : vector<24x1xf32> to vector<1xf32>
    %272 = vector.shape_cast %271 : vector<1xf32> to vector<1x1xf32>
    %cst_70 = arith.constant 1.000000e-30 : f32
    %273 = vector.broadcast %cst_70 : f32 to vector<1x1xf32>
    %274 = arith.maximumf %272, %273 : vector<1x1xf32>
    %275 = math.rsqrt %274 : vector<1x1xf32>
    %276 = vector.broadcast %275 : vector<1x1xf32> to vector<24x1xf32>
    %277 = arith.mulf %269, %276 : vector<24x1xf32>
    %278 = vector.broadcast %277 : vector<24x1xf32> to vector<24x12xf32>
    %279 = arith.mulf %0, %278 : vector<24x12xf32>
    %cst_71 = arith.constant dense<0.000000e+00> : vector<12xf32>
    %280 = vector.multi_reduction <add>, %279, %cst_71 [0] : vector<24x12xf32> to vector<12xf32>
    %281 = vector.shape_cast %280 : vector<12xf32> to vector<1x12xf32>
    %282 = arith.mulf %281, %281 : vector<1x12xf32>
    %cst_72 = arith.constant dense<0.000000e+00> : vector<1xf32>
    %283 = vector.multi_reduction <add>, %282, %cst_72 [1] : vector<1x12xf32> to vector<1xf32>
    %284 = vector.shape_cast %283 : vector<1xf32> to vector<1x1xf32>
    %cst_73 = arith.constant 1.000000e-30 : f32
    %285 = vector.broadcast %cst_73 : f32 to vector<1x1xf32>
    %286 = arith.maximumf %284, %285 : vector<1x1xf32>
    %287 = math.rsqrt %286 : vector<1x1xf32>
    %288 = vector.broadcast %287 : vector<1x1xf32> to vector<1x12xf32>
    %289 = arith.mulf %281, %288 : vector<1x12xf32>
    %290 = vector.broadcast %289 : vector<1x12xf32> to vector<24x12xf32>
    %291 = arith.mulf %0, %290 : vector<24x12xf32>
    %cst_74 = arith.constant dense<0.000000e+00> : vector<24xf32>
    %292 = vector.multi_reduction <add>, %291, %cst_74 [1] : vector<24x12xf32> to vector<24xf32>
    %293 = vector.shape_cast %292 : vector<24xf32> to vector<24x1xf32>
    %294 = arith.mulf %293, %293 : vector<24x1xf32>
    %cst_75 = arith.constant dense<0.000000e+00> : vector<1xf32>
    %295 = vector.multi_reduction <add>, %294, %cst_75 [0] : vector<24x1xf32> to vector<1xf32>
    %296 = vector.shape_cast %295 : vector<1xf32> to vector<1x1xf32>
    %cst_76 = arith.constant 1.000000e-30 : f32
    %297 = vector.broadcast %cst_76 : f32 to vector<1x1xf32>
    %298 = arith.maximumf %296, %297 : vector<1x1xf32>
    %299 = math.rsqrt %298 : vector<1x1xf32>
    %300 = vector.broadcast %299 : vector<1x1xf32> to vector<24x1xf32>
    %301 = arith.mulf %293, %300 : vector<24x1xf32>
    %302 = vector.broadcast %301 : vector<24x1xf32> to vector<24x12xf32>
    %303 = arith.mulf %0, %302 : vector<24x12xf32>
    %cst_77 = arith.constant dense<0.000000e+00> : vector<12xf32>
    %304 = vector.multi_reduction <add>, %303, %cst_77 [0] : vector<24x12xf32> to vector<12xf32>
    %305 = vector.shape_cast %304 : vector<12xf32> to vector<1x12xf32>
    %306 = arith.mulf %305, %305 : vector<1x12xf32>
    %cst_78 = arith.constant dense<0.000000e+00> : vector<1xf32>
    %307 = vector.multi_reduction <add>, %306, %cst_78 [1] : vector<1x12xf32> to vector<1xf32>
    %308 = vector.shape_cast %307 : vector<1xf32> to vector<1x1xf32>
    %cst_79 = arith.constant 1.000000e-30 : f32
    %309 = vector.broadcast %cst_79 : f32 to vector<1x1xf32>
    %310 = arith.maximumf %308, %309 : vector<1x1xf32>
    %311 = math.rsqrt %310 : vector<1x1xf32>
    %312 = vector.broadcast %311 : vector<1x1xf32> to vector<1x12xf32>
    %313 = arith.mulf %305, %312 : vector<1x12xf32>
    %314 = vector.broadcast %313 : vector<1x12xf32> to vector<24x12xf32>
    %315 = arith.mulf %0, %314 : vector<24x12xf32>
    %cst_80 = arith.constant dense<0.000000e+00> : vector<24xf32>
    %316 = vector.multi_reduction <add>, %315, %cst_80 [1] : vector<24x12xf32> to vector<24xf32>
    %317 = vector.shape_cast %316 : vector<24xf32> to vector<24x1xf32>
    %318 = arith.mulf %317, %317 : vector<24x1xf32>
    %cst_81 = arith.constant dense<0.000000e+00> : vector<1xf32>
    %319 = vector.multi_reduction <add>, %318, %cst_81 [0] : vector<24x1xf32> to vector<1xf32>
    %320 = vector.shape_cast %319 : vector<1xf32> to vector<1x1xf32>
    %cst_82 = arith.constant 1.000000e-30 : f32
    %321 = vector.broadcast %cst_82 : f32 to vector<1x1xf32>
    %322 = arith.maximumf %320, %321 : vector<1x1xf32>
    %323 = math.rsqrt %322 : vector<1x1xf32>
    %324 = vector.broadcast %323 : vector<1x1xf32> to vector<24x1xf32>
    %325 = arith.mulf %317, %324 : vector<24x1xf32>
    %326 = vector.broadcast %325 : vector<24x1xf32> to vector<24x12xf32>
    %327 = arith.mulf %0, %326 : vector<24x12xf32>
    %cst_83 = arith.constant dense<0.000000e+00> : vector<12xf32>
    %328 = vector.multi_reduction <add>, %327, %cst_83 [0] : vector<24x12xf32> to vector<12xf32>
    %329 = vector.shape_cast %328 : vector<12xf32> to vector<1x12xf32>
    %330 = arith.mulf %329, %329 : vector<1x12xf32>
    %cst_84 = arith.constant dense<0.000000e+00> : vector<1xf32>
    %331 = vector.multi_reduction <add>, %330, %cst_84 [1] : vector<1x12xf32> to vector<1xf32>
    %332 = vector.shape_cast %331 : vector<1xf32> to vector<1x1xf32>
    %cst_85 = arith.constant 1.000000e-30 : f32
    %333 = vector.broadcast %cst_85 : f32 to vector<1x1xf32>
    %334 = arith.maximumf %332, %333 : vector<1x1xf32>
    %335 = math.rsqrt %334 : vector<1x1xf32>
    %336 = vector.broadcast %335 : vector<1x1xf32> to vector<1x12xf32>
    %337 = arith.mulf %329, %336 : vector<1x12xf32>
    %338 = vector.broadcast %337 : vector<1x12xf32> to vector<24x12xf32>
    %339 = arith.mulf %0, %338 : vector<24x12xf32>
    %cst_86 = arith.constant dense<0.000000e+00> : vector<24xf32>
    %340 = vector.multi_reduction <add>, %339, %cst_86 [1] : vector<24x12xf32> to vector<24xf32>
    %341 = vector.shape_cast %340 : vector<24xf32> to vector<24x1xf32>
    %342 = arith.mulf %341, %341 : vector<24x1xf32>
    %cst_87 = arith.constant dense<0.000000e+00> : vector<1xf32>
    %343 = vector.multi_reduction <add>, %342, %cst_87 [0] : vector<24x1xf32> to vector<1xf32>
    %344 = vector.shape_cast %343 : vector<1xf32> to vector<1x1xf32>
    %cst_88 = arith.constant 1.000000e-30 : f32
    %345 = vector.broadcast %cst_88 : f32 to vector<1x1xf32>
    %346 = arith.maximumf %344, %345 : vector<1x1xf32>
    %347 = math.rsqrt %346 : vector<1x1xf32>
    %348 = vector.broadcast %347 : vector<1x1xf32> to vector<24x1xf32>
    %349 = arith.mulf %341, %348 : vector<24x1xf32>
    %350 = vector.broadcast %349 : vector<24x1xf32> to vector<24x12xf32>
    %351 = arith.mulf %0, %350 : vector<24x12xf32>
    %cst_89 = arith.constant dense<0.000000e+00> : vector<12xf32>
    %352 = vector.multi_reduction <add>, %351, %cst_89 [0] : vector<24x12xf32> to vector<12xf32>
    %353 = vector.shape_cast %352 : vector<12xf32> to vector<1x12xf32>
    %354 = arith.mulf %353, %353 : vector<1x12xf32>
    %cst_90 = arith.constant dense<0.000000e+00> : vector<1xf32>
    %355 = vector.multi_reduction <add>, %354, %cst_90 [1] : vector<1x12xf32> to vector<1xf32>
    %356 = vector.shape_cast %355 : vector<1xf32> to vector<1x1xf32>
    %cst_91 = arith.constant 1.000000e-30 : f32
    %357 = vector.broadcast %cst_91 : f32 to vector<1x1xf32>
    %358 = arith.maximumf %356, %357 : vector<1x1xf32>
    %359 = math.rsqrt %358 : vector<1x1xf32>
    %360 = vector.broadcast %359 : vector<1x1xf32> to vector<1x12xf32>
    %361 = arith.mulf %353, %360 : vector<1x12xf32>
    %362 = vector.broadcast %361 : vector<1x12xf32> to vector<24x12xf32>
    %363 = arith.mulf %0, %362 : vector<24x12xf32>
    %cst_92 = arith.constant dense<0.000000e+00> : vector<24xf32>
    %364 = vector.multi_reduction <add>, %363, %cst_92 [1] : vector<24x12xf32> to vector<24xf32>
    %365 = vector.shape_cast %364 : vector<24xf32> to vector<24x1xf32>
    %366 = arith.mulf %365, %365 : vector<24x1xf32>
    %cst_93 = arith.constant dense<0.000000e+00> : vector<1xf32>
    %367 = vector.multi_reduction <add>, %366, %cst_93 [0] : vector<24x1xf32> to vector<1xf32>
    %368 = vector.shape_cast %367 : vector<1xf32> to vector<1x1xf32>
    %cst_94 = arith.constant 1.000000e-30 : f32
    %369 = vector.broadcast %cst_94 : f32 to vector<1x1xf32>
    %370 = arith.maximumf %368, %369 : vector<1x1xf32>
    %371 = math.rsqrt %370 : vector<1x1xf32>
    %372 = vector.broadcast %371 : vector<1x1xf32> to vector<24x1xf32>
    %373 = arith.mulf %365, %372 : vector<24x1xf32>
    %374 = vector.broadcast %373 : vector<24x1xf32> to vector<24x12xf32>
    %375 = arith.mulf %0, %374 : vector<24x12xf32>
    %cst_95 = arith.constant dense<0.000000e+00> : vector<12xf32>
    %376 = vector.multi_reduction <add>, %375, %cst_95 [0] : vector<24x12xf32> to vector<12xf32>
    %377 = vector.shape_cast %376 : vector<12xf32> to vector<1x12xf32>
    %378 = arith.mulf %377, %377 : vector<1x12xf32>
    %cst_96 = arith.constant dense<0.000000e+00> : vector<1xf32>
    %379 = vector.multi_reduction <add>, %378, %cst_96 [1] : vector<1x12xf32> to vector<1xf32>
    %380 = vector.shape_cast %379 : vector<1xf32> to vector<1x1xf32>
    %cst_97 = arith.constant 1.000000e-30 : f32
    %381 = vector.broadcast %cst_97 : f32 to vector<1x1xf32>
    %382 = arith.maximumf %380, %381 : vector<1x1xf32>
    %383 = math.rsqrt %382 : vector<1x1xf32>
    %384 = vector.broadcast %383 : vector<1x1xf32> to vector<1x12xf32>
    %385 = arith.mulf %377, %384 : vector<1x12xf32>
    %386 = vector.broadcast %385 : vector<1x12xf32> to vector<24x12xf32>
    %387 = arith.mulf %0, %386 : vector<24x12xf32>
    %cst_98 = arith.constant dense<0.000000e+00> : vector<24xf32>
    %388 = vector.multi_reduction <add>, %387, %cst_98 [1] : vector<24x12xf32> to vector<24xf32>
    %389 = vector.shape_cast %388 : vector<24xf32> to vector<24x1xf32>
    %390 = arith.mulf %389, %389 : vector<24x1xf32>
    %cst_99 = arith.constant dense<0.000000e+00> : vector<1xf32>
    %391 = vector.multi_reduction <add>, %390, %cst_99 [0] : vector<24x1xf32> to vector<1xf32>
    %392 = vector.shape_cast %391 : vector<1xf32> to vector<1x1xf32>
    %cst_100 = arith.constant 1.000000e-30 : f32
    %393 = vector.broadcast %cst_100 : f32 to vector<1x1xf32>
    %394 = arith.maximumf %392, %393 : vector<1x1xf32>
    %395 = math.rsqrt %394 : vector<1x1xf32>
    %396 = vector.broadcast %395 : vector<1x1xf32> to vector<24x1xf32>
    %397 = arith.mulf %389, %396 : vector<24x1xf32>
    %398 = vector.broadcast %397 : vector<24x1xf32> to vector<24x12xf32>
    %399 = arith.mulf %0, %398 : vector<24x12xf32>
    %cst_101 = arith.constant dense<0.000000e+00> : vector<12xf32>
    %400 = vector.multi_reduction <add>, %399, %cst_101 [0] : vector<24x12xf32> to vector<12xf32>
    %401 = vector.shape_cast %400 : vector<12xf32> to vector<1x12xf32>
    %402 = arith.mulf %401, %401 : vector<1x12xf32>
    %cst_102 = arith.constant dense<0.000000e+00> : vector<1xf32>
    %403 = vector.multi_reduction <add>, %402, %cst_102 [1] : vector<1x12xf32> to vector<1xf32>
    %404 = vector.shape_cast %403 : vector<1xf32> to vector<1x1xf32>
    %cst_103 = arith.constant 1.000000e-30 : f32
    %405 = vector.broadcast %cst_103 : f32 to vector<1x1xf32>
    %406 = arith.maximumf %404, %405 : vector<1x1xf32>
    %407 = math.rsqrt %406 : vector<1x1xf32>
    %408 = vector.broadcast %407 : vector<1x1xf32> to vector<1x12xf32>
    %409 = arith.mulf %401, %408 : vector<1x12xf32>
    %410 = vector.broadcast %409 : vector<1x12xf32> to vector<24x12xf32>
    %411 = arith.mulf %0, %410 : vector<24x12xf32>
    %cst_104 = arith.constant dense<0.000000e+00> : vector<24xf32>
    %412 = vector.multi_reduction <add>, %411, %cst_104 [1] : vector<24x12xf32> to vector<24xf32>
    %413 = vector.shape_cast %412 : vector<24xf32> to vector<24x1xf32>
    %414 = arith.mulf %413, %413 : vector<24x1xf32>
    %cst_105 = arith.constant dense<0.000000e+00> : vector<1xf32>
    %415 = vector.multi_reduction <add>, %414, %cst_105 [0] : vector<24x1xf32> to vector<1xf32>
    %416 = vector.shape_cast %415 : vector<1xf32> to vector<1x1xf32>
    %cst_106 = arith.constant 1.000000e-30 : f32
    %417 = vector.broadcast %cst_106 : f32 to vector<1x1xf32>
    %418 = arith.maximumf %416, %417 : vector<1x1xf32>
    %419 = math.rsqrt %418 : vector<1x1xf32>
    %420 = vector.broadcast %419 : vector<1x1xf32> to vector<24x1xf32>
    %421 = arith.mulf %413, %420 : vector<24x1xf32>
    %422 = vector.broadcast %421 : vector<24x1xf32> to vector<24x12xf32>
    %423 = arith.mulf %0, %422 : vector<24x12xf32>
    %cst_107 = arith.constant dense<0.000000e+00> : vector<12xf32>
    %424 = vector.multi_reduction <add>, %423, %cst_107 [0] : vector<24x12xf32> to vector<12xf32>
    %425 = vector.shape_cast %424 : vector<12xf32> to vector<1x12xf32>
    %426 = arith.mulf %425, %425 : vector<1x12xf32>
    %cst_108 = arith.constant dense<0.000000e+00> : vector<1xf32>
    %427 = vector.multi_reduction <add>, %426, %cst_108 [1] : vector<1x12xf32> to vector<1xf32>
    %428 = vector.shape_cast %427 : vector<1xf32> to vector<1x1xf32>
    %cst_109 = arith.constant 1.000000e-30 : f32
    %429 = vector.broadcast %cst_109 : f32 to vector<1x1xf32>
    %430 = arith.maximumf %428, %429 : vector<1x1xf32>
    %431 = math.rsqrt %430 : vector<1x1xf32>
    %432 = vector.broadcast %431 : vector<1x1xf32> to vector<1x12xf32>
    %433 = arith.mulf %425, %432 : vector<1x12xf32>
    %434 = vector.broadcast %433 : vector<1x12xf32> to vector<24x12xf32>
    %435 = arith.mulf %0, %434 : vector<24x12xf32>
    %cst_110 = arith.constant dense<0.000000e+00> : vector<24xf32>
    %436 = vector.multi_reduction <add>, %435, %cst_110 [1] : vector<24x12xf32> to vector<24xf32>
    %437 = vector.shape_cast %436 : vector<24xf32> to vector<24x1xf32>
    %438 = arith.mulf %437, %437 : vector<24x1xf32>
    %cst_111 = arith.constant dense<0.000000e+00> : vector<1xf32>
    %439 = vector.multi_reduction <add>, %438, %cst_111 [0] : vector<24x1xf32> to vector<1xf32>
    %440 = vector.shape_cast %439 : vector<1xf32> to vector<1x1xf32>
    %cst_112 = arith.constant 1.000000e-30 : f32
    %441 = vector.broadcast %cst_112 : f32 to vector<1x1xf32>
    %442 = arith.maximumf %440, %441 : vector<1x1xf32>
    %443 = math.rsqrt %442 : vector<1x1xf32>
    %444 = vector.broadcast %443 : vector<1x1xf32> to vector<24x1xf32>
    %445 = arith.mulf %437, %444 : vector<24x1xf32>
    %446 = vector.broadcast %445 : vector<24x1xf32> to vector<24x12xf32>
    %447 = arith.mulf %0, %446 : vector<24x12xf32>
    %cst_113 = arith.constant dense<0.000000e+00> : vector<12xf32>
    %448 = vector.multi_reduction <add>, %447, %cst_113 [0] : vector<24x12xf32> to vector<12xf32>
    %449 = vector.shape_cast %448 : vector<12xf32> to vector<1x12xf32>
    %450 = arith.mulf %449, %449 : vector<1x12xf32>
    %cst_114 = arith.constant dense<0.000000e+00> : vector<1xf32>
    %451 = vector.multi_reduction <add>, %450, %cst_114 [1] : vector<1x12xf32> to vector<1xf32>
    %452 = vector.shape_cast %451 : vector<1xf32> to vector<1x1xf32>
    %cst_115 = arith.constant 1.000000e-30 : f32
    %453 = vector.broadcast %cst_115 : f32 to vector<1x1xf32>
    %454 = arith.maximumf %452, %453 : vector<1x1xf32>
    %455 = math.rsqrt %454 : vector<1x1xf32>
    %456 = vector.broadcast %455 : vector<1x1xf32> to vector<1x12xf32>
    %457 = arith.mulf %449, %456 : vector<1x12xf32>
    %458 = vector.broadcast %457 : vector<1x12xf32> to vector<24x12xf32>
    %459 = arith.mulf %0, %458 : vector<24x12xf32>
    %cst_116 = arith.constant dense<0.000000e+00> : vector<24xf32>
    %460 = vector.multi_reduction <add>, %459, %cst_116 [1] : vector<24x12xf32> to vector<24xf32>
    %461 = vector.shape_cast %460 : vector<24xf32> to vector<24x1xf32>
    %462 = arith.mulf %461, %461 : vector<24x1xf32>
    %cst_117 = arith.constant dense<0.000000e+00> : vector<1xf32>
    %463 = vector.multi_reduction <add>, %462, %cst_117 [0] : vector<24x1xf32> to vector<1xf32>
    %464 = vector.shape_cast %463 : vector<1xf32> to vector<1x1xf32>
    %cst_118 = arith.constant 1.000000e-30 : f32
    %465 = vector.broadcast %cst_118 : f32 to vector<1x1xf32>
    %466 = arith.maximumf %464, %465 : vector<1x1xf32>
    %467 = math.rsqrt %466 : vector<1x1xf32>
    %468 = vector.broadcast %467 : vector<1x1xf32> to vector<24x1xf32>
    %469 = arith.mulf %461, %468 : vector<24x1xf32>
    %470 = vector.broadcast %469 : vector<24x1xf32> to vector<24x12xf32>
    %471 = arith.mulf %0, %470 : vector<24x12xf32>
    %cst_119 = arith.constant dense<0.000000e+00> : vector<12xf32>
    %472 = vector.multi_reduction <add>, %471, %cst_119 [0] : vector<24x12xf32> to vector<12xf32>
    %473 = vector.shape_cast %472 : vector<12xf32> to vector<1x12xf32>
    %474 = arith.mulf %473, %473 : vector<1x12xf32>
    %cst_120 = arith.constant dense<0.000000e+00> : vector<1xf32>
    %475 = vector.multi_reduction <add>, %474, %cst_120 [1] : vector<1x12xf32> to vector<1xf32>
    %476 = vector.shape_cast %475 : vector<1xf32> to vector<1x1xf32>
    %cst_121 = arith.constant 1.000000e-30 : f32
    %477 = vector.broadcast %cst_121 : f32 to vector<1x1xf32>
    %478 = arith.maximumf %476, %477 : vector<1x1xf32>
    %479 = math.rsqrt %478 : vector<1x1xf32>
    %480 = vector.broadcast %479 : vector<1x1xf32> to vector<1x12xf32>
    %481 = arith.mulf %473, %480 : vector<1x12xf32>
    %482 = vector.broadcast %481 : vector<1x12xf32> to vector<24x12xf32>
    %483 = arith.mulf %0, %482 : vector<24x12xf32>
    %cst_122 = arith.constant dense<0.000000e+00> : vector<24xf32>
    %484 = vector.multi_reduction <add>, %483, %cst_122 [1] : vector<24x12xf32> to vector<24xf32>
    %485 = vector.shape_cast %484 : vector<24xf32> to vector<24x1xf32>
    %486 = arith.mulf %485, %485 : vector<24x1xf32>
    %cst_123 = arith.constant dense<0.000000e+00> : vector<1xf32>
    %487 = vector.multi_reduction <add>, %486, %cst_123 [0] : vector<24x1xf32> to vector<1xf32>
    %488 = vector.shape_cast %487 : vector<1xf32> to vector<1x1xf32>
    %cst_124 = arith.constant 1.000000e-30 : f32
    %489 = vector.broadcast %cst_124 : f32 to vector<1x1xf32>
    %490 = arith.maximumf %488, %489 : vector<1x1xf32>
    %491 = math.rsqrt %490 : vector<1x1xf32>
    %492 = vector.broadcast %491 : vector<1x1xf32> to vector<24x1xf32>
    %493 = arith.mulf %485, %492 : vector<24x1xf32>
    %494 = vector.broadcast %493 : vector<24x1xf32> to vector<24x12xf32>
    %495 = arith.mulf %0, %494 : vector<24x12xf32>
    %cst_125 = arith.constant dense<0.000000e+00> : vector<12xf32>
    %496 = vector.multi_reduction <add>, %495, %cst_125 [0] : vector<24x12xf32> to vector<12xf32>
    %497 = vector.shape_cast %496 : vector<12xf32> to vector<1x12xf32>
    %498 = arith.mulf %497, %497 : vector<1x12xf32>
    %cst_126 = arith.constant dense<0.000000e+00> : vector<1xf32>
    %499 = vector.multi_reduction <add>, %498, %cst_126 [1] : vector<1x12xf32> to vector<1xf32>
    %500 = vector.shape_cast %499 : vector<1xf32> to vector<1x1xf32>
    %cst_127 = arith.constant 1.000000e-30 : f32
    %501 = vector.broadcast %cst_127 : f32 to vector<1x1xf32>
    %502 = arith.maximumf %500, %501 : vector<1x1xf32>
    %503 = math.rsqrt %502 : vector<1x1xf32>
    %504 = vector.broadcast %503 : vector<1x1xf32> to vector<1x12xf32>
    %505 = arith.mulf %497, %504 : vector<1x12xf32>
    %506 = vector.broadcast %505 : vector<1x12xf32> to vector<24x12xf32>
    %507 = arith.mulf %0, %506 : vector<24x12xf32>
    %cst_128 = arith.constant dense<0.000000e+00> : vector<24xf32>
    %508 = vector.multi_reduction <add>, %507, %cst_128 [1] : vector<24x12xf32> to vector<24xf32>
    %509 = vector.shape_cast %508 : vector<24xf32> to vector<24x1xf32>
    %510 = arith.mulf %509, %509 : vector<24x1xf32>
    %cst_129 = arith.constant dense<0.000000e+00> : vector<1xf32>
    %511 = vector.multi_reduction <add>, %510, %cst_129 [0] : vector<24x1xf32> to vector<1xf32>
    %512 = vector.shape_cast %511 : vector<1xf32> to vector<1x1xf32>
    %cst_130 = arith.constant 1.000000e-30 : f32
    %513 = vector.broadcast %cst_130 : f32 to vector<1x1xf32>
    %514 = arith.maximumf %512, %513 : vector<1x1xf32>
    %515 = math.rsqrt %514 : vector<1x1xf32>
    %516 = vector.broadcast %515 : vector<1x1xf32> to vector<24x1xf32>
    %517 = arith.mulf %509, %516 : vector<24x1xf32>
    %518 = vector.broadcast %517 : vector<24x1xf32> to vector<24x12xf32>
    %519 = arith.mulf %0, %518 : vector<24x12xf32>
    %cst_131 = arith.constant dense<0.000000e+00> : vector<12xf32>
    %520 = vector.multi_reduction <add>, %519, %cst_131 [0] : vector<24x12xf32> to vector<12xf32>
    %521 = vector.shape_cast %520 : vector<12xf32> to vector<1x12xf32>
    %522 = arith.mulf %521, %521 : vector<1x12xf32>
    %cst_132 = arith.constant dense<0.000000e+00> : vector<1xf32>
    %523 = vector.multi_reduction <add>, %522, %cst_132 [1] : vector<1x12xf32> to vector<1xf32>
    %524 = vector.shape_cast %523 : vector<1xf32> to vector<1x1xf32>
    %cst_133 = arith.constant 1.000000e-30 : f32
    %525 = vector.broadcast %cst_133 : f32 to vector<1x1xf32>
    %526 = arith.maximumf %524, %525 : vector<1x1xf32>
    %527 = math.rsqrt %526 : vector<1x1xf32>
    %528 = vector.broadcast %527 : vector<1x1xf32> to vector<1x12xf32>
    %529 = arith.mulf %521, %528 : vector<1x12xf32>
    %530 = vector.broadcast %529 : vector<1x12xf32> to vector<24x12xf32>
    %531 = arith.mulf %0, %530 : vector<24x12xf32>
    %cst_134 = arith.constant dense<0.000000e+00> : vector<24xf32>
    %532 = vector.multi_reduction <add>, %531, %cst_134 [1] : vector<24x12xf32> to vector<24xf32>
    %533 = vector.shape_cast %532 : vector<24xf32> to vector<24x1xf32>
    %534 = arith.mulf %533, %533 : vector<24x1xf32>
    %cst_135 = arith.constant dense<0.000000e+00> : vector<1xf32>
    %535 = vector.multi_reduction <add>, %534, %cst_135 [0] : vector<24x1xf32> to vector<1xf32>
    %536 = vector.shape_cast %535 : vector<1xf32> to vector<1x1xf32>
    %cst_136 = arith.constant 1.000000e-30 : f32
    %537 = vector.broadcast %cst_136 : f32 to vector<1x1xf32>
    %538 = arith.maximumf %536, %537 : vector<1x1xf32>
    %539 = math.rsqrt %538 : vector<1x1xf32>
    %540 = vector.broadcast %539 : vector<1x1xf32> to vector<24x1xf32>
    %541 = arith.mulf %533, %540 : vector<24x1xf32>
    %542 = vector.broadcast %541 : vector<24x1xf32> to vector<24x12xf32>
    %543 = arith.mulf %0, %542 : vector<24x12xf32>
    %cst_137 = arith.constant dense<0.000000e+00> : vector<12xf32>
    %544 = vector.multi_reduction <add>, %543, %cst_137 [0] : vector<24x12xf32> to vector<12xf32>
    %545 = vector.shape_cast %544 : vector<12xf32> to vector<1x12xf32>
    %546 = arith.mulf %545, %545 : vector<1x12xf32>
    %cst_138 = arith.constant dense<0.000000e+00> : vector<1xf32>
    %547 = vector.multi_reduction <add>, %546, %cst_138 [1] : vector<1x12xf32> to vector<1xf32>
    %548 = vector.shape_cast %547 : vector<1xf32> to vector<1x1xf32>
    %cst_139 = arith.constant 1.000000e-30 : f32
    %549 = vector.broadcast %cst_139 : f32 to vector<1x1xf32>
    %550 = arith.maximumf %548, %549 : vector<1x1xf32>
    %551 = math.rsqrt %550 : vector<1x1xf32>
    %552 = vector.broadcast %551 : vector<1x1xf32> to vector<1x12xf32>
    %553 = arith.mulf %545, %552 : vector<1x12xf32>
    %554 = vector.broadcast %553 : vector<1x12xf32> to vector<24x12xf32>
    %555 = arith.mulf %0, %554 : vector<24x12xf32>
    %cst_140 = arith.constant dense<0.000000e+00> : vector<24xf32>
    %556 = vector.multi_reduction <add>, %555, %cst_140 [1] : vector<24x12xf32> to vector<24xf32>
    %557 = vector.shape_cast %556 : vector<24xf32> to vector<24x1xf32>
    %558 = arith.mulf %557, %557 : vector<24x1xf32>
    %cst_141 = arith.constant dense<0.000000e+00> : vector<1xf32>
    %559 = vector.multi_reduction <add>, %558, %cst_141 [0] : vector<24x1xf32> to vector<1xf32>
    %560 = vector.shape_cast %559 : vector<1xf32> to vector<1x1xf32>
    %cst_142 = arith.constant 1.000000e-30 : f32
    %561 = vector.broadcast %cst_142 : f32 to vector<1x1xf32>
    %562 = arith.maximumf %560, %561 : vector<1x1xf32>
    %563 = math.rsqrt %562 : vector<1x1xf32>
    %564 = vector.broadcast %563 : vector<1x1xf32> to vector<24x1xf32>
    %565 = arith.mulf %557, %564 : vector<24x1xf32>
    %566 = vector.broadcast %565 : vector<24x1xf32> to vector<24x12xf32>
    %567 = arith.mulf %0, %566 : vector<24x12xf32>
    %cst_143 = arith.constant dense<0.000000e+00> : vector<12xf32>
    %568 = vector.multi_reduction <add>, %567, %cst_143 [0] : vector<24x12xf32> to vector<12xf32>
    %569 = vector.shape_cast %568 : vector<12xf32> to vector<1x12xf32>
    %570 = arith.mulf %569, %569 : vector<1x12xf32>
    %cst_144 = arith.constant dense<0.000000e+00> : vector<1xf32>
    %571 = vector.multi_reduction <add>, %570, %cst_144 [1] : vector<1x12xf32> to vector<1xf32>
    %572 = vector.shape_cast %571 : vector<1xf32> to vector<1x1xf32>
    %cst_145 = arith.constant 1.000000e-30 : f32
    %573 = vector.broadcast %cst_145 : f32 to vector<1x1xf32>
    %574 = arith.maximumf %572, %573 : vector<1x1xf32>
    %575 = math.rsqrt %574 : vector<1x1xf32>
    %576 = vector.broadcast %575 : vector<1x1xf32> to vector<1x12xf32>
    %577 = arith.mulf %569, %576 : vector<1x12xf32>
    %578 = vector.broadcast %577 : vector<1x12xf32> to vector<24x12xf32>
    %579 = arith.mulf %0, %578 : vector<24x12xf32>
    %cst_146 = arith.constant dense<0.000000e+00> : vector<24xf32>
    %580 = vector.multi_reduction <add>, %579, %cst_146 [1] : vector<24x12xf32> to vector<24xf32>
    %581 = vector.shape_cast %580 : vector<24xf32> to vector<24x1xf32>
    %582 = arith.mulf %581, %581 : vector<24x1xf32>
    %cst_147 = arith.constant dense<0.000000e+00> : vector<1xf32>
    %583 = vector.multi_reduction <add>, %582, %cst_147 [0] : vector<24x1xf32> to vector<1xf32>
    %584 = vector.shape_cast %583 : vector<1xf32> to vector<1x1xf32>
    %cst_148 = arith.constant 1.000000e-30 : f32
    %585 = vector.broadcast %cst_148 : f32 to vector<1x1xf32>
    %586 = arith.maximumf %584, %585 : vector<1x1xf32>
    %587 = math.rsqrt %586 : vector<1x1xf32>
    %588 = vector.broadcast %587 : vector<1x1xf32> to vector<24x1xf32>
    %589 = arith.mulf %581, %588 : vector<24x1xf32>
    %590 = vector.broadcast %589 : vector<24x1xf32> to vector<24x12xf32>
    %591 = arith.mulf %0, %590 : vector<24x12xf32>
    %cst_149 = arith.constant dense<0.000000e+00> : vector<12xf32>
    %592 = vector.multi_reduction <add>, %591, %cst_149 [0] : vector<24x12xf32> to vector<12xf32>
    %593 = vector.shape_cast %592 : vector<12xf32> to vector<1x12xf32>
    %594 = arith.mulf %593, %593 : vector<1x12xf32>
    %cst_150 = arith.constant dense<0.000000e+00> : vector<1xf32>
    %595 = vector.multi_reduction <add>, %594, %cst_150 [1] : vector<1x12xf32> to vector<1xf32>
    %596 = vector.shape_cast %595 : vector<1xf32> to vector<1x1xf32>
    %cst_151 = arith.constant 1.000000e-30 : f32
    %597 = vector.broadcast %cst_151 : f32 to vector<1x1xf32>
    %598 = arith.maximumf %596, %597 : vector<1x1xf32>
    %599 = math.rsqrt %598 : vector<1x1xf32>
    %600 = vector.broadcast %599 : vector<1x1xf32> to vector<1x12xf32>
    %601 = arith.mulf %593, %600 : vector<1x12xf32>
    %602 = vector.broadcast %601 : vector<1x12xf32> to vector<24x12xf32>
    %603 = arith.mulf %0, %602 : vector<24x12xf32>
    %cst_152 = arith.constant dense<0.000000e+00> : vector<24xf32>
    %604 = vector.multi_reduction <add>, %603, %cst_152 [1] : vector<24x12xf32> to vector<24xf32>
    %605 = vector.shape_cast %604 : vector<24xf32> to vector<24x1xf32>
    %606 = arith.mulf %605, %605 : vector<24x1xf32>
    %cst_153 = arith.constant dense<0.000000e+00> : vector<1xf32>
    %607 = vector.multi_reduction <add>, %606, %cst_153 [0] : vector<24x1xf32> to vector<1xf32>
    %608 = vector.shape_cast %607 : vector<1xf32> to vector<1x1xf32>
    %cst_154 = arith.constant 1.000000e-30 : f32
    %609 = vector.broadcast %cst_154 : f32 to vector<1x1xf32>
    %610 = arith.maximumf %608, %609 : vector<1x1xf32>
    %611 = math.rsqrt %610 : vector<1x1xf32>
    %612 = vector.broadcast %611 : vector<1x1xf32> to vector<24x1xf32>
    %613 = arith.mulf %605, %612 : vector<24x1xf32>
    %614 = vector.broadcast %613 : vector<24x1xf32> to vector<24x12xf32>
    %615 = arith.mulf %0, %614 : vector<24x12xf32>
    %cst_155 = arith.constant dense<0.000000e+00> : vector<12xf32>
    %616 = vector.multi_reduction <add>, %615, %cst_155 [0] : vector<24x12xf32> to vector<12xf32>
    %617 = vector.shape_cast %616 : vector<12xf32> to vector<1x12xf32>
    %618 = arith.mulf %617, %617 : vector<1x12xf32>
    %cst_156 = arith.constant dense<0.000000e+00> : vector<1xf32>
    %619 = vector.multi_reduction <add>, %618, %cst_156 [1] : vector<1x12xf32> to vector<1xf32>
    %620 = vector.shape_cast %619 : vector<1xf32> to vector<1x1xf32>
    %cst_157 = arith.constant 1.000000e-30 : f32
    %621 = vector.broadcast %cst_157 : f32 to vector<1x1xf32>
    %622 = arith.maximumf %620, %621 : vector<1x1xf32>
    %623 = math.rsqrt %622 : vector<1x1xf32>
    %624 = vector.broadcast %623 : vector<1x1xf32> to vector<1x12xf32>
    %625 = arith.mulf %617, %624 : vector<1x12xf32>
    %626 = vector.broadcast %625 : vector<1x12xf32> to vector<24x12xf32>
    %627 = arith.mulf %0, %626 : vector<24x12xf32>
    %cst_158 = arith.constant dense<0.000000e+00> : vector<24xf32>
    %628 = vector.multi_reduction <add>, %627, %cst_158 [1] : vector<24x12xf32> to vector<24xf32>
    %629 = vector.shape_cast %628 : vector<24xf32> to vector<24x1xf32>
    %630 = arith.mulf %629, %629 : vector<24x1xf32>
    %cst_159 = arith.constant dense<0.000000e+00> : vector<1xf32>
    %631 = vector.multi_reduction <add>, %630, %cst_159 [0] : vector<24x1xf32> to vector<1xf32>
    %632 = vector.shape_cast %631 : vector<1xf32> to vector<1x1xf32>
    %cst_160 = arith.constant 1.000000e-30 : f32
    %633 = vector.broadcast %cst_160 : f32 to vector<1x1xf32>
    %634 = arith.maximumf %632, %633 : vector<1x1xf32>
    %635 = math.rsqrt %634 : vector<1x1xf32>
    %636 = vector.broadcast %635 : vector<1x1xf32> to vector<24x1xf32>
    %637 = arith.mulf %629, %636 : vector<24x1xf32>
    %638 = vector.broadcast %637 : vector<24x1xf32> to vector<24x12xf32>
    %639 = arith.mulf %0, %638 : vector<24x12xf32>
    %cst_161 = arith.constant dense<0.000000e+00> : vector<12xf32>
    %640 = vector.multi_reduction <add>, %639, %cst_161 [0] : vector<24x12xf32> to vector<12xf32>
    %641 = vector.shape_cast %640 : vector<12xf32> to vector<1x12xf32>
    %642 = arith.mulf %641, %641 : vector<1x12xf32>
    %cst_162 = arith.constant dense<0.000000e+00> : vector<1xf32>
    %643 = vector.multi_reduction <add>, %642, %cst_162 [1] : vector<1x12xf32> to vector<1xf32>
    %644 = vector.shape_cast %643 : vector<1xf32> to vector<1x1xf32>
    %cst_163 = arith.constant 1.000000e-30 : f32
    %645 = vector.broadcast %cst_163 : f32 to vector<1x1xf32>
    %646 = arith.maximumf %644, %645 : vector<1x1xf32>
    %647 = math.rsqrt %646 : vector<1x1xf32>
    %648 = vector.broadcast %647 : vector<1x1xf32> to vector<1x12xf32>
    %649 = arith.mulf %641, %648 : vector<1x12xf32>
    %650 = vector.broadcast %649 : vector<1x12xf32> to vector<24x12xf32>
    %651 = arith.mulf %0, %650 : vector<24x12xf32>
    %cst_164 = arith.constant dense<0.000000e+00> : vector<24xf32>
    %652 = vector.multi_reduction <add>, %651, %cst_164 [1] : vector<24x12xf32> to vector<24xf32>
    %653 = vector.shape_cast %652 : vector<24xf32> to vector<24x1xf32>
    %654 = arith.mulf %653, %653 : vector<24x1xf32>
    %cst_165 = arith.constant dense<0.000000e+00> : vector<1xf32>
    %655 = vector.multi_reduction <add>, %654, %cst_165 [0] : vector<24x1xf32> to vector<1xf32>
    %656 = vector.shape_cast %655 : vector<1xf32> to vector<1x1xf32>
    %cst_166 = arith.constant 1.000000e-30 : f32
    %657 = vector.broadcast %cst_166 : f32 to vector<1x1xf32>
    %658 = arith.maximumf %656, %657 : vector<1x1xf32>
    %659 = math.rsqrt %658 : vector<1x1xf32>
    %660 = vector.broadcast %659 : vector<1x1xf32> to vector<24x1xf32>
    %661 = arith.mulf %653, %660 : vector<24x1xf32>
    %662 = vector.broadcast %661 : vector<24x1xf32> to vector<24x12xf32>
    %663 = arith.mulf %0, %662 : vector<24x12xf32>
    %cst_167 = arith.constant dense<0.000000e+00> : vector<12xf32>
    %664 = vector.multi_reduction <add>, %663, %cst_167 [0] : vector<24x12xf32> to vector<12xf32>
    %665 = vector.shape_cast %664 : vector<12xf32> to vector<1x12xf32>
    %666 = arith.mulf %665, %665 : vector<1x12xf32>
    %cst_168 = arith.constant dense<0.000000e+00> : vector<1xf32>
    %667 = vector.multi_reduction <add>, %666, %cst_168 [1] : vector<1x12xf32> to vector<1xf32>
    %668 = vector.shape_cast %667 : vector<1xf32> to vector<1x1xf32>
    %cst_169 = arith.constant 1.000000e-30 : f32
    %669 = vector.broadcast %cst_169 : f32 to vector<1x1xf32>
    %670 = arith.maximumf %668, %669 : vector<1x1xf32>
    %671 = math.rsqrt %670 : vector<1x1xf32>
    %672 = vector.broadcast %671 : vector<1x1xf32> to vector<1x12xf32>
    %673 = arith.mulf %665, %672 : vector<1x12xf32>
    %674 = vector.broadcast %673 : vector<1x12xf32> to vector<24x12xf32>
    %675 = arith.mulf %0, %674 : vector<24x12xf32>
    %cst_170 = arith.constant dense<0.000000e+00> : vector<24xf32>
    %676 = vector.multi_reduction <add>, %675, %cst_170 [1] : vector<24x12xf32> to vector<24xf32>
    %677 = vector.shape_cast %676 : vector<24xf32> to vector<24x1xf32>
    %678 = arith.mulf %677, %677 : vector<24x1xf32>
    %cst_171 = arith.constant dense<0.000000e+00> : vector<1xf32>
    %679 = vector.multi_reduction <add>, %678, %cst_171 [0] : vector<24x1xf32> to vector<1xf32>
    %680 = vector.shape_cast %679 : vector<1xf32> to vector<1x1xf32>
    %cst_172 = arith.constant 1.000000e-30 : f32
    %681 = vector.broadcast %cst_172 : f32 to vector<1x1xf32>
    %682 = arith.maximumf %680, %681 : vector<1x1xf32>
    %683 = math.rsqrt %682 : vector<1x1xf32>
    %684 = vector.broadcast %683 : vector<1x1xf32> to vector<24x1xf32>
    %685 = arith.mulf %677, %684 : vector<24x1xf32>
    %686 = vector.broadcast %685 : vector<24x1xf32> to vector<24x12xf32>
    %687 = arith.mulf %0, %686 : vector<24x12xf32>
    %cst_173 = arith.constant dense<0.000000e+00> : vector<12xf32>
    %688 = vector.multi_reduction <add>, %687, %cst_173 [0] : vector<24x12xf32> to vector<12xf32>
    %689 = vector.shape_cast %688 : vector<12xf32> to vector<1x12xf32>
    %690 = arith.mulf %689, %689 : vector<1x12xf32>
    %cst_174 = arith.constant dense<0.000000e+00> : vector<1xf32>
    %691 = vector.multi_reduction <add>, %690, %cst_174 [1] : vector<1x12xf32> to vector<1xf32>
    %692 = vector.shape_cast %691 : vector<1xf32> to vector<1x1xf32>
    %cst_175 = arith.constant 1.000000e-30 : f32
    %693 = vector.broadcast %cst_175 : f32 to vector<1x1xf32>
    %694 = arith.maximumf %692, %693 : vector<1x1xf32>
    %695 = math.rsqrt %694 : vector<1x1xf32>
    %696 = vector.broadcast %695 : vector<1x1xf32> to vector<1x12xf32>
    %697 = arith.mulf %689, %696 : vector<1x12xf32>
    %698 = vector.broadcast %697 : vector<1x12xf32> to vector<24x12xf32>
    %699 = arith.mulf %0, %698 : vector<24x12xf32>
    %cst_176 = arith.constant dense<0.000000e+00> : vector<24xf32>
    %700 = vector.multi_reduction <add>, %699, %cst_176 [1] : vector<24x12xf32> to vector<24xf32>
    %701 = vector.shape_cast %700 : vector<24xf32> to vector<24x1xf32>
    %702 = arith.mulf %701, %701 : vector<24x1xf32>
    %cst_177 = arith.constant dense<0.000000e+00> : vector<1xf32>
    %703 = vector.multi_reduction <add>, %702, %cst_177 [0] : vector<24x1xf32> to vector<1xf32>
    %704 = vector.shape_cast %703 : vector<1xf32> to vector<1x1xf32>
    %cst_178 = arith.constant 1.000000e-30 : f32
    %705 = vector.broadcast %cst_178 : f32 to vector<1x1xf32>
    %706 = arith.maximumf %704, %705 : vector<1x1xf32>
    %707 = math.rsqrt %706 : vector<1x1xf32>
    %708 = vector.broadcast %707 : vector<1x1xf32> to vector<24x1xf32>
    %709 = arith.mulf %701, %708 : vector<24x1xf32>
    %710 = vector.broadcast %709 : vector<24x1xf32> to vector<24x12xf32>
    %711 = arith.mulf %0, %710 : vector<24x12xf32>
    %cst_179 = arith.constant dense<0.000000e+00> : vector<12xf32>
    %712 = vector.multi_reduction <add>, %711, %cst_179 [0] : vector<24x12xf32> to vector<12xf32>
    %713 = vector.shape_cast %712 : vector<12xf32> to vector<1x12xf32>
    %714 = arith.mulf %713, %713 : vector<1x12xf32>
    %cst_180 = arith.constant dense<0.000000e+00> : vector<1xf32>
    %715 = vector.multi_reduction <add>, %714, %cst_180 [1] : vector<1x12xf32> to vector<1xf32>
    %716 = vector.shape_cast %715 : vector<1xf32> to vector<1x1xf32>
    %cst_181 = arith.constant 1.000000e-30 : f32
    %717 = vector.broadcast %cst_181 : f32 to vector<1x1xf32>
    %718 = arith.maximumf %716, %717 : vector<1x1xf32>
    %719 = math.rsqrt %718 : vector<1x1xf32>
    %720 = vector.broadcast %719 : vector<1x1xf32> to vector<1x12xf32>
    %721 = arith.mulf %713, %720 : vector<1x12xf32>
    %722 = vector.broadcast %721 : vector<1x12xf32> to vector<24x12xf32>
    %723 = arith.mulf %0, %722 : vector<24x12xf32>
    %cst_182 = arith.constant dense<0.000000e+00> : vector<24xf32>
    %724 = vector.multi_reduction <add>, %723, %cst_182 [1] : vector<24x12xf32> to vector<24xf32>
    %725 = vector.shape_cast %724 : vector<24xf32> to vector<24x1xf32>
    %726 = arith.mulf %725, %725 : vector<24x1xf32>
    %cst_183 = arith.constant dense<0.000000e+00> : vector<1xf32>
    %727 = vector.multi_reduction <add>, %726, %cst_183 [0] : vector<24x1xf32> to vector<1xf32>
    %728 = vector.shape_cast %727 : vector<1xf32> to vector<1x1xf32>
    %cst_184 = arith.constant 1.000000e-30 : f32
    %729 = vector.broadcast %cst_184 : f32 to vector<1x1xf32>
    %730 = arith.maximumf %728, %729 : vector<1x1xf32>
    %731 = math.rsqrt %730 : vector<1x1xf32>
    %732 = vector.broadcast %731 : vector<1x1xf32> to vector<24x1xf32>
    %733 = arith.mulf %725, %732 : vector<24x1xf32>
    %734 = vector.broadcast %733 : vector<24x1xf32> to vector<24x12xf32>
    %735 = arith.mulf %0, %734 : vector<24x12xf32>
    %cst_185 = arith.constant dense<0.000000e+00> : vector<12xf32>
    %736 = vector.multi_reduction <add>, %735, %cst_185 [0] : vector<24x12xf32> to vector<12xf32>
    %737 = vector.shape_cast %736 : vector<12xf32> to vector<1x12xf32>
    %738 = arith.mulf %737, %737 : vector<1x12xf32>
    %cst_186 = arith.constant dense<0.000000e+00> : vector<1xf32>
    %739 = vector.multi_reduction <add>, %738, %cst_186 [1] : vector<1x12xf32> to vector<1xf32>
    %740 = vector.shape_cast %739 : vector<1xf32> to vector<1x1xf32>
    %cst_187 = arith.constant 1.000000e-30 : f32
    %741 = vector.broadcast %cst_187 : f32 to vector<1x1xf32>
    %742 = arith.maximumf %740, %741 : vector<1x1xf32>
    %743 = math.rsqrt %742 : vector<1x1xf32>
    %744 = vector.broadcast %743 : vector<1x1xf32> to vector<1x12xf32>
    %745 = arith.mulf %737, %744 : vector<1x12xf32>
    %746 = vector.broadcast %745 : vector<1x12xf32> to vector<24x12xf32>
    %747 = arith.mulf %0, %746 : vector<24x12xf32>
    %cst_188 = arith.constant dense<0.000000e+00> : vector<24xf32>
    %748 = vector.multi_reduction <add>, %747, %cst_188 [1] : vector<24x12xf32> to vector<24xf32>
    %749 = vector.shape_cast %748 : vector<24xf32> to vector<24x1xf32>
    %750 = arith.mulf %749, %749 : vector<24x1xf32>
    %cst_189 = arith.constant dense<0.000000e+00> : vector<1xf32>
    %751 = vector.multi_reduction <add>, %750, %cst_189 [0] : vector<24x1xf32> to vector<1xf32>
    %752 = vector.shape_cast %751 : vector<1xf32> to vector<1x1xf32>
    %cst_190 = arith.constant 1.000000e-30 : f32
    %753 = vector.broadcast %cst_190 : f32 to vector<1x1xf32>
    %754 = arith.maximumf %752, %753 : vector<1x1xf32>
    %755 = math.rsqrt %754 : vector<1x1xf32>
    %756 = vector.broadcast %755 : vector<1x1xf32> to vector<24x1xf32>
    %757 = arith.mulf %749, %756 : vector<24x1xf32>
    %758 = vector.broadcast %757 : vector<24x1xf32> to vector<24x12xf32>
    %759 = arith.mulf %0, %758 : vector<24x12xf32>
    %cst_191 = arith.constant dense<0.000000e+00> : vector<12xf32>
    %760 = vector.multi_reduction <add>, %759, %cst_191 [0] : vector<24x12xf32> to vector<12xf32>
    %761 = vector.shape_cast %760 : vector<12xf32> to vector<1x12xf32>
    %762 = arith.mulf %761, %761 : vector<1x12xf32>
    %cst_192 = arith.constant dense<0.000000e+00> : vector<1xf32>
    %763 = vector.multi_reduction <add>, %762, %cst_192 [1] : vector<1x12xf32> to vector<1xf32>
    %764 = vector.shape_cast %763 : vector<1xf32> to vector<1x1xf32>
    %cst_193 = arith.constant 1.000000e-30 : f32
    %765 = vector.broadcast %cst_193 : f32 to vector<1x1xf32>
    %766 = arith.maximumf %764, %765 : vector<1x1xf32>
    %767 = math.rsqrt %766 : vector<1x1xf32>
    %768 = vector.broadcast %767 : vector<1x1xf32> to vector<1x12xf32>
    %769 = arith.mulf %761, %768 : vector<1x12xf32>
    %770 = vector.broadcast %769 : vector<1x12xf32> to vector<24x12xf32>
    %771 = arith.mulf %0, %770 : vector<24x12xf32>
    %cst_194 = arith.constant dense<0.000000e+00> : vector<24xf32>
    %772 = vector.multi_reduction <add>, %771, %cst_194 [1] : vector<24x12xf32> to vector<24xf32>
    %773 = vector.shape_cast %772 : vector<24xf32> to vector<24x1xf32>
    %774 = arith.mulf %773, %773 : vector<24x1xf32>
    %cst_195 = arith.constant dense<0.000000e+00> : vector<1xf32>
    %775 = vector.multi_reduction <add>, %774, %cst_195 [0] : vector<24x1xf32> to vector<1xf32>
    %776 = vector.shape_cast %775 : vector<1xf32> to vector<1x1xf32>
    %cst_196 = arith.constant 1.000000e-30 : f32
    %777 = vector.broadcast %cst_196 : f32 to vector<1x1xf32>
    %778 = arith.maximumf %776, %777 : vector<1x1xf32>
    %779 = math.rsqrt %778 : vector<1x1xf32>
    %780 = vector.broadcast %779 : vector<1x1xf32> to vector<24x1xf32>
    %781 = arith.mulf %773, %780 : vector<24x1xf32>
    %782 = vector.broadcast %781 : vector<24x1xf32> to vector<24x12xf32>
    %783 = arith.mulf %0, %782 : vector<24x12xf32>
    %cst_197 = arith.constant dense<0.000000e+00> : vector<12xf32>
    %784 = vector.multi_reduction <add>, %783, %cst_197 [0] : vector<24x12xf32> to vector<12xf32>
    %785 = vector.shape_cast %784 : vector<12xf32> to vector<1x12xf32>
    %786 = arith.mulf %785, %785 : vector<1x12xf32>
    %cst_198 = arith.constant dense<0.000000e+00> : vector<1xf32>
    %787 = vector.multi_reduction <add>, %786, %cst_198 [1] : vector<1x12xf32> to vector<1xf32>
    %788 = vector.shape_cast %787 : vector<1xf32> to vector<1x1xf32>
    %cst_199 = arith.constant 1.000000e-30 : f32
    %789 = vector.broadcast %cst_199 : f32 to vector<1x1xf32>
    %790 = arith.maximumf %788, %789 : vector<1x1xf32>
    %791 = math.rsqrt %790 : vector<1x1xf32>
    %792 = vector.broadcast %791 : vector<1x1xf32> to vector<1x12xf32>
    %793 = arith.mulf %785, %792 : vector<1x12xf32>
    %794 = vector.broadcast %793 : vector<1x12xf32> to vector<24x12xf32>
    %795 = arith.mulf %0, %794 : vector<24x12xf32>
    %cst_200 = arith.constant dense<0.000000e+00> : vector<24xf32>
    %796 = vector.multi_reduction <add>, %795, %cst_200 [1] : vector<24x12xf32> to vector<24xf32>
    %797 = vector.shape_cast %796 : vector<24xf32> to vector<24x1xf32>
    %798 = arith.mulf %797, %797 : vector<24x1xf32>
    %cst_201 = arith.constant dense<0.000000e+00> : vector<1xf32>
    %799 = vector.multi_reduction <add>, %798, %cst_201 [0] : vector<24x1xf32> to vector<1xf32>
    %800 = vector.shape_cast %799 : vector<1xf32> to vector<1x1xf32>
    %cst_202 = arith.constant 1.000000e-30 : f32
    %801 = vector.broadcast %cst_202 : f32 to vector<1x1xf32>
    %802 = arith.maximumf %800, %801 : vector<1x1xf32>
    %803 = math.rsqrt %802 : vector<1x1xf32>
    %804 = vector.broadcast %803 : vector<1x1xf32> to vector<24x1xf32>
    %805 = arith.mulf %797, %804 : vector<24x1xf32>
    %806 = vector.broadcast %805 : vector<24x1xf32> to vector<24x12xf32>
    %807 = arith.mulf %0, %806 : vector<24x12xf32>
    %cst_203 = arith.constant dense<0.000000e+00> : vector<12xf32>
    %808 = vector.multi_reduction <add>, %807, %cst_203 [0] : vector<24x12xf32> to vector<12xf32>
    %809 = vector.shape_cast %808 : vector<12xf32> to vector<1x12xf32>
    %810 = arith.mulf %809, %809 : vector<1x12xf32>
    %cst_204 = arith.constant dense<0.000000e+00> : vector<1xf32>
    %811 = vector.multi_reduction <add>, %810, %cst_204 [1] : vector<1x12xf32> to vector<1xf32>
    %812 = vector.shape_cast %811 : vector<1xf32> to vector<1x1xf32>
    %cst_205 = arith.constant 1.000000e-30 : f32
    %813 = vector.broadcast %cst_205 : f32 to vector<1x1xf32>
    %814 = arith.maximumf %812, %813 : vector<1x1xf32>
    %815 = math.rsqrt %814 : vector<1x1xf32>
    %816 = vector.broadcast %815 : vector<1x1xf32> to vector<1x12xf32>
    %817 = arith.mulf %809, %816 : vector<1x12xf32>
    %818 = vector.broadcast %817 : vector<1x12xf32> to vector<24x12xf32>
    %819 = arith.mulf %0, %818 : vector<24x12xf32>
    %cst_206 = arith.constant dense<0.000000e+00> : vector<24xf32>
    %820 = vector.multi_reduction <add>, %819, %cst_206 [1] : vector<24x12xf32> to vector<24xf32>
    %821 = vector.shape_cast %820 : vector<24xf32> to vector<24x1xf32>
    %822 = arith.mulf %821, %821 : vector<24x1xf32>
    %cst_207 = arith.constant dense<0.000000e+00> : vector<1xf32>
    %823 = vector.multi_reduction <add>, %822, %cst_207 [0] : vector<24x1xf32> to vector<1xf32>
    %824 = vector.shape_cast %823 : vector<1xf32> to vector<1x1xf32>
    %cst_208 = arith.constant 1.000000e-30 : f32
    %825 = vector.broadcast %cst_208 : f32 to vector<1x1xf32>
    %826 = arith.maximumf %824, %825 : vector<1x1xf32>
    %827 = math.rsqrt %826 : vector<1x1xf32>
    %828 = vector.broadcast %827 : vector<1x1xf32> to vector<24x1xf32>
    %829 = arith.mulf %821, %828 : vector<24x1xf32>
    %830 = vector.broadcast %829 : vector<24x1xf32> to vector<24x12xf32>
    %831 = arith.mulf %0, %830 : vector<24x12xf32>
    %cst_209 = arith.constant dense<0.000000e+00> : vector<12xf32>
    %832 = vector.multi_reduction <add>, %831, %cst_209 [0] : vector<24x12xf32> to vector<12xf32>
    %833 = vector.shape_cast %832 : vector<12xf32> to vector<1x12xf32>
    %834 = arith.mulf %833, %833 : vector<1x12xf32>
    %cst_210 = arith.constant dense<0.000000e+00> : vector<1xf32>
    %835 = vector.multi_reduction <add>, %834, %cst_210 [1] : vector<1x12xf32> to vector<1xf32>
    %836 = vector.shape_cast %835 : vector<1xf32> to vector<1x1xf32>
    %cst_211 = arith.constant 1.000000e-30 : f32
    %837 = vector.broadcast %cst_211 : f32 to vector<1x1xf32>
    %838 = arith.maximumf %836, %837 : vector<1x1xf32>
    %839 = math.rsqrt %838 : vector<1x1xf32>
    %840 = vector.broadcast %839 : vector<1x1xf32> to vector<1x12xf32>
    %841 = arith.mulf %833, %840 : vector<1x12xf32>
    %842 = vector.broadcast %841 : vector<1x12xf32> to vector<24x12xf32>
    %843 = arith.mulf %0, %842 : vector<24x12xf32>
    %cst_212 = arith.constant dense<0.000000e+00> : vector<24xf32>
    %844 = vector.multi_reduction <add>, %843, %cst_212 [1] : vector<24x12xf32> to vector<24xf32>
    %845 = vector.shape_cast %844 : vector<24xf32> to vector<24x1xf32>
    %846 = arith.mulf %845, %845 : vector<24x1xf32>
    %cst_213 = arith.constant dense<0.000000e+00> : vector<1xf32>
    %847 = vector.multi_reduction <add>, %846, %cst_213 [0] : vector<24x1xf32> to vector<1xf32>
    %848 = vector.shape_cast %847 : vector<1xf32> to vector<1x1xf32>
    %cst_214 = arith.constant 1.000000e-30 : f32
    %849 = vector.broadcast %cst_214 : f32 to vector<1x1xf32>
    %850 = arith.maximumf %848, %849 : vector<1x1xf32>
    %851 = math.rsqrt %850 : vector<1x1xf32>
    %852 = vector.broadcast %851 : vector<1x1xf32> to vector<24x1xf32>
    %853 = arith.mulf %845, %852 : vector<24x1xf32>
    %854 = vector.broadcast %853 : vector<24x1xf32> to vector<24x12xf32>
    %855 = arith.mulf %0, %854 : vector<24x12xf32>
    %cst_215 = arith.constant dense<0.000000e+00> : vector<12xf32>
    %856 = vector.multi_reduction <add>, %855, %cst_215 [0] : vector<24x12xf32> to vector<12xf32>
    %857 = vector.shape_cast %856 : vector<12xf32> to vector<1x12xf32>
    %858 = arith.mulf %857, %857 : vector<1x12xf32>
    %cst_216 = arith.constant dense<0.000000e+00> : vector<1xf32>
    %859 = vector.multi_reduction <add>, %858, %cst_216 [1] : vector<1x12xf32> to vector<1xf32>
    %860 = vector.shape_cast %859 : vector<1xf32> to vector<1x1xf32>
    %cst_217 = arith.constant 1.000000e-30 : f32
    %861 = vector.broadcast %cst_217 : f32 to vector<1x1xf32>
    %862 = arith.maximumf %860, %861 : vector<1x1xf32>
    %863 = math.rsqrt %862 : vector<1x1xf32>
    %864 = vector.broadcast %863 : vector<1x1xf32> to vector<1x12xf32>
    %865 = arith.mulf %857, %864 : vector<1x12xf32>
    %866 = vector.broadcast %865 : vector<1x12xf32> to vector<24x12xf32>
    %867 = arith.mulf %0, %866 : vector<24x12xf32>
    %cst_218 = arith.constant dense<0.000000e+00> : vector<24xf32>
    %868 = vector.multi_reduction <add>, %867, %cst_218 [1] : vector<24x12xf32> to vector<24xf32>
    %869 = vector.shape_cast %868 : vector<24xf32> to vector<24x1xf32>
    %870 = arith.mulf %869, %869 : vector<24x1xf32>
    %cst_219 = arith.constant dense<0.000000e+00> : vector<1xf32>
    %871 = vector.multi_reduction <add>, %870, %cst_219 [0] : vector<24x1xf32> to vector<1xf32>
    %872 = vector.shape_cast %871 : vector<1xf32> to vector<1x1xf32>
    %cst_220 = arith.constant 1.000000e-30 : f32
    %873 = vector.broadcast %cst_220 : f32 to vector<1x1xf32>
    %874 = arith.maximumf %872, %873 : vector<1x1xf32>
    %875 = math.rsqrt %874 : vector<1x1xf32>
    %876 = vector.broadcast %875 : vector<1x1xf32> to vector<24x1xf32>
    %877 = arith.mulf %869, %876 : vector<24x1xf32>
    %878 = vector.broadcast %877 : vector<24x1xf32> to vector<24x12xf32>
    %879 = arith.mulf %0, %878 : vector<24x12xf32>
    %cst_221 = arith.constant dense<0.000000e+00> : vector<12xf32>
    %880 = vector.multi_reduction <add>, %879, %cst_221 [0] : vector<24x12xf32> to vector<12xf32>
    %881 = vector.shape_cast %880 : vector<12xf32> to vector<1x12xf32>
    %882 = arith.mulf %881, %881 : vector<1x12xf32>
    %cst_222 = arith.constant dense<0.000000e+00> : vector<1xf32>
    %883 = vector.multi_reduction <add>, %882, %cst_222 [1] : vector<1x12xf32> to vector<1xf32>
    %884 = vector.shape_cast %883 : vector<1xf32> to vector<1x1xf32>
    %cst_223 = arith.constant 1.000000e-30 : f32
    %885 = vector.broadcast %cst_223 : f32 to vector<1x1xf32>
    %886 = arith.maximumf %884, %885 : vector<1x1xf32>
    %887 = math.rsqrt %886 : vector<1x1xf32>
    %888 = vector.broadcast %887 : vector<1x1xf32> to vector<1x12xf32>
    %889 = arith.mulf %881, %888 : vector<1x12xf32>
    %890 = vector.broadcast %889 : vector<1x12xf32> to vector<24x12xf32>
    %891 = arith.mulf %0, %890 : vector<24x12xf32>
    %cst_224 = arith.constant dense<0.000000e+00> : vector<24xf32>
    %892 = vector.multi_reduction <add>, %891, %cst_224 [1] : vector<24x12xf32> to vector<24xf32>
    %893 = vector.shape_cast %892 : vector<24xf32> to vector<24x1xf32>
    %894 = arith.mulf %893, %893 : vector<24x1xf32>
    %cst_225 = arith.constant dense<0.000000e+00> : vector<1xf32>
    %895 = vector.multi_reduction <add>, %894, %cst_225 [0] : vector<24x1xf32> to vector<1xf32>
    %896 = vector.shape_cast %895 : vector<1xf32> to vector<1x1xf32>
    %cst_226 = arith.constant 1.000000e-30 : f32
    %897 = vector.broadcast %cst_226 : f32 to vector<1x1xf32>
    %898 = arith.maximumf %896, %897 : vector<1x1xf32>
    %899 = math.rsqrt %898 : vector<1x1xf32>
    %900 = vector.broadcast %899 : vector<1x1xf32> to vector<24x1xf32>
    %901 = arith.mulf %893, %900 : vector<24x1xf32>
    %902 = vector.broadcast %901 : vector<24x1xf32> to vector<24x12xf32>
    %903 = arith.mulf %0, %902 : vector<24x12xf32>
    %cst_227 = arith.constant dense<0.000000e+00> : vector<12xf32>
    %904 = vector.multi_reduction <add>, %903, %cst_227 [0] : vector<24x12xf32> to vector<12xf32>
    %905 = vector.shape_cast %904 : vector<12xf32> to vector<1x12xf32>
    %906 = arith.mulf %905, %905 : vector<1x12xf32>
    %cst_228 = arith.constant dense<0.000000e+00> : vector<1xf32>
    %907 = vector.multi_reduction <add>, %906, %cst_228 [1] : vector<1x12xf32> to vector<1xf32>
    %908 = vector.shape_cast %907 : vector<1xf32> to vector<1x1xf32>
    %cst_229 = arith.constant 1.000000e-30 : f32
    %909 = vector.broadcast %cst_229 : f32 to vector<1x1xf32>
    %910 = arith.maximumf %908, %909 : vector<1x1xf32>
    %911 = math.rsqrt %910 : vector<1x1xf32>
    %912 = vector.broadcast %911 : vector<1x1xf32> to vector<1x12xf32>
    %913 = arith.mulf %905, %912 : vector<1x12xf32>
    %914 = vector.broadcast %913 : vector<1x12xf32> to vector<24x12xf32>
    %915 = arith.mulf %0, %914 : vector<24x12xf32>
    %cst_230 = arith.constant dense<0.000000e+00> : vector<24xf32>
    %916 = vector.multi_reduction <add>, %915, %cst_230 [1] : vector<24x12xf32> to vector<24xf32>
    %917 = vector.shape_cast %916 : vector<24xf32> to vector<24x1xf32>
    %918 = arith.mulf %917, %917 : vector<24x1xf32>
    %cst_231 = arith.constant dense<0.000000e+00> : vector<1xf32>
    %919 = vector.multi_reduction <add>, %918, %cst_231 [0] : vector<24x1xf32> to vector<1xf32>
    %920 = vector.shape_cast %919 : vector<1xf32> to vector<1x1xf32>
    %cst_232 = arith.constant 1.000000e-30 : f32
    %921 = vector.broadcast %cst_232 : f32 to vector<1x1xf32>
    %922 = arith.maximumf %920, %921 : vector<1x1xf32>
    %923 = math.rsqrt %922 : vector<1x1xf32>
    %924 = vector.broadcast %923 : vector<1x1xf32> to vector<24x1xf32>
    %925 = arith.mulf %917, %924 : vector<24x1xf32>
    %926 = vector.broadcast %925 : vector<24x1xf32> to vector<24x12xf32>
    %927 = arith.mulf %0, %926 : vector<24x12xf32>
    %cst_233 = arith.constant dense<0.000000e+00> : vector<12xf32>
    %928 = vector.multi_reduction <add>, %927, %cst_233 [0] : vector<24x12xf32> to vector<12xf32>
    %929 = vector.shape_cast %928 : vector<12xf32> to vector<1x12xf32>
    %930 = arith.mulf %929, %929 : vector<1x12xf32>
    %cst_234 = arith.constant dense<0.000000e+00> : vector<1xf32>
    %931 = vector.multi_reduction <add>, %930, %cst_234 [1] : vector<1x12xf32> to vector<1xf32>
    %932 = vector.shape_cast %931 : vector<1xf32> to vector<1x1xf32>
    %cst_235 = arith.constant 1.000000e-30 : f32
    %933 = vector.broadcast %cst_235 : f32 to vector<1x1xf32>
    %934 = arith.maximumf %932, %933 : vector<1x1xf32>
    %935 = math.rsqrt %934 : vector<1x1xf32>
    %936 = vector.broadcast %935 : vector<1x1xf32> to vector<1x12xf32>
    %937 = arith.mulf %929, %936 : vector<1x12xf32>
    %938 = vector.broadcast %937 : vector<1x12xf32> to vector<24x12xf32>
    %939 = arith.mulf %0, %938 : vector<24x12xf32>
    %cst_236 = arith.constant dense<0.000000e+00> : vector<24xf32>
    %940 = vector.multi_reduction <add>, %939, %cst_236 [1] : vector<24x12xf32> to vector<24xf32>
    %941 = vector.shape_cast %940 : vector<24xf32> to vector<24x1xf32>
    %942 = arith.mulf %941, %941 : vector<24x1xf32>
    %cst_237 = arith.constant dense<0.000000e+00> : vector<1xf32>
    %943 = vector.multi_reduction <add>, %942, %cst_237 [0] : vector<24x1xf32> to vector<1xf32>
    %944 = vector.shape_cast %943 : vector<1xf32> to vector<1x1xf32>
    %cst_238 = arith.constant 1.000000e-30 : f32
    %945 = vector.broadcast %cst_238 : f32 to vector<1x1xf32>
    %946 = arith.maximumf %944, %945 : vector<1x1xf32>
    %947 = math.rsqrt %946 : vector<1x1xf32>
    %948 = vector.broadcast %947 : vector<1x1xf32> to vector<24x1xf32>
    %949 = arith.mulf %941, %948 : vector<24x1xf32>
    %950 = vector.broadcast %949 : vector<24x1xf32> to vector<24x12xf32>
    %951 = arith.mulf %0, %950 : vector<24x12xf32>
    %cst_239 = arith.constant dense<0.000000e+00> : vector<12xf32>
    %952 = vector.multi_reduction <add>, %951, %cst_239 [0] : vector<24x12xf32> to vector<12xf32>
    %953 = vector.shape_cast %952 : vector<12xf32> to vector<1x12xf32>
    %954 = arith.mulf %953, %953 : vector<1x12xf32>
    %cst_240 = arith.constant dense<0.000000e+00> : vector<1xf32>
    %955 = vector.multi_reduction <add>, %954, %cst_240 [1] : vector<1x12xf32> to vector<1xf32>
    %956 = vector.shape_cast %955 : vector<1xf32> to vector<1x1xf32>
    %cst_241 = arith.constant 1.000000e-30 : f32
    %957 = vector.broadcast %cst_241 : f32 to vector<1x1xf32>
    %958 = arith.maximumf %956, %957 : vector<1x1xf32>
    %959 = math.rsqrt %958 : vector<1x1xf32>
    %960 = vector.broadcast %959 : vector<1x1xf32> to vector<1x12xf32>
    %961 = arith.mulf %953, %960 : vector<1x12xf32>
    %962 = vector.broadcast %961 : vector<1x12xf32> to vector<24x12xf32>
    %963 = arith.mulf %0, %962 : vector<24x12xf32>
    %cst_242 = arith.constant dense<0.000000e+00> : vector<24xf32>
    %964 = vector.multi_reduction <add>, %963, %cst_242 [1] : vector<24x12xf32> to vector<24xf32>
    %965 = vector.shape_cast %964 : vector<24xf32> to vector<24x1xf32>
    %966 = arith.mulf %965, %965 : vector<24x1xf32>
    %cst_243 = arith.constant dense<0.000000e+00> : vector<1xf32>
    %967 = vector.multi_reduction <add>, %966, %cst_243 [0] : vector<24x1xf32> to vector<1xf32>
    %968 = vector.shape_cast %967 : vector<1xf32> to vector<1x1xf32>
    %cst_244 = arith.constant 1.000000e-30 : f32
    %969 = vector.broadcast %cst_244 : f32 to vector<1x1xf32>
    %970 = arith.maximumf %968, %969 : vector<1x1xf32>
    %971 = math.rsqrt %970 : vector<1x1xf32>
    %972 = vector.broadcast %971 : vector<1x1xf32> to vector<24x1xf32>
    %973 = arith.mulf %965, %972 : vector<24x1xf32>
    %974 = vector.broadcast %973 : vector<24x1xf32> to vector<24x12xf32>
    %975 = arith.mulf %0, %974 : vector<24x12xf32>
    %cst_245 = arith.constant dense<0.000000e+00> : vector<12xf32>
    %976 = vector.multi_reduction <add>, %975, %cst_245 [0] : vector<24x12xf32> to vector<12xf32>
    %977 = vector.shape_cast %976 : vector<12xf32> to vector<1x12xf32>
    %978 = arith.mulf %977, %977 : vector<1x12xf32>
    %cst_246 = arith.constant dense<0.000000e+00> : vector<1xf32>
    %979 = vector.multi_reduction <add>, %978, %cst_246 [1] : vector<1x12xf32> to vector<1xf32>
    %980 = vector.shape_cast %979 : vector<1xf32> to vector<1x1xf32>
    %cst_247 = arith.constant 1.000000e-30 : f32
    %981 = vector.broadcast %cst_247 : f32 to vector<1x1xf32>
    %982 = arith.maximumf %980, %981 : vector<1x1xf32>
    %983 = math.rsqrt %982 : vector<1x1xf32>
    %984 = vector.broadcast %983 : vector<1x1xf32> to vector<1x12xf32>
    %985 = arith.mulf %977, %984 : vector<1x12xf32>
    %986 = vector.broadcast %985 : vector<1x12xf32> to vector<24x12xf32>
    %987 = arith.mulf %0, %986 : vector<24x12xf32>
    %cst_248 = arith.constant dense<0.000000e+00> : vector<24xf32>
    %988 = vector.multi_reduction <add>, %987, %cst_248 [1] : vector<24x12xf32> to vector<24xf32>
    %989 = vector.shape_cast %988 : vector<24xf32> to vector<24x1xf32>
    %990 = arith.mulf %989, %989 : vector<24x1xf32>
    %cst_249 = arith.constant dense<0.000000e+00> : vector<1xf32>
    %991 = vector.multi_reduction <add>, %990, %cst_249 [0] : vector<24x1xf32> to vector<1xf32>
    %992 = vector.shape_cast %991 : vector<1xf32> to vector<1x1xf32>
    %cst_250 = arith.constant 1.000000e-30 : f32
    %993 = vector.broadcast %cst_250 : f32 to vector<1x1xf32>
    %994 = arith.maximumf %992, %993 : vector<1x1xf32>
    %995 = math.rsqrt %994 : vector<1x1xf32>
    %996 = vector.broadcast %995 : vector<1x1xf32> to vector<24x1xf32>
    %997 = arith.mulf %989, %996 : vector<24x1xf32>
    %998 = vector.broadcast %997 : vector<24x1xf32> to vector<24x12xf32>
    %999 = arith.mulf %0, %998 : vector<24x12xf32>
    %cst_251 = arith.constant dense<0.000000e+00> : vector<12xf32>
    %1000 = vector.multi_reduction <add>, %999, %cst_251 [0] : vector<24x12xf32> to vector<12xf32>
    %1001 = vector.shape_cast %1000 : vector<12xf32> to vector<1x12xf32>
    %1002 = arith.mulf %1001, %1001 : vector<1x12xf32>
    %cst_252 = arith.constant dense<0.000000e+00> : vector<1xf32>
    %1003 = vector.multi_reduction <add>, %1002, %cst_252 [1] : vector<1x12xf32> to vector<1xf32>
    %1004 = vector.shape_cast %1003 : vector<1xf32> to vector<1x1xf32>
    %cst_253 = arith.constant 1.000000e-30 : f32
    %1005 = vector.broadcast %cst_253 : f32 to vector<1x1xf32>
    %1006 = arith.maximumf %1004, %1005 : vector<1x1xf32>
    %1007 = math.rsqrt %1006 : vector<1x1xf32>
    %1008 = vector.broadcast %1007 : vector<1x1xf32> to vector<1x12xf32>
    %1009 = arith.mulf %1001, %1008 : vector<1x12xf32>
    %1010 = vector.broadcast %1009 : vector<1x12xf32> to vector<24x12xf32>
    %1011 = arith.mulf %0, %1010 : vector<24x12xf32>
    %cst_254 = arith.constant dense<0.000000e+00> : vector<24xf32>
    %1012 = vector.multi_reduction <add>, %1011, %cst_254 [1] : vector<24x12xf32> to vector<24xf32>
    %1013 = vector.shape_cast %1012 : vector<24xf32> to vector<24x1xf32>
    %1014 = arith.mulf %1013, %1013 : vector<24x1xf32>
    %cst_255 = arith.constant dense<0.000000e+00> : vector<1xf32>
    %1015 = vector.multi_reduction <add>, %1014, %cst_255 [0] : vector<24x1xf32> to vector<1xf32>
    %1016 = vector.shape_cast %1015 : vector<1xf32> to vector<1x1xf32>
    %cst_256 = arith.constant 1.000000e-30 : f32
    %1017 = vector.broadcast %cst_256 : f32 to vector<1x1xf32>
    %1018 = arith.maximumf %1016, %1017 : vector<1x1xf32>
    %1019 = math.rsqrt %1018 : vector<1x1xf32>
    %1020 = vector.broadcast %1019 : vector<1x1xf32> to vector<24x1xf32>
    %1021 = arith.mulf %1013, %1020 : vector<24x1xf32>
    %1022 = vector.broadcast %1021 : vector<24x1xf32> to vector<24x12xf32>
    %1023 = arith.mulf %0, %1022 : vector<24x12xf32>
    %cst_257 = arith.constant dense<0.000000e+00> : vector<12xf32>
    %1024 = vector.multi_reduction <add>, %1023, %cst_257 [0] : vector<24x12xf32> to vector<12xf32>
    %1025 = vector.shape_cast %1024 : vector<12xf32> to vector<1x12xf32>
    %1026 = arith.mulf %1025, %1025 : vector<1x12xf32>
    %cst_258 = arith.constant dense<0.000000e+00> : vector<1xf32>
    %1027 = vector.multi_reduction <add>, %1026, %cst_258 [1] : vector<1x12xf32> to vector<1xf32>
    %1028 = vector.shape_cast %1027 : vector<1xf32> to vector<1x1xf32>
    %cst_259 = arith.constant 1.000000e-30 : f32
    %1029 = vector.broadcast %cst_259 : f32 to vector<1x1xf32>
    %1030 = arith.maximumf %1028, %1029 : vector<1x1xf32>
    %1031 = math.rsqrt %1030 : vector<1x1xf32>
    %1032 = vector.broadcast %1031 : vector<1x1xf32> to vector<1x12xf32>
    %1033 = arith.mulf %1025, %1032 : vector<1x12xf32>
    %1034 = vector.broadcast %1033 : vector<1x12xf32> to vector<24x12xf32>
    %1035 = arith.mulf %0, %1034 : vector<24x12xf32>
    %cst_260 = arith.constant dense<0.000000e+00> : vector<24xf32>
    %1036 = vector.multi_reduction <add>, %1035, %cst_260 [1] : vector<24x12xf32> to vector<24xf32>
    %1037 = vector.shape_cast %1036 : vector<24xf32> to vector<24x1xf32>
    %1038 = arith.mulf %1037, %1037 : vector<24x1xf32>
    %cst_261 = arith.constant dense<0.000000e+00> : vector<1xf32>
    %1039 = vector.multi_reduction <add>, %1038, %cst_261 [0] : vector<24x1xf32> to vector<1xf32>
    %1040 = vector.shape_cast %1039 : vector<1xf32> to vector<1x1xf32>
    %cst_262 = arith.constant 1.000000e-30 : f32
    %1041 = vector.broadcast %cst_262 : f32 to vector<1x1xf32>
    %1042 = arith.maximumf %1040, %1041 : vector<1x1xf32>
    %1043 = math.rsqrt %1042 : vector<1x1xf32>
    %1044 = vector.broadcast %1043 : vector<1x1xf32> to vector<24x1xf32>
    %1045 = arith.mulf %1037, %1044 : vector<24x1xf32>
    %1046 = vector.broadcast %1045 : vector<24x1xf32> to vector<24x12xf32>
    %1047 = arith.mulf %0, %1046 : vector<24x12xf32>
    %cst_263 = arith.constant dense<0.000000e+00> : vector<12xf32>
    %1048 = vector.multi_reduction <add>, %1047, %cst_263 [0] : vector<24x12xf32> to vector<12xf32>
    %1049 = vector.shape_cast %1048 : vector<12xf32> to vector<1x12xf32>
    %1050 = arith.mulf %1049, %1049 : vector<1x12xf32>
    %cst_264 = arith.constant dense<0.000000e+00> : vector<1xf32>
    %1051 = vector.multi_reduction <add>, %1050, %cst_264 [1] : vector<1x12xf32> to vector<1xf32>
    %1052 = vector.shape_cast %1051 : vector<1xf32> to vector<1x1xf32>
    %cst_265 = arith.constant 1.000000e-30 : f32
    %1053 = vector.broadcast %cst_265 : f32 to vector<1x1xf32>
    %1054 = arith.maximumf %1052, %1053 : vector<1x1xf32>
    %1055 = math.rsqrt %1054 : vector<1x1xf32>
    %1056 = vector.broadcast %1055 : vector<1x1xf32> to vector<1x12xf32>
    %1057 = arith.mulf %1049, %1056 : vector<1x12xf32>
    %1058 = vector.broadcast %1057 : vector<1x12xf32> to vector<24x12xf32>
    %1059 = arith.mulf %0, %1058 : vector<24x12xf32>
    %cst_266 = arith.constant dense<0.000000e+00> : vector<24xf32>
    %1060 = vector.multi_reduction <add>, %1059, %cst_266 [1] : vector<24x12xf32> to vector<24xf32>
    %1061 = vector.shape_cast %1060 : vector<24xf32> to vector<24x1xf32>
    %1062 = arith.mulf %1061, %1061 : vector<24x1xf32>
    %cst_267 = arith.constant dense<0.000000e+00> : vector<1xf32>
    %1063 = vector.multi_reduction <add>, %1062, %cst_267 [0] : vector<24x1xf32> to vector<1xf32>
    %1064 = vector.shape_cast %1063 : vector<1xf32> to vector<1x1xf32>
    %cst_268 = arith.constant 1.000000e-30 : f32
    %1065 = vector.broadcast %cst_268 : f32 to vector<1x1xf32>
    %1066 = arith.maximumf %1064, %1065 : vector<1x1xf32>
    %1067 = math.rsqrt %1066 : vector<1x1xf32>
    %1068 = vector.broadcast %1067 : vector<1x1xf32> to vector<24x1xf32>
    %1069 = arith.mulf %1061, %1068 : vector<24x1xf32>
    %1070 = vector.broadcast %1069 : vector<24x1xf32> to vector<24x12xf32>
    %1071 = arith.mulf %0, %1070 : vector<24x12xf32>
    %cst_269 = arith.constant dense<0.000000e+00> : vector<12xf32>
    %1072 = vector.multi_reduction <add>, %1071, %cst_269 [0] : vector<24x12xf32> to vector<12xf32>
    %1073 = vector.shape_cast %1072 : vector<12xf32> to vector<1x12xf32>
    %1074 = arith.mulf %1073, %1073 : vector<1x12xf32>
    %cst_270 = arith.constant dense<0.000000e+00> : vector<1xf32>
    %1075 = vector.multi_reduction <add>, %1074, %cst_270 [1] : vector<1x12xf32> to vector<1xf32>
    %1076 = vector.shape_cast %1075 : vector<1xf32> to vector<1x1xf32>
    %cst_271 = arith.constant 1.000000e-30 : f32
    %1077 = vector.broadcast %cst_271 : f32 to vector<1x1xf32>
    %1078 = arith.maximumf %1076, %1077 : vector<1x1xf32>
    %1079 = math.rsqrt %1078 : vector<1x1xf32>
    %1080 = vector.broadcast %1079 : vector<1x1xf32> to vector<1x12xf32>
    %1081 = arith.mulf %1073, %1080 : vector<1x12xf32>
    %1082 = vector.broadcast %1081 : vector<1x12xf32> to vector<24x12xf32>
    %1083 = arith.mulf %0, %1082 : vector<24x12xf32>
    %cst_272 = arith.constant dense<0.000000e+00> : vector<24xf32>
    %1084 = vector.multi_reduction <add>, %1083, %cst_272 [1] : vector<24x12xf32> to vector<24xf32>
    %1085 = vector.shape_cast %1084 : vector<24xf32> to vector<24x1xf32>
    %1086 = arith.mulf %1085, %1085 : vector<24x1xf32>
    %cst_273 = arith.constant dense<0.000000e+00> : vector<1xf32>
    %1087 = vector.multi_reduction <add>, %1086, %cst_273 [0] : vector<24x1xf32> to vector<1xf32>
    %1088 = vector.shape_cast %1087 : vector<1xf32> to vector<1x1xf32>
    %cst_274 = arith.constant 1.000000e-30 : f32
    %1089 = vector.broadcast %cst_274 : f32 to vector<1x1xf32>
    %1090 = arith.maximumf %1088, %1089 : vector<1x1xf32>
    %1091 = math.rsqrt %1090 : vector<1x1xf32>
    %1092 = vector.broadcast %1091 : vector<1x1xf32> to vector<24x1xf32>
    %1093 = arith.mulf %1085, %1092 : vector<24x1xf32>
    %1094 = vector.broadcast %1093 : vector<24x1xf32> to vector<24x12xf32>
    %1095 = arith.mulf %0, %1094 : vector<24x12xf32>
    %cst_275 = arith.constant dense<0.000000e+00> : vector<12xf32>
    %1096 = vector.multi_reduction <add>, %1095, %cst_275 [0] : vector<24x12xf32> to vector<12xf32>
    %1097 = vector.shape_cast %1096 : vector<12xf32> to vector<1x12xf32>
    %1098 = arith.mulf %1097, %1097 : vector<1x12xf32>
    %cst_276 = arith.constant dense<0.000000e+00> : vector<1xf32>
    %1099 = vector.multi_reduction <add>, %1098, %cst_276 [1] : vector<1x12xf32> to vector<1xf32>
    %1100 = vector.shape_cast %1099 : vector<1xf32> to vector<1x1xf32>
    %cst_277 = arith.constant 1.000000e-30 : f32
    %1101 = vector.broadcast %cst_277 : f32 to vector<1x1xf32>
    %1102 = arith.maximumf %1100, %1101 : vector<1x1xf32>
    %1103 = math.rsqrt %1102 : vector<1x1xf32>
    %1104 = vector.broadcast %1103 : vector<1x1xf32> to vector<1x12xf32>
    %1105 = arith.mulf %1097, %1104 : vector<1x12xf32>
    %1106 = vector.broadcast %1105 : vector<1x12xf32> to vector<24x12xf32>
    %1107 = arith.mulf %0, %1106 : vector<24x12xf32>
    %cst_278 = arith.constant dense<0.000000e+00> : vector<24xf32>
    %1108 = vector.multi_reduction <add>, %1107, %cst_278 [1] : vector<24x12xf32> to vector<24xf32>
    %1109 = vector.shape_cast %1108 : vector<24xf32> to vector<24x1xf32>
    %1110 = arith.mulf %1109, %1109 : vector<24x1xf32>
    %cst_279 = arith.constant dense<0.000000e+00> : vector<1xf32>
    %1111 = vector.multi_reduction <add>, %1110, %cst_279 [0] : vector<24x1xf32> to vector<1xf32>
    %1112 = vector.shape_cast %1111 : vector<1xf32> to vector<1x1xf32>
    %cst_280 = arith.constant 1.000000e-30 : f32
    %1113 = vector.broadcast %cst_280 : f32 to vector<1x1xf32>
    %1114 = arith.maximumf %1112, %1113 : vector<1x1xf32>
    %1115 = math.rsqrt %1114 : vector<1x1xf32>
    %1116 = vector.broadcast %1115 : vector<1x1xf32> to vector<24x1xf32>
    %1117 = arith.mulf %1109, %1116 : vector<24x1xf32>
    %1118 = vector.broadcast %1117 : vector<24x1xf32> to vector<24x12xf32>
    %1119 = arith.mulf %0, %1118 : vector<24x12xf32>
    %cst_281 = arith.constant dense<0.000000e+00> : vector<12xf32>
    %1120 = vector.multi_reduction <add>, %1119, %cst_281 [0] : vector<24x12xf32> to vector<12xf32>
    %1121 = vector.shape_cast %1120 : vector<12xf32> to vector<1x12xf32>
    %1122 = arith.mulf %1121, %1121 : vector<1x12xf32>
    %cst_282 = arith.constant dense<0.000000e+00> : vector<1xf32>
    %1123 = vector.multi_reduction <add>, %1122, %cst_282 [1] : vector<1x12xf32> to vector<1xf32>
    %1124 = vector.shape_cast %1123 : vector<1xf32> to vector<1x1xf32>
    %cst_283 = arith.constant 1.000000e-30 : f32
    %1125 = vector.broadcast %cst_283 : f32 to vector<1x1xf32>
    %1126 = arith.maximumf %1124, %1125 : vector<1x1xf32>
    %1127 = math.rsqrt %1126 : vector<1x1xf32>
    %1128 = vector.broadcast %1127 : vector<1x1xf32> to vector<1x12xf32>
    %1129 = arith.mulf %1121, %1128 : vector<1x12xf32>
    %1130 = vector.broadcast %1129 : vector<1x12xf32> to vector<24x12xf32>
    %1131 = arith.mulf %0, %1130 : vector<24x12xf32>
    %cst_284 = arith.constant dense<0.000000e+00> : vector<24xf32>
    %1132 = vector.multi_reduction <add>, %1131, %cst_284 [1] : vector<24x12xf32> to vector<24xf32>
    %1133 = vector.shape_cast %1132 : vector<24xf32> to vector<24x1xf32>
    %1134 = arith.mulf %1133, %1133 : vector<24x1xf32>
    %cst_285 = arith.constant dense<0.000000e+00> : vector<1xf32>
    %1135 = vector.multi_reduction <add>, %1134, %cst_285 [0] : vector<24x1xf32> to vector<1xf32>
    %1136 = vector.shape_cast %1135 : vector<1xf32> to vector<1x1xf32>
    %cst_286 = arith.constant 1.000000e-30 : f32
    %1137 = vector.broadcast %cst_286 : f32 to vector<1x1xf32>
    %1138 = arith.maximumf %1136, %1137 : vector<1x1xf32>
    %1139 = math.rsqrt %1138 : vector<1x1xf32>
    %1140 = vector.broadcast %1139 : vector<1x1xf32> to vector<24x1xf32>
    %1141 = arith.mulf %1133, %1140 : vector<24x1xf32>
    %1142 = vector.broadcast %1141 : vector<24x1xf32> to vector<24x12xf32>
    %1143 = arith.mulf %0, %1142 : vector<24x12xf32>
    %cst_287 = arith.constant dense<0.000000e+00> : vector<12xf32>
    %1144 = vector.multi_reduction <add>, %1143, %cst_287 [0] : vector<24x12xf32> to vector<12xf32>
    %1145 = vector.shape_cast %1144 : vector<12xf32> to vector<1x12xf32>
    %1146 = arith.mulf %1145, %1145 : vector<1x12xf32>
    %cst_288 = arith.constant dense<0.000000e+00> : vector<1xf32>
    %1147 = vector.multi_reduction <add>, %1146, %cst_288 [1] : vector<1x12xf32> to vector<1xf32>
    %1148 = vector.shape_cast %1147 : vector<1xf32> to vector<1x1xf32>
    %cst_289 = arith.constant 1.000000e-30 : f32
    %1149 = vector.broadcast %cst_289 : f32 to vector<1x1xf32>
    %1150 = arith.maximumf %1148, %1149 : vector<1x1xf32>
    %1151 = math.rsqrt %1150 : vector<1x1xf32>
    %1152 = vector.broadcast %1151 : vector<1x1xf32> to vector<1x12xf32>
    %1153 = arith.mulf %1145, %1152 : vector<1x12xf32>
    %1154 = vector.broadcast %1153 : vector<1x12xf32> to vector<24x12xf32>
    %1155 = arith.mulf %0, %1154 : vector<24x12xf32>
    %cst_290 = arith.constant dense<0.000000e+00> : vector<24xf32>
    %1156 = vector.multi_reduction <add>, %1155, %cst_290 [1] : vector<24x12xf32> to vector<24xf32>
    %1157 = vector.shape_cast %1156 : vector<24xf32> to vector<24x1xf32>
    %1158 = arith.mulf %1157, %1157 : vector<24x1xf32>
    %cst_291 = arith.constant dense<0.000000e+00> : vector<1xf32>
    %1159 = vector.multi_reduction <add>, %1158, %cst_291 [0] : vector<24x1xf32> to vector<1xf32>
    %1160 = vector.shape_cast %1159 : vector<1xf32> to vector<1x1xf32>
    %cst_292 = arith.constant 1.000000e-30 : f32
    %1161 = vector.broadcast %cst_292 : f32 to vector<1x1xf32>
    %1162 = arith.maximumf %1160, %1161 : vector<1x1xf32>
    %1163 = math.rsqrt %1162 : vector<1x1xf32>
    %1164 = vector.broadcast %1163 : vector<1x1xf32> to vector<24x1xf32>
    %1165 = arith.mulf %1157, %1164 : vector<24x1xf32>
    %1166 = vector.broadcast %1165 : vector<24x1xf32> to vector<24x12xf32>
    %1167 = arith.mulf %0, %1166 : vector<24x12xf32>
    %cst_293 = arith.constant dense<0.000000e+00> : vector<12xf32>
    %1168 = vector.multi_reduction <add>, %1167, %cst_293 [0] : vector<24x12xf32> to vector<12xf32>
    %1169 = vector.shape_cast %1168 : vector<12xf32> to vector<1x12xf32>
    %1170 = arith.mulf %1169, %1169 : vector<1x12xf32>
    %cst_294 = arith.constant dense<0.000000e+00> : vector<1xf32>
    %1171 = vector.multi_reduction <add>, %1170, %cst_294 [1] : vector<1x12xf32> to vector<1xf32>
    %1172 = vector.shape_cast %1171 : vector<1xf32> to vector<1x1xf32>
    %cst_295 = arith.constant 1.000000e-30 : f32
    %1173 = vector.broadcast %cst_295 : f32 to vector<1x1xf32>
    %1174 = arith.maximumf %1172, %1173 : vector<1x1xf32>
    %1175 = math.rsqrt %1174 : vector<1x1xf32>
    %1176 = vector.broadcast %1175 : vector<1x1xf32> to vector<1x12xf32>
    %1177 = arith.mulf %1169, %1176 : vector<1x12xf32>
    %1178 = vector.broadcast %1177 : vector<1x12xf32> to vector<24x12xf32>
    %1179 = arith.mulf %0, %1178 : vector<24x12xf32>
    %cst_296 = arith.constant dense<0.000000e+00> : vector<24xf32>
    %1180 = vector.multi_reduction <add>, %1179, %cst_296 [1] : vector<24x12xf32> to vector<24xf32>
    %1181 = vector.shape_cast %1180 : vector<24xf32> to vector<24x1xf32>
    %1182 = arith.mulf %1181, %1181 : vector<24x1xf32>
    %cst_297 = arith.constant dense<0.000000e+00> : vector<1xf32>
    %1183 = vector.multi_reduction <add>, %1182, %cst_297 [0] : vector<24x1xf32> to vector<1xf32>
    %1184 = vector.shape_cast %1183 : vector<1xf32> to vector<1x1xf32>
    %cst_298 = arith.constant 1.000000e-30 : f32
    %1185 = vector.broadcast %cst_298 : f32 to vector<1x1xf32>
    %1186 = arith.maximumf %1184, %1185 : vector<1x1xf32>
    %1187 = math.rsqrt %1186 : vector<1x1xf32>
    %1188 = vector.broadcast %1187 : vector<1x1xf32> to vector<24x1xf32>
    %1189 = arith.mulf %1181, %1188 : vector<24x1xf32>
    %1190 = vector.broadcast %1189 : vector<24x1xf32> to vector<24x12xf32>
    %1191 = arith.mulf %0, %1190 : vector<24x12xf32>
    %cst_299 = arith.constant dense<0.000000e+00> : vector<12xf32>
    %1192 = vector.multi_reduction <add>, %1191, %cst_299 [0] : vector<24x12xf32> to vector<12xf32>
    %1193 = vector.shape_cast %1192 : vector<12xf32> to vector<1x12xf32>
    %1194 = arith.mulf %1193, %1193 : vector<1x12xf32>
    %cst_300 = arith.constant dense<0.000000e+00> : vector<1xf32>
    %1195 = vector.multi_reduction <add>, %1194, %cst_300 [1] : vector<1x12xf32> to vector<1xf32>
    %1196 = vector.shape_cast %1195 : vector<1xf32> to vector<1x1xf32>
    %cst_301 = arith.constant 1.000000e-30 : f32
    %1197 = vector.broadcast %cst_301 : f32 to vector<1x1xf32>
    %1198 = arith.maximumf %1196, %1197 : vector<1x1xf32>
    %1199 = math.rsqrt %1198 : vector<1x1xf32>
    %1200 = vector.broadcast %1199 : vector<1x1xf32> to vector<1x12xf32>
    %1201 = arith.mulf %1193, %1200 : vector<1x12xf32>
    %1202 = math.sqrt %1198 : vector<1x1xf32>
    %cst_302 = arith.constant 1.000000e+00 : f32
    %1203 = vector.broadcast %cst_302 : f32 to vector<1x1xf32>
    %1204 = arith.mulf %1203, %1202 : vector<1x1xf32>
    %c0_303 = arith.constant 0 : index
    %c0_304 = arith.constant 0 : index
    %1205 = vector.load %arg2[%c0_303, %c0_304] : memref<1x1xf32, #tpu.memory_space<vmem>>, vector<1x1xf32>
    tpu.vector_store %arg2[%c0_303, %c0_304], %1204 {strides = array<i32>} : memref<1x1xf32, #tpu.memory_space<vmem>>, vector<1x1xf32>,
    %c0_305 = arith.constant 0 : index
    %c0_306 = arith.constant 0 : index
    %1206 = vector.load %arg3[%c0_305, %c0_306] : memref<1x12xf32, #tpu.memory_space<vmem>>, vector<1x12xf32>
    tpu.vector_store %arg3[%c0_305, %c0_306], %1201 {strides = array<i32>} : memref<1x12xf32, #tpu.memory_space<vmem>>, vector<1x12xf32>,
    %c0_307 = arith.constant 0 : index
    %c0_308 = arith.constant 0 : index
    %1207 = vector.load %arg4[%c0_307, %c0_308] : memref<24x1xf32, #tpu.memory_space<vmem>>, vector<24x1xf32>
    tpu.vector_store %arg4[%c0_307, %c0_308], %1189 {strides = array<i32>} : memref<24x1xf32, #tpu.memory_space<vmem>>, vector<24x1xf32>,
    return
  }
}

</mosaic_0001>

<bundles_post_ra>
// kernel: _run_spectral_kernel.1
= control target key start
LH: loop header
LB: loop body
LE: loop exit
PB: predicated region body
PF: predicated region fallthrough
CT: control target
= control target key end

     0   :  { %10 = vsyncpa [#allocation3], 0  ;;  %vm26_vm0 = vcmask 97280   ;;  %s4503_s0 = inlined_call_operand.vmem [shape: f32[24,12], index: 0, kind: input, shape index: {}]   ;;  %s4504_s1 = inlined_call_operand.vmem [shape: f32[1,12], index: 1, kind: input, shape index: {}]   ;;  %s4505_s2 = inlined_call_operand.hbm [shape: f32[1,1], index: 2, kind: output, shape index: {0}]   ;;  %s4506_s3 = inlined_call_operand.hbm [shape: f32[1,12], index: 3, kind: output, shape index: {1}]   ;;  %s4507_s4 = inlined_call_operand.vmem [shape: f32[24,1], index: 4, kind: output, shape index: {2}]  }
   0x1   :  { %v3733_v0 = vld [vmem:[%s4503_s0] sm:$0xff]  ;;  %v3741_v2 = vld [vmem:[%s4503_s0 + $0x10] sm:$0xff] }
   0x2   :  { %v3432_v1 = vld [vmem:[%s4504_s1] ss:$0 sm:$0xff] }
   0x3   :  { %11 = vsyncpa [#allocation5], 0  ;;  %v23_v3 = vmul.f32 %v3432_v1, %v3733_v0  ;;  %v25_v4 = vmul.f32 %v3432_v1, %v3741_v2  ;;  %v3748_v5 = vld [vmem:[%s4503_s0 + $0x8] sm:$0xff]  ;;  %s3412_s13 = sshll.u32 %s4506_s3, 4  ;;  %s3704_s14 = smov [#allocation2]   ;;  %s3413_s13 = int_to_ptr.hbm [resolvable:$true] %s3412_s13 }
   0x4   :  { %v24_v8 = vmul.f32 %v3432_v1, %v3748_v5  ;;  %s3399_s15 = sshll.u32 %s3704_s14, 4  ;;  %s3401_s18 = sshll.u32 %s4505_s2, 4  ;;  %s3400_s15 = int_to_ptr.vmem [resolvable:$true] %s3399_s15  ;;  %s3402_s18 = int_to_ptr.hbm [resolvable:$true] %s3401_s18 }
   0x5   :  { %v27_v6 = vsel %vm26_vm0, %v23_v3, 0.0  ;;  %v33_v7 = vsel %vm26_vm0, %v25_v4, 0.0 }
   0x6   :  { %28 = vadd.xlane.f32.xlu0 %v27_v6  ;;  %34 = vadd.xlane.f32.xlu1 %v33_v7  ;;  %v30_v9 = vsel %vm26_vm0, %v24_v8, 0.0 }
   0xe   :  { %31 = vadd.xlane.f32.xlu0 %v30_v9 }
  0x79   :  { %v29_v10 = vpop.xlane.xlu0 %28  ;;  %v35_v11 = vpop.xlane.xlu1 %34 }
  0x7a   :  { %v36_v13 = vmul.f32 %v29_v10, %v29_v10  ;;  %v38_v15 = vmul.f32 %v35_v11, %v35_v11 }
  0x81   :  { %v32_v12 = vpop.xlane.xlu0 %31 }
  0x82   :  { %v37_v14 = vmul.f32 %v32_v12, %v32_v12 }
  0x84   :  { %v39_v16 = vadd.f32 %v37_v14, %v36_v13 }
  0x86   :  { %v40_v17 = vadd.f32 %v39_v16, %v38_v15 }
  0x88   :  { %v41_v18 = vrot.slane %v40_v17, 4 }
  0x8a   :  { %v42_v19 = vadd.f32 %v41_v18, %v40_v17 }
  0x8c   :  { %v43_v20 = vrot.slane %v42_v19, 2 }
  0x8e   :  { %v44_v21 = vadd.f32 %v43_v20, %v42_v19 }
  0x90   :  { %v45_v22 = vrot.slane %v44_v21, 1 }
  0x92   :  { %v46_v23 = vadd.f32 %v45_v22, %v44_v21 }
  0x94   :  { %v47_v24 = vmax.f32 %v46_v23, 1e-30 }
  0x96   :  { %3433 = vrsqrt.f32 %v47_v24  ;;  %vm54_vm2 = vweird.f32 %v47_v24 }
  0x9c   :  { %v3434_v25 = vpop.eup %3433 }
  0x9d   :  { %v49_v26 = vmul.f32 %v3434_v25, %v47_v24  ;;  %vm55_vm1 = vweird.f32 %v3434_v25 }
  0x9e   :  { %vm56_vm3 = vmor %vm54_vm2, %vm55_vm1 }
  0x9f   :  { %v50_v27 = vmul.f32 %v3434_v25, %v49_v26 }
  0xa1   :  { %v51_v28 = vmul.f32 0.5, %v50_v27 }
  0xa3   :  { %v52_v29 = vsub.f32 1.5, %v51_v28 }
  0xa5   :  { %v53_v30 = vmul.f32 %v3434_v25, %v52_v29 }
  0xa7   :  { %v57_v31 = vsel %vm56_vm3, %v3434_v25, %v53_v30 }
  0xa8   :  { %v58_v32 = vmul.f32 %v57_v31, %v29_v10  ;;  %v59_v33 = vmul.f32 %v57_v31, %v32_v12  ;;  %v60_v34 = vmul.f32 %v57_v31, %v35_v11 }
  0xaa   :  { %v61_v35 = vmul.f32 %v58_v32, %v3733_v0  ;;  %v62_v36 = vmul.f32 %v59_v33, %v3748_v5  ;;  %v63_v37 = vmul.f32 %v60_v34, %v3741_v2 }
  0xac   :  { %v64_v38 = vsel %vm26_vm0, %v61_v35, 0.0  ;;  %v65_v39 = vsel %vm26_vm0, %v62_v36, 0.0  ;;  %v67_v41 = vsel %vm26_vm0, %v63_v37, 0.0 }
  0xad   :  { %v66_v40 = vadd.f32 %v65_v39, %v64_v38 }
  0xaf   :  { %v68_v42 = vadd.f32 %v67_v41, %v66_v40 }
  0xb1   :  { %v69_v43 = vrot.slane %v68_v42, 4 }
  0xb3   :  { %v70_v44 = vadd.f32 %v69_v43, %v68_v42 }
  0xb5   :  { %v71_v45 = vrot.slane %v70_v44, 2 }
  0xb7   :  { %v72_v46 = vadd.f32 %v71_v45, %v70_v44 }
  0xb9   :  { %v73_v47 = vrot.slane %v72_v46, 1 }
  0xbb   :  { %v74_v48 = vadd.f32 %v73_v47, %v72_v46 }
  0xbd   :  { %v75_v49 = vmul.f32 %v74_v48, %v74_v48 }
  0xbf   :  { %v76_v50 = vsel %vm26_vm0, %v75_v49, 0.0 }
  0xc0   :  { %77 = vadd.xlane.f32.xlu1 %v76_v50 }
 0x133   :  { %v78_v51 = vpop.xlane.xlu1 %77 }
 0x134   :  { %v79_v52 = vmax.f32 %v78_v51, 1e-30 }
 0x136   :  { %3435 = vrsqrt.f32 %v79_v52  ;;  %vm86_vm5 = vweird.f32 %v79_v52 }
 0x13c   :  { %v3436_v53 = vpop.eup %3435 }
 0x13d   :  { %v81_v54 = vmul.f32 %v3436_v53, %v79_v52  ;;  %vm87_vm4 = vweird.f32 %v3436_v53 }
 0x13e   :  { %vm88_vm6 = vmor %vm86_vm5, %vm87_vm4 }
 0x13f   :  { %v82_v55 = vmul.f32 %v3436_v53, %v81_v54 }
 0x141   :  { %v83_v56 = vmul.f32 0.5, %v82_v55 }
 0x143   :  { %v84_v57 = vsub.f32 1.5, %v83_v56 }
 0x145   :  { %v85_v58 = vmul.f32 %v3436_v53, %v84_v57 }
 0x147   :  { %v89_v59 = vsel %vm88_vm6, %v3436_v53, %v85_v58 }
 0x148   :  { %v90_v60 = vmul.f32 %v89_v59, %v74_v48 }
 0x14a   :  { %v93_v61 = vmul.f32 %v90_v60, %v3741_v2  ;;  %v91_v62 = vmul.f32 %v90_v60, %v3733_v0  ;;  %v92_v3 = vmul.f32 %v90_v60, %v3748_v5 }
 0x14c   :  { %v100_v63 = vsel %vm26_vm0, %v93_v61, 0.0  ;;  %v94_v1 = vsel %vm26_vm0, %v91_v62, 0.0  ;;  %v97_v4 = vsel %vm26_vm0, %v92_v3, 0.0 }
 0x14d   :  { %101 = vadd.xlane.f32.xlu0 %v100_v63  ;;  %95 = vadd.xlane.f32.xlu2 %v94_v1 }
 0x155   :  { %98 = vadd.xlane.f32.xlu2 %v97_v4 }
 0x1c0   :  { %v96_v6 = vpop.xlane.xlu2 %95  ;;  %v102_v7 = vpop.xlane.xlu0 %101 }
 0x1c1   :  { %v103_v9 = vmul.f32 %v96_v6, %v96_v6  ;;  %v105_v11 = vmul.f32 %v102_v7, %v102_v7 }
 0x1c8   :  { %v99_v8 = vpop.xlane.xlu2 %98 }
 0x1c9   :  { %v104_v10 = vmul.f32 %v99_v8, %v99_v8 }
 0x1cb   :  { %v106_v12 = vadd.f32 %v104_v10, %v103_v9 }
 0x1cd   :  { %v107_v13 = vadd.f32 %v106_v12, %v105_v11 }
 0x1cf   :  { %v108_v14 = vrot.slane %v107_v13, 4 }
 0x1d1   :  { %v109_v15 = vadd.f32 %v108_v14, %v107_v13 }
 0x1d3   :  { %v110_v16 = vrot.slane %v109_v15, 2 }
 0x1d5   :  { %v111_v17 = vadd.f32 %v110_v16, %v109_v15 }
 0x1d7   :  { %v112_v18 = vrot.slane %v111_v17, 1 }
 0x1d9   :  { %v113_v19 = vadd.f32 %v112_v18, %v111_v17 }
 0x1db   :  { %v114_v20 = vmax.f32 %v113_v19, 1e-30 }
 0x1dd   :  { %3437 = vrsqrt.f32 %v114_v20  ;;  %vm121_vm8 = vweird.f32 %v114_v20 }
 0x1e3   :  { %v3438_v21 = vpop.eup %3437 }
 0x1e4   :  { %v116_v22 = vmul.f32 %v3438_v21, %v114_v20  ;;  %vm122_vm7 = vweird.f32 %v3438_v21 }
 0x1e5   :  { %vm123_vm9 = vmor %vm121_vm8, %vm122_vm7 }
 0x1e6   :  { %v117_v23 = vmul.f32 %v3438_v21, %v116_v22 }
 0x1e8   :  { %v118_v24 = vmul.f32 0.5, %v117_v23 }
 0x1ea   :  { %v119_v25 = vsub.f32 1.5, %v118_v24 }
 0x1ec   :  { %v120_v26 = vmul.f32 %v3438_v21, %v119_v25 }
 0x1ee   :  { %v124_v27 = vsel %vm123_vm9, %v3438_v21, %v120_v26 }
 0x1ef   :  { %v125_v28 = vmul.f32 %v124_v27, %v96_v6  ;;  %v126_v29 = vmul.f32 %v124_v27, %v99_v8  ;;  %v127_v30 = vmul.f32 %v124_v27, %v102_v7 }
 0x1f1   :  { %v128_v31 = vmul.f32 %v125_v28, %v3733_v0  ;;  %v129_v32 = vmul.f32 %v126_v29, %v3748_v5  ;;  %v130_v33 = vmul.f32 %v127_v30, %v3741_v2 }
 0x1f3   :  { %v131_v34 = vsel %vm26_vm0, %v128_v31, 0.0  ;;  %v132_v35 = vsel %vm26_vm0, %v129_v32, 0.0  ;;  %v134_v37 = vsel %vm26_vm0, %v130_v33, 0.0 }
 0x1f4   :  { %v133_v36 = vadd.f32 %v132_v35, %v131_v34 }
 0x1f6   :  { %v135_v38 = vadd.f32 %v134_v37, %v133_v36 }
 0x1f8   :  { %v136_v39 = vrot.slane %v135_v38, 4 }
 0x1fa   :  { %v137_v40 = vadd.f32 %v136_v39, %v135_v38 }
 0x1fc   :  { %v138_v41 = vrot.slane %v137_v40, 2 }
 0x1fe   :  { %v139_v42 = vadd.f32 %v138_v41, %v137_v40 }
 0x200   :  { %v140_v43 = vrot.slane %v139_v42, 1 }
 0x202   :  { %v141_v44 = vadd.f32 %v140_v43, %v139_v42 }
 0x204   :  { %v142_v45 = vmul.f32 %v141_v44, %v141_v44 }
 0x206   :  { %v143_v46 = vsel %vm26_vm0, %v142_v45, 0.0 }
 0x207   :  { %144 = vadd.xlane.f32.xlu1 %v143_v46 }
 0x27a   :  { %v145_v47 = vpop.xlane.xlu1 %144 }
 0x27b   :  { %v146_v48 = vmax.f32 %v145_v47, 1e-30 }
 0x27d   :  { %3439 = vrsqrt.f32 %v146_v48  ;;  %vm153_vm11 = vweird.f32 %v146_v48 }
 0x283   :  { %v3440_v49 = vpop.eup %3439 }
 0x284   :  { %v148_v50 = vmul.f32 %v3440_v49, %v146_v48  ;;  %vm154_vm10 = vweird.f32 %v3440_v49 }
 0x285   :  { %vm155_vm12 = vmor %vm153_vm11, %vm154_vm10 }
 0x286   :  { %v149_v51 = vmul.f32 %v3440_v49, %v148_v50 }
 0x288   :  { %v150_v52 = vmul.f32 0.5, %v149_v51 }
 0x28a   :  { %v151_v53 = vsub.f32 1.5, %v150_v52 }
 0x28c   :  { %v152_v54 = vmul.f32 %v3440_v49, %v151_v53 }
 0x28e   :  { %v156_v55 = vsel %vm155_vm12, %v3440_v49, %v152_v54 }
 0x28f   :  { %v157_v56 = vmul.f32 %v156_v55, %v141_v44 }
 0x291   :  { %v160_v57 = vmul.f32 %v157_v56, %v3741_v2  ;;  %v159_v58 = vmul.f32 %v157_v56, %v3748_v5  ;;  %v158_v59 = vmul.f32 %v157_v56, %v3733_v0 }
 0x293   :  { %v167_v60 = vsel %vm26_vm0, %v160_v57, 0.0  ;;  %v164_v61 = vsel %vm26_vm0, %v159_v58, 0.0  ;;  %v161_v62 = vsel %vm26_vm0, %v158_v59, 0.0 }
 0x294   :  { %168 = vadd.xlane.f32.xlu1 %v167_v60  ;;  %165 = vadd.xlane.f32.xlu0 %v164_v61 }
 0x295   :  { %162 = vadd.xlane.f32.xlu2 %v161_v62 }
 0x307   :  { %v166_v63 = vpop.xlane.xlu0 %165  ;;  %v169_v1 = vpop.xlane.xlu1 %168 }
 0x308   :  { %v171_v3 = vmul.f32 %v166_v63, %v166_v63  ;;  %v163_v4 = vpop.xlane.xlu2 %162  ;;  %v172_v7 = vmul.f32 %v169_v1, %v169_v1 }
 0x309   :  { %v170_v6 = vmul.f32 %v163_v4, %v163_v4 }
 0x30b   :  { %v173_v8 = vadd.f32 %v171_v3, %v170_v6 }
 0x30d   :  { %v174_v9 = vadd.f32 %v173_v8, %v172_v7 }
 0x30f   :  { %v175_v10 = vrot.slane %v174_v9, 4 }
 0x311   :  { %v176_v11 = vadd.f32 %v175_v10, %v174_v9 }
 0x313   :  { %v177_v12 = vrot.slane %v176_v11, 2 }
 0x315   :  { %v178_v13 = vadd.f32 %v177_v12, %v176_v11 }
 0x317   :  { %v179_v14 = vrot.slane %v178_v13, 1 }
 0x319   :  { %v180_v15 = vadd.f32 %v179_v14, %v178_v13 }
 0x31b   :  { %v181_v16 = vmax.f32 %v180_v15, 1e-30 }
 0x31d   :  { %3441 = vrsqrt.f32 %v181_v16  ;;  %vm188_vm14 = vweird.f32 %v181_v16 }
 0x323   :  { %v3442_v17 = vpop.eup %3441 }
 0x324   :  { %v183_v18 = vmul.f32 %v3442_v17, %v181_v16  ;;  %vm189_vm13 = vweird.f32 %v3442_v17 }
 0x325   :  { %vm190_vm15 = vmor %vm188_vm14, %vm189_vm13 }
 0x326   :  { %v184_v19 = vmul.f32 %v3442_v17, %v183_v18 }
 0x328   :  { %v185_v20 = vmul.f32 0.5, %v184_v19 }
 0x32a   :  { %v186_v21 = vsub.f32 1.5, %v185_v20 }
 0x32c   :  { %v187_v22 = vmul.f32 %v3442_v17, %v186_v21 }
 0x32e   :  { %v191_v23 = vsel %vm190_vm15, %v3442_v17, %v187_v22 }
 0x32f   :  { %v192_v24 = vmul.f32 %v191_v23, %v163_v4  ;;  %v193_v25 = vmul.f32 %v191_v23, %v166_v63  ;;  %v194_v26 = vmul.f32 %v191_v23, %v169_v1 }
 0x331   :  { %v195_v27 = vmul.f32 %v192_v24, %v3733_v0  ;;  %v196_v28 = vmul.f32 %v193_v25, %v3748_v5  ;;  %v197_v29 = vmul.f32 %v194_v26, %v3741_v2 }
 0x333   :  { %v198_v30 = vsel %vm26_vm0, %v195_v27, 0.0  ;;  %v199_v31 = vsel %vm26_vm0, %v196_v28, 0.0  ;;  %v201_v33 = vsel %vm26_vm0, %v197_v29, 0.0 }
 0x334   :  { %v200_v32 = vadd.f32 %v199_v31, %v198_v30 }
 0x336   :  { %v202_v34 = vadd.f32 %v201_v33, %v200_v32 }
 0x338   :  { %v203_v35 = vrot.slane %v202_v34, 4 }
 0x33a   :  { %v204_v36 = vadd.f32 %v203_v35, %v202_v34 }
 0x33c   :  { %v205_v37 = vrot.slane %v204_v36, 2 }
 0x33e   :  { %v206_v38 = vadd.f32 %v205_v37, %v204_v36 }
 0x340   :  { %v207_v39 = vrot.slane %v206_v38, 1 }
 0x342   :  { %v208_v40 = vadd.f32 %v207_v39, %v206_v38 }
 0x344   :  { %v209_v41 = vmul.f32 %v208_v40, %v208_v40 }
 0x346   :  { %v210_v42 = vsel %vm26_vm0, %v209_v41, 0.0 }
 0x347   :  { %211 = vadd.xlane.f32.xlu2 %v210_v42 }
 0x3ba   :  { %v212_v43 = vpop.xlane.xlu2 %211 }
 0x3bb   :  { %v213_v44 = vmax.f32 %v212_v43, 1e-30 }
 0x3bd   :  { %3443 = vrsqrt.f32 %v213_v44  ;;  %vm220_vm2 = vweird.f32 %v213_v44 }
 0x3c3   :  { %v3444_v45 = vpop.eup %3443 }
 0x3c4   :  { %v215_v46 = vmul.f32 %v3444_v45, %v213_v44  ;;  %vm221_vm1 = vweird.f32 %v3444_v45 }
 0x3c5   :  { %vm222_vm3 = vmor %vm220_vm2, %vm221_vm1 }
 0x3c6   :  { %v216_v47 = vmul.f32 %v3444_v45, %v215_v46 }
 0x3c8   :  { %v217_v48 = vmul.f32 0.5, %v216_v47 }
 0x3ca   :  { %v218_v49 = vsub.f32 1.5, %v217_v48 }
 0x3cc   :  { %v219_v50 = vmul.f32 %v3444_v45, %v218_v49 }
 0x3ce   :  { %v223_v51 = vsel %vm222_vm3, %v3444_v45, %v219_v50 }
 0x3cf   :  { %v224_v52 = vmul.f32 %v223_v51, %v208_v40 }
 0x3d1   :  { %v227_v53 = vmul.f32 %v224_v52, %v3741_v2  ;;  %v226_v54 = vmul.f32 %v224_v52, %v3748_v5  ;;  %v225_v55 = vmul.f32 %v224_v52, %v3733_v0 }
 0x3d3   :  { %v234_v56 = vsel %vm26_vm0, %v227_v53, 0.0  ;;  %v231_v57 = vsel %vm26_vm0, %v226_v54, 0.0  ;;  %v228_v58 = vsel %vm26_vm0, %v225_v55, 0.0 }
 0x3d4   :  { %235 = vadd.xlane.f32.xlu2 %v234_v56  ;;  %232 = vadd.xlane.f32.xlu1 %v231_v57 }
 0x3d5   :  { %229 = vadd.xlane.f32.xlu0 %v228_v58 }
 0x447   :  { %v233_v59 = vpop.xlane.xlu1 %232  ;;  %v236_v60 = vpop.xlane.xlu2 %235 }
 0x448   :  { %v238_v61 = vmul.f32 %v233_v59, %v233_v59  ;;  %v230_v62 = vpop.xlane.xlu0 %229  ;;  %v239_v1 = vmul.f32 %v236_v60, %v236_v60 }
 0x449   :  { %v237_v63 = vmul.f32 %v230_v62, %v230_v62 }
 0x44b   :  { %v240_v3 = vadd.f32 %v238_v61, %v237_v63 }
 0x44d   :  { %v241_v4 = vadd.f32 %v240_v3, %v239_v1 }
 0x44f   :  { %v242_v6 = vrot.slane %v241_v4, 4 }
 0x451   :  { %v243_v7 = vadd.f32 %v242_v6, %v241_v4 }
 0x453   :  { %v244_v8 = vrot.slane %v243_v7, 2 }
 0x455   :  { %v245_v9 = vadd.f32 %v244_v8, %v243_v7 }
 0x457   :  { %v246_v10 = vrot.slane %v245_v9, 1 }
 0x459   :  { %v247_v11 = vadd.f32 %v246_v10, %v245_v9 }
 0x45b   :  { %v248_v12 = vmax.f32 %v247_v11, 1e-30 }
 0x45d   :  { %3445 = vrsqrt.f32 %v248_v12  ;;  %vm255_vm5 = vweird.f32 %v248_v12 }
 0x463   :  { %v3446_v13 = vpop.eup %3445 }
 0x464   :  { %v250_v14 = vmul.f32 %v3446_v13, %v248_v12  ;;  %vm256_vm4 = vweird.f32 %v3446_v13 }
 0x465   :  { %vm257_vm6 = vmor %vm255_vm5, %vm256_vm4 }
 0x466   :  { %v251_v15 = vmul.f32 %v3446_v13, %v250_v14 }
 0x468   :  { %v252_v16 = vmul.f32 0.5, %v251_v15 }
 0x46a   :  { %v253_v17 = vsub.f32 1.5, %v252_v16 }
 0x46c   :  { %v254_v18 = vmul.f32 %v3446_v13, %v253_v17 }
 0x46e   :  { %v258_v19 = vsel %vm257_vm6, %v3446_v13, %v254_v18 }
 0x46f   :  { %v259_v20 = vmul.f32 %v258_v19, %v230_v62  ;;  %v260_v21 = vmul.f32 %v258_v19, %v233_v59  ;;  %v261_v22 = vmul.f32 %v258_v19, %v236_v60 }
 0x471   :  { %v262_v23 = vmul.f32 %v259_v20, %v3733_v0  ;;  %v263_v24 = vmul.f32 %v260_v21, %v3748_v5  ;;  %v264_v25 = vmul.f32 %v261_v22, %v3741_v2 }
 0x473   :  { %v265_v26 = vsel %vm26_vm0, %v262_v23, 0.0  ;;  %v266_v27 = vsel %vm26_vm0, %v263_v24, 0.0  ;;  %v268_v29 = vsel %vm26_vm0, %v264_v25, 0.0 }
 0x474   :  { %v267_v28 = vadd.f32 %v266_v27, %v265_v26 }
 0x476   :  { %v269_v30 = vadd.f32 %v268_v29, %v267_v28 }
 0x478   :  { %v270_v31 = vrot.slane %v269_v30, 4 }
 0x47a   :  { %v271_v32 = vadd.f32 %v270_v31, %v269_v30 }
 0x47c   :  { %v272_v33 = vrot.slane %v271_v32, 2 }
 0x47e   :  { %v273_v34 = vadd.f32 %v272_v33, %v271_v32 }
 0x480   :  { %v274_v35 = vrot.slane %v273_v34, 1 }
 0x482   :  { %v275_v36 = vadd.f32 %v274_v35, %v273_v34 }
 0x484   :  { %v276_v37 = vmul.f32 %v275_v36, %v275_v36 }
 0x486   :  { %v277_v38 = vsel %vm26_vm0, %v276_v37, 0.0 }
 0x487   :  { %278 = vadd.xlane.f32.xlu0 %v277_v38 }
 0x4fa   :  { %v279_v39 = vpop.xlane.xlu0 %278 }
 0x4fb   :  { %v280_v40 = vmax.f32 %v279_v39, 1e-30 }
 0x4fd   :  { %3447 = vrsqrt.f32 %v280_v40  ;;  %vm287_vm8 = vweird.f32 %v280_v40 }
 0x503   :  { %v3448_v41 = vpop.eup %3447 }
 0x504   :  { %v282_v42 = vmul.f32 %v3448_v41, %v280_v40  ;;  %vm288_vm7 = vweird.f32 %v3448_v41 }
 0x505   :  { %vm289_vm9 = vmor %vm287_vm8, %vm288_vm7 }
 0x506   :  { %v283_v43 = vmul.f32 %v3448_v41, %v282_v42 }
 0x508   :  { %v284_v44 = vmul.f32 0.5, %v283_v43 }
 0x50a   :  { %v285_v45 = vsub.f32 1.5, %v284_v44 }
 0x50c   :  { %v286_v46 = vmul.f32 %v3448_v41, %v285_v45 }
 0x50e   :  { %v290_v47 = vsel %vm289_vm9, %v3448_v41, %v286_v46 }
 0x50f   :  { %v291_v48 = vmul.f32 %v290_v47, %v275_v36 }
 0x511   :  { %v294_v49 = vmul.f32 %v291_v48, %v3741_v2  ;;  %v293_v50 = vmul.f32 %v291_v48, %v3748_v5  ;;  %v292_v51 = vmul.f32 %v291_v48, %v3733_v0 }
 0x513   :  { %v301_v52 = vsel %vm26_vm0, %v294_v49, 0.0  ;;  %v298_v53 = vsel %vm26_vm0, %v293_v50, 0.0  ;;  %v295_v54 = vsel %vm26_vm0, %v292_v51, 0.0 }
 0x514   :  { %302 = vadd.xlane.f32.xlu0 %v301_v52  ;;  %299 = vadd.xlane.f32.xlu2 %v298_v53 }
 0x515   :  { %296 = vadd.xlane.f32.xlu1 %v295_v54 }
 0x587   :  { %v300_v55 = vpop.xlane.xlu2 %299  ;;  %v303_v56 = vpop.xlane.xlu0 %302 }
 0x588   :  { %v305_v57 = vmul.f32 %v300_v55, %v300_v55  ;;  %v297_v58 = vpop.xlane.xlu1 %296  ;;  %v306_v60 = vmul.f32 %v303_v56, %v303_v56 }
 0x589   :  { %v304_v59 = vmul.f32 %v297_v58, %v297_v58 }
 0x58b   :  { %v307_v61 = vadd.f32 %v305_v57, %v304_v59 }
 0x58d   :  { %v308_v62 = vadd.f32 %v307_v61, %v306_v60 }
 0x58f   :  { %v309_v63 = vrot.slane %v308_v62, 4 }
 0x591   :  { %v310_v1 = vadd.f32 %v309_v63, %v308_v62 }
 0x593   :  { %v311_v3 = vrot.slane %v310_v1, 2 }
 0x595   :  { %v312_v4 = vadd.f32 %v311_v3, %v310_v1 }
 0x597   :  { %v313_v6 = vrot.slane %v312_v4, 1 }
 0x599   :  { %v314_v7 = vadd.f32 %v313_v6, %v312_v4 }
 0x59b   :  { %v315_v8 = vmax.f32 %v314_v7, 1e-30 }
 0x59d   :  { %3449 = vrsqrt.f32 %v315_v8  ;;  %vm322_vm11 = vweird.f32 %v315_v8 }
 0x5a3   :  { %v3450_v9 = vpop.eup %3449 }
 0x5a4   :  { %v317_v10 = vmul.f32 %v3450_v9, %v315_v8  ;;  %vm323_vm10 = vweird.f32 %v3450_v9 }
 0x5a5   :  { %vm324_vm12 = vmor %vm322_vm11, %vm323_vm10 }
 0x5a6   :  { %v318_v11 = vmul.f32 %v3450_v9, %v317_v10 }
 0x5a8   :  { %v319_v12 = vmul.f32 0.5, %v318_v11 }
 0x5aa   :  { %v320_v13 = vsub.f32 1.5, %v319_v12 }
 0x5ac   :  { %v321_v14 = vmul.f32 %v3450_v9, %v320_v13 }
 0x5ae   :  { %v325_v15 = vsel %vm324_vm12, %v3450_v9, %v321_v14 }
 0x5af   :  { %v326_v16 = vmul.f32 %v325_v15, %v297_v58  ;;  %v327_v17 = vmul.f32 %v325_v15, %v300_v55  ;;  %v328_v18 = vmul.f32 %v325_v15, %v303_v56 }
 0x5b1   :  { %v329_v19 = vmul.f32 %v326_v16, %v3733_v0  ;;  %v330_v20 = vmul.f32 %v327_v17, %v3748_v5  ;;  %v331_v21 = vmul.f32 %v328_v18, %v3741_v2 }
 0x5b3   :  { %v332_v22 = vsel %vm26_vm0, %v329_v19, 0.0  ;;  %v333_v23 = vsel %vm26_vm0, %v330_v20, 0.0  ;;  %v335_v25 = vsel %vm26_vm0, %v331_v21, 0.0 }
 0x5b4   :  { %v334_v24 = vadd.f32 %v333_v23, %v332_v22 }
 0x5b6   :  { %v336_v26 = vadd.f32 %v335_v25, %v334_v24 }
 0x5b8   :  { %v337_v27 = vrot.slane %v336_v26, 4 }
 0x5ba   :  { %v338_v28 = vadd.f32 %v337_v27, %v336_v26 }
 0x5bc   :  { %v339_v29 = vrot.slane %v338_v28, 2 }
 0x5be   :  { %v340_v30 = vadd.f32 %v339_v29, %v338_v28 }
 0x5c0   :  { %v341_v31 = vrot.slane %v340_v30, 1 }
 0x5c2   :  { %v342_v32 = vadd.f32 %v341_v31, %v340_v30 }
 0x5c4   :  { %v343_v33 = vmul.f32 %v342_v32, %v342_v32 }
 0x5c6   :  { %v344_v34 = vsel %vm26_vm0, %v343_v33, 0.0 }
 0x5c7   :  { %345 = vadd.xlane.f32.xlu1 %v344_v34 }
 0x63a   :  { %v346_v35 = vpop.xlane.xlu1 %345 }
 0x63b   :  { %v347_v36 = vmax.f32 %v346_v35, 1e-30 }
 0x63d   :  { %3451 = vrsqrt.f32 %v347_v36  ;;  %vm354_vm14 = vweird.f32 %v347_v36 }
 0x643   :  { %v3452_v37 = vpop.eup %3451 }
 0x644   :  { %v349_v38 = vmul.f32 %v3452_v37, %v347_v36  ;;  %vm355_vm13 = vweird.f32 %v3452_v37 }
 0x645   :  { %vm356_vm15 = vmor %vm354_vm14, %vm355_vm13 }
 0x646   :  { %v350_v39 = vmul.f32 %v3452_v37, %v349_v38 }
 0x648   :  { %v351_v40 = vmul.f32 0.5, %v350_v39 }
 0x64a   :  { %v352_v41 = vsub.f32 1.5, %v351_v40 }
 0x64c   :  { %v353_v42 = vmul.f32 %v3452_v37, %v352_v41 }
 0x64e   :  { %v357_v43 = vsel %vm356_vm15, %v3452_v37, %v353_v42 }
 0x64f   :  { %v358_v44 = vmul.f32 %v357_v43, %v342_v32 }
 0x651   :  { %v361_v45 = vmul.f32 %v358_v44, %v3741_v2  ;;  %v360_v46 = vmul.f32 %v358_v44, %v3748_v5  ;;  %v359_v47 = vmul.f32 %v358_v44, %v3733_v0 }
 0x653   :  { %v368_v48 = vsel %vm26_vm0, %v361_v45, 0.0  ;;  %v365_v49 = vsel %vm26_vm0, %v360_v46, 0.0  ;;  %v362_v50 = vsel %vm26_vm0, %v359_v47, 0.0 }
 0x654   :  { %369 = vadd.xlane.f32.xlu1 %v368_v48  ;;  %366 = vadd.xlane.f32.xlu0 %v365_v49 }
 0x655   :  { %363 = vadd.xlane.f32.xlu2 %v362_v50 }
 0x6c7   :  { %v367_v51 = vpop.xlane.xlu0 %366  ;;  %v370_v52 = vpop.xlane.xlu1 %369 }
 0x6c8   :  { %v372_v53 = vmul.f32 %v367_v51, %v367_v51  ;;  %v364_v54 = vpop.xlane.xlu2 %363  ;;  %v373_v56 = vmul.f32 %v370_v52, %v370_v52 }
 0x6c9   :  { %v371_v55 = vmul.f32 %v364_v54, %v364_v54 }
 0x6cb   :  { %v374_v57 = vadd.f32 %v372_v53, %v371_v55 }
 0x6cd   :  { %v375_v58 = vadd.f32 %v374_v57, %v373_v56 }
 0x6cf   :  { %v376_v59 = vrot.slane %v375_v58, 4 }
 0x6d1   :  { %v377_v60 = vadd.f32 %v376_v59, %v375_v58 }
 0x6d3   :  { %v378_v61 = vrot.slane %v377_v60, 2 }
 0x6d5   :  { %v379_v62 = vadd.f32 %v378_v61, %v377_v60 }
 0x6d7   :  { %v380_v63 = vrot.slane %v379_v62, 1 }
 0x6d9   :  { %v381_v1 = vadd.f32 %v380_v63, %v379_v62 }
 0x6db   :  { %v382_v3 = vmax.f32 %v381_v1, 1e-30 }
 0x6dd   :  { %3453 = vrsqrt.f32 %v382_v3  ;;  %vm389_vm2 = vweird.f32 %v382_v3 }
 0x6e3   :  { %v3454_v4 = vpop.eup %3453 }
 0x6e4   :  { %v384_v6 = vmul.f32 %v3454_v4, %v382_v3  ;;  %vm390_vm1 = vweird.f32 %v3454_v4 }
 0x6e5   :  { %vm391_vm3 = vmor %vm389_vm2, %vm390_vm1 }
 0x6e6   :  { %v385_v7 = vmul.f32 %v3454_v4, %v384_v6 }
 0x6e8   :  { %v386_v8 = vmul.f32 0.5, %v385_v7 }
 0x6ea   :  { %v387_v9 = vsub.f32 1.5, %v386_v8 }
 0x6ec   :  { %v388_v10 = vmul.f32 %v3454_v4, %v387_v9 }
 0x6ee   :  { %v392_v11 = vsel %vm391_vm3, %v3454_v4, %v388_v10 }
 0x6ef   :  { %v393_v12 = vmul.f32 %v392_v11, %v364_v54  ;;  %v394_v13 = vmul.f32 %v392_v11, %v367_v51  ;;  %v395_v14 = vmul.f32 %v392_v11, %v370_v52 }
 0x6f1   :  { %v396_v15 = vmul.f32 %v393_v12, %v3733_v0  ;;  %v397_v16 = vmul.f32 %v394_v13, %v3748_v5  ;;  %v398_v17 = vmul.f32 %v395_v14, %v3741_v2 }
 0x6f3   :  { %v399_v18 = vsel %vm26_vm0, %v396_v15, 0.0  ;;  %v400_v19 = vsel %vm26_vm0, %v397_v16, 0.0  ;;  %v402_v21 = vsel %vm26_vm0, %v398_v17, 0.0 }
 0x6f4   :  { %v401_v20 = vadd.f32 %v400_v19, %v399_v18 }
 0x6f6   :  { %v403_v22 = vadd.f32 %v402_v21, %v401_v20 }
 0x6f8   :  { %v404_v23 = vrot.slane %v403_v22, 4 }
 0x6fa   :  { %v405_v24 = vadd.f32 %v404_v23, %v403_v22 }
 0x6fc   :  { %v406_v25 = vrot.slane %v405_v24, 2 }
 0x6fe   :  { %v407_v26 = vadd.f32 %v406_v25, %v405_v24 }
 0x700   :  { %v408_v27 = vrot.slane %v407_v26, 1 }
 0x702   :  { %v409_v28 = vadd.f32 %v408_v27, %v407_v26 }
 0x704   :  { %v410_v29 = vmul.f32 %v409_v28, %v409_v28 }
 0x706   :  { %v411_v30 = vsel %vm26_vm0, %v410_v29, 0.0 }
 0x707   :  { %412 = vadd.xlane.f32.xlu2 %v411_v30 }
 0x77a   :  { %v413_v31 = vpop.xlane.xlu2 %412 }
 0x77b   :  { %v414_v32 = vmax.f32 %v413_v31, 1e-30 }
 0x77d   :  { %3455 = vrsqrt.f32 %v414_v32  ;;  %vm421_vm5 = vweird.f32 %v414_v32 }
 0x783   :  { %v3456_v33 = vpop.eup %3455 }
 0x784   :  { %v416_v34 = vmul.f32 %v3456_v33, %v414_v32  ;;  %vm422_vm4 = vweird.f32 %v3456_v33 }
 0x785   :  { %vm423_vm6 = vmor %vm421_vm5, %vm422_vm4 }
 0x786   :  { %v417_v35 = vmul.f32 %v3456_v33, %v416_v34 }
 0x788   :  { %v418_v36 = vmul.f32 0.5, %v417_v35 }
 0x78a   :  { %v419_v37 = vsub.f32 1.5, %v418_v36 }
 0x78c   :  { %v420_v38 = vmul.f32 %v3456_v33, %v419_v37 }
 0x78e   :  { %v424_v39 = vsel %vm423_vm6, %v3456_v33, %v420_v38 }
 0x78f   :  { %v425_v40 = vmul.f32 %v424_v39, %v409_v28 }
 0x791   :  { %v428_v41 = vmul.f32 %v425_v40, %v3741_v2  ;;  %v427_v42 = vmul.f32 %v425_v40, %v3748_v5  ;;  %v426_v43 = vmul.f32 %v425_v40, %v3733_v0 }
 0x793   :  { %v435_v44 = vsel %vm26_vm0, %v428_v41, 0.0  ;;  %v432_v45 = vsel %vm26_vm0, %v427_v42, 0.0  ;;  %v429_v46 = vsel %vm26_vm0, %v426_v43, 0.0 }
 0x794   :  { %436 = vadd.xlane.f32.xlu2 %v435_v44  ;;  %433 = vadd.xlane.f32.xlu1 %v432_v45 }
 0x795   :  { %430 = vadd.xlane.f32.xlu0 %v429_v46 }
 0x807   :  { %v434_v47 = vpop.xlane.xlu1 %433  ;;  %v437_v48 = vpop.xlane.xlu2 %436 }
 0x808   :  { %v439_v49 = vmul.f32 %v434_v47, %v434_v47  ;;  %v431_v50 = vpop.xlane.xlu0 %430  ;;  %v440_v52 = vmul.f32 %v437_v48, %v437_v48 }
 0x809   :  { %v438_v51 = vmul.f32 %v431_v50, %v431_v50 }
 0x80b   :  { %v441_v53 = vadd.f32 %v439_v49, %v438_v51 }
 0x80d   :  { %v442_v54 = vadd.f32 %v441_v53, %v440_v52 }
 0x80f   :  { %v443_v55 = vrot.slane %v442_v54, 4 }
 0x811   :  { %v444_v56 = vadd.f32 %v443_v55, %v442_v54 }
 0x813   :  { %v445_v57 = vrot.slane %v444_v56, 2 }
 0x815   :  { %v446_v58 = vadd.f32 %v445_v57, %v444_v56 }
 0x817   :  { %v447_v59 = vrot.slane %v446_v58, 1 }
 0x819   :  { %v448_v60 = vadd.f32 %v447_v59, %v446_v58 }
 0x81b   :  { %v449_v61 = vmax.f32 %v448_v60, 1e-30 }
 0x81d   :  { %3457 = vrsqrt.f32 %v449_v61  ;;  %vm456_vm8 = vweird.f32 %v449_v61 }
 0x823   :  { %v3458_v62 = vpop.eup %3457 }
 0x824   :  { %v451_v63 = vmul.f32 %v3458_v62, %v449_v61  ;;  %vm457_vm7 = vweird.f32 %v3458_v62 }
 0x825   :  { %vm458_vm9 = vmor %vm456_vm8, %vm457_vm7 }
 0x826   :  { %v452_v1 = vmul.f32 %v3458_v62, %v451_v63 }
 0x828   :  { %v453_v3 = vmul.f32 0.5, %v452_v1 }
 0x82a   :  { %v454_v4 = vsub.f32 1.5, %v453_v3  ;;  %v3848_v3 = vld [vmem:[%s4503_s0] sm:$0xff] }
 0x82c   :  { %v455_v6 = vmul.f32 %v3458_v62, %v454_v4 }
 0x82e   :  { %v459_v7 = vsel %vm458_vm9, %v3458_v62, %v455_v6  ;;  %v3854_v6 = vld [vmem:[%s4503_s0 + $0x8] sm:$0xff] }
 0x82f   :  { %v460_v8 = vmul.f32 %v459_v7, %v431_v50  ;;  %v461_v9 = vmul.f32 %v459_v7, %v434_v47  ;;  %v462_v10 = vmul.f32 %v459_v7, %v437_v48 }
 0x831   :  { %v463_v11 = vmul.f32 %v460_v8, %v3733_v0  ;;  %v464_v12 = vmul.f32 %v461_v9, %v3748_v5  ;;  %v465_v13 = vmul.f32 %v462_v10, %v3741_v2  ;;  %v3860_v8 = vld [vmem:[%s4503_s0 + $0x10] sm:$0xff] }
 0x833   :  { %v466_v14 = vsel %vm26_vm0, %v463_v11, 0.0  ;;  %v467_v15 = vsel %vm26_vm0, %v464_v12, 0.0  ;;  %v469_v17 = vsel %vm26_vm0, %v465_v13, 0.0 }
 0x834   :  { %v468_v16 = vadd.f32 %v467_v15, %v466_v14 }
 0x836   :  { %v470_v18 = vadd.f32 %v469_v17, %v468_v16 }
 0x838   :  { %v471_v19 = vrot.slane %v470_v18, 4 }
 0x83a   :  { %v472_v20 = vadd.f32 %v471_v19, %v470_v18 }
 0x83c   :  { %v473_v21 = vrot.slane %v472_v20, 2 }
 0x83e   :  { %v474_v22 = vadd.f32 %v473_v21, %v472_v20 }
 0x840   :  { %v475_v23 = vrot.slane %v474_v22, 1 }
 0x842   :  { %v476_v24 = vadd.f32 %v475_v23, %v474_v22 }
 0x844   :  { %v477_v25 = vmul.f32 %v476_v24, %v476_v24 }
 0x846   :  { %v478_v26 = vsel %vm26_vm0, %v477_v25, 0.0 }
 0x847   :  { %479 = vadd.xlane.f32.xlu0 %v478_v26 }
 0x8ba   :  { %v480_v27 = vpop.xlane.xlu0 %479 }
 0x8bb   :  { %v481_v28 = vmax.f32 %v480_v27, 1e-30 }
 0x8bd   :  { %3459 = vrsqrt.f32 %v481_v28  ;;  %vm488_vm11 = vweird.f32 %v481_v28 }
 0x8c3   :  { %v3460_v29 = vpop.eup %3459 }
 0x8c4   :  { %v483_v30 = vmul.f32 %v3460_v29, %v481_v28  ;;  %vm489_vm10 = vweird.f32 %v3460_v29 }
 0x8c5   :  { %vm490_vm12 = vmor %vm488_vm11, %vm489_vm10 }
 0x8c6   :  { %v484_v31 = vmul.f32 %v3460_v29, %v483_v30 }
 0x8c8   :  { %v485_v32 = vmul.f32 0.5, %v484_v31 }
 0x8ca   :  { %v486_v33 = vsub.f32 1.5, %v485_v32 }
 0x8cc   :  { %v487_v34 = vmul.f32 %v3460_v29, %v486_v33 }
 0x8ce   :  { %v491_v35 = vsel %vm490_vm12, %v3460_v29, %v487_v34 }
 0x8cf   :  { %v492_v36 = vmul.f32 %v491_v35, %v476_v24 }
 0x8d1   :  { %v495_v37 = vmul.f32 %v492_v36, %v3741_v2  ;;  %v494_v38 = vmul.f32 %v492_v36, %v3748_v5  ;;  %v493_v39 = vmul.f32 %v492_v36, %v3733_v0 }
 0x8d3   :  { %v502_v40 = vsel %vm26_vm0, %v495_v37, 0.0  ;;  %v499_v41 = vsel %vm26_vm0, %v494_v38, 0.0  ;;  %v496_v42 = vsel %vm26_vm0, %v493_v39, 0.0 }
 0x8d4   :  { %503 = vadd.xlane.f32.xlu0 %v502_v40  ;;  %500 = vadd.xlane.f32.xlu2 %v499_v41 }
 0x8d5   :  { %497 = vadd.xlane.f32.xlu1 %v496_v42 }
 0x947   :  { %v501_v43 = vpop.xlane.xlu2 %500  ;;  %v504_v44 = vpop.xlane.xlu0 %503 }
 0x948   :  { %v506_v45 = vmul.f32 %v501_v43, %v501_v43  ;;  %v498_v46 = vpop.xlane.xlu1 %497  ;;  %v507_v48 = vmul.f32 %v504_v44, %v504_v44 }
 0x949   :  { %v505_v47 = vmul.f32 %v498_v46, %v498_v46 }
 0x94b   :  { %v508_v2 = vadd.f32 %v506_v45, %v505_v47 }
 0x94d   :  { %v509_v49 = vadd.f32 %v508_v2, %v507_v48 }
 0x94f   :  { %v510_v5 = vrot.slane %v509_v49, 4 }
 0x951   :  { %v511_v50 = vadd.f32 %v510_v5, %v509_v49 }
 0x953   :  { %v512_v0 = vrot.slane %v511_v50, 2 }
 0x955   :  { %v513_v51 = vadd.f32 %v512_v0, %v511_v50 }
 0x957   :  { %v514_v52 = vrot.slane %v513_v51, 1 }
 0x959   :  { %v515_v53 = vadd.f32 %v514_v52, %v513_v51 }
 0x95b   :  { %v516_v54 = vmax.f32 %v515_v53, 1e-30 }
 0x95d   :  { %3461 = vrsqrt.f32 %v516_v54  ;;  %vm523_vm14 = vweird.f32 %v516_v54 }
 0x963   :  { %v3462_v55 = vpop.eup %3461 }
 0x964   :  { %v518_v56 = vmul.f32 %v3462_v55, %v516_v54  ;;  %vm524_vm13 = vweird.f32 %v3462_v55 }
 0x965   :  { %vm525_vm15 = vmor %vm523_vm14, %vm524_vm13 }
 0x966   :  { %v519_v57 = vmul.f32 %v3462_v55, %v518_v56 }
 0x968   :  { %v520_v58 = vmul.f32 0.5, %v519_v57 }
 0x96a   :  { %v521_v59 = vsub.f32 1.5, %v520_v58 }
 0x96c   :  { %v522_v60 = vmul.f32 %v3462_v55, %v521_v59 }
 0x96e   :  { %v526_v61 = vsel %vm525_vm15, %v3462_v55, %v522_v60 }
 0x96f   :  { %v527_v62 = vmul.f32 %v526_v61, %v498_v46  ;;  %v528_v63 = vmul.f32 %v526_v61, %v501_v43  ;;  %v529_v1 = vmul.f32 %v526_v61, %v504_v44 }
 0x971   :  { %v530_v4 = vmul.f32 %v3848_v3, %v527_v62  ;;  %v531_v7 = vmul.f32 %v3854_v6, %v528_v63  ;;  %v532_v9 = vmul.f32 %v3860_v8, %v529_v1 }
 0x973   :  { %v533_v10 = vsel %vm26_vm0, %v530_v4, 0.0  ;;  %v534_v11 = vsel %vm26_vm0, %v531_v7, 0.0  ;;  %v536_v13 = vsel %vm26_vm0, %v532_v9, 0.0 }
 0x974   :  { %v535_v12 = vadd.f32 %v534_v11, %v533_v10 }
 0x976   :  { %v537_v14 = vadd.f32 %v536_v13, %v535_v12 }
 0x978   :  { %v538_v15 = vrot.slane %v537_v14, 4 }
 0x97a   :  { %v539_v16 = vadd.f32 %v538_v15, %v537_v14 }
 0x97c   :  { %v540_v17 = vrot.slane %v539_v16, 2 }
 0x97e   :  { %v541_v18 = vadd.f32 %v540_v17, %v539_v16 }
 0x980   :  { %v542_v19 = vrot.slane %v541_v18, 1 }
 0x982   :  { %v543_v20 = vadd.f32 %v542_v19, %v541_v18 }
 0x984   :  { %v544_v21 = vmul.f32 %v543_v20, %v543_v20 }
 0x986   :  { %v545_v22 = vsel %vm26_vm0, %v544_v21, 0.0 }
 0x987   :  { %546 = vadd.xlane.f32.xlu1 %v545_v22 }
 0x9fa   :  { %v547_v23 = vpop.xlane.xlu1 %546 }
 0x9fb   :  { %v548_v24 = vmax.f32 %v547_v23, 1e-30 }
 0x9fd   :  { %3463 = vrsqrt.f32 %v548_v24  ;;  %vm555_vm2 = vweird.f32 %v548_v24 }
 0xa03   :  { %v3464_v25 = vpop.eup %3463 }
 0xa04   :  { %v550_v26 = vmul.f32 %v3464_v25, %v548_v24  ;;  %vm556_vm1 = vweird.f32 %v3464_v25 }
 0xa05   :  { %vm557_vm3 = vmor %vm555_vm2, %vm556_vm1 }
 0xa06   :  { %v551_v27 = vmul.f32 %v3464_v25, %v550_v26 }
 0xa08   :  { %v552_v28 = vmul.f32 0.5, %v551_v27 }
 0xa0a   :  { %v553_v29 = vsub.f32 1.5, %v552_v28 }
 0xa0c   :  { %v554_v30 = vmul.f32 %v3464_v25, %v553_v29 }
 0xa0e   :  { %v558_v31 = vsel %vm557_vm3, %v3464_v25, %v554_v30 }
 0xa0f   :  { %v559_v32 = vmul.f32 %v558_v31, %v543_v20 }
 0xa11   :  { %v562_v33 = vmul.f32 %v3860_v8, %v559_v32  ;;  %v561_v34 = vmul.f32 %v3854_v6, %v559_v32  ;;  %v560_v35 = vmul.f32 %v3848_v3, %v559_v32 }
 0xa13   :  { %v569_v36 = vsel %vm26_vm0, %v562_v33, 0.0  ;;  %v566_v37 = vsel %vm26_vm0, %v561_v34, 0.0  ;;  %v563_v38 = vsel %vm26_vm0, %v560_v35, 0.0 }
 0xa14   :  { %570 = vadd.xlane.f32.xlu1 %v569_v36  ;;  %567 = vadd.xlane.f32.xlu0 %v566_v37 }
 0xa15   :  { %564 = vadd.xlane.f32.xlu2 %v563_v38 }
 0xa87   :  { %v568_v39 = vpop.xlane.xlu0 %567  ;;  %v571_v40 = vpop.xlane.xlu1 %570 }
 0xa88   :  { %v573_v41 = vmul.f32 %v568_v39, %v568_v39  ;;  %v565_v42 = vpop.xlane.xlu2 %564  ;;  %v574_v44 = vmul.f32 %v571_v40, %v571_v40 }
 0xa89   :  { %v572_v43 = vmul.f32 %v565_v42, %v565_v42 }
 0xa8b   :  { %v575_v45 = vadd.f32 %v573_v41, %v572_v43 }
 0xa8d   :  { %v576_v46 = vadd.f32 %v575_v45, %v574_v44 }
 0xa8f   :  { %v577_v47 = vrot.slane %v576_v46, 4 }
 0xa91   :  { %v578_v48 = vadd.f32 %v577_v47, %v576_v46 }
 0xa93   :  { %v579_v2 = vrot.slane %v578_v48, 2 }
 0xa95   :  { %v580_v49 = vadd.f32 %v579_v2, %v578_v48 }
 0xa97   :  { %v581_v5 = vrot.slane %v580_v49, 1 }
 0xa99   :  { %v582_v50 = vadd.f32 %v581_v5, %v580_v49 }
 0xa9b   :  { %v583_v0 = vmax.f32 %v582_v50, 1e-30 }
 0xa9d   :  { %3465 = vrsqrt.f32 %v583_v0  ;;  %vm590_vm5 = vweird.f32 %v583_v0 }
 0xaa3   :  { %v3466_v51 = vpop.eup %3465 }
 0xaa4   :  { %v585_v52 = vmul.f32 %v3466_v51, %v583_v0  ;;  %vm591_vm4 = vweird.f32 %v3466_v51 }
 0xaa5   :  { %vm592_vm6 = vmor %vm590_vm5, %vm591_vm4 }
 0xaa6   :  { %v586_v53 = vmul.f32 %v3466_v51, %v585_v52 }
 0xaa8   :  { %v587_v54 = vmul.f32 0.5, %v586_v53 }
 0xaaa   :  { %v588_v55 = vsub.f32 1.5, %v587_v54 }
 0xaac   :  { %v589_v56 = vmul.f32 %v3466_v51, %v588_v55 }
 0xaae   :  { %v593_v57 = vsel %vm592_vm6, %v3466_v51, %v589_v56 }
 0xaaf   :  { %v594_v58 = vmul.f32 %v593_v57, %v565_v42  ;;  %v595_v59 = vmul.f32 %v593_v57, %v568_v39  ;;  %v596_v60 = vmul.f32 %v593_v57, %v571_v40 }
 0xab1   :  { %v597_v61 = vmul.f32 %v3848_v3, %v594_v58  ;;  %v598_v62 = vmul.f32 %v3854_v6, %v595_v59  ;;  %v599_v63 = vmul.f32 %v3860_v8, %v596_v60 }
 0xab3   :  { %v600_v1 = vsel %vm26_vm0, %v597_v61, 0.0  ;;  %v601_v4 = vsel %vm26_vm0, %v598_v62, 0.0  ;;  %v603_v9 = vsel %vm26_vm0, %v599_v63, 0.0 }
 0xab4   :  { %v602_v7 = vadd.f32 %v601_v4, %v600_v1 }
 0xab6   :  { %v604_v10 = vadd.f32 %v603_v9, %v602_v7 }
 0xab8   :  { %v605_v11 = vrot.slane %v604_v10, 4 }
 0xaba   :  { %v606_v12 = vadd.f32 %v605_v11, %v604_v10 }
 0xabc   :  { %v607_v13 = vrot.slane %v606_v12, 2 }
 0xabe   :  { %v608_v14 = vadd.f32 %v607_v13, %v606_v12 }
 0xac0   :  { %v609_v15 = vrot.slane %v608_v14, 1 }
 0xac2   :  { %v610_v16 = vadd.f32 %v609_v15, %v608_v14 }
 0xac4   :  { %v611_v17 = vmul.f32 %v610_v16, %v610_v16 }
 0xac6   :  { %v612_v18 = vsel %vm26_vm0, %v611_v17, 0.0 }
 0xac7   :  { %613 = vadd.xlane.f32.xlu2 %v612_v18 }
 0xb3a   :  { %v614_v19 = vpop.xlane.xlu2 %613 }
 0xb3b   :  { %v615_v20 = vmax.f32 %v614_v19, 1e-30 }
 0xb3d   :  { %3467 = vrsqrt.f32 %v615_v20  ;;  %vm622_vm8 = vweird.f32 %v615_v20 }
 0xb43   :  { %v3468_v21 = vpop.eup %3467 }
 0xb44   :  { %v617_v22 = vmul.f32 %v3468_v21, %v615_v20  ;;  %vm623_vm7 = vweird.f32 %v3468_v21 }
 0xb45   :  { %vm624_vm9 = vmor %vm622_vm8, %vm623_vm7 }
 0xb46   :  { %v618_v23 = vmul.f32 %v3468_v21, %v617_v22 }
 0xb48   :  { %v619_v24 = vmul.f32 0.5, %v618_v23 }
 0xb4a   :  { %v620_v25 = vsub.f32 1.5, %v619_v24 }
 0xb4c   :  { %v621_v26 = vmul.f32 %v3468_v21, %v620_v25 }
 0xb4e   :  { %v625_v27 = vsel %vm624_vm9, %v3468_v21, %v621_v26 }
 0xb4f   :  { %v626_v28 = vmul.f32 %v625_v27, %v610_v16 }
 0xb51   :  { %v629_v29 = vmul.f32 %v3860_v8, %v626_v28  ;;  %v628_v30 = vmul.f32 %v3854_v6, %v626_v28  ;;  %v627_v31 = vmul.f32 %v3848_v3, %v626_v28 }
 0xb53   :  { %v636_v32 = vsel %vm26_vm0, %v629_v29, 0.0  ;;  %v633_v33 = vsel %vm26_vm0, %v628_v30, 0.0  ;;  %v630_v34 = vsel %vm26_vm0, %v627_v31, 0.0 }
 0xb54   :  { %637 = vadd.xlane.f32.xlu2 %v636_v32  ;;  %634 = vadd.xlane.f32.xlu1 %v633_v33 }
 0xb55   :  { %631 = vadd.xlane.f32.xlu0 %v630_v34 }
 0xbc7   :  { %v635_v35 = vpop.xlane.xlu1 %634  ;;  %v638_v36 = vpop.xlane.xlu2 %637 }
 0xbc8   :  { %v640_v37 = vmul.f32 %v635_v35, %v635_v35  ;;  %v632_v38 = vpop.xlane.xlu0 %631  ;;  %v641_v40 = vmul.f32 %v638_v36, %v638_v36 }
 0xbc9   :  { %v639_v39 = vmul.f32 %v632_v38, %v632_v38 }
 0xbcb   :  { %v642_v41 = vadd.f32 %v640_v37, %v639_v39 }
 0xbcd   :  { %v643_v42 = vadd.f32 %v642_v41, %v641_v40 }
 0xbcf   :  { %v644_v43 = vrot.slane %v643_v42, 4 }
 0xbd1   :  { %v645_v44 = vadd.f32 %v644_v43, %v643_v42 }
 0xbd3   :  { %v646_v45 = vrot.slane %v645_v44, 2 }
 0xbd5   :  { %v647_v46 = vadd.f32 %v646_v45, %v645_v44 }
 0xbd7   :  { %v648_v47 = vrot.slane %v647_v46, 1 }
 0xbd9   :  { %v649_v48 = vadd.f32 %v648_v47, %v647_v46 }
 0xbdb   :  { %v650_v2 = vmax.f32 %v649_v48, 1e-30 }
 0xbdd   :  { %3469 = vrsqrt.f32 %v650_v2  ;;  %vm657_vm11 = vweird.f32 %v650_v2 }
 0xbe3   :  { %v3470_v49 = vpop.eup %3469 }
 0xbe4   :  { %v652_v5 = vmul.f32 %v3470_v49, %v650_v2  ;;  %vm658_vm10 = vweird.f32 %v3470_v49 }
 0xbe5   :  { %vm659_vm12 = vmor %vm657_vm11, %vm658_vm10 }
 0xbe6   :  { %v653_v50 = vmul.f32 %v3470_v49, %v652_v5 }
 0xbe8   :  { %v654_v0 = vmul.f32 0.5, %v653_v50 }
 0xbea   :  { %v655_v51 = vsub.f32 1.5, %v654_v0 }
 0xbec   :  { %v656_v52 = vmul.f32 %v3470_v49, %v655_v51 }
 0xbee   :  { %v660_v53 = vsel %vm659_vm12, %v3470_v49, %v656_v52 }
 0xbef   :  { %v661_v54 = vmul.f32 %v660_v53, %v632_v38  ;;  %v662_v55 = vmul.f32 %v660_v53, %v635_v35  ;;  %v663_v56 = vmul.f32 %v660_v53, %v638_v36 }
 0xbf1   :  { %v664_v57 = vmul.f32 %v3848_v3, %v661_v54  ;;  %v665_v58 = vmul.f32 %v3854_v6, %v662_v55  ;;  %v666_v59 = vmul.f32 %v3860_v8, %v663_v56 }
 0xbf3   :  { %v667_v60 = vsel %vm26_vm0, %v664_v57, 0.0  ;;  %v668_v61 = vsel %vm26_vm0, %v665_v58, 0.0  ;;  %v670_v63 = vsel %vm26_vm0, %v666_v59, 0.0 }
 0xbf4   :  { %v669_v62 = vadd.f32 %v668_v61, %v667_v60 }
 0xbf6   :  { %v671_v1 = vadd.f32 %v670_v63, %v669_v62 }
 0xbf8   :  { %v672_v4 = vrot.slane %v671_v1, 4 }
 0xbfa   :  { %v673_v7 = vadd.f32 %v672_v4, %v671_v1 }
 0xbfc   :  { %v674_v9 = vrot.slane %v673_v7, 2 }
 0xbfe   :  { %v675_v10 = vadd.f32 %v674_v9, %v673_v7 }
 0xc00   :  { %v676_v11 = vrot.slane %v675_v10, 1 }
 0xc02   :  { %v677_v12 = vadd.f32 %v676_v11, %v675_v10 }
 0xc04   :  { %v678_v13 = vmul.f32 %v677_v12, %v677_v12 }
 0xc06   :  { %v679_v14 = vsel %vm26_vm0, %v678_v13, 0.0 }
 0xc07   :  { %680 = vadd.xlane.f32.xlu0 %v679_v14 }
 0xc7a   :  { %v681_v15 = vpop.xlane.xlu0 %680 }
 0xc7b   :  { %v682_v16 = vmax.f32 %v681_v15, 1e-30 }
 0xc7d   :  { %3471 = vrsqrt.f32 %v682_v16  ;;  %vm689_vm14 = vweird.f32 %v682_v16 }
 0xc83   :  { %v3472_v17 = vpop.eup %3471 }
 0xc84   :  { %v684_v18 = vmul.f32 %v3472_v17, %v682_v16  ;;  %vm690_vm13 = vweird.f32 %v3472_v17 }
 0xc85   :  { %vm691_vm15 = vmor %vm689_vm14, %vm690_vm13 }
 0xc86   :  { %v685_v19 = vmul.f32 %v3472_v17, %v684_v18 }
 0xc88   :  { %v686_v20 = vmul.f32 0.5, %v685_v19 }
 0xc8a   :  { %v687_v21 = vsub.f32 1.5, %v686_v20 }
 0xc8c   :  { %v688_v22 = vmul.f32 %v3472_v17, %v687_v21 }
 0xc8e   :  { %v692_v23 = vsel %vm691_vm15, %v3472_v17, %v688_v22 }
 0xc8f   :  { %v693_v24 = vmul.f32 %v692_v23, %v677_v12 }
 0xc91   :  { %v696_v25 = vmul.f32 %v3860_v8, %v693_v24  ;;  %v695_v26 = vmul.f32 %v3854_v6, %v693_v24  ;;  %v694_v27 = vmul.f32 %v3848_v3, %v693_v24 }
 0xc93   :  { %v703_v28 = vsel %vm26_vm0, %v696_v25, 0.0  ;;  %v700_v29 = vsel %vm26_vm0, %v695_v26, 0.0  ;;  %v697_v30 = vsel %vm26_vm0, %v694_v27, 0.0 }
 0xc94   :  { %704 = vadd.xlane.f32.xlu0 %v703_v28  ;;  %701 = vadd.xlane.f32.xlu2 %v700_v29 }
 0xc95   :  { %698 = vadd.xlane.f32.xlu1 %v697_v30 }
 0xd07   :  { %v702_v31 = vpop.xlane.xlu2 %701  ;;  %v705_v32 = vpop.xlane.xlu0 %704 }
 0xd08   :  { %v707_v33 = vmul.f32 %v702_v31, %v702_v31  ;;  %v699_v34 = vpop.xlane.xlu1 %698  ;;  %v708_v36 = vmul.f32 %v705_v32, %v705_v32 }
 0xd09   :  { %v706_v35 = vmul.f32 %v699_v34, %v699_v34 }
 0xd0b   :  { %v709_v37 = vadd.f32 %v707_v33, %v706_v35 }
 0xd0d   :  { %v710_v38 = vadd.f32 %v709_v37, %v708_v36 }
 0xd0f   :  { %v711_v39 = vrot.slane %v710_v38, 4 }
 0xd11   :  { %v712_v40 = vadd.f32 %v711_v39, %v710_v38 }
 0xd13   :  { %v713_v41 = vrot.slane %v712_v40, 2 }
 0xd15   :  { %v714_v42 = vadd.f32 %v713_v41, %v712_v40 }
 0xd17   :  { %v715_v43 = vrot.slane %v714_v42, 1 }
 0xd19   :  { %v716_v44 = vadd.f32 %v715_v43, %v714_v42 }
 0xd1b   :  { %v717_v45 = vmax.f32 %v716_v44, 1e-30 }
 0xd1d   :  { %3473 = vrsqrt.f32 %v717_v45  ;;  %vm724_vm2 = vweird.f32 %v717_v45 }
 0xd23   :  { %v3474_v46 = vpop.eup %3473 }
 0xd24   :  { %v719_v47 = vmul.f32 %v3474_v46, %v717_v45  ;;  %vm725_vm1 = vweird.f32 %v3474_v46 }
 0xd25   :  { %vm726_vm3 = vmor %vm724_vm2, %vm725_vm1 }
 0xd26   :  { %v720_v48 = vmul.f32 %v3474_v46, %v719_v47 }
 0xd28   :  { %v721_v2 = vmul.f32 0.5, %v720_v48 }
 0xd2a   :  { %v722_v49 = vsub.f32 1.5, %v721_v2 }
 0xd2c   :  { %v723_v5 = vmul.f32 %v3474_v46, %v722_v49 }
 0xd2e   :  { %v727_v50 = vsel %vm726_vm3, %v3474_v46, %v723_v5 }
 0xd2f   :  { %v728_v0 = vmul.f32 %v727_v50, %v699_v34  ;;  %v729_v51 = vmul.f32 %v727_v50, %v702_v31  ;;  %v730_v52 = vmul.f32 %v727_v50, %v705_v32 }
 0xd31   :  { %v731_v53 = vmul.f32 %v3848_v3, %v728_v0  ;;  %v732_v54 = vmul.f32 %v3854_v6, %v729_v51  ;;  %v733_v55 = vmul.f32 %v3860_v8, %v730_v52 }
 0xd33   :  { %v734_v56 = vsel %vm26_vm0, %v731_v53, 0.0  ;;  %v735_v57 = vsel %vm26_vm0, %v732_v54, 0.0  ;;  %v737_v59 = vsel %vm26_vm0, %v733_v55, 0.0 }
 0xd34   :  { %v736_v58 = vadd.f32 %v735_v57, %v734_v56 }
 0xd36   :  { %v738_v60 = vadd.f32 %v737_v59, %v736_v58 }
 0xd38   :  { %v739_v61 = vrot.slane %v738_v60, 4 }
 0xd3a   :  { %v740_v62 = vadd.f32 %v739_v61, %v738_v60 }
 0xd3c   :  { %v741_v63 = vrot.slane %v740_v62, 2 }
 0xd3e   :  { %v742_v1 = vadd.f32 %v741_v63, %v740_v62 }
 0xd40   :  { %v743_v4 = vrot.slane %v742_v1, 1 }
 0xd42   :  { %v744_v7 = vadd.f32 %v743_v4, %v742_v1 }
 0xd44   :  { %v745_v9 = vmul.f32 %v744_v7, %v744_v7 }
 0xd46   :  { %v746_v10 = vsel %vm26_vm0, %v745_v9, 0.0 }
 0xd47   :  { %747 = vadd.xlane.f32.xlu1 %v746_v10 }
 0xdba   :  { %v748_v11 = vpop.xlane.xlu1 %747 }
 0xdbb   :  { %v749_v12 = vmax.f32 %v748_v11, 1e-30 }
 0xdbd   :  { %3475 = vrsqrt.f32 %v749_v12  ;;  %vm756_vm5 = vweird.f32 %v749_v12 }
 0xdc3   :  { %v3476_v13 = vpop.eup %3475 }
 0xdc4   :  { %v751_v14 = vmul.f32 %v3476_v13, %v749_v12  ;;  %vm757_vm4 = vweird.f32 %v3476_v13 }
 0xdc5   :  { %vm758_vm6 = vmor %vm756_vm5, %vm757_vm4 }
 0xdc6   :  { %v752_v15 = vmul.f32 %v3476_v13, %v751_v14 }
 0xdc8   :  { %v753_v16 = vmul.f32 0.5, %v752_v15 }
 0xdca   :  { %v754_v17 = vsub.f32 1.5, %v753_v16 }
 0xdcc   :  { %v755_v18 = vmul.f32 %v3476_v13, %v754_v17 }
 0xdce   :  { %v759_v19 = vsel %vm758_vm6, %v3476_v13, %v755_v18 }
 0xdcf   :  { %v760_v20 = vmul.f32 %v759_v19, %v744_v7 }
 0xdd1   :  { %v763_v21 = vmul.f32 %v3860_v8, %v760_v20  ;;  %v762_v22 = vmul.f32 %v3854_v6, %v760_v20  ;;  %v761_v23 = vmul.f32 %v3848_v3, %v760_v20 }
 0xdd3   :  { %v770_v24 = vsel %vm26_vm0, %v763_v21, 0.0  ;;  %v767_v25 = vsel %vm26_vm0, %v762_v22, 0.0  ;;  %v764_v26 = vsel %vm26_vm0, %v761_v23, 0.0 }
 0xdd4   :  { %771 = vadd.xlane.f32.xlu1 %v770_v24  ;;  %768 = vadd.xlane.f32.xlu0 %v767_v25 }
 0xdd5   :  { %765 = vadd.xlane.f32.xlu2 %v764_v26 }
 0xe47   :  { %v769_v27 = vpop.xlane.xlu0 %768  ;;  %v772_v28 = vpop.xlane.xlu1 %771 }
 0xe48   :  { %v774_v29 = vmul.f32 %v769_v27, %v769_v27  ;;  %v766_v30 = vpop.xlane.xlu2 %765  ;;  %v775_v32 = vmul.f32 %v772_v28, %v772_v28 }
 0xe49   :  { %v773_v31 = vmul.f32 %v766_v30, %v766_v30 }
 0xe4b   :  { %v776_v33 = vadd.f32 %v774_v29, %v773_v31 }
 0xe4d   :  { %v777_v34 = vadd.f32 %v776_v33, %v775_v32 }
 0xe4f   :  { %v778_v35 = vrot.slane %v777_v34, 4 }
 0xe51   :  { %v779_v36 = vadd.f32 %v778_v35, %v777_v34 }
 0xe53   :  { %v780_v37 = vrot.slane %v779_v36, 2 }
 0xe55   :  { %v781_v38 = vadd.f32 %v780_v37, %v779_v36 }
 0xe57   :  { %v782_v39 = vrot.slane %v781_v38, 1 }
 0xe59   :  { %v783_v40 = vadd.f32 %v782_v39, %v781_v38 }
 0xe5b   :  { %v784_v41 = vmax.f32 %v783_v40, 1e-30 }
 0xe5d   :  { %3477 = vrsqrt.f32 %v784_v41  ;;  %vm791_vm8 = vweird.f32 %v784_v41 }
 0xe63   :  { %v3478_v42 = vpop.eup %3477 }
 0xe64   :  { %v786_v43 = vmul.f32 %v3478_v42, %v784_v41  ;;  %vm792_vm7 = vweird.f32 %v3478_v42 }
 0xe65   :  { %vm793_vm9 = vmor %vm791_vm8, %vm792_vm7 }
 0xe66   :  { %v787_v44 = vmul.f32 %v3478_v42, %v786_v43 }
 0xe68   :  { %v788_v45 = vmul.f32 0.5, %v787_v44 }
 0xe6a   :  { %v789_v46 = vsub.f32 1.5, %v788_v45 }
 0xe6c   :  { %v790_v47 = vmul.f32 %v3478_v42, %v789_v46 }
 0xe6e   :  { %v794_v48 = vsel %vm793_vm9, %v3478_v42, %v790_v47 }
 0xe6f   :  { %v795_v2 = vmul.f32 %v794_v48, %v766_v30  ;;  %v796_v49 = vmul.f32 %v794_v48, %v769_v27  ;;  %v797_v5 = vmul.f32 %v794_v48, %v772_v28 }
 0xe71   :  { %v798_v50 = vmul.f32 %v3848_v3, %v795_v2  ;;  %v799_v0 = vmul.f32 %v3854_v6, %v796_v49  ;;  %v800_v51 = vmul.f32 %v3860_v8, %v797_v5 }
 0xe73   :  { %v801_v52 = vsel %vm26_vm0, %v798_v50, 0.0  ;;  %v802_v53 = vsel %vm26_vm0, %v799_v0, 0.0  ;;  %v804_v55 = vsel %vm26_vm0, %v800_v51, 0.0 }
 0xe74   :  { %v803_v54 = vadd.f32 %v802_v53, %v801_v52 }
 0xe76   :  { %v805_v56 = vadd.f32 %v804_v55, %v803_v54 }
 0xe78   :  { %v806_v57 = vrot.slane %v805_v56, 4 }
 0xe7a   :  { %v807_v58 = vadd.f32 %v806_v57, %v805_v56 }
 0xe7c   :  { %v808_v59 = vrot.slane %v807_v58, 2 }
 0xe7e   :  { %v809_v60 = vadd.f32 %v808_v59, %v807_v58 }
 0xe80   :  { %v810_v61 = vrot.slane %v809_v60, 1 }
 0xe82   :  { %v811_v62 = vadd.f32 %v810_v61, %v809_v60 }
 0xe84   :  { %v812_v63 = vmul.f32 %v811_v62, %v811_v62 }
 0xe86   :  { %v813_v1 = vsel %vm26_vm0, %v812_v63, 0.0 }
 0xe87   :  { %814 = vadd.xlane.f32.xlu2 %v813_v1 }
 0xefa   :  { %v815_v4 = vpop.xlane.xlu2 %814 }
 0xefb   :  { %v816_v7 = vmax.f32 %v815_v4, 1e-30 }
 0xefd   :  { %3479 = vrsqrt.f32 %v816_v7  ;;  %vm823_vm11 = vweird.f32 %v816_v7 }
 0xf03   :  { %v3480_v9 = vpop.eup %3479 }
 0xf04   :  { %v818_v10 = vmul.f32 %v3480_v9, %v816_v7  ;;  %vm824_vm10 = vweird.f32 %v3480_v9 }
 0xf05   :  { %vm825_vm12 = vmor %vm823_vm11, %vm824_vm10 }
 0xf06   :  { %v819_v11 = vmul.f32 %v3480_v9, %v818_v10 }
 0xf08   :  { %v820_v12 = vmul.f32 0.5, %v819_v11 }
 0xf0a   :  { %v821_v13 = vsub.f32 1.5, %v820_v12 }
 0xf0c   :  { %v822_v14 = vmul.f32 %v3480_v9, %v821_v13 }
 0xf0e   :  { %v826_v15 = vsel %vm825_vm12, %v3480_v9, %v822_v14 }
 0xf0f   :  { %v827_v16 = vmul.f32 %v826_v15, %v811_v62 }
 0xf11   :  { %v830_v17 = vmul.f32 %v3860_v8, %v827_v16  ;;  %v829_v18 = vmul.f32 %v3854_v6, %v827_v16  ;;  %v828_v19 = vmul.f32 %v3848_v3, %v827_v16 }
 0xf13   :  { %v837_v20 = vsel %vm26_vm0, %v830_v17, 0.0  ;;  %v834_v21 = vsel %vm26_vm0, %v829_v18, 0.0  ;;  %v831_v22 = vsel %vm26_vm0, %v828_v19, 0.0 }
 0xf14   :  { %838 = vadd.xlane.f32.xlu2 %v837_v20  ;;  %835 = vadd.xlane.f32.xlu1 %v834_v21 }
 0xf15   :  { %832 = vadd.xlane.f32.xlu0 %v831_v22 }
 0xf87   :  { %v836_v23 = vpop.xlane.xlu1 %835  ;;  %v839_v24 = vpop.xlane.xlu2 %838 }
 0xf88   :  { %v841_v25 = vmul.f32 %v836_v23, %v836_v23  ;;  %v833_v26 = vpop.xlane.xlu0 %832  ;;  %v842_v28 = vmul.f32 %v839_v24, %v839_v24 }
 0xf89   :  { %v840_v27 = vmul.f32 %v833_v26, %v833_v26 }
 0xf8b   :  { %v843_v29 = vadd.f32 %v841_v25, %v840_v27 }
 0xf8d   :  { %v844_v30 = vadd.f32 %v843_v29, %v842_v28 }
 0xf8f   :  { %v845_v31 = vrot.slane %v844_v30, 4 }
 0xf91   :  { %v846_v32 = vadd.f32 %v845_v31, %v844_v30 }
 0xf93   :  { %v847_v33 = vrot.slane %v846_v32, 2 }
 0xf95   :  { %v848_v34 = vadd.f32 %v847_v33, %v846_v32 }
 0xf97   :  { %v849_v35 = vrot.slane %v848_v34, 1 }
 0xf99   :  { %v850_v36 = vadd.f32 %v849_v35, %v848_v34 }
 0xf9b   :  { %v851_v37 = vmax.f32 %v850_v36, 1e-30 }
 0xf9d   :  { %3481 = vrsqrt.f32 %v851_v37  ;;  %vm858_vm14 = vweird.f32 %v851_v37 }
 0xfa3   :  { %v3482_v38 = vpop.eup %3481 }
 0xfa4   :  { %v853_v39 = vmul.f32 %v3482_v38, %v851_v37  ;;  %vm859_vm13 = vweird.f32 %v3482_v38 }
 0xfa5   :  { %vm860_vm15 = vmor %vm858_vm14, %vm859_vm13 }
 0xfa6   :  { %v854_v40 = vmul.f32 %v3482_v38, %v853_v39 }
 0xfa8   :  { %v855_v41 = vmul.f32 0.5, %v854_v40 }
 0xfaa   :  { %v856_v42 = vsub.f32 1.5, %v855_v41 }
 0xfac   :  { %v857_v43 = vmul.f32 %v3482_v38, %v856_v42 }
 0xfae   :  { %v861_v44 = vsel %vm860_vm15, %v3482_v38, %v857_v43 }
 0xfaf   :  { %v862_v45 = vmul.f32 %v861_v44, %v833_v26  ;;  %v863_v46 = vmul.f32 %v861_v44, %v836_v23  ;;  %v864_v47 = vmul.f32 %v861_v44, %v839_v24 }
 0xfb1   :  { %v865_v48 = vmul.f32 %v3848_v3, %v862_v45  ;;  %v866_v2 = vmul.f32 %v3854_v6, %v863_v46  ;;  %v867_v49 = vmul.f32 %v3860_v8, %v864_v47 }
 0xfb3   :  { %v868_v5 = vsel %vm26_vm0, %v865_v48, 0.0  ;;  %v869_v50 = vsel %vm26_vm0, %v866_v2, 0.0  ;;  %v871_v51 = vsel %vm26_vm0, %v867_v49, 0.0 }
 0xfb4   :  { %v870_v0 = vadd.f32 %v869_v50, %v868_v5 }
 0xfb6   :  { %v872_v52 = vadd.f32 %v871_v51, %v870_v0 }
 0xfb8   :  { %v873_v53 = vrot.slane %v872_v52, 4 }
 0xfba   :  { %v874_v54 = vadd.f32 %v873_v53, %v872_v52 }
 0xfbc   :  { %v875_v55 = vrot.slane %v874_v54, 2 }
 0xfbe   :  { %v876_v56 = vadd.f32 %v875_v55, %v874_v54 }
 0xfc0   :  { %v877_v57 = vrot.slane %v876_v56, 1 }
 0xfc2   :  { %v878_v58 = vadd.f32 %v877_v57, %v876_v56 }
 0xfc4   :  { %v879_v59 = vmul.f32 %v878_v58, %v878_v58 }
 0xfc6   :  { %v880_v60 = vsel %vm26_vm0, %v879_v59, 0.0 }
 0xfc7   :  { %881 = vadd.xlane.f32.xlu0 %v880_v60 }
0x103a   :  { %v882_v61 = vpop.xlane.xlu0 %881 }
0x103b   :  { %v883_v62 = vmax.f32 %v882_v61, 1e-30 }
0x103d   :  { %3483 = vrsqrt.f32 %v883_v62  ;;  %vm890_vm2 = vweird.f32 %v883_v62 }
0x1043   :  { %v3484_v63 = vpop.eup %3483 }
0x1044   :  { %v885_v1 = vmul.f32 %v3484_v63, %v883_v62  ;;  %vm891_vm1 = vweird.f32 %v3484_v63 }
0x1045   :  { %vm892_vm3 = vmor %vm890_vm2, %vm891_vm1 }
0x1046   :  { %v886_v4 = vmul.f32 %v3484_v63, %v885_v1 }
0x1048   :  { %v887_v7 = vmul.f32 0.5, %v886_v4 }
0x104a   :  { %v888_v9 = vsub.f32 1.5, %v887_v7 }
0x104c   :  { %v889_v10 = vmul.f32 %v3484_v63, %v888_v9 }
0x104e   :  { %v893_v11 = vsel %vm892_vm3, %v3484_v63, %v889_v10 }
0x104f   :  { %v894_v12 = vmul.f32 %v893_v11, %v878_v58 }
0x1051   :  { %v897_v13 = vmul.f32 %v3860_v8, %v894_v12  ;;  %v896_v14 = vmul.f32 %v3854_v6, %v894_v12  ;;  %v895_v15 = vmul.f32 %v3848_v3, %v894_v12 }
0x1053   :  { %v904_v16 = vsel %vm26_vm0, %v897_v13, 0.0  ;;  %v901_v17 = vsel %vm26_vm0, %v896_v14, 0.0  ;;  %v898_v18 = vsel %vm26_vm0, %v895_v15, 0.0 }
0x1054   :  { %905 = vadd.xlane.f32.xlu0 %v904_v16  ;;  %902 = vadd.xlane.f32.xlu2 %v901_v17 }
0x1055   :  { %899 = vadd.xlane.f32.xlu1 %v898_v18 }
0x10c7   :  { %v903_v19 = vpop.xlane.xlu2 %902  ;;  %v906_v20 = vpop.xlane.xlu0 %905 }
0x10c8   :  { %v908_v21 = vmul.f32 %v903_v19, %v903_v19  ;;  %v900_v22 = vpop.xlane.xlu1 %899  ;;  %v909_v24 = vmul.f32 %v906_v20, %v906_v20 }
0x10c9   :  { %v907_v23 = vmul.f32 %v900_v22, %v900_v22 }
0x10cb   :  { %v910_v25 = vadd.f32 %v908_v21, %v907_v23 }
0x10cd   :  { %v911_v26 = vadd.f32 %v910_v25, %v909_v24 }
0x10cf   :  { %v912_v27 = vrot.slane %v911_v26, 4 }
0x10d1   :  { %v913_v28 = vadd.f32 %v912_v27, %v911_v26 }
0x10d3   :  { %v914_v29 = vrot.slane %v913_v28, 2 }
0x10d5   :  { %v915_v30 = vadd.f32 %v914_v29, %v913_v28 }
0x10d7   :  { %v916_v31 = vrot.slane %v915_v30, 1 }
0x10d9   :  { %v917_v32 = vadd.f32 %v916_v31, %v915_v30 }
0x10db   :  { %v918_v33 = vmax.f32 %v917_v32, 1e-30 }
0x10dd   :  { %3485 = vrsqrt.f32 %v918_v33  ;;  %vm925_vm5 = vweird.f32 %v918_v33 }
0x10e3   :  { %v3486_v34 = vpop.eup %3485 }
0x10e4   :  { %v920_v35 = vmul.f32 %v3486_v34, %v918_v33  ;;  %vm926_vm4 = vweird.f32 %v3486_v34 }
0x10e5   :  { %vm927_vm6 = vmor %vm925_vm5, %vm926_vm4 }
0x10e6   :  { %v921_v36 = vmul.f32 %v3486_v34, %v920_v35 }
0x10e8   :  { %v922_v37 = vmul.f32 0.5, %v921_v36 }
0x10ea   :  { %v923_v38 = vsub.f32 1.5, %v922_v37 }
0x10ec   :  { %v924_v39 = vmul.f32 %v3486_v34, %v923_v38 }
0x10ee   :  { %v928_v40 = vsel %vm927_vm6, %v3486_v34, %v924_v39 }
0x10ef   :  { %v929_v41 = vmul.f32 %v928_v40, %v900_v22  ;;  %v930_v42 = vmul.f32 %v928_v40, %v903_v19  ;;  %v931_v43 = vmul.f32 %v928_v40, %v906_v20 }
0x10f1   :  { %v932_v44 = vmul.f32 %v3848_v3, %v929_v41  ;;  %v933_v45 = vmul.f32 %v3854_v6, %v930_v42  ;;  %v934_v46 = vmul.f32 %v3860_v8, %v931_v43 }
0x10f3   :  { %v935_v47 = vsel %vm26_vm0, %v932_v44, 0.0  ;;  %v936_v48 = vsel %vm26_vm0, %v933_v45, 0.0  ;;  %v938_v49 = vsel %vm26_vm0, %v934_v46, 0.0 }
0x10f4   :  { %v937_v2 = vadd.f32 %v936_v48, %v935_v47 }
0x10f6   :  { %v939_v5 = vadd.f32 %v938_v49, %v937_v2 }
0x10f8   :  { %v940_v50 = vrot.slane %v939_v5, 4 }
0x10fa   :  { %v941_v0 = vadd.f32 %v940_v50, %v939_v5 }
0x10fc   :  { %v942_v51 = vrot.slane %v941_v0, 2 }
0x10fe   :  { %v943_v52 = vadd.f32 %v942_v51, %v941_v0 }
0x1100   :  { %v944_v53 = vrot.slane %v943_v52, 1 }
0x1102   :  { %v945_v54 = vadd.f32 %v944_v53, %v943_v52 }
0x1104   :  { %v946_v55 = vmul.f32 %v945_v54, %v945_v54 }
0x1106   :  { %v947_v56 = vsel %vm26_vm0, %v946_v55, 0.0 }
0x1107   :  { %948 = vadd.xlane.f32.xlu1 %v947_v56 }
0x117a   :  { %v949_v57 = vpop.xlane.xlu1 %948 }
0x117b   :  { %v950_v58 = vmax.f32 %v949_v57, 1e-30 }
0x117d   :  { %3487 = vrsqrt.f32 %v950_v58  ;;  %vm957_vm8 = vweird.f32 %v950_v58 }
0x1183   :  { %v3488_v59 = vpop.eup %3487 }
0x1184   :  { %v952_v60 = vmul.f32 %v3488_v59, %v950_v58  ;;  %vm958_vm7 = vweird.f32 %v3488_v59 }
0x1185   :  { %vm959_vm9 = vmor %vm957_vm8, %vm958_vm7 }
0x1186   :  { %v953_v61 = vmul.f32 %v3488_v59, %v952_v60  ;;  %v3961_v60 = vld [vmem:[%s4503_s0 + $0x10] sm:$0xff] }
0x1188   :  { %v954_v62 = vmul.f32 0.5, %v953_v61 }
0x118a   :  { %v955_v63 = vsub.f32 1.5, %v954_v62  ;;  %v3967_v62 = vld [vmem:[%s4503_s0 + $0x8] sm:$0xff] }
0x118c   :  { %v956_v1 = vmul.f32 %v3488_v59, %v955_v63 }
0x118e   :  { %v960_v4 = vsel %vm959_vm9, %v3488_v59, %v956_v1  ;;  %v3973_v1 = vld [vmem:[%s4503_s0] sm:$0xff] }
0x118f   :  { %v961_v7 = vmul.f32 %v960_v4, %v945_v54 }
0x1191   :  { %v964_v9 = vmul.f32 %v3860_v8, %v961_v7  ;;  %v963_v10 = vmul.f32 %v3854_v6, %v961_v7  ;;  %v962_v11 = vmul.f32 %v3848_v3, %v961_v7 }
0x1193   :  { %v971_v12 = vsel %vm26_vm0, %v964_v9, 0.0  ;;  %v968_v13 = vsel %vm26_vm0, %v963_v10, 0.0  ;;  %v965_v14 = vsel %vm26_vm0, %v962_v11, 0.0 }
0x1194   :  { %972 = vadd.xlane.f32.xlu1 %v971_v12  ;;  %969 = vadd.xlane.f32.xlu0 %v968_v13 }
0x1195   :  { %966 = vadd.xlane.f32.xlu2 %v965_v14 }
0x1207   :  { %v970_v15 = vpop.xlane.xlu0 %969  ;;  %v973_v16 = vpop.xlane.xlu1 %972 }
0x1208   :  { %v975_v17 = vmul.f32 %v970_v15, %v970_v15  ;;  %v967_v18 = vpop.xlane.xlu2 %966  ;;  %v976_v20 = vmul.f32 %v973_v16, %v973_v16 }
0x1209   :  { %v974_v19 = vmul.f32 %v967_v18, %v967_v18 }
0x120b   :  { %v977_v21 = vadd.f32 %v975_v17, %v974_v19 }
0x120d   :  { %v978_v22 = vadd.f32 %v977_v21, %v976_v20 }
0x120f   :  { %v979_v23 = vrot.slane %v978_v22, 4 }
0x1211   :  { %v980_v24 = vadd.f32 %v979_v23, %v978_v22 }
0x1213   :  { %v981_v25 = vrot.slane %v980_v24, 2 }
0x1215   :  { %v982_v26 = vadd.f32 %v981_v25, %v980_v24 }
0x1217   :  { %v983_v27 = vrot.slane %v982_v26, 1 }
0x1219   :  { %v984_v28 = vadd.f32 %v983_v27, %v982_v26 }
0x121b   :  { %v985_v29 = vmax.f32 %v984_v28, 1e-30 }
0x121d   :  { %3489 = vrsqrt.f32 %v985_v29  ;;  %vm992_vm11 = vweird.f32 %v985_v29 }
0x1223   :  { %v3490_v30 = vpop.eup %3489 }
0x1224   :  { %v987_v31 = vmul.f32 %v3490_v30, %v985_v29  ;;  %vm993_vm10 = vweird.f32 %v3490_v30 }
0x1225   :  { %vm994_vm12 = vmor %vm992_vm11, %vm993_vm10 }
0x1226   :  { %v988_v32 = vmul.f32 %v3490_v30, %v987_v31 }
0x1228   :  { %v989_v33 = vmul.f32 0.5, %v988_v32 }
0x122a   :  { %v990_v34 = vsub.f32 1.5, %v989_v33 }
0x122c   :  { %v991_v35 = vmul.f32 %v3490_v30, %v990_v34 }
0x122e   :  { %v995_v36 = vsel %vm994_vm12, %v3490_v30, %v991_v35 }
0x122f   :  { %v996_v37 = vmul.f32 %v995_v36, %v967_v18  ;;  %v997_v38 = vmul.f32 %v995_v36, %v970_v15  ;;  %v998_v39 = vmul.f32 %v995_v36, %v973_v16 }
0x1231   :  { %v999_v40 = vmul.f32 %v3848_v3, %v996_v37  ;;  %v1000_v41 = vmul.f32 %v3854_v6, %v997_v38  ;;  %v1001_v42 = vmul.f32 %v3860_v8, %v998_v39 }
0x1233   :  { %v1002_v43 = vsel %vm26_vm0, %v999_v40, 0.0  ;;  %v1003_v44 = vsel %vm26_vm0, %v1000_v41, 0.0  ;;  %v1005_v46 = vsel %vm26_vm0, %v1001_v42, 0.0 }
0x1234   :  { %v1004_v45 = vadd.f32 %v1003_v44, %v1002_v43 }
0x1236   :  { %v1006_v47 = vadd.f32 %v1005_v46, %v1004_v45 }
0x1238   :  { %v1007_v48 = vrot.slane %v1006_v47, 4 }
0x123a   :  { %v1008_v2 = vadd.f32 %v1007_v48, %v1006_v47 }
0x123c   :  { %v1009_v49 = vrot.slane %v1008_v2, 2 }
0x123e   :  { %v1010_v5 = vadd.f32 %v1009_v49, %v1008_v2 }
0x1240   :  { %v1011_v50 = vrot.slane %v1010_v5, 1 }
0x1242   :  { %v1012_v0 = vadd.f32 %v1011_v50, %v1010_v5 }
0x1244   :  { %v1013_v51 = vmul.f32 %v1012_v0, %v1012_v0 }
0x1246   :  { %v1014_v3 = vsel %vm26_vm0, %v1013_v51, 0.0 }
0x1247   :  { %1015 = vadd.xlane.f32.xlu2 %v1014_v3 }
0x12ba   :  { %v1016_v6 = vpop.xlane.xlu2 %1015 }
0x12bb   :  { %v1017_v8 = vmax.f32 %v1016_v6, 1e-30 }
0x12bd   :  { %3491 = vrsqrt.f32 %v1017_v8  ;;  %vm1024_vm14 = vweird.f32 %v1017_v8 }
0x12c3   :  { %v3492_v52 = vpop.eup %3491 }
0x12c4   :  { %v1019_v53 = vmul.f32 %v3492_v52, %v1017_v8  ;;  %vm1025_vm13 = vweird.f32 %v3492_v52 }
0x12c5   :  { %vm1026_vm15 = vmor %vm1024_vm14, %vm1025_vm13 }
0x12c6   :  { %v1020_v54 = vmul.f32 %v3492_v52, %v1019_v53 }
0x12c8   :  { %v1021_v55 = vmul.f32 0.5, %v1020_v54 }
0x12ca   :  { %v1022_v56 = vsub.f32 1.5, %v1021_v55 }
0x12cc   :  { %v1023_v57 = vmul.f32 %v3492_v52, %v1022_v56 }
0x12ce   :  { %v1027_v58 = vsel %vm1026_vm15, %v3492_v52, %v1023_v57 }
0x12cf   :  { %v1028_v59 = vmul.f32 %v1027_v58, %v1012_v0 }
0x12d1   :  { %v1031_v61 = vmul.f32 %v3961_v60, %v1028_v59  ;;  %v1030_v63 = vmul.f32 %v3967_v62, %v1028_v59  ;;  %v1029_v4 = vmul.f32 %v3973_v1, %v1028_v59 }
0x12d3   :  { %v1038_v7 = vsel %vm26_vm0, %v1031_v61, 0.0  ;;  %v1035_v9 = vsel %vm26_vm0, %v1030_v63, 0.0  ;;  %v1032_v10 = vsel %vm26_vm0, %v1029_v4, 0.0 }
0x12d4   :  { %1039 = vadd.xlane.f32.xlu2 %v1038_v7  ;;  %1036 = vadd.xlane.f32.xlu1 %v1035_v9 }
0x12d5   :  { %1033 = vadd.xlane.f32.xlu0 %v1032_v10 }
0x1347   :  { %v1037_v11 = vpop.xlane.xlu1 %1036  ;;  %v1040_v12 = vpop.xlane.xlu2 %1039 }
0x1348   :  { %v1042_v13 = vmul.f32 %v1037_v11, %v1037_v11  ;;  %v1034_v14 = vpop.xlane.xlu0 %1033  ;;  %v1043_v16 = vmul.f32 %v1040_v12, %v1040_v12 }
0x1349   :  { %v1041_v15 = vmul.f32 %v1034_v14, %v1034_v14 }
0x134b   :  { %v1044_v17 = vadd.f32 %v1042_v13, %v1041_v15 }
0x134d   :  { %v1045_v18 = vadd.f32 %v1044_v17, %v1043_v16 }
0x134f   :  { %v1046_v19 = vrot.slane %v1045_v18, 4 }
0x1351   :  { %v1047_v20 = vadd.f32 %v1046_v19, %v1045_v18 }
0x1353   :  { %v1048_v21 = vrot.slane %v1047_v20, 2 }
0x1355   :  { %v1049_v22 = vadd.f32 %v1048_v21, %v1047_v20 }
0x1357   :  { %v1050_v23 = vrot.slane %v1049_v22, 1 }
0x1359   :  { %v1051_v24 = vadd.f32 %v1050_v23, %v1049_v22 }
0x135b   :  { %v1052_v25 = vmax.f32 %v1051_v24, 1e-30 }
0x135d   :  { %3493 = vrsqrt.f32 %v1052_v25  ;;  %vm1059_vm2 = vweird.f32 %v1052_v25 }
0x1363   :  { %v3494_v26 = vpop.eup %3493 }
0x1364   :  { %v1054_v27 = vmul.f32 %v3494_v26, %v1052_v25  ;;  %vm1060_vm1 = vweird.f32 %v3494_v26 }
0x1365   :  { %vm1061_vm3 = vmor %vm1059_vm2, %vm1060_vm1 }
0x1366   :  { %v1055_v28 = vmul.f32 %v3494_v26, %v1054_v27 }
0x1368   :  { %v1056_v29 = vmul.f32 0.5, %v1055_v28 }
0x136a   :  { %v1057_v30 = vsub.f32 1.5, %v1056_v29 }
0x136c   :  { %v1058_v31 = vmul.f32 %v3494_v26, %v1057_v30 }
0x136e   :  { %v1062_v32 = vsel %vm1061_vm3, %v3494_v26, %v1058_v31 }
0x136f   :  { %v1063_v33 = vmul.f32 %v1062_v32, %v1034_v14  ;;  %v1064_v34 = vmul.f32 %v1062_v32, %v1037_v11  ;;  %v1065_v35 = vmul.f32 %v1062_v32, %v1040_v12 }
0x1371   :  { %v1066_v36 = vmul.f32 %v3973_v1, %v1063_v33  ;;  %v1067_v37 = vmul.f32 %v3967_v62, %v1064_v34  ;;  %v1068_v38 = vmul.f32 %v3961_v60, %v1065_v35 }
0x1373   :  { %v1069_v39 = vsel %vm26_vm0, %v1066_v36, 0.0  ;;  %v1070_v40 = vsel %vm26_vm0, %v1067_v37, 0.0  ;;  %v1072_v42 = vsel %vm26_vm0, %v1068_v38, 0.0 }
0x1374   :  { %v1071_v41 = vadd.f32 %v1070_v40, %v1069_v39 }
0x1376   :  { %v1073_v43 = vadd.f32 %v1072_v42, %v1071_v41 }
0x1378   :  { %v1074_v44 = vrot.slane %v1073_v43, 4 }
0x137a   :  { %v1075_v45 = vadd.f32 %v1074_v44, %v1073_v43 }
0x137c   :  { %v1076_v46 = vrot.slane %v1075_v45, 2 }
0x137e   :  { %v1077_v47 = vadd.f32 %v1076_v46, %v1075_v45 }
0x1380   :  { %v1078_v48 = vrot.slane %v1077_v47, 1 }
0x1382   :  { %v1079_v2 = vadd.f32 %v1078_v48, %v1077_v47 }
0x1384   :  { %v1080_v49 = vmul.f32 %v1079_v2, %v1079_v2 }
0x1386   :  { %v1081_v5 = vsel %vm26_vm0, %v1080_v49, 0.0 }
0x1387   :  { %1082 = vadd.xlane.f32.xlu0 %v1081_v5 }
0x13fa   :  { %v1083_v50 = vpop.xlane.xlu0 %1082 }
0x13fb   :  { %v1084_v0 = vmax.f32 %v1083_v50, 1e-30 }
0x13fd   :  { %3495 = vrsqrt.f32 %v1084_v0  ;;  %vm1091_vm5 = vweird.f32 %v1084_v0 }
0x1403   :  { %v3496_v51 = vpop.eup %3495 }
0x1404   :  { %v1086_v3 = vmul.f32 %v3496_v51, %v1084_v0  ;;  %vm1092_vm4 = vweird.f32 %v3496_v51 }
0x1405   :  { %vm1093_vm6 = vmor %vm1091_vm5, %vm1092_vm4 }
0x1406   :  { %v1087_v6 = vmul.f32 %v3496_v51, %v1086_v3 }
0x1408   :  { %v1088_v8 = vmul.f32 0.5, %v1087_v6 }
0x140a   :  { %v1089_v52 = vsub.f32 1.5, %v1088_v8 }
0x140c   :  { %v1090_v53 = vmul.f32 %v3496_v51, %v1089_v52 }
0x140e   :  { %v1094_v54 = vsel %vm1093_vm6, %v3496_v51, %v1090_v53 }
0x140f   :  { %v1095_v55 = vmul.f32 %v1094_v54, %v1079_v2 }
0x1411   :  { %v1098_v56 = vmul.f32 %v3961_v60, %v1095_v55  ;;  %v1097_v57 = vmul.f32 %v3967_v62, %v1095_v55  ;;  %v1096_v58 = vmul.f32 %v3973_v1, %v1095_v55 }
0x1413   :  { %v1105_v59 = vsel %vm26_vm0, %v1098_v56, 0.0  ;;  %v1102_v61 = vsel %vm26_vm0, %v1097_v57, 0.0  ;;  %v1099_v63 = vsel %vm26_vm0, %v1096_v58, 0.0 }
0x1414   :  { %1106 = vadd.xlane.f32.xlu0 %v1105_v59  ;;  %1103 = vadd.xlane.f32.xlu2 %v1102_v61 }
0x1415   :  { %1100 = vadd.xlane.f32.xlu1 %v1099_v63 }
0x1487   :  { %v1104_v4 = vpop.xlane.xlu2 %1103  ;;  %v1107_v7 = vpop.xlane.xlu0 %1106 }
0x1488   :  { %v1109_v9 = vmul.f32 %v1104_v4, %v1104_v4  ;;  %v1101_v10 = vpop.xlane.xlu1 %1100  ;;  %v1110_v12 = vmul.f32 %v1107_v7, %v1107_v7 }
0x1489   :  { %v1108_v11 = vmul.f32 %v1101_v10, %v1101_v10 }
0x148b   :  { %v1111_v13 = vadd.f32 %v1109_v9, %v1108_v11 }
0x148d   :  { %v1112_v14 = vadd.f32 %v1111_v13, %v1110_v12 }
0x148f   :  { %v1113_v15 = vrot.slane %v1112_v14, 4 }
0x1491   :  { %v1114_v16 = vadd.f32 %v1113_v15, %v1112_v14 }
0x1493   :  { %v1115_v17 = vrot.slane %v1114_v16, 2 }
0x1495   :  { %v1116_v18 = vadd.f32 %v1115_v17, %v1114_v16 }
0x1497   :  { %v1117_v19 = vrot.slane %v1116_v18, 1 }
0x1499   :  { %v1118_v20 = vadd.f32 %v1117_v19, %v1116_v18 }
0x149b   :  { %v1119_v21 = vmax.f32 %v1118_v20, 1e-30 }
0x149d   :  { %3497 = vrsqrt.f32 %v1119_v21  ;;  %vm1126_vm8 = vweird.f32 %v1119_v21 }
0x14a3   :  { %v3498_v22 = vpop.eup %3497 }
0x14a4   :  { %v1121_v23 = vmul.f32 %v3498_v22, %v1119_v21  ;;  %vm1127_vm7 = vweird.f32 %v3498_v22 }
0x14a5   :  { %vm1128_vm9 = vmor %vm1126_vm8, %vm1127_vm7 }
0x14a6   :  { %v1122_v24 = vmul.f32 %v3498_v22, %v1121_v23 }
0x14a8   :  { %v1123_v25 = vmul.f32 0.5, %v1122_v24 }
0x14aa   :  { %v1124_v26 = vsub.f32 1.5, %v1123_v25 }
0x14ac   :  { %v1125_v27 = vmul.f32 %v3498_v22, %v1124_v26 }
0x14ae   :  { %v1129_v28 = vsel %vm1128_vm9, %v3498_v22, %v1125_v27 }
0x14af   :  { %v1130_v29 = vmul.f32 %v1129_v28, %v1101_v10  ;;  %v1131_v30 = vmul.f32 %v1129_v28, %v1104_v4  ;;  %v1132_v31 = vmul.f32 %v1129_v28, %v1107_v7 }
0x14b1   :  { %v1133_v32 = vmul.f32 %v3973_v1, %v1130_v29  ;;  %v1134_v33 = vmul.f32 %v3967_v62, %v1131_v30  ;;  %v1135_v34 = vmul.f32 %v3961_v60, %v1132_v31 }
0x14b3   :  { %v1136_v35 = vsel %vm26_vm0, %v1133_v32, 0.0  ;;  %v1137_v36 = vsel %vm26_vm0, %v1134_v33, 0.0  ;;  %v1139_v38 = vsel %vm26_vm0, %v1135_v34, 0.0 }
0x14b4   :  { %v1138_v37 = vadd.f32 %v1137_v36, %v1136_v35 }
0x14b6   :  { %v1140_v39 = vadd.f32 %v1139_v38, %v1138_v37 }
0x14b8   :  { %v1141_v40 = vrot.slane %v1140_v39, 4 }
0x14ba   :  { %v1142_v41 = vadd.f32 %v1141_v40, %v1140_v39 }
0x14bc   :  { %v1143_v42 = vrot.slane %v1142_v41, 2 }
0x14be   :  { %v1144_v43 = vadd.f32 %v1143_v42, %v1142_v41 }
0x14c0   :  { %v1145_v44 = vrot.slane %v1144_v43, 1 }
0x14c2   :  { %v1146_v45 = vadd.f32 %v1145_v44, %v1144_v43 }
0x14c4   :  { %v1147_v46 = vmul.f32 %v1146_v45, %v1146_v45 }
0x14c6   :  { %v1148_v47 = vsel %vm26_vm0, %v1147_v46, 0.0 }
0x14c7   :  { %1149 = vadd.xlane.f32.xlu1 %v1148_v47 }
0x153a   :  { %v1150_v48 = vpop.xlane.xlu1 %1149 }
0x153b   :  { %v1151_v2 = vmax.f32 %v1150_v48, 1e-30 }
0x153d   :  { %3499 = vrsqrt.f32 %v1151_v2  ;;  %vm1158_vm11 = vweird.f32 %v1151_v2 }
0x1543   :  { %v3500_v49 = vpop.eup %3499 }
0x1544   :  { %v1153_v5 = vmul.f32 %v3500_v49, %v1151_v2  ;;  %vm1159_vm10 = vweird.f32 %v3500_v49 }
0x1545   :  { %vm1160_vm12 = vmor %vm1158_vm11, %vm1159_vm10 }
0x1546   :  { %v1154_v50 = vmul.f32 %v3500_v49, %v1153_v5 }
0x1548   :  { %v1155_v0 = vmul.f32 0.5, %v1154_v50 }
0x154a   :  { %v1156_v51 = vsub.f32 1.5, %v1155_v0 }
0x154c   :  { %v1157_v3 = vmul.f32 %v3500_v49, %v1156_v51 }
0x154e   :  { %v1161_v6 = vsel %vm1160_vm12, %v3500_v49, %v1157_v3 }
0x154f   :  { %v1162_v8 = vmul.f32 %v1161_v6, %v1146_v45 }
0x1551   :  { %v1165_v52 = vmul.f32 %v3961_v60, %v1162_v8  ;;  %v1164_v53 = vmul.f32 %v3967_v62, %v1162_v8  ;;  %v1163_v54 = vmul.f32 %v3973_v1, %v1162_v8 }
0x1553   :  { %v1172_v55 = vsel %vm26_vm0, %v1165_v52, 0.0  ;;  %v1169_v56 = vsel %vm26_vm0, %v1164_v53, 0.0  ;;  %v1166_v57 = vsel %vm26_vm0, %v1163_v54, 0.0 }
0x1554   :  { %1173 = vadd.xlane.f32.xlu1 %v1172_v55  ;;  %1170 = vadd.xlane.f32.xlu0 %v1169_v56 }
0x1555   :  { %1167 = vadd.xlane.f32.xlu2 %v1166_v57 }
0x15c7   :  { %v1171_v58 = vpop.xlane.xlu0 %1170  ;;  %v1174_v59 = vpop.xlane.xlu1 %1173 }
0x15c8   :  { %v1176_v61 = vmul.f32 %v1171_v58, %v1171_v58  ;;  %v1168_v63 = vpop.xlane.xlu2 %1167  ;;  %v1177_v7 = vmul.f32 %v1174_v59, %v1174_v59 }
0x15c9   :  { %v1175_v4 = vmul.f32 %v1168_v63, %v1168_v63 }
0x15cb   :  { %v1178_v9 = vadd.f32 %v1176_v61, %v1175_v4 }
0x15cd   :  { %v1179_v10 = vadd.f32 %v1178_v9, %v1177_v7 }
0x15cf   :  { %v1180_v11 = vrot.slane %v1179_v10, 4 }
0x15d1   :  { %v1181_v12 = vadd.f32 %v1180_v11, %v1179_v10 }
0x15d3   :  { %v1182_v13 = vrot.slane %v1181_v12, 2 }
0x15d5   :  { %v1183_v14 = vadd.f32 %v1182_v13, %v1181_v12 }
0x15d7   :  { %v1184_v15 = vrot.slane %v1183_v14, 1 }
0x15d9   :  { %v1185_v16 = vadd.f32 %v1184_v15, %v1183_v14 }
0x15db   :  { %v1186_v17 = vmax.f32 %v1185_v16, 1e-30 }
0x15dd   :  { %3501 = vrsqrt.f32 %v1186_v17  ;;  %vm1193_vm14 = vweird.f32 %v1186_v17 }
0x15e3   :  { %v3502_v18 = vpop.eup %3501 }
0x15e4   :  { %v1188_v19 = vmul.f32 %v3502_v18, %v1186_v17  ;;  %vm1194_vm13 = vweird.f32 %v3502_v18 }
0x15e5   :  { %vm1195_vm15 = vmor %vm1193_vm14, %vm1194_vm13 }
0x15e6   :  { %v1189_v20 = vmul.f32 %v3502_v18, %v1188_v19 }
0x15e8   :  { %v1190_v21 = vmul.f32 0.5, %v1189_v20 }
0x15ea   :  { %v1191_v22 = vsub.f32 1.5, %v1190_v21 }
0x15ec   :  { %v1192_v23 = vmul.f32 %v3502_v18, %v1191_v22 }
0x15ee   :  { %v1196_v24 = vsel %vm1195_vm15, %v3502_v18, %v1192_v23 }
0x15ef   :  { %v1197_v25 = vmul.f32 %v1196_v24, %v1168_v63  ;;  %v1198_v26 = vmul.f32 %v1196_v24, %v1171_v58  ;;  %v1199_v27 = vmul.f32 %v1196_v24, %v1174_v59 }
0x15f1   :  { %v1200_v28 = vmul.f32 %v3973_v1, %v1197_v25  ;;  %v1201_v29 = vmul.f32 %v3967_v62, %v1198_v26  ;;  %v1202_v30 = vmul.f32 %v3961_v60, %v1199_v27 }
0x15f3   :  { %v1203_v31 = vsel %vm26_vm0, %v1200_v28, 0.0  ;;  %v1204_v32 = vsel %vm26_vm0, %v1201_v29, 0.0  ;;  %v1206_v34 = vsel %vm26_vm0, %v1202_v30, 0.0 }
0x15f4   :  { %v1205_v33 = vadd.f32 %v1204_v32, %v1203_v31 }
0x15f6   :  { %v1207_v35 = vadd.f32 %v1206_v34, %v1205_v33 }
0x15f8   :  { %v1208_v36 = vrot.slane %v1207_v35, 4 }
0x15fa   :  { %v1209_v37 = vadd.f32 %v1208_v36, %v1207_v35 }
0x15fc   :  { %v1210_v38 = vrot.slane %v1209_v37, 2 }
0x15fe   :  { %v1211_v39 = vadd.f32 %v1210_v38, %v1209_v37 }
0x1600   :  { %v1212_v40 = vrot.slane %v1211_v39, 1 }
0x1602   :  { %v1213_v41 = vadd.f32 %v1212_v40, %v1211_v39 }
0x1604   :  { %v1214_v42 = vmul.f32 %v1213_v41, %v1213_v41 }
0x1606   :  { %v1215_v43 = vsel %vm26_vm0, %v1214_v42, 0.0 }
0x1607   :  { %1216 = vadd.xlane.f32.xlu2 %v1215_v43 }
0x167a   :  { %v1217_v44 = vpop.xlane.xlu2 %1216 }
0x167b   :  { %v1218_v45 = vmax.f32 %v1217_v44, 1e-30 }
0x167d   :  { %3503 = vrsqrt.f32 %v1218_v45  ;;  %vm1225_vm2 = vweird.f32 %v1218_v45 }
0x1683   :  { %v3504_v46 = vpop.eup %3503 }
0x1684   :  { %v1220_v47 = vmul.f32 %v3504_v46, %v1218_v45  ;;  %vm1226_vm1 = vweird.f32 %v3504_v46 }
0x1685   :  { %vm1227_vm3 = vmor %vm1225_vm2, %vm1226_vm1 }
0x1686   :  { %v1221_v48 = vmul.f32 %v3504_v46, %v1220_v47 }
0x1688   :  { %v1222_v2 = vmul.f32 0.5, %v1221_v48 }
0x168a   :  { %v1223_v49 = vsub.f32 1.5, %v1222_v2 }
0x168c   :  { %v1224_v5 = vmul.f32 %v3504_v46, %v1223_v49 }
0x168e   :  { %v1228_v50 = vsel %vm1227_vm3, %v3504_v46, %v1224_v5 }
0x168f   :  { %v1229_v0 = vmul.f32 %v1228_v50, %v1213_v41 }
0x1691   :  { %v1232_v51 = vmul.f32 %v3961_v60, %v1229_v0  ;;  %v1231_v3 = vmul.f32 %v3967_v62, %v1229_v0  ;;  %v1230_v6 = vmul.f32 %v3973_v1, %v1229_v0 }
0x1693   :  { %v1239_v8 = vsel %vm26_vm0, %v1232_v51, 0.0  ;;  %v1236_v52 = vsel %vm26_vm0, %v1231_v3, 0.0  ;;  %v1233_v53 = vsel %vm26_vm0, %v1230_v6, 0.0 }
0x1694   :  { %1240 = vadd.xlane.f32.xlu2 %v1239_v8  ;;  %1237 = vadd.xlane.f32.xlu1 %v1236_v52 }
0x1695   :  { %1234 = vadd.xlane.f32.xlu0 %v1233_v53 }
0x1707   :  { %v1238_v54 = vpop.xlane.xlu1 %1237  ;;  %v1241_v55 = vpop.xlane.xlu2 %1240 }
0x1708   :  { %v1243_v56 = vmul.f32 %v1238_v54, %v1238_v54  ;;  %v1235_v57 = vpop.xlane.xlu0 %1234  ;;  %v1244_v59 = vmul.f32 %v1241_v55, %v1241_v55 }
0x1709   :  { %v1242_v58 = vmul.f32 %v1235_v57, %v1235_v57 }
0x170b   :  { %v1245_v61 = vadd.f32 %v1243_v56, %v1242_v58 }
0x170d   :  { %v1246_v63 = vadd.f32 %v1245_v61, %v1244_v59 }
0x170f   :  { %v1247_v4 = vrot.slane %v1246_v63, 4 }
0x1711   :  { %v1248_v7 = vadd.f32 %v1247_v4, %v1246_v63 }
0x1713   :  { %v1249_v9 = vrot.slane %v1248_v7, 2 }
0x1715   :  { %v1250_v10 = vadd.f32 %v1249_v9, %v1248_v7 }
0x1717   :  { %v1251_v11 = vrot.slane %v1250_v10, 1 }
0x1719   :  { %v1252_v12 = vadd.f32 %v1251_v11, %v1250_v10 }
0x171b   :  { %v1253_v13 = vmax.f32 %v1252_v12, 1e-30 }
0x171d   :  { %3505 = vrsqrt.f32 %v1253_v13  ;;  %vm1260_vm5 = vweird.f32 %v1253_v13 }
0x1723   :  { %v3506_v14 = vpop.eup %3505 }
0x1724   :  { %v1255_v15 = vmul.f32 %v3506_v14, %v1253_v13  ;;  %vm1261_vm4 = vweird.f32 %v3506_v14 }
0x1725   :  { %vm1262_vm6 = vmor %vm1260_vm5, %vm1261_vm4 }
0x1726   :  { %v1256_v16 = vmul.f32 %v3506_v14, %v1255_v15 }
0x1728   :  { %v1257_v17 = vmul.f32 0.5, %v1256_v16 }
0x172a   :  { %v1258_v18 = vsub.f32 1.5, %v1257_v17 }
0x172c   :  { %v1259_v19 = vmul.f32 %v3506_v14, %v1258_v18 }
0x172e   :  { %v1263_v20 = vsel %vm1262_vm6, %v3506_v14, %v1259_v19 }
0x172f   :  { %v1264_v21 = vmul.f32 %v1263_v20, %v1235_v57  ;;  %v1265_v22 = vmul.f32 %v1263_v20, %v1238_v54  ;;  %v1266_v23 = vmul.f32 %v1263_v20, %v1241_v55 }
0x1731   :  { %v1267_v24 = vmul.f32 %v3973_v1, %v1264_v21  ;;  %v1268_v25 = vmul.f32 %v3967_v62, %v1265_v22  ;;  %v1269_v26 = vmul.f32 %v3961_v60, %v1266_v23 }
0x1733   :  { %v1270_v27 = vsel %vm26_vm0, %v1267_v24, 0.0  ;;  %v1271_v28 = vsel %vm26_vm0, %v1268_v25, 0.0  ;;  %v1273_v30 = vsel %vm26_vm0, %v1269_v26, 0.0 }
0x1734   :  { %v1272_v29 = vadd.f32 %v1271_v28, %v1270_v27 }
0x1736   :  { %v1274_v31 = vadd.f32 %v1273_v30, %v1272_v29 }
0x1738   :  { %v1275_v32 = vrot.slane %v1274_v31, 4 }
0x173a   :  { %v1276_v33 = vadd.f32 %v1275_v32, %v1274_v31 }
0x173c   :  { %v1277_v34 = vrot.slane %v1276_v33, 2 }
0x173e   :  { %v1278_v35 = vadd.f32 %v1277_v34, %v1276_v33 }
0x1740   :  { %v1279_v36 = vrot.slane %v1278_v35, 1 }
0x1742   :  { %v1280_v37 = vadd.f32 %v1279_v36, %v1278_v35 }
0x1744   :  { %v1281_v38 = vmul.f32 %v1280_v37, %v1280_v37 }
0x1746   :  { %v1282_v39 = vsel %vm26_vm0, %v1281_v38, 0.0 }
0x1747   :  { %1283 = vadd.xlane.f32.xlu0 %v1282_v39 }
0x17ba   :  { %v1284_v40 = vpop.xlane.xlu0 %1283 }
0x17bb   :  { %v1285_v41 = vmax.f32 %v1284_v40, 1e-30 }
0x17bd   :  { %3507 = vrsqrt.f32 %v1285_v41  ;;  %vm1292_vm8 = vweird.f32 %v1285_v41 }
0x17c3   :  { %v3508_v42 = vpop.eup %3507 }
0x17c4   :  { %v1287_v43 = vmul.f32 %v3508_v42, %v1285_v41  ;;  %vm1293_vm7 = vweird.f32 %v3508_v42 }
0x17c5   :  { %vm1294_vm9 = vmor %vm1292_vm8, %vm1293_vm7 }
0x17c6   :  { %v1288_v44 = vmul.f32 %v3508_v42, %v1287_v43 }
0x17c8   :  { %v1289_v45 = vmul.f32 0.5, %v1288_v44 }
0x17ca   :  { %v1290_v46 = vsub.f32 1.5, %v1289_v45 }
0x17cc   :  { %v1291_v47 = vmul.f32 %v3508_v42, %v1290_v46 }
0x17ce   :  { %v1295_v48 = vsel %vm1294_vm9, %v3508_v42, %v1291_v47 }
0x17cf   :  { %v1296_v2 = vmul.f32 %v1295_v48, %v1280_v37 }
0x17d1   :  { %v1299_v49 = vmul.f32 %v3961_v60, %v1296_v2  ;;  %v1298_v5 = vmul.f32 %v3967_v62, %v1296_v2  ;;  %v1297_v50 = vmul.f32 %v3973_v1, %v1296_v2 }
0x17d3   :  { %v1306_v0 = vsel %vm26_vm0, %v1299_v49, 0.0  ;;  %v1303_v51 = vsel %vm26_vm0, %v1298_v5, 0.0  ;;  %v1300_v3 = vsel %vm26_vm0, %v1297_v50, 0.0 }
0x17d4   :  { %1307 = vadd.xlane.f32.xlu0 %v1306_v0  ;;  %1304 = vadd.xlane.f32.xlu2 %v1303_v51 }
0x17d5   :  { %1301 = vadd.xlane.f32.xlu1 %v1300_v3 }
0x1847   :  { %v1305_v6 = vpop.xlane.xlu2 %1304  ;;  %v1308_v8 = vpop.xlane.xlu0 %1307 }
0x1848   :  { %v1310_v52 = vmul.f32 %v1305_v6, %v1305_v6  ;;  %v1302_v53 = vpop.xlane.xlu1 %1301  ;;  %v1311_v55 = vmul.f32 %v1308_v8, %v1308_v8 }
0x1849   :  { %v1309_v54 = vmul.f32 %v1302_v53, %v1302_v53 }
0x184b   :  { %v1312_v56 = vadd.f32 %v1310_v52, %v1309_v54 }
0x184d   :  { %v1313_v57 = vadd.f32 %v1312_v56, %v1311_v55 }
0x184f   :  { %v1314_v58 = vrot.slane %v1313_v57, 4 }
0x1851   :  { %v1315_v59 = vadd.f32 %v1314_v58, %v1313_v57 }
0x1853   :  { %v1316_v61 = vrot.slane %v1315_v59, 2 }
0x1855   :  { %v1317_v63 = vadd.f32 %v1316_v61, %v1315_v59 }
0x1857   :  { %v1318_v4 = vrot.slane %v1317_v63, 1 }
0x1859   :  { %v1319_v7 = vadd.f32 %v1318_v4, %v1317_v63 }
0x185b   :  { %v1320_v9 = vmax.f32 %v1319_v7, 1e-30 }
0x185d   :  { %3509 = vrsqrt.f32 %v1320_v9  ;;  %vm1327_vm11 = vweird.f32 %v1320_v9 }
0x1863   :  { %v3510_v10 = vpop.eup %3509 }
0x1864   :  { %v1322_v11 = vmul.f32 %v3510_v10, %v1320_v9  ;;  %vm1328_vm10 = vweird.f32 %v3510_v10 }
0x1865   :  { %vm1329_vm12 = vmor %vm1327_vm11, %vm1328_vm10 }
0x1866   :  { %v1323_v12 = vmul.f32 %v3510_v10, %v1322_v11 }
0x1868   :  { %v1324_v13 = vmul.f32 0.5, %v1323_v12 }
0x186a   :  { %v1325_v14 = vsub.f32 1.5, %v1324_v13 }
0x186c   :  { %v1326_v15 = vmul.f32 %v3510_v10, %v1325_v14 }
0x186e   :  { %v1330_v16 = vsel %vm1329_vm12, %v3510_v10, %v1326_v15 }
0x186f   :  { %v1331_v17 = vmul.f32 %v1330_v16, %v1302_v53  ;;  %v1332_v18 = vmul.f32 %v1330_v16, %v1305_v6  ;;  %v1333_v19 = vmul.f32 %v1330_v16, %v1308_v8 }
0x1871   :  { %v1334_v20 = vmul.f32 %v3973_v1, %v1331_v17  ;;  %v1335_v21 = vmul.f32 %v3967_v62, %v1332_v18  ;;  %v1336_v22 = vmul.f32 %v3961_v60, %v1333_v19 }
0x1873   :  { %v1337_v23 = vsel %vm26_vm0, %v1334_v20, 0.0  ;;  %v1338_v24 = vsel %vm26_vm0, %v1335_v21, 0.0  ;;  %v1340_v26 = vsel %vm26_vm0, %v1336_v22, 0.0 }
0x1874   :  { %v1339_v25 = vadd.f32 %v1338_v24, %v1337_v23 }
0x1876   :  { %v1341_v27 = vadd.f32 %v1340_v26, %v1339_v25 }
0x1878   :  { %v1342_v28 = vrot.slane %v1341_v27, 4 }
0x187a   :  { %v1343_v29 = vadd.f32 %v1342_v28, %v1341_v27 }
0x187c   :  { %v1344_v30 = vrot.slane %v1343_v29, 2 }
0x187e   :  { %v1345_v31 = vadd.f32 %v1344_v30, %v1343_v29 }
0x1880   :  { %v1346_v32 = vrot.slane %v1345_v31, 1 }
0x1882   :  { %v1347_v33 = vadd.f32 %v1346_v32, %v1345_v31 }
0x1884   :  { %v1348_v34 = vmul.f32 %v1347_v33, %v1347_v33 }
0x1886   :  { %v1349_v35 = vsel %vm26_vm0, %v1348_v34, 0.0 }
0x1887   :  { %1350 = vadd.xlane.f32.xlu1 %v1349_v35 }
0x18fa   :  { %v1351_v36 = vpop.xlane.xlu1 %1350 }
0x18fb   :  { %v1352_v37 = vmax.f32 %v1351_v36, 1e-30 }
0x18fd   :  { %3511 = vrsqrt.f32 %v1352_v37  ;;  %vm1359_vm14 = vweird.f32 %v1352_v37 }
0x1903   :  { %v3512_v38 = vpop.eup %3511 }
0x1904   :  { %v1354_v39 = vmul.f32 %v3512_v38, %v1352_v37  ;;  %vm1360_vm13 = vweird.f32 %v3512_v38 }
0x1905   :  { %vm1361_vm15 = vmor %vm1359_vm14, %vm1360_vm13 }
0x1906   :  { %v1355_v40 = vmul.f32 %v3512_v38, %v1354_v39 }
0x1908   :  { %v1356_v41 = vmul.f32 0.5, %v1355_v40 }
0x190a   :  { %v1357_v42 = vsub.f32 1.5, %v1356_v41 }
0x190c   :  { %v1358_v43 = vmul.f32 %v3512_v38, %v1357_v42 }
0x190e   :  { %v1362_v44 = vsel %vm1361_vm15, %v3512_v38, %v1358_v43 }
0x190f   :  { %v1363_v45 = vmul.f32 %v1362_v44, %v1347_v33 }
0x1911   :  { %v1366_v46 = vmul.f32 %v3961_v60, %v1363_v45  ;;  %v1365_v47 = vmul.f32 %v3967_v62, %v1363_v45  ;;  %v1364_v48 = vmul.f32 %v3973_v1, %v1363_v45 }
0x1913   :  { %v1373_v2 = vsel %vm26_vm0, %v1366_v46, 0.0  ;;  %v1370_v49 = vsel %vm26_vm0, %v1365_v47, 0.0  ;;  %v1367_v5 = vsel %vm26_vm0, %v1364_v48, 0.0 }
0x1914   :  { %1374 = vadd.xlane.f32.xlu1 %v1373_v2  ;;  %1371 = vadd.xlane.f32.xlu0 %v1370_v49 }
0x1915   :  { %1368 = vadd.xlane.f32.xlu2 %v1367_v5 }
0x1987   :  { %v1372_v50 = vpop.xlane.xlu0 %1371  ;;  %v1375_v0 = vpop.xlane.xlu1 %1374 }
0x1988   :  { %v1377_v51 = vmul.f32 %v1372_v50, %v1372_v50  ;;  %v1369_v3 = vpop.xlane.xlu2 %1368  ;;  %v1378_v8 = vmul.f32 %v1375_v0, %v1375_v0 }
0x1989   :  { %v1376_v6 = vmul.f32 %v1369_v3, %v1369_v3 }
0x198b   :  { %v1379_v52 = vadd.f32 %v1377_v51, %v1376_v6 }
0x198d   :  { %v1380_v53 = vadd.f32 %v1379_v52, %v1378_v8 }
0x198f   :  { %v1381_v54 = vrot.slane %v1380_v53, 4 }
0x1991   :  { %v1382_v55 = vadd.f32 %v1381_v54, %v1380_v53 }
0x1993   :  { %v1383_v56 = vrot.slane %v1382_v55, 2 }
0x1995   :  { %v1384_v57 = vadd.f32 %v1383_v56, %v1382_v55 }
0x1997   :  { %v1385_v58 = vrot.slane %v1384_v57, 1 }
0x1999   :  { %v1386_v59 = vadd.f32 %v1385_v58, %v1384_v57 }
0x199b   :  { %v1387_v61 = vmax.f32 %v1386_v59, 1e-30 }
0x199d   :  { %3513 = vrsqrt.f32 %v1387_v61  ;;  %vm1394_vm2 = vweird.f32 %v1387_v61 }
0x19a3   :  { %v3514_v63 = vpop.eup %3513 }
0x19a4   :  { %v1389_v4 = vmul.f32 %v3514_v63, %v1387_v61  ;;  %vm1395_vm1 = vweird.f32 %v3514_v63 }
0x19a5   :  { %vm1396_vm3 = vmor %vm1394_vm2, %vm1395_vm1 }
0x19a6   :  { %v1390_v7 = vmul.f32 %v3514_v63, %v1389_v4 }
0x19a8   :  { %v1391_v9 = vmul.f32 0.5, %v1390_v7 }
0x19aa   :  { %v1392_v10 = vsub.f32 1.5, %v1391_v9 }
0x19ac   :  { %v1393_v11 = vmul.f32 %v3514_v63, %v1392_v10 }
0x19ae   :  { %v1397_v12 = vsel %vm1396_vm3, %v3514_v63, %v1393_v11 }
0x19af   :  { %v1398_v13 = vmul.f32 %v1397_v12, %v1369_v3  ;;  %v1399_v14 = vmul.f32 %v1397_v12, %v1372_v50  ;;  %v1400_v15 = vmul.f32 %v1397_v12, %v1375_v0 }
0x19b1   :  { %v1401_v16 = vmul.f32 %v3973_v1, %v1398_v13  ;;  %v1402_v17 = vmul.f32 %v3967_v62, %v1399_v14  ;;  %v1403_v18 = vmul.f32 %v3961_v60, %v1400_v15 }
0x19b3   :  { %v1404_v19 = vsel %vm26_vm0, %v1401_v16, 0.0  ;;  %v1405_v20 = vsel %vm26_vm0, %v1402_v17, 0.0  ;;  %v1407_v22 = vsel %vm26_vm0, %v1403_v18, 0.0 }
0x19b4   :  { %v1406_v21 = vadd.f32 %v1405_v20, %v1404_v19 }
0x19b6   :  { %v1408_v23 = vadd.f32 %v1407_v22, %v1406_v21 }
0x19b8   :  { %v1409_v24 = vrot.slane %v1408_v23, 4 }
0x19ba   :  { %v1410_v25 = vadd.f32 %v1409_v24, %v1408_v23 }
0x19bc   :  { %v1411_v26 = vrot.slane %v1410_v25, 2 }
0x19be   :  { %v1412_v27 = vadd.f32 %v1411_v26, %v1410_v25 }
0x19c0   :  { %v1413_v28 = vrot.slane %v1412_v27, 1 }
0x19c2   :  { %v1414_v29 = vadd.f32 %v1413_v28, %v1412_v27 }
0x19c4   :  { %v1415_v30 = vmul.f32 %v1414_v29, %v1414_v29 }
0x19c6   :  { %v1416_v31 = vsel %vm26_vm0, %v1415_v30, 0.0 }
0x19c7   :  { %1417 = vadd.xlane.f32.xlu2 %v1416_v31 }
0x1a3a   :  { %v1418_v32 = vpop.xlane.xlu2 %1417 }
0x1a3b   :  { %v1419_v33 = vmax.f32 %v1418_v32, 1e-30 }
0x1a3d   :  { %3515 = vrsqrt.f32 %v1419_v33  ;;  %vm1426_vm5 = vweird.f32 %v1419_v33 }
0x1a43   :  { %v3516_v34 = vpop.eup %3515 }
0x1a44   :  { %v1421_v35 = vmul.f32 %v3516_v34, %v1419_v33  ;;  %vm1427_vm4 = vweird.f32 %v3516_v34 }
0x1a45   :  { %vm1428_vm6 = vmor %vm1426_vm5, %vm1427_vm4 }
0x1a46   :  { %v1422_v36 = vmul.f32 %v3516_v34, %v1421_v35 }
0x1a48   :  { %v1423_v37 = vmul.f32 0.5, %v1422_v36 }
0x1a4a   :  { %v1424_v38 = vsub.f32 1.5, %v1423_v37 }
0x1a4c   :  { %v1425_v39 = vmul.f32 %v3516_v34, %v1424_v38 }
0x1a4e   :  { %v1429_v40 = vsel %vm1428_vm6, %v3516_v34, %v1425_v39 }
0x1a4f   :  { %v1430_v41 = vmul.f32 %v1429_v40, %v1414_v29 }
0x1a51   :  { %v1433_v42 = vmul.f32 %v3961_v60, %v1430_v41  ;;  %v1432_v43 = vmul.f32 %v3967_v62, %v1430_v41  ;;  %v1431_v44 = vmul.f32 %v3973_v1, %v1430_v41 }
0x1a53   :  { %v1440_v45 = vsel %vm26_vm0, %v1433_v42, 0.0  ;;  %v1437_v46 = vsel %vm26_vm0, %v1432_v43, 0.0  ;;  %v1434_v47 = vsel %vm26_vm0, %v1431_v44, 0.0 }
0x1a54   :  { %1441 = vadd.xlane.f32.xlu2 %v1440_v45  ;;  %1438 = vadd.xlane.f32.xlu1 %v1437_v46 }
0x1a55   :  { %1435 = vadd.xlane.f32.xlu0 %v1434_v47 }
0x1ac7   :  { %v1439_v48 = vpop.xlane.xlu1 %1438  ;;  %v1442_v2 = vpop.xlane.xlu2 %1441 }
0x1ac8   :  { %v1444_v49 = vmul.f32 %v1439_v48, %v1439_v48  ;;  %v1436_v5 = vpop.xlane.xlu0 %1435  ;;  %v1445_v0 = vmul.f32 %v1442_v2, %v1442_v2 }
0x1ac9   :  { %v1443_v50 = vmul.f32 %v1436_v5, %v1436_v5 }
0x1acb   :  { %v1446_v51 = vadd.f32 %v1444_v49, %v1443_v50 }
0x1acd   :  { %v1447_v3 = vadd.f32 %v1446_v51, %v1445_v0 }
0x1acf   :  { %v1448_v6 = vrot.slane %v1447_v3, 4 }
0x1ad1   :  { %v1449_v8 = vadd.f32 %v1448_v6, %v1447_v3 }
0x1ad3   :  { %v1450_v52 = vrot.slane %v1449_v8, 2 }
0x1ad5   :  { %v1451_v53 = vadd.f32 %v1450_v52, %v1449_v8 }
0x1ad7   :  { %v1452_v54 = vrot.slane %v1451_v53, 1 }
0x1ad9   :  { %v1453_v55 = vadd.f32 %v1452_v54, %v1451_v53 }
0x1adb   :  { %v1454_v56 = vmax.f32 %v1453_v55, 1e-30 }
0x1add   :  { %3517 = vrsqrt.f32 %v1454_v56  ;;  %vm1461_vm8 = vweird.f32 %v1454_v56 }
0x1ae3   :  { %v3518_v57 = vpop.eup %3517 }
0x1ae4   :  { %v1456_v58 = vmul.f32 %v3518_v57, %v1454_v56  ;;  %vm1462_vm7 = vweird.f32 %v3518_v57 }
0x1ae5   :  { %vm1463_vm9 = vmor %vm1461_vm8, %vm1462_vm7 }
0x1ae6   :  { %v1457_v59 = vmul.f32 %v3518_v57, %v1456_v58 }
0x1ae8   :  { %v1458_v61 = vmul.f32 0.5, %v1457_v59 }
0x1aea   :  { %v1459_v63 = vsub.f32 1.5, %v1458_v61  ;;  %v4073_v61 = vld [vmem:[%s4503_s0] sm:$0xff] }
0x1aec   :  { %v1460_v4 = vmul.f32 %v3518_v57, %v1459_v63 }
0x1aee   :  { %v1464_v7 = vsel %vm1463_vm9, %v3518_v57, %v1460_v4  ;;  %v4079_v4 = vld [vmem:[%s4503_s0 + $0x8] sm:$0xff] }
0x1aef   :  { %v1465_v9 = vmul.f32 %v1464_v7, %v1436_v5  ;;  %v1466_v10 = vmul.f32 %v1464_v7, %v1439_v48  ;;  %v1467_v11 = vmul.f32 %v1464_v7, %v1442_v2 }
0x1af1   :  { %v1468_v12 = vmul.f32 %v3973_v1, %v1465_v9  ;;  %v1469_v13 = vmul.f32 %v3967_v62, %v1466_v10  ;;  %v1470_v14 = vmul.f32 %v3961_v60, %v1467_v11  ;;  %v4085_v9 = vld [vmem:[%s4503_s0 + $0x10] sm:$0xff] }
0x1af3   :  { %v1471_v15 = vsel %vm26_vm0, %v1468_v12, 0.0  ;;  %v1472_v16 = vsel %vm26_vm0, %v1469_v13, 0.0  ;;  %v1474_v18 = vsel %vm26_vm0, %v1470_v14, 0.0 }
0x1af4   :  { %v1473_v17 = vadd.f32 %v1472_v16, %v1471_v15 }
0x1af6   :  { %v1475_v19 = vadd.f32 %v1474_v18, %v1473_v17 }
0x1af8   :  { %v1476_v20 = vrot.slane %v1475_v19, 4 }
0x1afa   :  { %v1477_v21 = vadd.f32 %v1476_v20, %v1475_v19 }
0x1afc   :  { %v1478_v22 = vrot.slane %v1477_v21, 2 }
0x1afe   :  { %v1479_v23 = vadd.f32 %v1478_v22, %v1477_v21 }
0x1b00   :  { %v1480_v24 = vrot.slane %v1479_v23, 1 }
0x1b02   :  { %v1481_v25 = vadd.f32 %v1480_v24, %v1479_v23 }
0x1b04   :  { %v1482_v26 = vmul.f32 %v1481_v25, %v1481_v25 }
0x1b06   :  { %v1483_v27 = vsel %vm26_vm0, %v1482_v26, 0.0 }
0x1b07   :  { %1484 = vadd.xlane.f32.xlu0 %v1483_v27 }
0x1b7a   :  { %v1485_v28 = vpop.xlane.xlu0 %1484 }
0x1b7b   :  { %v1486_v29 = vmax.f32 %v1485_v28, 1e-30 }
0x1b7d   :  { %3519 = vrsqrt.f32 %v1486_v29  ;;  %vm1493_vm11 = vweird.f32 %v1486_v29 }
0x1b83   :  { %v3520_v30 = vpop.eup %3519 }
0x1b84   :  { %v1488_v31 = vmul.f32 %v3520_v30, %v1486_v29  ;;  %vm1494_vm10 = vweird.f32 %v3520_v30 }
0x1b85   :  { %vm1495_vm12 = vmor %vm1493_vm11, %vm1494_vm10 }
0x1b86   :  { %v1489_v32 = vmul.f32 %v3520_v30, %v1488_v31 }
0x1b88   :  { %v1490_v33 = vmul.f32 0.5, %v1489_v32 }
0x1b8a   :  { %v1491_v34 = vsub.f32 1.5, %v1490_v33 }
0x1b8c   :  { %v1492_v35 = vmul.f32 %v3520_v30, %v1491_v34 }
0x1b8e   :  { %v1496_v36 = vsel %vm1495_vm12, %v3520_v30, %v1492_v35 }
0x1b8f   :  { %v1497_v37 = vmul.f32 %v1496_v36, %v1481_v25 }
0x1b91   :  { %v1500_v38 = vmul.f32 %v3961_v60, %v1497_v37  ;;  %v1499_v39 = vmul.f32 %v3967_v62, %v1497_v37  ;;  %v1498_v40 = vmul.f32 %v3973_v1, %v1497_v37 }
0x1b93   :  { %v1507_v41 = vsel %vm26_vm0, %v1500_v38, 0.0  ;;  %v1504_v42 = vsel %vm26_vm0, %v1499_v39, 0.0  ;;  %v1501_v43 = vsel %vm26_vm0, %v1498_v40, 0.0 }
0x1b94   :  { %1508 = vadd.xlane.f32.xlu0 %v1507_v41  ;;  %1505 = vadd.xlane.f32.xlu2 %v1504_v42 }
0x1b95   :  { %1502 = vadd.xlane.f32.xlu1 %v1501_v43 }
0x1c07   :  { %v1506_v44 = vpop.xlane.xlu2 %1505  ;;  %v1509_v45 = vpop.xlane.xlu0 %1508 }
0x1c08   :  { %v1511_v46 = vmul.f32 %v1506_v44, %v1506_v44  ;;  %v1503_v47 = vpop.xlane.xlu1 %1502  ;;  %v1512_v2 = vmul.f32 %v1509_v45, %v1509_v45 }
0x1c09   :  { %v1510_v48 = vmul.f32 %v1503_v47, %v1503_v47 }
0x1c0b   :  { %v1513_v60 = vadd.f32 %v1511_v46, %v1510_v48 }
0x1c0d   :  { %v1514_v49 = vadd.f32 %v1513_v60, %v1512_v2 }
0x1c0f   :  { %v1515_v62 = vrot.slane %v1514_v49, 4 }
0x1c11   :  { %v1516_v5 = vadd.f32 %v1515_v62, %v1514_v49 }
0x1c13   :  { %v1517_v1 = vrot.slane %v1516_v5, 2 }
0x1c15   :  { %v1518_v50 = vadd.f32 %v1517_v1, %v1516_v5 }
0x1c17   :  { %v1519_v0 = vrot.slane %v1518_v50, 1 }
0x1c19   :  { %v1520_v51 = vadd.f32 %v1519_v0, %v1518_v50 }
0x1c1b   :  { %v1521_v3 = vmax.f32 %v1520_v51, 1e-30 }
0x1c1d   :  { %3521 = vrsqrt.f32 %v1521_v3  ;;  %vm1528_vm14 = vweird.f32 %v1521_v3 }
0x1c23   :  { %v3522_v6 = vpop.eup %3521 }
0x1c24   :  { %v1523_v8 = vmul.f32 %v3522_v6, %v1521_v3  ;;  %vm1529_vm13 = vweird.f32 %v3522_v6 }
0x1c25   :  { %vm1530_vm15 = vmor %vm1528_vm14, %vm1529_vm13 }
0x1c26   :  { %v1524_v52 = vmul.f32 %v3522_v6, %v1523_v8 }
0x1c28   :  { %v1525_v53 = vmul.f32 0.5, %v1524_v52 }
0x1c2a   :  { %v1526_v54 = vsub.f32 1.5, %v1525_v53 }
0x1c2c   :  { %v1527_v55 = vmul.f32 %v3522_v6, %v1526_v54 }
0x1c2e   :  { %v1531_v56 = vsel %vm1530_vm15, %v3522_v6, %v1527_v55 }
0x1c2f   :  { %v1532_v57 = vmul.f32 %v1531_v56, %v1503_v47  ;;  %v1533_v58 = vmul.f32 %v1531_v56, %v1506_v44  ;;  %v1534_v59 = vmul.f32 %v1531_v56, %v1509_v45 }
0x1c31   :  { %v1535_v63 = vmul.f32 %v4073_v61, %v1532_v57  ;;  %v1536_v7 = vmul.f32 %v4079_v4, %v1533_v58  ;;  %v1537_v10 = vmul.f32 %v4085_v9, %v1534_v59 }
0x1c33   :  { %v1538_v11 = vsel %vm26_vm0, %v1535_v63, 0.0  ;;  %v1539_v12 = vsel %vm26_vm0, %v1536_v7, 0.0  ;;  %v1541_v14 = vsel %vm26_vm0, %v1537_v10, 0.0 }
0x1c34   :  { %v1540_v13 = vadd.f32 %v1539_v12, %v1538_v11 }
0x1c36   :  { %v1542_v15 = vadd.f32 %v1541_v14, %v1540_v13 }
0x1c38   :  { %v1543_v16 = vrot.slane %v1542_v15, 4 }
0x1c3a   :  { %v1544_v17 = vadd.f32 %v1543_v16, %v1542_v15 }
0x1c3c   :  { %v1545_v18 = vrot.slane %v1544_v17, 2 }
0x1c3e   :  { %v1546_v19 = vadd.f32 %v1545_v18, %v1544_v17 }
0x1c40   :  { %v1547_v20 = vrot.slane %v1546_v19, 1 }
0x1c42   :  { %v1548_v21 = vadd.f32 %v1547_v20, %v1546_v19 }
0x1c44   :  { %v1549_v22 = vmul.f32 %v1548_v21, %v1548_v21 }
0x1c46   :  { %v1550_v23 = vsel %vm26_vm0, %v1549_v22, 0.0 }
0x1c47   :  { %1551 = vadd.xlane.f32.xlu1 %v1550_v23 }
0x1cba   :  { %v1552_v24 = vpop.xlane.xlu1 %1551 }
0x1cbb   :  { %v1553_v25 = vmax.f32 %v1552_v24, 1e-30 }
0x1cbd   :  { %3523 = vrsqrt.f32 %v1553_v25  ;;  %vm1560_vm2 = vweird.f32 %v1553_v25 }
0x1cc3   :  { %v3524_v26 = vpop.eup %3523 }
0x1cc4   :  { %v1555_v27 = vmul.f32 %v3524_v26, %v1553_v25  ;;  %vm1561_vm1 = vweird.f32 %v3524_v26 }
0x1cc5   :  { %vm1562_vm3 = vmor %vm1560_vm2, %vm1561_vm1 }
0x1cc6   :  { %v1556_v28 = vmul.f32 %v3524_v26, %v1555_v27 }
0x1cc8   :  { %v1557_v29 = vmul.f32 0.5, %v1556_v28 }
0x1cca   :  { %v1558_v30 = vsub.f32 1.5, %v1557_v29 }
0x1ccc   :  { %v1559_v31 = vmul.f32 %v3524_v26, %v1558_v30 }
0x1cce   :  { %v1563_v32 = vsel %vm1562_vm3, %v3524_v26, %v1559_v31 }
0x1ccf   :  { %v1564_v33 = vmul.f32 %v1563_v32, %v1548_v21 }
0x1cd1   :  { %v1567_v34 = vmul.f32 %v4085_v9, %v1564_v33  ;;  %v1566_v35 = vmul.f32 %v4079_v4, %v1564_v33  ;;  %v1565_v36 = vmul.f32 %v4073_v61, %v1564_v33 }
0x1cd3   :  { %v1574_v37 = vsel %vm26_vm0, %v1567_v34, 0.0  ;;  %v1571_v38 = vsel %vm26_vm0, %v1566_v35, 0.0  ;;  %v1568_v39 = vsel %vm26_vm0, %v1565_v36, 0.0 }
0x1cd4   :  { %1575 = vadd.xlane.f32.xlu1 %v1574_v37  ;;  %1572 = vadd.xlane.f32.xlu0 %v1571_v38 }
0x1cd5   :  { %1569 = vadd.xlane.f32.xlu2 %v1568_v39 }
0x1d47   :  { %v1573_v40 = vpop.xlane.xlu0 %1572  ;;  %v1576_v41 = vpop.xlane.xlu1 %1575 }
0x1d48   :  { %v1578_v42 = vmul.f32 %v1573_v40, %v1573_v40  ;;  %v1570_v43 = vpop.xlane.xlu2 %1569  ;;  %v1579_v45 = vmul.f32 %v1576_v41, %v1576_v41 }
0x1d49   :  { %v1577_v44 = vmul.f32 %v1570_v43, %v1570_v43 }
0x1d4b   :  { %v1580_v46 = vadd.f32 %v1578_v42, %v1577_v44 }
0x1d4d   :  { %v1581_v47 = vadd.f32 %v1580_v46, %v1579_v45 }
0x1d4f   :  { %v1582_v48 = vrot.slane %v1581_v47, 4 }
0x1d51   :  { %v1583_v2 = vadd.f32 %v1582_v48, %v1581_v47 }
0x1d53   :  { %v1584_v60 = vrot.slane %v1583_v2, 2 }
0x1d55   :  { %v1585_v49 = vadd.f32 %v1584_v60, %v1583_v2 }
0x1d57   :  { %v1586_v62 = vrot.slane %v1585_v49, 1 }
0x1d59   :  { %v1587_v5 = vadd.f32 %v1586_v62, %v1585_v49 }
0x1d5b   :  { %v1588_v1 = vmax.f32 %v1587_v5, 1e-30 }
0x1d5d   :  { %3525 = vrsqrt.f32 %v1588_v1  ;;  %vm1595_vm5 = vweird.f32 %v1588_v1 }
0x1d63   :  { %v3526_v50 = vpop.eup %3525 }
0x1d64   :  { %v1590_v0 = vmul.f32 %v3526_v50, %v1588_v1  ;;  %vm1596_vm4 = vweird.f32 %v3526_v50 }
0x1d65   :  { %vm1597_vm6 = vmor %vm1595_vm5, %vm1596_vm4 }
0x1d66   :  { %v1591_v51 = vmul.f32 %v3526_v50, %v1590_v0 }
0x1d68   :  { %v1592_v3 = vmul.f32 0.5, %v1591_v51 }
0x1d6a   :  { %v1593_v6 = vsub.f32 1.5, %v1592_v3 }
0x1d6c   :  { %v1594_v8 = vmul.f32 %v3526_v50, %v1593_v6 }
0x1d6e   :  { %v1598_v52 = vsel %vm1597_vm6, %v3526_v50, %v1594_v8 }
0x1d6f   :  { %v1599_v53 = vmul.f32 %v1598_v52, %v1570_v43  ;;  %v1600_v54 = vmul.f32 %v1598_v52, %v1573_v40  ;;  %v1601_v55 = vmul.f32 %v1598_v52, %v1576_v41 }
0x1d71   :  { %v1602_v56 = vmul.f32 %v4073_v61, %v1599_v53  ;;  %v1603_v57 = vmul.f32 %v4079_v4, %v1600_v54  ;;  %v1604_v58 = vmul.f32 %v4085_v9, %v1601_v55 }
0x1d73   :  { %v1605_v59 = vsel %vm26_vm0, %v1602_v56, 0.0  ;;  %v1606_v63 = vsel %vm26_vm0, %v1603_v57, 0.0  ;;  %v1608_v10 = vsel %vm26_vm0, %v1604_v58, 0.0 }
0x1d74   :  { %v1607_v7 = vadd.f32 %v1606_v63, %v1605_v59 }
0x1d76   :  { %v1609_v11 = vadd.f32 %v1608_v10, %v1607_v7 }
0x1d78   :  { %v1610_v12 = vrot.slane %v1609_v11, 4 }
0x1d7a   :  { %v1611_v13 = vadd.f32 %v1610_v12, %v1609_v11 }
0x1d7c   :  { %v1612_v14 = vrot.slane %v1611_v13, 2 }
0x1d7e   :  { %v1613_v15 = vadd.f32 %v1612_v14, %v1611_v13 }
0x1d80   :  { %v1614_v16 = vrot.slane %v1613_v15, 1 }
0x1d82   :  { %v1615_v17 = vadd.f32 %v1614_v16, %v1613_v15 }
0x1d84   :  { %v1616_v18 = vmul.f32 %v1615_v17, %v1615_v17 }
0x1d86   :  { %v1617_v19 = vsel %vm26_vm0, %v1616_v18, 0.0 }
0x1d87   :  { %1618 = vadd.xlane.f32.xlu2 %v1617_v19 }
0x1dfa   :  { %v1619_v20 = vpop.xlane.xlu2 %1618 }
0x1dfb   :  { %v1620_v21 = vmax.f32 %v1619_v20, 1e-30 }
0x1dfd   :  { %3527 = vrsqrt.f32 %v1620_v21  ;;  %vm1627_vm8 = vweird.f32 %v1620_v21 }
0x1e03   :  { %v3528_v22 = vpop.eup %3527 }
0x1e04   :  { %v1622_v23 = vmul.f32 %v3528_v22, %v1620_v21  ;;  %vm1628_vm7 = vweird.f32 %v3528_v22 }
0x1e05   :  { %vm1629_vm9 = vmor %vm1627_vm8, %vm1628_vm7 }
0x1e06   :  { %v1623_v24 = vmul.f32 %v3528_v22, %v1622_v23 }
0x1e08   :  { %v1624_v25 = vmul.f32 0.5, %v1623_v24 }
0x1e0a   :  { %v1625_v26 = vsub.f32 1.5, %v1624_v25 }
0x1e0c   :  { %v1626_v27 = vmul.f32 %v3528_v22, %v1625_v26 }
0x1e0e   :  { %v1630_v28 = vsel %vm1629_vm9, %v3528_v22, %v1626_v27 }
0x1e0f   :  { %v1631_v29 = vmul.f32 %v1630_v28, %v1615_v17 }
0x1e11   :  { %v1634_v30 = vmul.f32 %v4085_v9, %v1631_v29  ;;  %v1633_v31 = vmul.f32 %v4079_v4, %v1631_v29  ;;  %v1632_v32 = vmul.f32 %v4073_v61, %v1631_v29 }
0x1e13   :  { %v1641_v33 = vsel %vm26_vm0, %v1634_v30, 0.0  ;;  %v1638_v34 = vsel %vm26_vm0, %v1633_v31, 0.0  ;;  %v1635_v35 = vsel %vm26_vm0, %v1632_v32, 0.0 }
0x1e14   :  { %1642 = vadd.xlane.f32.xlu2 %v1641_v33  ;;  %1639 = vadd.xlane.f32.xlu1 %v1638_v34 }
0x1e15   :  { %1636 = vadd.xlane.f32.xlu0 %v1635_v35 }
0x1e87   :  { %v1640_v36 = vpop.xlane.xlu1 %1639  ;;  %v1643_v37 = vpop.xlane.xlu2 %1642 }
0x1e88   :  { %v1645_v38 = vmul.f32 %v1640_v36, %v1640_v36  ;;  %v1637_v39 = vpop.xlane.xlu0 %1636  ;;  %v1646_v41 = vmul.f32 %v1643_v37, %v1643_v37 }
0x1e89   :  { %v1644_v40 = vmul.f32 %v1637_v39, %v1637_v39 }
0x1e8b   :  { %v1647_v42 = vadd.f32 %v1645_v38, %v1644_v40 }
0x1e8d   :  { %v1648_v43 = vadd.f32 %v1647_v42, %v1646_v41 }
0x1e8f   :  { %v1649_v44 = vrot.slane %v1648_v43, 4 }
0x1e91   :  { %v1650_v45 = vadd.f32 %v1649_v44, %v1648_v43 }
0x1e93   :  { %v1651_v46 = vrot.slane %v1650_v45, 2 }
0x1e95   :  { %v1652_v47 = vadd.f32 %v1651_v46, %v1650_v45 }
0x1e97   :  { %v1653_v48 = vrot.slane %v1652_v47, 1 }
0x1e99   :  { %v1654_v2 = vadd.f32 %v1653_v48, %v1652_v47 }
0x1e9b   :  { %v1655_v60 = vmax.f32 %v1654_v2, 1e-30 }
0x1e9d   :  { %3529 = vrsqrt.f32 %v1655_v60  ;;  %vm1662_vm11 = vweird.f32 %v1655_v60 }
0x1ea3   :  { %v3530_v49 = vpop.eup %3529 }
0x1ea4   :  { %v1657_v62 = vmul.f32 %v3530_v49, %v1655_v60  ;;  %vm1663_vm10 = vweird.f32 %v3530_v49 }
0x1ea5   :  { %vm1664_vm12 = vmor %vm1662_vm11, %vm1663_vm10 }
0x1ea6   :  { %v1658_v5 = vmul.f32 %v3530_v49, %v1657_v62 }
0x1ea8   :  { %v1659_v1 = vmul.f32 0.5, %v1658_v5 }
0x1eaa   :  { %v1660_v50 = vsub.f32 1.5, %v1659_v1 }
0x1eac   :  { %v1661_v0 = vmul.f32 %v3530_v49, %v1660_v50 }
0x1eae   :  { %v1665_v51 = vsel %vm1664_vm12, %v3530_v49, %v1661_v0 }
0x1eaf   :  { %v1666_v3 = vmul.f32 %v1665_v51, %v1637_v39  ;;  %v1667_v6 = vmul.f32 %v1665_v51, %v1640_v36  ;;  %v1668_v8 = vmul.f32 %v1665_v51, %v1643_v37 }
0x1eb1   :  { %v1669_v52 = vmul.f32 %v4073_v61, %v1666_v3  ;;  %v1670_v53 = vmul.f32 %v4079_v4, %v1667_v6  ;;  %v1671_v54 = vmul.f32 %v4085_v9, %v1668_v8 }
0x1eb3   :  { %v1672_v55 = vsel %vm26_vm0, %v1669_v52, 0.0  ;;  %v1673_v56 = vsel %vm26_vm0, %v1670_v53, 0.0  ;;  %v1675_v58 = vsel %vm26_vm0, %v1671_v54, 0.0 }
0x1eb4   :  { %v1674_v57 = vadd.f32 %v1673_v56, %v1672_v55 }
0x1eb6   :  { %v1676_v59 = vadd.f32 %v1675_v58, %v1674_v57 }
0x1eb8   :  { %v1677_v63 = vrot.slane %v1676_v59, 4 }
0x1eba   :  { %v1678_v7 = vadd.f32 %v1677_v63, %v1676_v59 }
0x1ebc   :  { %v1679_v10 = vrot.slane %v1678_v7, 2 }
0x1ebe   :  { %v1680_v11 = vadd.f32 %v1679_v10, %v1678_v7 }
0x1ec0   :  { %v1681_v12 = vrot.slane %v1680_v11, 1 }
0x1ec2   :  { %v1682_v13 = vadd.f32 %v1681_v12, %v1680_v11 }
0x1ec4   :  { %v1683_v14 = vmul.f32 %v1682_v13, %v1682_v13 }
0x1ec6   :  { %v1684_v15 = vsel %vm26_vm0, %v1683_v14, 0.0 }
0x1ec7   :  { %1685 = vadd.xlane.f32.xlu0 %v1684_v15 }
0x1f3a   :  { %v1686_v16 = vpop.xlane.xlu0 %1685 }
0x1f3b   :  { %v1687_v17 = vmax.f32 %v1686_v16, 1e-30 }
0x1f3d   :  { %3531 = vrsqrt.f32 %v1687_v17  ;;  %vm1694_vm14 = vweird.f32 %v1687_v17 }
0x1f43   :  { %v3532_v18 = vpop.eup %3531 }
0x1f44   :  { %v1689_v19 = vmul.f32 %v3532_v18, %v1687_v17  ;;  %vm1695_vm13 = vweird.f32 %v3532_v18 }
0x1f45   :  { %vm1696_vm15 = vmor %vm1694_vm14, %vm1695_vm13 }
0x1f46   :  { %v1690_v20 = vmul.f32 %v3532_v18, %v1689_v19 }
0x1f48   :  { %v1691_v21 = vmul.f32 0.5, %v1690_v20 }
0x1f4a   :  { %v1692_v22 = vsub.f32 1.5, %v1691_v21 }
0x1f4c   :  { %v1693_v23 = vmul.f32 %v3532_v18, %v1692_v22 }
0x1f4e   :  { %v1697_v24 = vsel %vm1696_vm15, %v3532_v18, %v1693_v23 }
0x1f4f   :  { %v1698_v25 = vmul.f32 %v1697_v24, %v1682_v13 }
0x1f51   :  { %v1701_v26 = vmul.f32 %v4085_v9, %v1698_v25  ;;  %v1700_v27 = vmul.f32 %v4079_v4, %v1698_v25  ;;  %v1699_v28 = vmul.f32 %v4073_v61, %v1698_v25 }
0x1f53   :  { %v1708_v29 = vsel %vm26_vm0, %v1701_v26, 0.0  ;;  %v1705_v30 = vsel %vm26_vm0, %v1700_v27, 0.0  ;;  %v1702_v31 = vsel %vm26_vm0, %v1699_v28, 0.0 }
0x1f54   :  { %1709 = vadd.xlane.f32.xlu0 %v1708_v29  ;;  %1706 = vadd.xlane.f32.xlu2 %v1705_v30 }
0x1f55   :  { %1703 = vadd.xlane.f32.xlu1 %v1702_v31 }
0x1fc7   :  { %v1707_v32 = vpop.xlane.xlu2 %1706  ;;  %v1710_v33 = vpop.xlane.xlu0 %1709 }
0x1fc8   :  { %v1712_v34 = vmul.f32 %v1707_v32, %v1707_v32  ;;  %v1704_v35 = vpop.xlane.xlu1 %1703  ;;  %v1713_v37 = vmul.f32 %v1710_v33, %v1710_v33 }
0x1fc9   :  { %v1711_v36 = vmul.f32 %v1704_v35, %v1704_v35 }
0x1fcb   :  { %v1714_v38 = vadd.f32 %v1712_v34, %v1711_v36 }
0x1fcd   :  { %v1715_v39 = vadd.f32 %v1714_v38, %v1713_v37 }
0x1fcf   :  { %v1716_v40 = vrot.slane %v1715_v39, 4 }
0x1fd1   :  { %v1717_v41 = vadd.f32 %v1716_v40, %v1715_v39 }
0x1fd3   :  { %v1718_v42 = vrot.slane %v1717_v41, 2 }
0x1fd5   :  { %v1719_v43 = vadd.f32 %v1718_v42, %v1717_v41 }
0x1fd7   :  { %v1720_v44 = vrot.slane %v1719_v43, 1 }
0x1fd9   :  { %v1721_v45 = vadd.f32 %v1720_v44, %v1719_v43 }
0x1fdb   :  { %v1722_v46 = vmax.f32 %v1721_v45, 1e-30 }
0x1fdd   :  { %3533 = vrsqrt.f32 %v1722_v46  ;;  %vm1729_vm2 = vweird.f32 %v1722_v46 }
0x1fe3   :  { %v3534_v47 = vpop.eup %3533 }
0x1fe4   :  { %v1724_v48 = vmul.f32 %v3534_v47, %v1722_v46  ;;  %vm1730_vm1 = vweird.f32 %v3534_v47 }
0x1fe5   :  { %vm1731_vm3 = vmor %vm1729_vm2, %vm1730_vm1 }
0x1fe6   :  { %v1725_v2 = vmul.f32 %v3534_v47, %v1724_v48 }
0x1fe8   :  { %v1726_v60 = vmul.f32 0.5, %v1725_v2 }
0x1fea   :  { %v1727_v49 = vsub.f32 1.5, %v1726_v60 }
0x1fec   :  { %v1728_v62 = vmul.f32 %v3534_v47, %v1727_v49 }
0x1fee   :  { %v1732_v5 = vsel %vm1731_vm3, %v3534_v47, %v1728_v62 }
0x1fef   :  { %v1733_v1 = vmul.f32 %v1732_v5, %v1704_v35  ;;  %v1734_v50 = vmul.f32 %v1732_v5, %v1707_v32  ;;  %v1735_v0 = vmul.f32 %v1732_v5, %v1710_v33 }
0x1ff1   :  { %v1736_v51 = vmul.f32 %v4073_v61, %v1733_v1  ;;  %v1737_v3 = vmul.f32 %v4079_v4, %v1734_v50  ;;  %v1738_v6 = vmul.f32 %v4085_v9, %v1735_v0 }
0x1ff3   :  { %v1739_v8 = vsel %vm26_vm0, %v1736_v51, 0.0  ;;  %v1740_v52 = vsel %vm26_vm0, %v1737_v3, 0.0  ;;  %v1742_v54 = vsel %vm26_vm0, %v1738_v6, 0.0 }
0x1ff4   :  { %v1741_v53 = vadd.f32 %v1740_v52, %v1739_v8 }
0x1ff6   :  { %v1743_v55 = vadd.f32 %v1742_v54, %v1741_v53 }
0x1ff8   :  { %v1744_v56 = vrot.slane %v1743_v55, 4 }
0x1ffa   :  { %v1745_v57 = vadd.f32 %v1744_v56, %v1743_v55 }
0x1ffc   :  { %v1746_v58 = vrot.slane %v1745_v57, 2 }
0x1ffe   :  { %v1747_v59 = vadd.f32 %v1746_v58, %v1745_v57 }
0x2000   :  { %v1748_v63 = vrot.slane %v1747_v59, 1 }
0x2002   :  { %v1749_v7 = vadd.f32 %v1748_v63, %v1747_v59 }
0x2004   :  { %v1750_v10 = vmul.f32 %v1749_v7, %v1749_v7 }
0x2006   :  { %v1751_v11 = vsel %vm26_vm0, %v1750_v10, 0.0 }
0x2007   :  { %1752 = vadd.xlane.f32.xlu1 %v1751_v11 }
0x207a   :  { %v1753_v12 = vpop.xlane.xlu1 %1752 }
0x207b   :  { %v1754_v13 = vmax.f32 %v1753_v12, 1e-30 }
0x207d   :  { %3535 = vrsqrt.f32 %v1754_v13  ;;  %vm1761_vm5 = vweird.f32 %v1754_v13 }
0x2083   :  { %v3536_v14 = vpop.eup %3535 }
0x2084   :  { %v1756_v15 = vmul.f32 %v3536_v14, %v1754_v13  ;;  %vm1762_vm4 = vweird.f32 %v3536_v14 }
0x2085   :  { %vm1763_vm6 = vmor %vm1761_vm5, %vm1762_vm4 }
0x2086   :  { %v1757_v16 = vmul.f32 %v3536_v14, %v1756_v15 }
0x2088   :  { %v1758_v17 = vmul.f32 0.5, %v1757_v16 }
0x208a   :  { %v1759_v18 = vsub.f32 1.5, %v1758_v17 }
0x208c   :  { %v1760_v19 = vmul.f32 %v3536_v14, %v1759_v18 }
0x208e   :  { %v1764_v20 = vsel %vm1763_vm6, %v3536_v14, %v1760_v19 }
0x208f   :  { %v1765_v21 = vmul.f32 %v1764_v20, %v1749_v7 }
0x2091   :  { %v1768_v22 = vmul.f32 %v4085_v9, %v1765_v21  ;;  %v1767_v23 = vmul.f32 %v4079_v4, %v1765_v21  ;;  %v1766_v24 = vmul.f32 %v4073_v61, %v1765_v21 }
0x2093   :  { %v1775_v25 = vsel %vm26_vm0, %v1768_v22, 0.0  ;;  %v1772_v26 = vsel %vm26_vm0, %v1767_v23, 0.0  ;;  %v1769_v27 = vsel %vm26_vm0, %v1766_v24, 0.0 }
0x2094   :  { %1776 = vadd.xlane.f32.xlu1 %v1775_v25  ;;  %1773 = vadd.xlane.f32.xlu0 %v1772_v26 }
0x2095   :  { %1770 = vadd.xlane.f32.xlu2 %v1769_v27 }
0x2107   :  { %v1774_v28 = vpop.xlane.xlu0 %1773  ;;  %v1777_v29 = vpop.xlane.xlu1 %1776 }
0x2108   :  { %v1779_v30 = vmul.f32 %v1774_v28, %v1774_v28  ;;  %v1771_v31 = vpop.xlane.xlu2 %1770  ;;  %v1780_v33 = vmul.f32 %v1777_v29, %v1777_v29 }
0x2109   :  { %v1778_v32 = vmul.f32 %v1771_v31, %v1771_v31 }
0x210b   :  { %v1781_v34 = vadd.f32 %v1779_v30, %v1778_v32 }
0x210d   :  { %v1782_v35 = vadd.f32 %v1781_v34, %v1780_v33 }
0x210f   :  { %v1783_v36 = vrot.slane %v1782_v35, 4 }
0x2111   :  { %v1784_v37 = vadd.f32 %v1783_v36, %v1782_v35 }
0x2113   :  { %v1785_v38 = vrot.slane %v1784_v37, 2 }
0x2115   :  { %v1786_v39 = vadd.f32 %v1785_v38, %v1784_v37 }
0x2117   :  { %v1787_v40 = vrot.slane %v1786_v39, 1 }
0x2119   :  { %v1788_v41 = vadd.f32 %v1787_v40, %v1786_v39 }
0x211b   :  { %v1789_v42 = vmax.f32 %v1788_v41, 1e-30 }
0x211d   :  { %3537 = vrsqrt.f32 %v1789_v42  ;;  %vm1796_vm8 = vweird.f32 %v1789_v42 }
0x2123   :  { %v3538_v43 = vpop.eup %3537 }
0x2124   :  { %v1791_v44 = vmul.f32 %v3538_v43, %v1789_v42  ;;  %vm1797_vm7 = vweird.f32 %v3538_v43 }
0x2125   :  { %vm1798_vm9 = vmor %vm1796_vm8, %vm1797_vm7 }
0x2126   :  { %v1792_v45 = vmul.f32 %v3538_v43, %v1791_v44 }
0x2128   :  { %v1793_v46 = vmul.f32 0.5, %v1792_v45 }
0x212a   :  { %v1794_v47 = vsub.f32 1.5, %v1793_v46 }
0x212c   :  { %v1795_v48 = vmul.f32 %v3538_v43, %v1794_v47 }
0x212e   :  { %v1799_v2 = vsel %vm1798_vm9, %v3538_v43, %v1795_v48 }
0x212f   :  { %v1800_v60 = vmul.f32 %v1799_v2, %v1771_v31  ;;  %v1801_v49 = vmul.f32 %v1799_v2, %v1774_v28  ;;  %v1802_v62 = vmul.f32 %v1799_v2, %v1777_v29 }
0x2131   :  { %v1803_v5 = vmul.f32 %v4073_v61, %v1800_v60  ;;  %v1804_v1 = vmul.f32 %v4079_v4, %v1801_v49  ;;  %v1805_v50 = vmul.f32 %v4085_v9, %v1802_v62 }
0x2133   :  { %v1806_v0 = vsel %vm26_vm0, %v1803_v5, 0.0  ;;  %v1807_v51 = vsel %vm26_vm0, %v1804_v1, 0.0  ;;  %v1809_v6 = vsel %vm26_vm0, %v1805_v50, 0.0 }
0x2134   :  { %v1808_v3 = vadd.f32 %v1807_v51, %v1806_v0 }
0x2136   :  { %v1810_v8 = vadd.f32 %v1809_v6, %v1808_v3 }
0x2138   :  { %v1811_v52 = vrot.slane %v1810_v8, 4 }
0x213a   :  { %v1812_v53 = vadd.f32 %v1811_v52, %v1810_v8 }
0x213c   :  { %v1813_v54 = vrot.slane %v1812_v53, 2 }
0x213e   :  { %v1814_v55 = vadd.f32 %v1813_v54, %v1812_v53 }
0x2140   :  { %v1815_v56 = vrot.slane %v1814_v55, 1 }
0x2142   :  { %v1816_v57 = vadd.f32 %v1815_v56, %v1814_v55 }
0x2144   :  { %v1817_v58 = vmul.f32 %v1816_v57, %v1816_v57 }
0x2146   :  { %v1818_v59 = vsel %vm26_vm0, %v1817_v58, 0.0 }
0x2147   :  { %1819 = vadd.xlane.f32.xlu2 %v1818_v59 }
0x21ba   :  { %v1820_v63 = vpop.xlane.xlu2 %1819 }
0x21bb   :  { %v1821_v7 = vmax.f32 %v1820_v63, 1e-30 }
0x21bd   :  { %3539 = vrsqrt.f32 %v1821_v7  ;;  %vm1828_vm11 = vweird.f32 %v1821_v7 }
0x21c3   :  { %v3540_v10 = vpop.eup %3539 }
0x21c4   :  { %v1823_v11 = vmul.f32 %v3540_v10, %v1821_v7  ;;  %vm1829_vm10 = vweird.f32 %v3540_v10 }
0x21c5   :  { %vm1830_vm12 = vmor %vm1828_vm11, %vm1829_vm10 }
0x21c6   :  { %v1824_v12 = vmul.f32 %v3540_v10, %v1823_v11 }
0x21c8   :  { %v1825_v13 = vmul.f32 0.5, %v1824_v12 }
0x21ca   :  { %v1826_v14 = vsub.f32 1.5, %v1825_v13 }
0x21cc   :  { %v1827_v15 = vmul.f32 %v3540_v10, %v1826_v14 }
0x21ce   :  { %v1831_v16 = vsel %vm1830_vm12, %v3540_v10, %v1827_v15 }
0x21cf   :  { %v1832_v17 = vmul.f32 %v1831_v16, %v1816_v57 }
0x21d1   :  { %v1835_v18 = vmul.f32 %v4085_v9, %v1832_v17  ;;  %v1834_v19 = vmul.f32 %v4079_v4, %v1832_v17  ;;  %v1833_v20 = vmul.f32 %v4073_v61, %v1832_v17 }
0x21d3   :  { %v1842_v21 = vsel %vm26_vm0, %v1835_v18, 0.0  ;;  %v1839_v22 = vsel %vm26_vm0, %v1834_v19, 0.0  ;;  %v1836_v23 = vsel %vm26_vm0, %v1833_v20, 0.0 }
0x21d4   :  { %1843 = vadd.xlane.f32.xlu2 %v1842_v21  ;;  %1840 = vadd.xlane.f32.xlu1 %v1839_v22 }
0x21d5   :  { %1837 = vadd.xlane.f32.xlu0 %v1836_v23 }
0x2247   :  { %v1841_v24 = vpop.xlane.xlu1 %1840  ;;  %v1844_v25 = vpop.xlane.xlu2 %1843 }
0x2248   :  { %v1846_v26 = vmul.f32 %v1841_v24, %v1841_v24  ;;  %v1838_v27 = vpop.xlane.xlu0 %1837  ;;  %v1847_v29 = vmul.f32 %v1844_v25, %v1844_v25 }
0x2249   :  { %v1845_v28 = vmul.f32 %v1838_v27, %v1838_v27 }
0x224b   :  { %v1848_v30 = vadd.f32 %v1846_v26, %v1845_v28 }
0x224d   :  { %v1849_v31 = vadd.f32 %v1848_v30, %v1847_v29 }
0x224f   :  { %v1850_v32 = vrot.slane %v1849_v31, 4 }
0x2251   :  { %v1851_v33 = vadd.f32 %v1850_v32, %v1849_v31 }
0x2253   :  { %v1852_v34 = vrot.slane %v1851_v33, 2 }
0x2255   :  { %v1853_v35 = vadd.f32 %v1852_v34, %v1851_v33 }
0x2257   :  { %v1854_v36 = vrot.slane %v1853_v35, 1 }
0x2259   :  { %v1855_v37 = vadd.f32 %v1854_v36, %v1853_v35 }
0x225b   :  { %v1856_v38 = vmax.f32 %v1855_v37, 1e-30 }
0x225d   :  { %3541 = vrsqrt.f32 %v1856_v38  ;;  %vm1863_vm14 = vweird.f32 %v1856_v38 }
0x2263   :  { %v3542_v39 = vpop.eup %3541 }
0x2264   :  { %v1858_v40 = vmul.f32 %v3542_v39, %v1856_v38  ;;  %vm1864_vm13 = vweird.f32 %v3542_v39 }
0x2265   :  { %vm1865_vm15 = vmor %vm1863_vm14, %vm1864_vm13 }
0x2266   :  { %v1859_v41 = vmul.f32 %v3542_v39, %v1858_v40 }
0x2268   :  { %v1860_v42 = vmul.f32 0.5, %v1859_v41 }
0x226a   :  { %v1861_v43 = vsub.f32 1.5, %v1860_v42 }
0x226c   :  { %v1862_v44 = vmul.f32 %v3542_v39, %v1861_v43 }
0x226e   :  { %v1866_v45 = vsel %vm1865_vm15, %v3542_v39, %v1862_v44 }
0x226f   :  { %v1867_v46 = vmul.f32 %v1866_v45, %v1838_v27  ;;  %v1868_v47 = vmul.f32 %v1866_v45, %v1841_v24  ;;  %v1869_v48 = vmul.f32 %v1866_v45, %v1844_v25 }
0x2271   :  { %v1870_v2 = vmul.f32 %v4073_v61, %v1867_v46  ;;  %v1871_v60 = vmul.f32 %v4079_v4, %v1868_v47  ;;  %v1872_v49 = vmul.f32 %v4085_v9, %v1869_v48 }
0x2273   :  { %v1873_v62 = vsel %vm26_vm0, %v1870_v2, 0.0  ;;  %v1874_v5 = vsel %vm26_vm0, %v1871_v60, 0.0  ;;  %v1876_v50 = vsel %vm26_vm0, %v1872_v49, 0.0 }
0x2274   :  { %v1875_v1 = vadd.f32 %v1874_v5, %v1873_v62 }
0x2276   :  { %v1877_v0 = vadd.f32 %v1876_v50, %v1875_v1 }
0x2278   :  { %v1878_v51 = vrot.slane %v1877_v0, 4 }
0x227a   :  { %v1879_v3 = vadd.f32 %v1878_v51, %v1877_v0 }
0x227c   :  { %v1880_v6 = vrot.slane %v1879_v3, 2 }
0x227e   :  { %v1881_v8 = vadd.f32 %v1880_v6, %v1879_v3 }
0x2280   :  { %v1882_v52 = vrot.slane %v1881_v8, 1 }
0x2282   :  { %v1883_v53 = vadd.f32 %v1882_v52, %v1881_v8 }
0x2284   :  { %v1884_v54 = vmul.f32 %v1883_v53, %v1883_v53 }
0x2286   :  { %v1885_v55 = vsel %vm26_vm0, %v1884_v54, 0.0 }
0x2287   :  { %1886 = vadd.xlane.f32.xlu0 %v1885_v55 }
0x22fa   :  { %v1887_v56 = vpop.xlane.xlu0 %1886 }
0x22fb   :  { %v1888_v57 = vmax.f32 %v1887_v56, 1e-30 }
0x22fd   :  { %3543 = vrsqrt.f32 %v1888_v57  ;;  %vm1895_vm2 = vweird.f32 %v1888_v57 }
0x2303   :  { %v3544_v58 = vpop.eup %3543 }
0x2304   :  { %v1890_v59 = vmul.f32 %v3544_v58, %v1888_v57  ;;  %vm1896_vm1 = vweird.f32 %v3544_v58 }
0x2305   :  { %vm1897_vm3 = vmor %vm1895_vm2, %vm1896_vm1 }
0x2306   :  { %v1891_v63 = vmul.f32 %v3544_v58, %v1890_v59 }
0x2308   :  { %v1892_v7 = vmul.f32 0.5, %v1891_v63 }
0x230a   :  { %v1893_v10 = vsub.f32 1.5, %v1892_v7 }
0x230c   :  { %v1894_v11 = vmul.f32 %v3544_v58, %v1893_v10 }
0x230e   :  { %v1898_v12 = vsel %vm1897_vm3, %v3544_v58, %v1894_v11 }
0x230f   :  { %v1899_v13 = vmul.f32 %v1898_v12, %v1883_v53 }
0x2311   :  { %v1902_v14 = vmul.f32 %v4085_v9, %v1899_v13  ;;  %v1901_v15 = vmul.f32 %v4079_v4, %v1899_v13  ;;  %v1900_v16 = vmul.f32 %v4073_v61, %v1899_v13 }
0x2313   :  { %v1909_v17 = vsel %vm26_vm0, %v1902_v14, 0.0  ;;  %v1906_v18 = vsel %vm26_vm0, %v1901_v15, 0.0  ;;  %v1903_v19 = vsel %vm26_vm0, %v1900_v16, 0.0 }
0x2314   :  { %1910 = vadd.xlane.f32.xlu0 %v1909_v17  ;;  %1907 = vadd.xlane.f32.xlu2 %v1906_v18 }
0x2315   :  { %1904 = vadd.xlane.f32.xlu1 %v1903_v19 }
0x2387   :  { %v1908_v20 = vpop.xlane.xlu2 %1907  ;;  %v1911_v21 = vpop.xlane.xlu0 %1910 }
0x2388   :  { %v1913_v22 = vmul.f32 %v1908_v20, %v1908_v20  ;;  %v1905_v23 = vpop.xlane.xlu1 %1904  ;;  %v1914_v25 = vmul.f32 %v1911_v21, %v1911_v21 }
0x2389   :  { %v1912_v24 = vmul.f32 %v1905_v23, %v1905_v23 }
0x238b   :  { %v1915_v26 = vadd.f32 %v1913_v22, %v1912_v24 }
0x238d   :  { %v1916_v27 = vadd.f32 %v1915_v26, %v1914_v25 }
0x238f   :  { %v1917_v28 = vrot.slane %v1916_v27, 4 }
0x2391   :  { %v1918_v29 = vadd.f32 %v1917_v28, %v1916_v27 }
0x2393   :  { %v1919_v30 = vrot.slane %v1918_v29, 2 }
0x2395   :  { %v1920_v31 = vadd.f32 %v1919_v30, %v1918_v29 }
0x2397   :  { %v1921_v32 = vrot.slane %v1920_v31, 1 }
0x2399   :  { %v1922_v33 = vadd.f32 %v1921_v32, %v1920_v31 }
0x239b   :  { %v1923_v34 = vmax.f32 %v1922_v33, 1e-30 }
0x239d   :  { %3545 = vrsqrt.f32 %v1923_v34  ;;  %vm1930_vm5 = vweird.f32 %v1923_v34 }
0x23a3   :  { %v3546_v35 = vpop.eup %3545 }
0x23a4   :  { %v1925_v36 = vmul.f32 %v3546_v35, %v1923_v34  ;;  %vm1931_vm4 = vweird.f32 %v3546_v35 }
0x23a5   :  { %vm1932_vm6 = vmor %vm1930_vm5, %vm1931_vm4 }
0x23a6   :  { %v1926_v37 = vmul.f32 %v3546_v35, %v1925_v36 }
0x23a8   :  { %v1927_v38 = vmul.f32 0.5, %v1926_v37 }
0x23aa   :  { %v1928_v39 = vsub.f32 1.5, %v1927_v38 }
0x23ac   :  { %v1929_v40 = vmul.f32 %v3546_v35, %v1928_v39 }
0x23ae   :  { %v1933_v41 = vsel %vm1932_vm6, %v3546_v35, %v1929_v40 }
0x23af   :  { %v1934_v42 = vmul.f32 %v1933_v41, %v1905_v23  ;;  %v1935_v43 = vmul.f32 %v1933_v41, %v1908_v20  ;;  %v1936_v44 = vmul.f32 %v1933_v41, %v1911_v21 }
0x23b1   :  { %v1937_v45 = vmul.f32 %v4073_v61, %v1934_v42  ;;  %v1938_v46 = vmul.f32 %v4079_v4, %v1935_v43  ;;  %v1939_v47 = vmul.f32 %v4085_v9, %v1936_v44 }
0x23b3   :  { %v1940_v48 = vsel %vm26_vm0, %v1937_v45, 0.0  ;;  %v1941_v2 = vsel %vm26_vm0, %v1938_v46, 0.0  ;;  %v1943_v49 = vsel %vm26_vm0, %v1939_v47, 0.0 }
0x23b4   :  { %v1942_v60 = vadd.f32 %v1941_v2, %v1940_v48 }
0x23b6   :  { %v1944_v62 = vadd.f32 %v1943_v49, %v1942_v60 }
0x23b8   :  { %v1945_v5 = vrot.slane %v1944_v62, 4 }
0x23ba   :  { %v1946_v1 = vadd.f32 %v1945_v5, %v1944_v62 }
0x23bc   :  { %v1947_v50 = vrot.slane %v1946_v1, 2 }
0x23be   :  { %v1948_v0 = vadd.f32 %v1947_v50, %v1946_v1 }
0x23c0   :  { %v1949_v51 = vrot.slane %v1948_v0, 1 }
0x23c2   :  { %v1950_v3 = vadd.f32 %v1949_v51, %v1948_v0 }
0x23c4   :  { %v1951_v6 = vmul.f32 %v1950_v3, %v1950_v3 }
0x23c6   :  { %v1952_v8 = vsel %vm26_vm0, %v1951_v6, 0.0 }
0x23c7   :  { %1953 = vadd.xlane.f32.xlu1 %v1952_v8 }
0x243a   :  { %v1954_v52 = vpop.xlane.xlu1 %1953 }
0x243b   :  { %v1955_v53 = vmax.f32 %v1954_v52, 1e-30 }
0x243d   :  { %3547 = vrsqrt.f32 %v1955_v53  ;;  %vm1962_vm8 = vweird.f32 %v1955_v53 }
0x2443   :  { %v3548_v54 = vpop.eup %3547 }
0x2444   :  { %v1957_v55 = vmul.f32 %v3548_v54, %v1955_v53  ;;  %vm1963_vm7 = vweird.f32 %v3548_v54 }
0x2445   :  { %vm1964_vm9 = vmor %vm1962_vm8, %vm1963_vm7 }
0x2446   :  { %v1958_v56 = vmul.f32 %v3548_v54, %v1957_v55  ;;  %v4186_v55 = vld [vmem:[%s4503_s0 + $0x10] sm:$0xff] }
0x2448   :  { %v1959_v57 = vmul.f32 0.5, %v1958_v56 }
0x244a   :  { %v1960_v58 = vsub.f32 1.5, %v1959_v57  ;;  %v4192_v57 = vld [vmem:[%s4503_s0 + $0x8] sm:$0xff] }
0x244c   :  { %v1961_v59 = vmul.f32 %v3548_v54, %v1960_v58 }
0x244e   :  { %v1965_v63 = vsel %vm1964_vm9, %v3548_v54, %v1961_v59  ;;  %v4198_v59 = vld [vmem:[%s4503_s0] sm:$0xff] }
0x244f   :  { %v1966_v7 = vmul.f32 %v1965_v63, %v1950_v3 }
0x2451   :  { %v1969_v10 = vmul.f32 %v4085_v9, %v1966_v7  ;;  %v1968_v11 = vmul.f32 %v4079_v4, %v1966_v7  ;;  %v1967_v12 = vmul.f32 %v4073_v61, %v1966_v7 }
0x2453   :  { %v1976_v13 = vsel %vm26_vm0, %v1969_v10, 0.0  ;;  %v1973_v14 = vsel %vm26_vm0, %v1968_v11, 0.0  ;;  %v1970_v15 = vsel %vm26_vm0, %v1967_v12, 0.0 }
0x2454   :  { %1977 = vadd.xlane.f32.xlu1 %v1976_v13  ;;  %1974 = vadd.xlane.f32.xlu0 %v1973_v14 }
0x2455   :  { %1971 = vadd.xlane.f32.xlu2 %v1970_v15 }
0x24c7   :  { %v1975_v16 = vpop.xlane.xlu0 %1974  ;;  %v1978_v17 = vpop.xlane.xlu1 %1977 }
0x24c8   :  { %v1980_v18 = vmul.f32 %v1975_v16, %v1975_v16  ;;  %v1972_v19 = vpop.xlane.xlu2 %1971  ;;  %v1981_v21 = vmul.f32 %v1978_v17, %v1978_v17 }
0x24c9   :  { %v1979_v20 = vmul.f32 %v1972_v19, %v1972_v19 }
0x24cb   :  { %v1982_v22 = vadd.f32 %v1980_v18, %v1979_v20 }
0x24cd   :  { %v1983_v23 = vadd.f32 %v1982_v22, %v1981_v21 }
0x24cf   :  { %v1984_v24 = vrot.slane %v1983_v23, 4 }
0x24d1   :  { %v1985_v25 = vadd.f32 %v1984_v24, %v1983_v23 }
0x24d3   :  { %v1986_v26 = vrot.slane %v1985_v25, 2 }
0x24d5   :  { %v1987_v27 = vadd.f32 %v1986_v26, %v1985_v25 }
0x24d7   :  { %v1988_v28 = vrot.slane %v1987_v27, 1 }
0x24d9   :  { %v1989_v29 = vadd.f32 %v1988_v28, %v1987_v27 }
0x24db   :  { %v1990_v30 = vmax.f32 %v1989_v29, 1e-30 }
0x24dd   :  { %3549 = vrsqrt.f32 %v1990_v30  ;;  %vm1997_vm11 = vweird.f32 %v1990_v30 }
0x24e3   :  { %v3550_v31 = vpop.eup %3549 }
0x24e4   :  { %v1992_v32 = vmul.f32 %v3550_v31, %v1990_v30  ;;  %vm1998_vm10 = vweird.f32 %v3550_v31 }
0x24e5   :  { %vm1999_vm12 = vmor %vm1997_vm11, %vm1998_vm10 }
0x24e6   :  { %v1993_v33 = vmul.f32 %v3550_v31, %v1992_v32 }
0x24e8   :  { %v1994_v34 = vmul.f32 0.5, %v1993_v33 }
0x24ea   :  { %v1995_v35 = vsub.f32 1.5, %v1994_v34 }
0x24ec   :  { %v1996_v36 = vmul.f32 %v3550_v31, %v1995_v35 }
0x24ee   :  { %v2000_v37 = vsel %vm1999_vm12, %v3550_v31, %v1996_v36 }
0x24ef   :  { %v2001_v38 = vmul.f32 %v2000_v37, %v1972_v19  ;;  %v2002_v39 = vmul.f32 %v2000_v37, %v1975_v16  ;;  %v2003_v40 = vmul.f32 %v2000_v37, %v1978_v17 }
0x24f1   :  { %v2004_v41 = vmul.f32 %v4073_v61, %v2001_v38  ;;  %v2005_v42 = vmul.f32 %v4079_v4, %v2002_v39  ;;  %v2006_v43 = vmul.f32 %v4085_v9, %v2003_v40 }
0x24f3   :  { %v2007_v44 = vsel %vm26_vm0, %v2004_v41, 0.0  ;;  %v2008_v45 = vsel %vm26_vm0, %v2005_v42, 0.0  ;;  %v2010_v47 = vsel %vm26_vm0, %v2006_v43, 0.0 }
0x24f4   :  { %v2009_v46 = vadd.f32 %v2008_v45, %v2007_v44 }
0x24f6   :  { %v2011_v48 = vadd.f32 %v2010_v47, %v2009_v46 }
0x24f8   :  { %v2012_v2 = vrot.slane %v2011_v48, 4 }
0x24fa   :  { %v2013_v60 = vadd.f32 %v2012_v2, %v2011_v48 }
0x24fc   :  { %v2014_v49 = vrot.slane %v2013_v60, 2 }
0x24fe   :  { %v2015_v62 = vadd.f32 %v2014_v49, %v2013_v60 }
0x2500   :  { %v2016_v5 = vrot.slane %v2015_v62, 1 }
0x2502   :  { %v2017_v1 = vadd.f32 %v2016_v5, %v2015_v62 }
0x2504   :  { %v2018_v50 = vmul.f32 %v2017_v1, %v2017_v1 }
0x2506   :  { %v2019_v61 = vsel %vm26_vm0, %v2018_v50, 0.0 }
0x2507   :  { %2020 = vadd.xlane.f32.xlu2 %v2019_v61 }
0x257a   :  { %v2021_v4 = vpop.xlane.xlu2 %2020 }
0x257b   :  { %v2022_v9 = vmax.f32 %v2021_v4, 1e-30 }
0x257d   :  { %3551 = vrsqrt.f32 %v2022_v9  ;;  %vm2029_vm14 = vweird.f32 %v2022_v9 }
0x2583   :  { %v3552_v0 = vpop.eup %3551 }
0x2584   :  { %v2024_v51 = vmul.f32 %v3552_v0, %v2022_v9  ;;  %vm2030_vm13 = vweird.f32 %v3552_v0 }
0x2585   :  { %vm2031_vm15 = vmor %vm2029_vm14, %vm2030_vm13 }
0x2586   :  { %v2025_v3 = vmul.f32 %v3552_v0, %v2024_v51 }
0x2588   :  { %v2026_v6 = vmul.f32 0.5, %v2025_v3 }
0x258a   :  { %v2027_v8 = vsub.f32 1.5, %v2026_v6 }
0x258c   :  { %v2028_v52 = vmul.f32 %v3552_v0, %v2027_v8 }
0x258e   :  { %v2032_v53 = vsel %vm2031_vm15, %v3552_v0, %v2028_v52 }
0x258f   :  { %v2033_v54 = vmul.f32 %v2032_v53, %v2017_v1 }
0x2591   :  { %v2036_v56 = vmul.f32 %v4186_v55, %v2033_v54  ;;  %v2035_v58 = vmul.f32 %v4192_v57, %v2033_v54  ;;  %v2034_v63 = vmul.f32 %v4198_v59, %v2033_v54 }
0x2593   :  { %v2043_v7 = vsel %vm26_vm0, %v2036_v56, 0.0  ;;  %v2040_v10 = vsel %vm26_vm0, %v2035_v58, 0.0  ;;  %v2037_v11 = vsel %vm26_vm0, %v2034_v63, 0.0 }
0x2594   :  { %2044 = vadd.xlane.f32.xlu2 %v2043_v7  ;;  %2041 = vadd.xlane.f32.xlu1 %v2040_v10 }
0x2595   :  { %2038 = vadd.xlane.f32.xlu0 %v2037_v11 }
0x2607   :  { %v2042_v12 = vpop.xlane.xlu1 %2041  ;;  %v2045_v13 = vpop.xlane.xlu2 %2044 }
0x2608   :  { %v2047_v14 = vmul.f32 %v2042_v12, %v2042_v12  ;;  %v2039_v15 = vpop.xlane.xlu0 %2038  ;;  %v2048_v17 = vmul.f32 %v2045_v13, %v2045_v13 }
0x2609   :  { %v2046_v16 = vmul.f32 %v2039_v15, %v2039_v15 }
0x260b   :  { %v2049_v18 = vadd.f32 %v2047_v14, %v2046_v16 }
0x260d   :  { %v2050_v19 = vadd.f32 %v2049_v18, %v2048_v17 }
0x260f   :  { %v2051_v20 = vrot.slane %v2050_v19, 4 }
0x2611   :  { %v2052_v21 = vadd.f32 %v2051_v20, %v2050_v19 }
0x2613   :  { %v2053_v22 = vrot.slane %v2052_v21, 2 }
0x2615   :  { %v2054_v23 = vadd.f32 %v2053_v22, %v2052_v21 }
0x2617   :  { %v2055_v24 = vrot.slane %v2054_v23, 1 }
0x2619   :  { %v2056_v25 = vadd.f32 %v2055_v24, %v2054_v23 }
0x261b   :  { %v2057_v26 = vmax.f32 %v2056_v25, 1e-30 }
0x261d   :  { %3553 = vrsqrt.f32 %v2057_v26  ;;  %vm2064_vm2 = vweird.f32 %v2057_v26 }
0x2623   :  { %v3554_v27 = vpop.eup %3553 }
0x2624   :  { %v2059_v28 = vmul.f32 %v3554_v27, %v2057_v26  ;;  %vm2065_vm1 = vweird.f32 %v3554_v27 }
0x2625   :  { %vm2066_vm3 = vmor %vm2064_vm2, %vm2065_vm1 }
0x2626   :  { %v2060_v29 = vmul.f32 %v3554_v27, %v2059_v28 }
0x2628   :  { %v2061_v30 = vmul.f32 0.5, %v2060_v29 }
0x262a   :  { %v2062_v31 = vsub.f32 1.5, %v2061_v30 }
0x262c   :  { %v2063_v32 = vmul.f32 %v3554_v27, %v2062_v31 }
0x262e   :  { %v2067_v33 = vsel %vm2066_vm3, %v3554_v27, %v2063_v32 }
0x262f   :  { %v2068_v34 = vmul.f32 %v2067_v33, %v2039_v15  ;;  %v2069_v35 = vmul.f32 %v2067_v33, %v2042_v12  ;;  %v2070_v36 = vmul.f32 %v2067_v33, %v2045_v13 }
0x2631   :  { %v2071_v37 = vmul.f32 %v4198_v59, %v2068_v34  ;;  %v2072_v38 = vmul.f32 %v4192_v57, %v2069_v35  ;;  %v2073_v39 = vmul.f32 %v4186_v55, %v2070_v36 }
0x2633   :  { %v2074_v40 = vsel %vm26_vm0, %v2071_v37, 0.0  ;;  %v2075_v41 = vsel %vm26_vm0, %v2072_v38, 0.0  ;;  %v2077_v43 = vsel %vm26_vm0, %v2073_v39, 0.0 }
0x2634   :  { %v2076_v42 = vadd.f32 %v2075_v41, %v2074_v40 }
0x2636   :  { %v2078_v44 = vadd.f32 %v2077_v43, %v2076_v42 }
0x2638   :  { %v2079_v45 = vrot.slane %v2078_v44, 4 }
0x263a   :  { %v2080_v46 = vadd.f32 %v2079_v45, %v2078_v44 }
0x263c   :  { %v2081_v47 = vrot.slane %v2080_v46, 2 }
0x263e   :  { %v2082_v48 = vadd.f32 %v2081_v47, %v2080_v46 }
0x2640   :  { %v2083_v2 = vrot.slane %v2082_v48, 1 }
0x2642   :  { %v2084_v60 = vadd.f32 %v2083_v2, %v2082_v48 }
0x2644   :  { %v2085_v49 = vmul.f32 %v2084_v60, %v2084_v60 }
0x2646   :  { %v2086_v62 = vsel %vm26_vm0, %v2085_v49, 0.0 }
0x2647   :  { %2087 = vadd.xlane.f32.xlu0 %v2086_v62 }
0x26ba   :  { %v2088_v5 = vpop.xlane.xlu0 %2087 }
0x26bb   :  { %v2089_v1 = vmax.f32 %v2088_v5, 1e-30 }
0x26bd   :  { %3555 = vrsqrt.f32 %v2089_v1  ;;  %vm2096_vm5 = vweird.f32 %v2089_v1 }
0x26c3   :  { %v3556_v50 = vpop.eup %3555 }
0x26c4   :  { %v2091_v61 = vmul.f32 %v3556_v50, %v2089_v1  ;;  %vm2097_vm4 = vweird.f32 %v3556_v50 }
0x26c5   :  { %vm2098_vm6 = vmor %vm2096_vm5, %vm2097_vm4 }
0x26c6   :  { %v2092_v4 = vmul.f32 %v3556_v50, %v2091_v61 }
0x26c8   :  { %v2093_v9 = vmul.f32 0.5, %v2092_v4 }
0x26ca   :  { %v2094_v0 = vsub.f32 1.5, %v2093_v9 }
0x26cc   :  { %v2095_v51 = vmul.f32 %v3556_v50, %v2094_v0 }
0x26ce   :  { %v2099_v3 = vsel %vm2098_vm6, %v3556_v50, %v2095_v51 }
0x26cf   :  { %v2100_v6 = vmul.f32 %v2099_v3, %v2084_v60 }
0x26d1   :  { %v2103_v8 = vmul.f32 %v4186_v55, %v2100_v6  ;;  %v2102_v52 = vmul.f32 %v4192_v57, %v2100_v6  ;;  %v2101_v53 = vmul.f32 %v4198_v59, %v2100_v6 }
0x26d3   :  { %v2110_v54 = vsel %vm26_vm0, %v2103_v8, 0.0  ;;  %v2107_v56 = vsel %vm26_vm0, %v2102_v52, 0.0  ;;  %v2104_v58 = vsel %vm26_vm0, %v2101_v53, 0.0 }
0x26d4   :  { %2111 = vadd.xlane.f32.xlu0 %v2110_v54  ;;  %2108 = vadd.xlane.f32.xlu2 %v2107_v56 }
0x26d5   :  { %2105 = vadd.xlane.f32.xlu1 %v2104_v58 }
0x2747   :  { %v2109_v63 = vpop.xlane.xlu2 %2108  ;;  %v2112_v7 = vpop.xlane.xlu0 %2111 }
0x2748   :  { %v2114_v10 = vmul.f32 %v2109_v63, %v2109_v63  ;;  %v2106_v11 = vpop.xlane.xlu1 %2105  ;;  %v2115_v13 = vmul.f32 %v2112_v7, %v2112_v7 }
0x2749   :  { %v2113_v12 = vmul.f32 %v2106_v11, %v2106_v11 }
0x274b   :  { %v2116_v14 = vadd.f32 %v2114_v10, %v2113_v12 }
0x274d   :  { %v2117_v15 = vadd.f32 %v2116_v14, %v2115_v13 }
0x274f   :  { %v2118_v16 = vrot.slane %v2117_v15, 4 }
0x2751   :  { %v2119_v17 = vadd.f32 %v2118_v16, %v2117_v15 }
0x2753   :  { %v2120_v18 = vrot.slane %v2119_v17, 2 }
0x2755   :  { %v2121_v19 = vadd.f32 %v2120_v18, %v2119_v17 }
0x2757   :  { %v2122_v20 = vrot.slane %v2121_v19, 1 }
0x2759   :  { %v2123_v21 = vadd.f32 %v2122_v20, %v2121_v19 }
0x275b   :  { %v2124_v22 = vmax.f32 %v2123_v21, 1e-30 }
0x275d   :  { %3557 = vrsqrt.f32 %v2124_v22  ;;  %vm2131_vm8 = vweird.f32 %v2124_v22 }
0x2763   :  { %v3558_v23 = vpop.eup %3557 }
0x2764   :  { %v2126_v24 = vmul.f32 %v3558_v23, %v2124_v22  ;;  %vm2132_vm7 = vweird.f32 %v3558_v23 }
0x2765   :  { %vm2133_vm9 = vmor %vm2131_vm8, %vm2132_vm7 }
0x2766   :  { %v2127_v25 = vmul.f32 %v3558_v23, %v2126_v24 }
0x2768   :  { %v2128_v26 = vmul.f32 0.5, %v2127_v25 }
0x276a   :  { %v2129_v27 = vsub.f32 1.5, %v2128_v26 }
0x276c   :  { %v2130_v28 = vmul.f32 %v3558_v23, %v2129_v27 }
0x276e   :  { %v2134_v29 = vsel %vm2133_vm9, %v3558_v23, %v2130_v28 }
0x276f   :  { %v2135_v30 = vmul.f32 %v2134_v29, %v2106_v11  ;;  %v2136_v31 = vmul.f32 %v2134_v29, %v2109_v63  ;;  %v2137_v32 = vmul.f32 %v2134_v29, %v2112_v7 }
0x2771   :  { %v2138_v33 = vmul.f32 %v4198_v59, %v2135_v30  ;;  %v2139_v34 = vmul.f32 %v4192_v57, %v2136_v31  ;;  %v2140_v35 = vmul.f32 %v4186_v55, %v2137_v32 }
0x2773   :  { %v2141_v36 = vsel %vm26_vm0, %v2138_v33, 0.0  ;;  %v2142_v37 = vsel %vm26_vm0, %v2139_v34, 0.0  ;;  %v2144_v39 = vsel %vm26_vm0, %v2140_v35, 0.0 }
0x2774   :  { %v2143_v38 = vadd.f32 %v2142_v37, %v2141_v36 }
0x2776   :  { %v2145_v40 = vadd.f32 %v2144_v39, %v2143_v38 }
0x2778   :  { %v2146_v41 = vrot.slane %v2145_v40, 4 }
0x277a   :  { %v2147_v42 = vadd.f32 %v2146_v41, %v2145_v40 }
0x277c   :  { %v2148_v43 = vrot.slane %v2147_v42, 2 }
0x277e   :  { %v2149_v44 = vadd.f32 %v2148_v43, %v2147_v42 }
0x2780   :  { %v2150_v45 = vrot.slane %v2149_v44, 1 }
0x2782   :  { %v2151_v46 = vadd.f32 %v2150_v45, %v2149_v44 }
0x2784   :  { %v2152_v47 = vmul.f32 %v2151_v46, %v2151_v46 }
0x2786   :  { %v2153_v48 = vsel %vm26_vm0, %v2152_v47, 0.0 }
0x2787   :  { %2154 = vadd.xlane.f32.xlu1 %v2153_v48 }
0x27fa   :  { %v2155_v2 = vpop.xlane.xlu1 %2154 }
0x27fb   :  { %v2156_v60 = vmax.f32 %v2155_v2, 1e-30 }
0x27fd   :  { %3559 = vrsqrt.f32 %v2156_v60  ;;  %vm2163_vm11 = vweird.f32 %v2156_v60 }
0x2803   :  { %v3560_v49 = vpop.eup %3559 }
0x2804   :  { %v2158_v62 = vmul.f32 %v3560_v49, %v2156_v60  ;;  %vm2164_vm10 = vweird.f32 %v3560_v49 }
0x2805   :  { %vm2165_vm12 = vmor %vm2163_vm11, %vm2164_vm10 }
0x2806   :  { %v2159_v5 = vmul.f32 %v3560_v49, %v2158_v62 }
0x2808   :  { %v2160_v1 = vmul.f32 0.5, %v2159_v5 }
0x280a   :  { %v2161_v50 = vsub.f32 1.5, %v2160_v1 }
0x280c   :  { %v2162_v61 = vmul.f32 %v3560_v49, %v2161_v50 }
0x280e   :  { %v2166_v4 = vsel %vm2165_vm12, %v3560_v49, %v2162_v61 }
0x280f   :  { %v2167_v9 = vmul.f32 %v2166_v4, %v2151_v46 }
0x2811   :  { %v2170_v0 = vmul.f32 %v4186_v55, %v2167_v9  ;;  %v2169_v51 = vmul.f32 %v4192_v57, %v2167_v9  ;;  %v2168_v3 = vmul.f32 %v4198_v59, %v2167_v9 }
0x2813   :  { %v2177_v6 = vsel %vm26_vm0, %v2170_v0, 0.0  ;;  %v2174_v8 = vsel %vm26_vm0, %v2169_v51, 0.0  ;;  %v2171_v52 = vsel %vm26_vm0, %v2168_v3, 0.0 }
0x2814   :  { %2178 = vadd.xlane.f32.xlu1 %v2177_v6  ;;  %2175 = vadd.xlane.f32.xlu0 %v2174_v8 }
0x2815   :  { %2172 = vadd.xlane.f32.xlu2 %v2171_v52 }
0x2887   :  { %v2176_v53 = vpop.xlane.xlu0 %2175  ;;  %v2179_v54 = vpop.xlane.xlu1 %2178 }
0x2888   :  { %v2181_v56 = vmul.f32 %v2176_v53, %v2176_v53  ;;  %v2173_v58 = vpop.xlane.xlu2 %2172  ;;  %v2182_v7 = vmul.f32 %v2179_v54, %v2179_v54 }
0x2889   :  { %v2180_v63 = vmul.f32 %v2173_v58, %v2173_v58 }
0x288b   :  { %v2183_v10 = vadd.f32 %v2181_v56, %v2180_v63 }
0x288d   :  { %v2184_v11 = vadd.f32 %v2183_v10, %v2182_v7 }
0x288f   :  { %v2185_v12 = vrot.slane %v2184_v11, 4 }
0x2891   :  { %v2186_v13 = vadd.f32 %v2185_v12, %v2184_v11 }
0x2893   :  { %v2187_v14 = vrot.slane %v2186_v13, 2 }
0x2895   :  { %v2188_v15 = vadd.f32 %v2187_v14, %v2186_v13 }
0x2897   :  { %v2189_v16 = vrot.slane %v2188_v15, 1 }
0x2899   :  { %v2190_v17 = vadd.f32 %v2189_v16, %v2188_v15 }
0x289b   :  { %v2191_v18 = vmax.f32 %v2190_v17, 1e-30 }
0x289d   :  { %3561 = vrsqrt.f32 %v2191_v18  ;;  %vm2198_vm14 = vweird.f32 %v2191_v18 }
0x28a3   :  { %v3562_v19 = vpop.eup %3561 }
0x28a4   :  { %v2193_v20 = vmul.f32 %v3562_v19, %v2191_v18  ;;  %vm2199_vm13 = vweird.f32 %v3562_v19 }
0x28a5   :  { %vm2200_vm15 = vmor %vm2198_vm14, %vm2199_vm13 }
0x28a6   :  { %v2194_v21 = vmul.f32 %v3562_v19, %v2193_v20 }
0x28a8   :  { %v2195_v22 = vmul.f32 0.5, %v2194_v21 }
0x28aa   :  { %v2196_v23 = vsub.f32 1.5, %v2195_v22 }
0x28ac   :  { %v2197_v24 = vmul.f32 %v3562_v19, %v2196_v23 }
0x28ae   :  { %v2201_v25 = vsel %vm2200_vm15, %v3562_v19, %v2197_v24 }
0x28af   :  { %v2202_v26 = vmul.f32 %v2201_v25, %v2173_v58  ;;  %v2203_v27 = vmul.f32 %v2201_v25, %v2176_v53  ;;  %v2204_v28 = vmul.f32 %v2201_v25, %v2179_v54 }
0x28b1   :  { %v2205_v29 = vmul.f32 %v4198_v59, %v2202_v26  ;;  %v2206_v30 = vmul.f32 %v4192_v57, %v2203_v27  ;;  %v2207_v31 = vmul.f32 %v4186_v55, %v2204_v28 }
0x28b3   :  { %v2208_v32 = vsel %vm26_vm0, %v2205_v29, 0.0  ;;  %v2209_v33 = vsel %vm26_vm0, %v2206_v30, 0.0  ;;  %v2211_v35 = vsel %vm26_vm0, %v2207_v31, 0.0 }
0x28b4   :  { %v2210_v34 = vadd.f32 %v2209_v33, %v2208_v32 }
0x28b6   :  { %v2212_v36 = vadd.f32 %v2211_v35, %v2210_v34 }
0x28b8   :  { %v2213_v37 = vrot.slane %v2212_v36, 4 }
0x28ba   :  { %v2214_v38 = vadd.f32 %v2213_v37, %v2212_v36 }
0x28bc   :  { %v2215_v39 = vrot.slane %v2214_v38, 2 }
0x28be   :  { %v2216_v40 = vadd.f32 %v2215_v39, %v2214_v38 }
0x28c0   :  { %v2217_v41 = vrot.slane %v2216_v40, 1 }
0x28c2   :  { %v2218_v42 = vadd.f32 %v2217_v41, %v2216_v40 }
0x28c4   :  { %v2219_v43 = vmul.f32 %v2218_v42, %v2218_v42 }
0x28c6   :  { %v2220_v44 = vsel %vm26_vm0, %v2219_v43, 0.0 }
0x28c7   :  { %2221 = vadd.xlane.f32.xlu2 %v2220_v44 }
0x293a   :  { %v2222_v45 = vpop.xlane.xlu2 %2221 }
0x293b   :  { %v2223_v46 = vmax.f32 %v2222_v45, 1e-30 }
0x293d   :  { %3563 = vrsqrt.f32 %v2223_v46  ;;  %vm2230_vm2 = vweird.f32 %v2223_v46 }
0x2943   :  { %v3564_v47 = vpop.eup %3563 }
0x2944   :  { %v2225_v48 = vmul.f32 %v3564_v47, %v2223_v46  ;;  %vm2231_vm1 = vweird.f32 %v3564_v47 }
0x2945   :  { %vm2232_vm3 = vmor %vm2230_vm2, %vm2231_vm1 }
0x2946   :  { %v2226_v2 = vmul.f32 %v3564_v47, %v2225_v48 }
0x2948   :  { %v2227_v60 = vmul.f32 0.5, %v2226_v2 }
0x294a   :  { %v2228_v49 = vsub.f32 1.5, %v2227_v60 }
0x294c   :  { %v2229_v62 = vmul.f32 %v3564_v47, %v2228_v49 }
0x294e   :  { %v2233_v5 = vsel %vm2232_vm3, %v3564_v47, %v2229_v62 }
0x294f   :  { %v2234_v1 = vmul.f32 %v2233_v5, %v2218_v42 }
0x2951   :  { %v2237_v50 = vmul.f32 %v4186_v55, %v2234_v1  ;;  %v2236_v61 = vmul.f32 %v4192_v57, %v2234_v1  ;;  %v2235_v4 = vmul.f32 %v4198_v59, %v2234_v1 }
0x2953   :  { %v2244_v9 = vsel %vm26_vm0, %v2237_v50, 0.0  ;;  %v2241_v0 = vsel %vm26_vm0, %v2236_v61, 0.0  ;;  %v2238_v51 = vsel %vm26_vm0, %v2235_v4, 0.0 }
0x2954   :  { %2245 = vadd.xlane.f32.xlu2 %v2244_v9  ;;  %2242 = vadd.xlane.f32.xlu1 %v2241_v0 }
0x2955   :  { %2239 = vadd.xlane.f32.xlu0 %v2238_v51 }
0x29c7   :  { %v2243_v3 = vpop.xlane.xlu1 %2242  ;;  %v2246_v6 = vpop.xlane.xlu2 %2245 }
0x29c8   :  { %v2248_v8 = vmul.f32 %v2243_v3, %v2243_v3  ;;  %v2240_v52 = vpop.xlane.xlu0 %2239  ;;  %v2249_v54 = vmul.f32 %v2246_v6, %v2246_v6 }
0x29c9   :  { %v2247_v53 = vmul.f32 %v2240_v52, %v2240_v52 }
0x29cb   :  { %v2250_v56 = vadd.f32 %v2248_v8, %v2247_v53 }
0x29cd   :  { %v2251_v58 = vadd.f32 %v2250_v56, %v2249_v54 }
0x29cf   :  { %v2252_v63 = vrot.slane %v2251_v58, 4 }
0x29d1   :  { %v2253_v7 = vadd.f32 %v2252_v63, %v2251_v58 }
0x29d3   :  { %v2254_v10 = vrot.slane %v2253_v7, 2 }
0x29d5   :  { %v2255_v11 = vadd.f32 %v2254_v10, %v2253_v7 }
0x29d7   :  { %v2256_v12 = vrot.slane %v2255_v11, 1 }
0x29d9   :  { %v2257_v13 = vadd.f32 %v2256_v12, %v2255_v11 }
0x29db   :  { %v2258_v14 = vmax.f32 %v2257_v13, 1e-30 }
0x29dd   :  { %3565 = vrsqrt.f32 %v2258_v14  ;;  %vm2265_vm5 = vweird.f32 %v2258_v14 }
0x29e3   :  { %v3566_v15 = vpop.eup %3565 }
0x29e4   :  { %v2260_v16 = vmul.f32 %v3566_v15, %v2258_v14  ;;  %vm2266_vm4 = vweird.f32 %v3566_v15 }
0x29e5   :  { %vm2267_vm6 = vmor %vm2265_vm5, %vm2266_vm4 }
0x29e6   :  { %v2261_v17 = vmul.f32 %v3566_v15, %v2260_v16 }
0x29e8   :  { %v2262_v18 = vmul.f32 0.5, %v2261_v17 }
0x29ea   :  { %v2263_v19 = vsub.f32 1.5, %v2262_v18 }
0x29ec   :  { %v2264_v20 = vmul.f32 %v3566_v15, %v2263_v19 }
0x29ee   :  { %v2268_v21 = vsel %vm2267_vm6, %v3566_v15, %v2264_v20 }
0x29ef   :  { %v2269_v22 = vmul.f32 %v2268_v21, %v2240_v52  ;;  %v2270_v23 = vmul.f32 %v2268_v21, %v2243_v3  ;;  %v2271_v24 = vmul.f32 %v2268_v21, %v2246_v6 }
0x29f1   :  { %v2272_v25 = vmul.f32 %v4198_v59, %v2269_v22  ;;  %v2273_v26 = vmul.f32 %v4192_v57, %v2270_v23  ;;  %v2274_v27 = vmul.f32 %v4186_v55, %v2271_v24 }
0x29f3   :  { %v2275_v28 = vsel %vm26_vm0, %v2272_v25, 0.0  ;;  %v2276_v29 = vsel %vm26_vm0, %v2273_v26, 0.0  ;;  %v2278_v31 = vsel %vm26_vm0, %v2274_v27, 0.0 }
0x29f4   :  { %v2277_v30 = vadd.f32 %v2276_v29, %v2275_v28 }
0x29f6   :  { %v2279_v32 = vadd.f32 %v2278_v31, %v2277_v30 }
0x29f8   :  { %v2280_v33 = vrot.slane %v2279_v32, 4 }
0x29fa   :  { %v2281_v34 = vadd.f32 %v2280_v33, %v2279_v32 }
0x29fc   :  { %v2282_v35 = vrot.slane %v2281_v34, 2 }
0x29fe   :  { %v2283_v36 = vadd.f32 %v2282_v35, %v2281_v34 }
0x2a00   :  { %v2284_v37 = vrot.slane %v2283_v36, 1 }
0x2a02   :  { %v2285_v38 = vadd.f32 %v2284_v37, %v2283_v36 }
0x2a04   :  { %v2286_v39 = vmul.f32 %v2285_v38, %v2285_v38 }
0x2a06   :  { %v2287_v40 = vsel %vm26_vm0, %v2286_v39, 0.0 }
0x2a07   :  { %2288 = vadd.xlane.f32.xlu0 %v2287_v40 }
0x2a7a   :  { %v2289_v41 = vpop.xlane.xlu0 %2288 }
0x2a7b   :  { %v2290_v42 = vmax.f32 %v2289_v41, 1e-30 }
0x2a7d   :  { %3567 = vrsqrt.f32 %v2290_v42  ;;  %vm2297_vm8 = vweird.f32 %v2290_v42 }
0x2a83   :  { %v3568_v43 = vpop.eup %3567 }
0x2a84   :  { %v2292_v44 = vmul.f32 %v3568_v43, %v2290_v42  ;;  %vm2298_vm7 = vweird.f32 %v3568_v43 }
0x2a85   :  { %vm2299_vm9 = vmor %vm2297_vm8, %vm2298_vm7 }
0x2a86   :  { %v2293_v45 = vmul.f32 %v3568_v43, %v2292_v44 }
0x2a88   :  { %v2294_v46 = vmul.f32 0.5, %v2293_v45 }
0x2a8a   :  { %v2295_v47 = vsub.f32 1.5, %v2294_v46 }
0x2a8c   :  { %v2296_v48 = vmul.f32 %v3568_v43, %v2295_v47 }
0x2a8e   :  { %v2300_v2 = vsel %vm2299_vm9, %v3568_v43, %v2296_v48 }
0x2a8f   :  { %v2301_v60 = vmul.f32 %v2300_v2, %v2285_v38 }
0x2a91   :  { %v2304_v49 = vmul.f32 %v4186_v55, %v2301_v60  ;;  %v2303_v62 = vmul.f32 %v4192_v57, %v2301_v60  ;;  %v2302_v5 = vmul.f32 %v4198_v59, %v2301_v60 }
0x2a93   :  { %v2311_v1 = vsel %vm26_vm0, %v2304_v49, 0.0  ;;  %v2308_v50 = vsel %vm26_vm0, %v2303_v62, 0.0  ;;  %v2305_v61 = vsel %vm26_vm0, %v2302_v5, 0.0 }
0x2a94   :  { %2312 = vadd.xlane.f32.xlu0 %v2311_v1  ;;  %2309 = vadd.xlane.f32.xlu2 %v2308_v50 }
0x2a95   :  { %2306 = vadd.xlane.f32.xlu1 %v2305_v61 }
0x2b07   :  { %v2310_v4 = vpop.xlane.xlu2 %2309  ;;  %v2313_v9 = vpop.xlane.xlu0 %2312 }
0x2b08   :  { %v2315_v0 = vmul.f32 %v2310_v4, %v2310_v4  ;;  %v2307_v51 = vpop.xlane.xlu1 %2306  ;;  %v2316_v6 = vmul.f32 %v2313_v9, %v2313_v9 }
0x2b09   :  { %v2314_v3 = vmul.f32 %v2307_v51, %v2307_v51 }
0x2b0b   :  { %v2317_v8 = vadd.f32 %v2315_v0, %v2314_v3 }
0x2b0d   :  { %v2318_v52 = vadd.f32 %v2317_v8, %v2316_v6 }
0x2b0f   :  { %v2319_v53 = vrot.slane %v2318_v52, 4 }
0x2b11   :  { %v2320_v54 = vadd.f32 %v2319_v53, %v2318_v52 }
0x2b13   :  { %v2321_v56 = vrot.slane %v2320_v54, 2 }
0x2b15   :  { %v2322_v58 = vadd.f32 %v2321_v56, %v2320_v54 }
0x2b17   :  { %v2323_v63 = vrot.slane %v2322_v58, 1 }
0x2b19   :  { %v2324_v7 = vadd.f32 %v2323_v63, %v2322_v58 }
0x2b1b   :  { %v2325_v10 = vmax.f32 %v2324_v7, 1e-30 }
0x2b1d   :  { %3569 = vrsqrt.f32 %v2325_v10  ;;  %vm2332_vm11 = vweird.f32 %v2325_v10 }
0x2b23   :  { %v3570_v11 = vpop.eup %3569 }
0x2b24   :  { %v2327_v12 = vmul.f32 %v3570_v11, %v2325_v10  ;;  %vm2333_vm10 = vweird.f32 %v3570_v11 }
0x2b25   :  { %vm2334_vm12 = vmor %vm2332_vm11, %vm2333_vm10 }
0x2b26   :  { %v2328_v13 = vmul.f32 %v3570_v11, %v2327_v12 }
0x2b28   :  { %v2329_v14 = vmul.f32 0.5, %v2328_v13 }
0x2b2a   :  { %v2330_v15 = vsub.f32 1.5, %v2329_v14 }
0x2b2c   :  { %v2331_v16 = vmul.f32 %v3570_v11, %v2330_v15 }
0x2b2e   :  { %v2335_v17 = vsel %vm2334_vm12, %v3570_v11, %v2331_v16 }
0x2b2f   :  { %v2336_v18 = vmul.f32 %v2335_v17, %v2307_v51  ;;  %v2337_v19 = vmul.f32 %v2335_v17, %v2310_v4  ;;  %v2338_v20 = vmul.f32 %v2335_v17, %v2313_v9 }
0x2b31   :  { %v2339_v21 = vmul.f32 %v4198_v59, %v2336_v18  ;;  %v2340_v22 = vmul.f32 %v4192_v57, %v2337_v19  ;;  %v2341_v23 = vmul.f32 %v4186_v55, %v2338_v20 }
0x2b33   :  { %v2342_v24 = vsel %vm26_vm0, %v2339_v21, 0.0  ;;  %v2343_v25 = vsel %vm26_vm0, %v2340_v22, 0.0  ;;  %v2345_v27 = vsel %vm26_vm0, %v2341_v23, 0.0 }
0x2b34   :  { %v2344_v26 = vadd.f32 %v2343_v25, %v2342_v24 }
0x2b36   :  { %v2346_v28 = vadd.f32 %v2345_v27, %v2344_v26 }
0x2b38   :  { %v2347_v29 = vrot.slane %v2346_v28, 4 }
0x2b3a   :  { %v2348_v30 = vadd.f32 %v2347_v29, %v2346_v28 }
0x2b3c   :  { %v2349_v31 = vrot.slane %v2348_v30, 2 }
0x2b3e   :  { %v2350_v32 = vadd.f32 %v2349_v31, %v2348_v30 }
0x2b40   :  { %v2351_v33 = vrot.slane %v2350_v32, 1 }
0x2b42   :  { %v2352_v34 = vadd.f32 %v2351_v33, %v2350_v32 }
0x2b44   :  { %v2353_v35 = vmul.f32 %v2352_v34, %v2352_v34 }
0x2b46   :  { %v2354_v36 = vsel %vm26_vm0, %v2353_v35, 0.0 }
0x2b47   :  { %2355 = vadd.xlane.f32.xlu1 %v2354_v36 }
0x2bba   :  { %v2356_v37 = vpop.xlane.xlu1 %2355 }
0x2bbb   :  { %v2357_v38 = vmax.f32 %v2356_v37, 1e-30 }
0x2bbd   :  { %3571 = vrsqrt.f32 %v2357_v38  ;;  %vm2364_vm14 = vweird.f32 %v2357_v38 }
0x2bc3   :  { %v3572_v39 = vpop.eup %3571 }
0x2bc4   :  { %v2359_v40 = vmul.f32 %v3572_v39, %v2357_v38  ;;  %vm2365_vm13 = vweird.f32 %v3572_v39 }
0x2bc5   :  { %vm2366_vm15 = vmor %vm2364_vm14, %vm2365_vm13 }
0x2bc6   :  { %v2360_v41 = vmul.f32 %v3572_v39, %v2359_v40 }
0x2bc8   :  { %v2361_v42 = vmul.f32 0.5, %v2360_v41 }
0x2bca   :  { %v2362_v43 = vsub.f32 1.5, %v2361_v42 }
0x2bcc   :  { %v2363_v44 = vmul.f32 %v3572_v39, %v2362_v43 }
0x2bce   :  { %v2367_v45 = vsel %vm2366_vm15, %v3572_v39, %v2363_v44 }
0x2bcf   :  { %v2368_v46 = vmul.f32 %v2367_v45, %v2352_v34 }
0x2bd1   :  { %v2371_v47 = vmul.f32 %v4186_v55, %v2368_v46  ;;  %v2370_v48 = vmul.f32 %v4192_v57, %v2368_v46  ;;  %v2369_v2 = vmul.f32 %v4198_v59, %v2368_v46 }
0x2bd3   :  { %v2378_v60 = vsel %vm26_vm0, %v2371_v47, 0.0  ;;  %v2375_v49 = vsel %vm26_vm0, %v2370_v48, 0.0  ;;  %v2372_v62 = vsel %vm26_vm0, %v2369_v2, 0.0 }
0x2bd4   :  { %2379 = vadd.xlane.f32.xlu1 %v2378_v60  ;;  %2376 = vadd.xlane.f32.xlu0 %v2375_v49 }
0x2bd5   :  { %2373 = vadd.xlane.f32.xlu2 %v2372_v62 }
0x2c47   :  { %v2377_v5 = vpop.xlane.xlu0 %2376  ;;  %v2380_v1 = vpop.xlane.xlu1 %2379 }
0x2c48   :  { %v2382_v50 = vmul.f32 %v2377_v5, %v2377_v5  ;;  %v2374_v61 = vpop.xlane.xlu2 %2373  ;;  %v2383_v9 = vmul.f32 %v2380_v1, %v2380_v1 }
0x2c49   :  { %v2381_v4 = vmul.f32 %v2374_v61, %v2374_v61 }
0x2c4b   :  { %v2384_v0 = vadd.f32 %v2382_v50, %v2381_v4 }
0x2c4d   :  { %v2385_v51 = vadd.f32 %v2384_v0, %v2383_v9 }
0x2c4f   :  { %v2386_v3 = vrot.slane %v2385_v51, 4 }
0x2c51   :  { %v2387_v6 = vadd.f32 %v2386_v3, %v2385_v51 }
0x2c53   :  { %v2388_v8 = vrot.slane %v2387_v6, 2 }
0x2c55   :  { %v2389_v52 = vadd.f32 %v2388_v8, %v2387_v6 }
0x2c57   :  { %v2390_v53 = vrot.slane %v2389_v52, 1 }
0x2c59   :  { %v2391_v54 = vadd.f32 %v2390_v53, %v2389_v52 }
0x2c5b   :  { %v2392_v56 = vmax.f32 %v2391_v54, 1e-30 }
0x2c5d   :  { %3573 = vrsqrt.f32 %v2392_v56  ;;  %vm2399_vm2 = vweird.f32 %v2392_v56 }
0x2c63   :  { %v3574_v58 = vpop.eup %3573 }
0x2c64   :  { %v2394_v63 = vmul.f32 %v3574_v58, %v2392_v56  ;;  %vm2400_vm1 = vweird.f32 %v3574_v58 }
0x2c65   :  { %vm2401_vm3 = vmor %vm2399_vm2, %vm2400_vm1 }
0x2c66   :  { %v2395_v7 = vmul.f32 %v3574_v58, %v2394_v63 }
0x2c68   :  { %v2396_v10 = vmul.f32 0.5, %v2395_v7 }
0x2c6a   :  { %v2397_v11 = vsub.f32 1.5, %v2396_v10 }
0x2c6c   :  { %v2398_v12 = vmul.f32 %v3574_v58, %v2397_v11 }
0x2c6e   :  { %v2402_v13 = vsel %vm2401_vm3, %v3574_v58, %v2398_v12 }
0x2c6f   :  { %v2403_v14 = vmul.f32 %v2402_v13, %v2374_v61  ;;  %v2404_v15 = vmul.f32 %v2402_v13, %v2377_v5  ;;  %v2405_v16 = vmul.f32 %v2402_v13, %v2380_v1 }
0x2c71   :  { %v2406_v17 = vmul.f32 %v4198_v59, %v2403_v14  ;;  %v2407_v18 = vmul.f32 %v4192_v57, %v2404_v15  ;;  %v2408_v19 = vmul.f32 %v4186_v55, %v2405_v16 }
0x2c73   :  { %v2409_v20 = vsel %vm26_vm0, %v2406_v17, 0.0  ;;  %v2410_v21 = vsel %vm26_vm0, %v2407_v18, 0.0  ;;  %v2412_v23 = vsel %vm26_vm0, %v2408_v19, 0.0 }
0x2c74   :  { %v2411_v22 = vadd.f32 %v2410_v21, %v2409_v20 }
0x2c76   :  { %v2413_v24 = vadd.f32 %v2412_v23, %v2411_v22 }
0x2c78   :  { %v2414_v25 = vrot.slane %v2413_v24, 4 }
0x2c7a   :  { %v2415_v26 = vadd.f32 %v2414_v25, %v2413_v24 }
0x2c7c   :  { %v2416_v27 = vrot.slane %v2415_v26, 2 }
0x2c7e   :  { %v2417_v28 = vadd.f32 %v2416_v27, %v2415_v26 }
0x2c80   :  { %v2418_v29 = vrot.slane %v2417_v28, 1 }
0x2c82   :  { %v2419_v30 = vadd.f32 %v2418_v29, %v2417_v28 }
0x2c84   :  { %v2420_v31 = vmul.f32 %v2419_v30, %v2419_v30 }
0x2c86   :  { %v2421_v32 = vsel %vm26_vm0, %v2420_v31, 0.0 }
0x2c87   :  { %2422 = vadd.xlane.f32.xlu2 %v2421_v32 }
0x2cfa   :  { %v2423_v33 = vpop.xlane.xlu2 %2422 }
0x2cfb   :  { %v2424_v34 = vmax.f32 %v2423_v33, 1e-30 }
0x2cfd   :  { %3575 = vrsqrt.f32 %v2424_v34  ;;  %vm2431_vm5 = vweird.f32 %v2424_v34 }
0x2d03   :  { %v3576_v35 = vpop.eup %3575 }
0x2d04   :  { %v2426_v36 = vmul.f32 %v3576_v35, %v2424_v34  ;;  %vm2432_vm4 = vweird.f32 %v3576_v35 }
0x2d05   :  { %vm2433_vm6 = vmor %vm2431_vm5, %vm2432_vm4 }
0x2d06   :  { %v2427_v37 = vmul.f32 %v3576_v35, %v2426_v36 }
0x2d08   :  { %v2428_v38 = vmul.f32 0.5, %v2427_v37 }
0x2d0a   :  { %v2429_v39 = vsub.f32 1.5, %v2428_v38 }
0x2d0c   :  { %v2430_v40 = vmul.f32 %v3576_v35, %v2429_v39 }
0x2d0e   :  { %v2434_v41 = vsel %vm2433_vm6, %v3576_v35, %v2430_v40 }
0x2d0f   :  { %v2435_v42 = vmul.f32 %v2434_v41, %v2419_v30 }
0x2d11   :  { %v2438_v43 = vmul.f32 %v4186_v55, %v2435_v42  ;;  %v2437_v44 = vmul.f32 %v4192_v57, %v2435_v42  ;;  %v2436_v45 = vmul.f32 %v4198_v59, %v2435_v42 }
0x2d13   :  { %v2445_v46 = vsel %vm26_vm0, %v2438_v43, 0.0  ;;  %v2442_v47 = vsel %vm26_vm0, %v2437_v44, 0.0  ;;  %v2439_v48 = vsel %vm26_vm0, %v2436_v45, 0.0 }
0x2d14   :  { %2446 = vadd.xlane.f32.xlu2 %v2445_v46  ;;  %2443 = vadd.xlane.f32.xlu1 %v2442_v47 }
0x2d15   :  { %2440 = vadd.xlane.f32.xlu0 %v2439_v48 }
0x2d87   :  { %v2444_v2 = vpop.xlane.xlu1 %2443  ;;  %v2447_v60 = vpop.xlane.xlu2 %2446 }
0x2d88   :  { %v2449_v49 = vmul.f32 %v2444_v2, %v2444_v2  ;;  %v2441_v62 = vpop.xlane.xlu0 %2440  ;;  %v2450_v1 = vmul.f32 %v2447_v60, %v2447_v60 }
0x2d89   :  { %v2448_v5 = vmul.f32 %v2441_v62, %v2441_v62 }
0x2d8b   :  { %v2451_v50 = vadd.f32 %v2449_v49, %v2448_v5 }
0x2d8d   :  { %v2452_v61 = vadd.f32 %v2451_v50, %v2450_v1 }
0x2d8f   :  { %v2453_v4 = vrot.slane %v2452_v61, 4 }
0x2d91   :  { %v2454_v9 = vadd.f32 %v2453_v4, %v2452_v61 }
0x2d93   :  { %v2455_v0 = vrot.slane %v2454_v9, 2 }
0x2d95   :  { %v2456_v51 = vadd.f32 %v2455_v0, %v2454_v9 }
0x2d97   :  { %v2457_v3 = vrot.slane %v2456_v51, 1 }
0x2d99   :  { %v2458_v6 = vadd.f32 %v2457_v3, %v2456_v51 }
0x2d9b   :  { %v2459_v8 = vmax.f32 %v2458_v6, 1e-30 }
0x2d9d   :  { %3577 = vrsqrt.f32 %v2459_v8  ;;  %vm2466_vm8 = vweird.f32 %v2459_v8 }
0x2da3   :  { %v3578_v52 = vpop.eup %3577 }
0x2da4   :  { %v2461_v53 = vmul.f32 %v3578_v52, %v2459_v8  ;;  %vm2467_vm7 = vweird.f32 %v3578_v52 }
0x2da5   :  { %vm2468_vm9 = vmor %vm2466_vm8, %vm2467_vm7 }
0x2da6   :  { %v2462_v54 = vmul.f32 %v3578_v52, %v2461_v53 }
0x2da8   :  { %v2463_v56 = vmul.f32 0.5, %v2462_v54 }
0x2daa   :  { %v2464_v58 = vsub.f32 1.5, %v2463_v56  ;;  %v4298_v56 = vld [vmem:[%s4503_s0] sm:$0xff] }
0x2dac   :  { %v2465_v63 = vmul.f32 %v3578_v52, %v2464_v58 }
0x2dae   :  { %v2469_v7 = vsel %vm2468_vm9, %v3578_v52, %v2465_v63  ;;  %v4304_v63 = vld [vmem:[%s4503_s0 + $0x8] sm:$0xff] }
0x2daf   :  { %v2470_v10 = vmul.f32 %v2469_v7, %v2441_v62  ;;  %v2471_v11 = vmul.f32 %v2469_v7, %v2444_v2  ;;  %v2472_v12 = vmul.f32 %v2469_v7, %v2447_v60 }
0x2db1   :  { %v2473_v13 = vmul.f32 %v4198_v59, %v2470_v10  ;;  %v2474_v14 = vmul.f32 %v4192_v57, %v2471_v11  ;;  %v2475_v15 = vmul.f32 %v4186_v55, %v2472_v12  ;;  %v4310_v10 = vld [vmem:[%s4503_s0 + $0x10] sm:$0xff] }
0x2db3   :  { %v2476_v16 = vsel %vm26_vm0, %v2473_v13, 0.0  ;;  %v2477_v17 = vsel %vm26_vm0, %v2474_v14, 0.0  ;;  %v2479_v19 = vsel %vm26_vm0, %v2475_v15, 0.0 }
0x2db4   :  { %v2478_v18 = vadd.f32 %v2477_v17, %v2476_v16 }
0x2db6   :  { %v2480_v20 = vadd.f32 %v2479_v19, %v2478_v18 }
0x2db8   :  { %v2481_v21 = vrot.slane %v2480_v20, 4 }
0x2dba   :  { %v2482_v22 = vadd.f32 %v2481_v21, %v2480_v20 }
0x2dbc   :  { %v2483_v23 = vrot.slane %v2482_v22, 2 }
0x2dbe   :  { %v2484_v24 = vadd.f32 %v2483_v23, %v2482_v22 }
0x2dc0   :  { %v2485_v25 = vrot.slane %v2484_v24, 1 }
0x2dc2   :  { %v2486_v26 = vadd.f32 %v2485_v25, %v2484_v24 }
0x2dc4   :  { %v2487_v27 = vmul.f32 %v2486_v26, %v2486_v26 }
0x2dc6   :  { %v2488_v28 = vsel %vm26_vm0, %v2487_v27, 0.0 }
0x2dc7   :  { %2489 = vadd.xlane.f32.xlu0 %v2488_v28 }
0x2e3a   :  { %v2490_v29 = vpop.xlane.xlu0 %2489 }
0x2e3b   :  { %v2491_v30 = vmax.f32 %v2490_v29, 1e-30 }
0x2e3d   :  { %3579 = vrsqrt.f32 %v2491_v30  ;;  %vm2498_vm11 = vweird.f32 %v2491_v30 }
0x2e43   :  { %v3580_v31 = vpop.eup %3579 }
0x2e44   :  { %v2493_v32 = vmul.f32 %v3580_v31, %v2491_v30  ;;  %vm2499_vm10 = vweird.f32 %v3580_v31 }
0x2e45   :  { %vm2500_vm12 = vmor %vm2498_vm11, %vm2499_vm10 }
0x2e46   :  { %v2494_v33 = vmul.f32 %v3580_v31, %v2493_v32 }
0x2e48   :  { %v2495_v34 = vmul.f32 0.5, %v2494_v33 }
0x2e4a   :  { %v2496_v35 = vsub.f32 1.5, %v2495_v34 }
0x2e4c   :  { %v2497_v36 = vmul.f32 %v3580_v31, %v2496_v35 }
0x2e4e   :  { %v2501_v37 = vsel %vm2500_vm12, %v3580_v31, %v2497_v36 }
0x2e4f   :  { %v2502_v38 = vmul.f32 %v2501_v37, %v2486_v26 }
0x2e51   :  { %v2505_v39 = vmul.f32 %v4186_v55, %v2502_v38  ;;  %v2504_v40 = vmul.f32 %v4192_v57, %v2502_v38  ;;  %v2503_v41 = vmul.f32 %v4198_v59, %v2502_v38 }
0x2e53   :  { %v2512_v42 = vsel %vm26_vm0, %v2505_v39, 0.0  ;;  %v2509_v43 = vsel %vm26_vm0, %v2504_v40, 0.0  ;;  %v2506_v44 = vsel %vm26_vm0, %v2503_v41, 0.0 }
0x2e54   :  { %2513 = vadd.xlane.f32.xlu0 %v2512_v42  ;;  %2510 = vadd.xlane.f32.xlu2 %v2509_v43 }
0x2e55   :  { %2507 = vadd.xlane.f32.xlu1 %v2506_v44 }
0x2ec7   :  { %v2511_v45 = vpop.xlane.xlu2 %2510  ;;  %v2514_v46 = vpop.xlane.xlu0 %2513 }
0x2ec8   :  { %v2516_v47 = vmul.f32 %v2511_v45, %v2511_v45  ;;  %v2508_v48 = vpop.xlane.xlu1 %2507  ;;  %v2517_v60 = vmul.f32 %v2514_v46, %v2514_v46 }
0x2ec9   :  { %v2515_v2 = vmul.f32 %v2508_v48, %v2508_v48 }
0x2ecb   :  { %v2518_v55 = vadd.f32 %v2516_v47, %v2515_v2 }
0x2ecd   :  { %v2519_v49 = vadd.f32 %v2518_v55, %v2517_v60 }
0x2ecf   :  { %v2520_v57 = vrot.slane %v2519_v49, 4 }
0x2ed1   :  { %v2521_v62 = vadd.f32 %v2520_v57, %v2519_v49 }
0x2ed3   :  { %v2522_v59 = vrot.slane %v2521_v62, 2 }
0x2ed5   :  { %v2523_v5 = vadd.f32 %v2522_v59, %v2521_v62 }
0x2ed7   :  { %v2524_v1 = vrot.slane %v2523_v5, 1 }
0x2ed9   :  { %v2525_v50 = vadd.f32 %v2524_v1, %v2523_v5 }
0x2edb   :  { %v2526_v61 = vmax.f32 %v2525_v50, 1e-30 }
0x2edd   :  { %3581 = vrsqrt.f32 %v2526_v61  ;;  %vm2533_vm14 = vweird.f32 %v2526_v61 }
0x2ee3   :  { %v3582_v4 = vpop.eup %3581 }
0x2ee4   :  { %v2528_v9 = vmul.f32 %v3582_v4, %v2526_v61  ;;  %vm2534_vm13 = vweird.f32 %v3582_v4 }
0x2ee5   :  { %vm2535_vm15 = vmor %vm2533_vm14, %vm2534_vm13 }
0x2ee6   :  { %v2529_v0 = vmul.f32 %v3582_v4, %v2528_v9 }
0x2ee8   :  { %v2530_v51 = vmul.f32 0.5, %v2529_v0 }
0x2eea   :  { %v2531_v3 = vsub.f32 1.5, %v2530_v51 }
0x2eec   :  { %v2532_v6 = vmul.f32 %v3582_v4, %v2531_v3 }
0x2eee   :  { %v2536_v8 = vsel %vm2535_vm15, %v3582_v4, %v2532_v6 }
0x2eef   :  { %v2537_v52 = vmul.f32 %v2536_v8, %v2508_v48  ;;  %v2538_v53 = vmul.f32 %v2536_v8, %v2511_v45  ;;  %v2539_v54 = vmul.f32 %v2536_v8, %v2514_v46 }
0x2ef1   :  { %v2540_v58 = vmul.f32 %v4298_v56, %v2537_v52  ;;  %v2541_v7 = vmul.f32 %v4304_v63, %v2538_v53  ;;  %v2542_v11 = vmul.f32 %v4310_v10, %v2539_v54 }
0x2ef3   :  { %v2543_v12 = vsel %vm26_vm0, %v2540_v58, 0.0  ;;  %v2544_v13 = vsel %vm26_vm0, %v2541_v7, 0.0  ;;  %v2546_v15 = vsel %vm26_vm0, %v2542_v11, 0.0 }
0x2ef4   :  { %v2545_v14 = vadd.f32 %v2544_v13, %v2543_v12 }
0x2ef6   :  { %v2547_v16 = vadd.f32 %v2546_v15, %v2545_v14 }
0x2ef8   :  { %v2548_v17 = vrot.slane %v2547_v16, 4 }
0x2efa   :  { %v2549_v18 = vadd.f32 %v2548_v17, %v2547_v16 }
0x2efc   :  { %v2550_v19 = vrot.slane %v2549_v18, 2 }
0x2efe   :  { %v2551_v20 = vadd.f32 %v2550_v19, %v2549_v18 }
0x2f00   :  { %v2552_v21 = vrot.slane %v2551_v20, 1 }
0x2f02   :  { %v2553_v22 = vadd.f32 %v2552_v21, %v2551_v20 }
0x2f04   :  { %v2554_v23 = vmul.f32 %v2553_v22, %v2553_v22 }
0x2f06   :  { %v2555_v24 = vsel %vm26_vm0, %v2554_v23, 0.0 }
0x2f07   :  { %2556 = vadd.xlane.f32.xlu1 %v2555_v24 }
0x2f7a   :  { %v2557_v25 = vpop.xlane.xlu1 %2556 }
0x2f7b   :  { %v2558_v26 = vmax.f32 %v2557_v25, 1e-30 }
0x2f7d   :  { %3583 = vrsqrt.f32 %v2558_v26  ;;  %vm2565_vm2 = vweird.f32 %v2558_v26 }
0x2f83   :  { %v3584_v27 = vpop.eup %3583 }
0x2f84   :  { %v2560_v28 = vmul.f32 %v3584_v27, %v2558_v26  ;;  %vm2566_vm1 = vweird.f32 %v3584_v27 }
0x2f85   :  { %vm2567_vm3 = vmor %vm2565_vm2, %vm2566_vm1 }
0x2f86   :  { %v2561_v29 = vmul.f32 %v3584_v27, %v2560_v28 }
0x2f88   :  { %v2562_v30 = vmul.f32 0.5, %v2561_v29 }
0x2f8a   :  { %v2563_v31 = vsub.f32 1.5, %v2562_v30 }
0x2f8c   :  { %v2564_v32 = vmul.f32 %v3584_v27, %v2563_v31 }
0x2f8e   :  { %v2568_v33 = vsel %vm2567_vm3, %v3584_v27, %v2564_v32 }
0x2f8f   :  { %v2569_v34 = vmul.f32 %v2568_v33, %v2553_v22 }
0x2f91   :  { %v2572_v35 = vmul.f32 %v4310_v10, %v2569_v34  ;;  %v2571_v36 = vmul.f32 %v4304_v63, %v2569_v34  ;;  %v2570_v37 = vmul.f32 %v4298_v56, %v2569_v34 }
0x2f93   :  { %v2579_v38 = vsel %vm26_vm0, %v2572_v35, 0.0  ;;  %v2576_v39 = vsel %vm26_vm0, %v2571_v36, 0.0  ;;  %v2573_v40 = vsel %vm26_vm0, %v2570_v37, 0.0 }
0x2f94   :  { %2580 = vadd.xlane.f32.xlu1 %v2579_v38  ;;  %2577 = vadd.xlane.f32.xlu0 %v2576_v39 }
0x2f95   :  { %2574 = vadd.xlane.f32.xlu2 %v2573_v40 }
0x3007   :  { %v2578_v41 = vpop.xlane.xlu0 %2577  ;;  %v2581_v42 = vpop.xlane.xlu1 %2580 }
0x3008   :  { %v2583_v43 = vmul.f32 %v2578_v41, %v2578_v41  ;;  %v2575_v44 = vpop.xlane.xlu2 %2574  ;;  %v2584_v46 = vmul.f32 %v2581_v42, %v2581_v42 }
0x3009   :  { %v2582_v45 = vmul.f32 %v2575_v44, %v2575_v44 }
0x300b   :  { %v2585_v47 = vadd.f32 %v2583_v43, %v2582_v45 }
0x300d   :  { %v2586_v48 = vadd.f32 %v2585_v47, %v2584_v46 }
0x300f   :  { %v2587_v2 = vrot.slane %v2586_v48, 4 }
0x3011   :  { %v2588_v60 = vadd.f32 %v2587_v2, %v2586_v48 }
0x3013   :  { %v2589_v55 = vrot.slane %v2588_v60, 2 }
0x3015   :  { %v2590_v49 = vadd.f32 %v2589_v55, %v2588_v60 }
0x3017   :  { %v2591_v57 = vrot.slane %v2590_v49, 1 }
0x3019   :  { %v2592_v62 = vadd.f32 %v2591_v57, %v2590_v49 }
0x301b   :  { %v2593_v59 = vmax.f32 %v2592_v62, 1e-30 }
0x301d   :  { %3585 = vrsqrt.f32 %v2593_v59  ;;  %vm2600_vm5 = vweird.f32 %v2593_v59 }
0x3023   :  { %v3586_v5 = vpop.eup %3585 }
0x3024   :  { %v2595_v1 = vmul.f32 %v3586_v5, %v2593_v59  ;;  %vm2601_vm4 = vweird.f32 %v3586_v5 }
0x3025   :  { %vm2602_vm6 = vmor %vm2600_vm5, %vm2601_vm4 }
0x3026   :  { %v2596_v50 = vmul.f32 %v3586_v5, %v2595_v1 }
0x3028   :  { %v2597_v61 = vmul.f32 0.5, %v2596_v50 }
0x302a   :  { %v2598_v4 = vsub.f32 1.5, %v2597_v61 }
0x302c   :  { %v2599_v9 = vmul.f32 %v3586_v5, %v2598_v4 }
0x302e   :  { %v2603_v0 = vsel %vm2602_vm6, %v3586_v5, %v2599_v9 }
0x302f   :  { %v2604_v51 = vmul.f32 %v2603_v0, %v2575_v44  ;;  %v2605_v3 = vmul.f32 %v2603_v0, %v2578_v41  ;;  %v2606_v6 = vmul.f32 %v2603_v0, %v2581_v42 }
0x3031   :  { %v2607_v8 = vmul.f32 %v4298_v56, %v2604_v51  ;;  %v2608_v52 = vmul.f32 %v4304_v63, %v2605_v3  ;;  %v2609_v53 = vmul.f32 %v4310_v10, %v2606_v6 }
0x3033   :  { %v2610_v54 = vsel %vm26_vm0, %v2607_v8, 0.0  ;;  %v2611_v58 = vsel %vm26_vm0, %v2608_v52, 0.0  ;;  %v2613_v11 = vsel %vm26_vm0, %v2609_v53, 0.0 }
0x3034   :  { %v2612_v7 = vadd.f32 %v2611_v58, %v2610_v54 }
0x3036   :  { %v2614_v12 = vadd.f32 %v2613_v11, %v2612_v7 }
0x3038   :  { %v2615_v13 = vrot.slane %v2614_v12, 4 }
0x303a   :  { %v2616_v14 = vadd.f32 %v2615_v13, %v2614_v12 }
0x303c   :  { %v2617_v15 = vrot.slane %v2616_v14, 2 }
0x303e   :  { %v2618_v16 = vadd.f32 %v2617_v15, %v2616_v14 }
0x3040   :  { %v2619_v17 = vrot.slane %v2618_v16, 1 }
0x3042   :  { %v2620_v18 = vadd.f32 %v2619_v17, %v2618_v16 }
0x3044   :  { %v2621_v19 = vmul.f32 %v2620_v18, %v2620_v18 }
0x3046   :  { %v2622_v20 = vsel %vm26_vm0, %v2621_v19, 0.0 }
0x3047   :  { %2623 = vadd.xlane.f32.xlu2 %v2622_v20 }
0x30ba   :  { %v2624_v21 = vpop.xlane.xlu2 %2623 }
0x30bb   :  { %v2625_v22 = vmax.f32 %v2624_v21, 1e-30 }
0x30bd   :  { %3587 = vrsqrt.f32 %v2625_v22  ;;  %vm2632_vm8 = vweird.f32 %v2625_v22 }
0x30c3   :  { %v3588_v23 = vpop.eup %3587 }
0x30c4   :  { %v2627_v24 = vmul.f32 %v3588_v23, %v2625_v22  ;;  %vm2633_vm7 = vweird.f32 %v3588_v23 }
0x30c5   :  { %vm2634_vm9 = vmor %vm2632_vm8, %vm2633_vm7 }
0x30c6   :  { %v2628_v25 = vmul.f32 %v3588_v23, %v2627_v24 }
0x30c8   :  { %v2629_v26 = vmul.f32 0.5, %v2628_v25 }
0x30ca   :  { %v2630_v27 = vsub.f32 1.5, %v2629_v26 }
0x30cc   :  { %v2631_v28 = vmul.f32 %v3588_v23, %v2630_v27 }
0x30ce   :  { %v2635_v29 = vsel %vm2634_vm9, %v3588_v23, %v2631_v28 }
0x30cf   :  { %v2636_v30 = vmul.f32 %v2635_v29, %v2620_v18 }
0x30d1   :  { %v2639_v31 = vmul.f32 %v4310_v10, %v2636_v30  ;;  %v2638_v32 = vmul.f32 %v4304_v63, %v2636_v30  ;;  %v2637_v33 = vmul.f32 %v4298_v56, %v2636_v30 }
0x30d3   :  { %v2646_v34 = vsel %vm26_vm0, %v2639_v31, 0.0  ;;  %v2643_v35 = vsel %vm26_vm0, %v2638_v32, 0.0  ;;  %v2640_v36 = vsel %vm26_vm0, %v2637_v33, 0.0 }
0x30d4   :  { %2647 = vadd.xlane.f32.xlu2 %v2646_v34  ;;  %2644 = vadd.xlane.f32.xlu1 %v2643_v35 }
0x30d5   :  { %2641 = vadd.xlane.f32.xlu0 %v2640_v36 }
0x3147   :  { %v2645_v37 = vpop.xlane.xlu1 %2644  ;;  %v2648_v38 = vpop.xlane.xlu2 %2647 }
0x3148   :  { %v2650_v39 = vmul.f32 %v2645_v37, %v2645_v37  ;;  %v2642_v40 = vpop.xlane.xlu0 %2641  ;;  %v2651_v42 = vmul.f32 %v2648_v38, %v2648_v38 }
0x3149   :  { %v2649_v41 = vmul.f32 %v2642_v40, %v2642_v40 }
0x314b   :  { %v2652_v43 = vadd.f32 %v2650_v39, %v2649_v41 }
0x314d   :  { %v2653_v44 = vadd.f32 %v2652_v43, %v2651_v42 }
0x314f   :  { %v2654_v45 = vrot.slane %v2653_v44, 4 }
0x3151   :  { %v2655_v46 = vadd.f32 %v2654_v45, %v2653_v44 }
0x3153   :  { %v2656_v47 = vrot.slane %v2655_v46, 2 }
0x3155   :  { %v2657_v48 = vadd.f32 %v2656_v47, %v2655_v46 }
0x3157   :  { %v2658_v2 = vrot.slane %v2657_v48, 1 }
0x3159   :  { %v2659_v60 = vadd.f32 %v2658_v2, %v2657_v48 }
0x315b   :  { %v2660_v55 = vmax.f32 %v2659_v60, 1e-30 }
0x315d   :  { %3589 = vrsqrt.f32 %v2660_v55  ;;  %vm2667_vm11 = vweird.f32 %v2660_v55 }
0x3163   :  { %v3590_v49 = vpop.eup %3589 }
0x3164   :  { %v2662_v57 = vmul.f32 %v3590_v49, %v2660_v55  ;;  %vm2668_vm10 = vweird.f32 %v3590_v49 }
0x3165   :  { %vm2669_vm12 = vmor %vm2667_vm11, %vm2668_vm10 }
0x3166   :  { %v2663_v62 = vmul.f32 %v3590_v49, %v2662_v57 }
0x3168   :  { %v2664_v59 = vmul.f32 0.5, %v2663_v62 }
0x316a   :  { %v2665_v5 = vsub.f32 1.5, %v2664_v59 }
0x316c   :  { %v2666_v1 = vmul.f32 %v3590_v49, %v2665_v5 }
0x316e   :  { %v2670_v50 = vsel %vm2669_vm12, %v3590_v49, %v2666_v1 }
0x316f   :  { %v2671_v61 = vmul.f32 %v2670_v50, %v2642_v40  ;;  %v2672_v4 = vmul.f32 %v2670_v50, %v2645_v37  ;;  %v2673_v9 = vmul.f32 %v2670_v50, %v2648_v38 }
0x3171   :  { %v2674_v0 = vmul.f32 %v4298_v56, %v2671_v61  ;;  %v2675_v51 = vmul.f32 %v4304_v63, %v2672_v4  ;;  %v2676_v3 = vmul.f32 %v4310_v10, %v2673_v9 }
0x3173   :  { %v2677_v6 = vsel %vm26_vm0, %v2674_v0, 0.0  ;;  %v2678_v8 = vsel %vm26_vm0, %v2675_v51, 0.0  ;;  %v2680_v53 = vsel %vm26_vm0, %v2676_v3, 0.0 }
0x3174   :  { %v2679_v52 = vadd.f32 %v2678_v8, %v2677_v6 }
0x3176   :  { %v2681_v54 = vadd.f32 %v2680_v53, %v2679_v52 }
0x3178   :  { %v2682_v58 = vrot.slane %v2681_v54, 4 }
0x317a   :  { %v2683_v7 = vadd.f32 %v2682_v58, %v2681_v54 }
0x317c   :  { %v2684_v11 = vrot.slane %v2683_v7, 2 }
0x317e   :  { %v2685_v12 = vadd.f32 %v2684_v11, %v2683_v7 }
0x3180   :  { %v2686_v13 = vrot.slane %v2685_v12, 1 }
0x3182   :  { %v2687_v14 = vadd.f32 %v2686_v13, %v2685_v12 }
0x3184   :  { %v2688_v15 = vmul.f32 %v2687_v14, %v2687_v14 }
0x3186   :  { %v2689_v16 = vsel %vm26_vm0, %v2688_v15, 0.0 }
0x3187   :  { %2690 = vadd.xlane.f32.xlu0 %v2689_v16 }
0x31fa   :  { %v2691_v17 = vpop.xlane.xlu0 %2690 }
0x31fb   :  { %v2692_v18 = vmax.f32 %v2691_v17, 1e-30 }
0x31fd   :  { %3591 = vrsqrt.f32 %v2692_v18  ;;  %vm2699_vm14 = vweird.f32 %v2692_v18 }
0x3203   :  { %v3592_v19 = vpop.eup %3591 }
0x3204   :  { %v2694_v20 = vmul.f32 %v3592_v19, %v2692_v18  ;;  %vm2700_vm13 = vweird.f32 %v3592_v19 }
0x3205   :  { %vm2701_vm15 = vmor %vm2699_vm14, %vm2700_vm13 }
0x3206   :  { %v2695_v21 = vmul.f32 %v3592_v19, %v2694_v20 }
0x3208   :  { %v2696_v22 = vmul.f32 0.5, %v2695_v21 }
0x320a   :  { %v2697_v23 = vsub.f32 1.5, %v2696_v22 }
0x320c   :  { %v2698_v24 = vmul.f32 %v3592_v19, %v2697_v23 }
0x320e   :  { %v2702_v25 = vsel %vm2701_vm15, %v3592_v19, %v2698_v24 }
0x320f   :  { %v2703_v26 = vmul.f32 %v2702_v25, %v2687_v14 }
0x3211   :  { %v2706_v27 = vmul.f32 %v4310_v10, %v2703_v26  ;;  %v2705_v28 = vmul.f32 %v4304_v63, %v2703_v26  ;;  %v2704_v29 = vmul.f32 %v4298_v56, %v2703_v26 }
0x3213   :  { %v2713_v30 = vsel %vm26_vm0, %v2706_v27, 0.0  ;;  %v2710_v31 = vsel %vm26_vm0, %v2705_v28, 0.0  ;;  %v2707_v32 = vsel %vm26_vm0, %v2704_v29, 0.0 }
0x3214   :  { %2714 = vadd.xlane.f32.xlu0 %v2713_v30  ;;  %2711 = vadd.xlane.f32.xlu2 %v2710_v31 }
0x3215   :  { %2708 = vadd.xlane.f32.xlu1 %v2707_v32 }
0x3287   :  { %v2712_v33 = vpop.xlane.xlu2 %2711  ;;  %v2715_v34 = vpop.xlane.xlu0 %2714 }
0x3288   :  { %v2717_v35 = vmul.f32 %v2712_v33, %v2712_v33  ;;  %v2709_v36 = vpop.xlane.xlu1 %2708  ;;  %v2718_v38 = vmul.f32 %v2715_v34, %v2715_v34 }
0x3289   :  { %v2716_v37 = vmul.f32 %v2709_v36, %v2709_v36 }
0x328b   :  { %v2719_v39 = vadd.f32 %v2717_v35, %v2716_v37 }
0x328d   :  { %v2720_v40 = vadd.f32 %v2719_v39, %v2718_v38 }
0x328f   :  { %v2721_v41 = vrot.slane %v2720_v40, 4 }
0x3291   :  { %v2722_v42 = vadd.f32 %v2721_v41, %v2720_v40 }
0x3293   :  { %v2723_v43 = vrot.slane %v2722_v42, 2 }
0x3295   :  { %v2724_v44 = vadd.f32 %v2723_v43, %v2722_v42 }
0x3297   :  { %v2725_v45 = vrot.slane %v2724_v44, 1 }
0x3299   :  { %v2726_v46 = vadd.f32 %v2725_v45, %v2724_v44 }
0x329b   :  { %v2727_v47 = vmax.f32 %v2726_v46, 1e-30 }
0x329d   :  { %3593 = vrsqrt.f32 %v2727_v47  ;;  %vm2734_vm2 = vweird.f32 %v2727_v47 }
0x32a3   :  { %v3594_v48 = vpop.eup %3593 }
0x32a4   :  { %v2729_v2 = vmul.f32 %v3594_v48, %v2727_v47  ;;  %vm2735_vm1 = vweird.f32 %v3594_v48 }
0x32a5   :  { %vm2736_vm3 = vmor %vm2734_vm2, %vm2735_vm1 }
0x32a6   :  { %v2730_v60 = vmul.f32 %v3594_v48, %v2729_v2 }
0x32a8   :  { %v2731_v55 = vmul.f32 0.5, %v2730_v60 }
0x32aa   :  { %v2732_v49 = vsub.f32 1.5, %v2731_v55 }
0x32ac   :  { %v2733_v57 = vmul.f32 %v3594_v48, %v2732_v49 }
0x32ae   :  { %v2737_v62 = vsel %vm2736_vm3, %v3594_v48, %v2733_v57 }
0x32af   :  { %v2738_v59 = vmul.f32 %v2737_v62, %v2709_v36  ;;  %v2739_v5 = vmul.f32 %v2737_v62, %v2712_v33  ;;  %v2740_v1 = vmul.f32 %v2737_v62, %v2715_v34 }
0x32b1   :  { %v2741_v50 = vmul.f32 %v4298_v56, %v2738_v59  ;;  %v2742_v61 = vmul.f32 %v4304_v63, %v2739_v5  ;;  %v2743_v4 = vmul.f32 %v4310_v10, %v2740_v1 }
0x32b3   :  { %v2744_v9 = vsel %vm26_vm0, %v2741_v50, 0.0  ;;  %v2745_v0 = vsel %vm26_vm0, %v2742_v61, 0.0  ;;  %v2747_v3 = vsel %vm26_vm0, %v2743_v4, 0.0 }
0x32b4   :  { %v2746_v51 = vadd.f32 %v2745_v0, %v2744_v9 }
0x32b6   :  { %v2748_v6 = vadd.f32 %v2747_v3, %v2746_v51 }
0x32b8   :  { %v2749_v8 = vrot.slane %v2748_v6, 4 }
0x32ba   :  { %v2750_v52 = vadd.f32 %v2749_v8, %v2748_v6 }
0x32bc   :  { %v2751_v53 = vrot.slane %v2750_v52, 2 }
0x32be   :  { %v2752_v54 = vadd.f32 %v2751_v53, %v2750_v52 }
0x32c0   :  { %v2753_v58 = vrot.slane %v2752_v54, 1 }
0x32c2   :  { %v2754_v7 = vadd.f32 %v2753_v58, %v2752_v54 }
0x32c4   :  { %v2755_v11 = vmul.f32 %v2754_v7, %v2754_v7 }
0x32c6   :  { %v2756_v12 = vsel %vm26_vm0, %v2755_v11, 0.0 }
0x32c7   :  { %2757 = vadd.xlane.f32.xlu1 %v2756_v12 }
0x333a   :  { %v2758_v13 = vpop.xlane.xlu1 %2757 }
0x333b   :  { %v2759_v14 = vmax.f32 %v2758_v13, 1e-30 }
0x333d   :  { %3595 = vrsqrt.f32 %v2759_v14  ;;  %vm2766_vm5 = vweird.f32 %v2759_v14 }
0x3343   :  { %v3596_v15 = vpop.eup %3595 }
0x3344   :  { %v2761_v16 = vmul.f32 %v3596_v15, %v2759_v14  ;;  %vm2767_vm4 = vweird.f32 %v3596_v15 }
0x3345   :  { %vm2768_vm6 = vmor %vm2766_vm5, %vm2767_vm4 }
0x3346   :  { %v2762_v17 = vmul.f32 %v3596_v15, %v2761_v16 }
0x3348   :  { %v2763_v18 = vmul.f32 0.5, %v2762_v17 }
0x334a   :  { %v2764_v19 = vsub.f32 1.5, %v2763_v18 }
0x334c   :  { %v2765_v20 = vmul.f32 %v3596_v15, %v2764_v19 }
0x334e   :  { %v2769_v21 = vsel %vm2768_vm6, %v3596_v15, %v2765_v20 }
0x334f   :  { %v2770_v22 = vmul.f32 %v2769_v21, %v2754_v7 }
0x3351   :  { %v2773_v23 = vmul.f32 %v4310_v10, %v2770_v22  ;;  %v2772_v24 = vmul.f32 %v4304_v63, %v2770_v22  ;;  %v2771_v25 = vmul.f32 %v4298_v56, %v2770_v22 }
0x3353   :  { %v2780_v26 = vsel %vm26_vm0, %v2773_v23, 0.0  ;;  %v2777_v27 = vsel %vm26_vm0, %v2772_v24, 0.0  ;;  %v2774_v28 = vsel %vm26_vm0, %v2771_v25, 0.0 }
0x3354   :  { %2781 = vadd.xlane.f32.xlu1 %v2780_v26  ;;  %2778 = vadd.xlane.f32.xlu0 %v2777_v27 }
0x3355   :  { %2775 = vadd.xlane.f32.xlu2 %v2774_v28 }
0x33c7   :  { %v2779_v29 = vpop.xlane.xlu0 %2778  ;;  %v2782_v30 = vpop.xlane.xlu1 %2781 }
0x33c8   :  { %v2784_v31 = vmul.f32 %v2779_v29, %v2779_v29  ;;  %v2776_v32 = vpop.xlane.xlu2 %2775  ;;  %v2785_v34 = vmul.f32 %v2782_v30, %v2782_v30 }
0x33c9   :  { %v2783_v33 = vmul.f32 %v2776_v32, %v2776_v32 }
0x33cb   :  { %v2786_v35 = vadd.f32 %v2784_v31, %v2783_v33 }
0x33cd   :  { %v2787_v36 = vadd.f32 %v2786_v35, %v2785_v34 }
0x33cf   :  { %v2788_v37 = vrot.slane %v2787_v36, 4 }
0x33d1   :  { %v2789_v38 = vadd.f32 %v2788_v37, %v2787_v36 }
0x33d3   :  { %v2790_v39 = vrot.slane %v2789_v38, 2 }
0x33d5   :  { %v2791_v40 = vadd.f32 %v2790_v39, %v2789_v38 }
0x33d7   :  { %v2792_v41 = vrot.slane %v2791_v40, 1 }
0x33d9   :  { %v2793_v42 = vadd.f32 %v2792_v41, %v2791_v40 }
0x33db   :  { %v2794_v43 = vmax.f32 %v2793_v42, 1e-30 }
0x33dd   :  { %3597 = vrsqrt.f32 %v2794_v43  ;;  %vm2801_vm8 = vweird.f32 %v2794_v43 }
0x33e3   :  { %v3598_v44 = vpop.eup %3597 }
0x33e4   :  { %v2796_v45 = vmul.f32 %v3598_v44, %v2794_v43  ;;  %vm2802_vm7 = vweird.f32 %v3598_v44 }
0x33e5   :  { %vm2803_vm9 = vmor %vm2801_vm8, %vm2802_vm7 }
0x33e6   :  { %v2797_v46 = vmul.f32 %v3598_v44, %v2796_v45 }
0x33e8   :  { %v2798_v47 = vmul.f32 0.5, %v2797_v46 }
0x33ea   :  { %v2799_v48 = vsub.f32 1.5, %v2798_v47 }
0x33ec   :  { %v2800_v2 = vmul.f32 %v3598_v44, %v2799_v48 }
0x33ee   :  { %v2804_v60 = vsel %vm2803_vm9, %v3598_v44, %v2800_v2 }
0x33ef   :  { %v2805_v55 = vmul.f32 %v2804_v60, %v2776_v32  ;;  %v2806_v49 = vmul.f32 %v2804_v60, %v2779_v29  ;;  %v2807_v57 = vmul.f32 %v2804_v60, %v2782_v30 }
0x33f1   :  { %v2808_v62 = vmul.f32 %v4298_v56, %v2805_v55  ;;  %v2809_v59 = vmul.f32 %v4304_v63, %v2806_v49  ;;  %v2810_v5 = vmul.f32 %v4310_v10, %v2807_v57 }
0x33f3   :  { %v2811_v1 = vsel %vm26_vm0, %v2808_v62, 0.0  ;;  %v2812_v50 = vsel %vm26_vm0, %v2809_v59, 0.0  ;;  %v2814_v4 = vsel %vm26_vm0, %v2810_v5, 0.0 }
0x33f4   :  { %v2813_v61 = vadd.f32 %v2812_v50, %v2811_v1 }
0x33f6   :  { %v2815_v9 = vadd.f32 %v2814_v4, %v2813_v61 }
0x33f8   :  { %v2816_v0 = vrot.slane %v2815_v9, 4 }
0x33fa   :  { %v2817_v51 = vadd.f32 %v2816_v0, %v2815_v9 }
0x33fc   :  { %v2818_v3 = vrot.slane %v2817_v51, 2 }
0x33fe   :  { %v2819_v6 = vadd.f32 %v2818_v3, %v2817_v51 }
0x3400   :  { %v2820_v8 = vrot.slane %v2819_v6, 1 }
0x3402   :  { %v2821_v52 = vadd.f32 %v2820_v8, %v2819_v6 }
0x3404   :  { %v2822_v53 = vmul.f32 %v2821_v52, %v2821_v52 }
0x3406   :  { %v2823_v54 = vsel %vm26_vm0, %v2822_v53, 0.0 }
0x3407   :  { %2824 = vadd.xlane.f32.xlu2 %v2823_v54 }
0x347a   :  { %v2825_v58 = vpop.xlane.xlu2 %2824 }
0x347b   :  { %v2826_v7 = vmax.f32 %v2825_v58, 1e-30 }
0x347d   :  { %3599 = vrsqrt.f32 %v2826_v7  ;;  %vm2833_vm11 = vweird.f32 %v2826_v7 }
0x3483   :  { %v3600_v11 = vpop.eup %3599 }
0x3484   :  { %v2828_v12 = vmul.f32 %v3600_v11, %v2826_v7  ;;  %vm2834_vm10 = vweird.f32 %v3600_v11 }
0x3485   :  { %vm2835_vm12 = vmor %vm2833_vm11, %vm2834_vm10 }
0x3486   :  { %v2829_v13 = vmul.f32 %v3600_v11, %v2828_v12 }
0x3488   :  { %v2830_v14 = vmul.f32 0.5, %v2829_v13 }
0x348a   :  { %v2831_v15 = vsub.f32 1.5, %v2830_v14 }
0x348c   :  { %v2832_v16 = vmul.f32 %v3600_v11, %v2831_v15 }
0x348e   :  { %v2836_v17 = vsel %vm2835_vm12, %v3600_v11, %v2832_v16 }
0x348f   :  { %v2837_v18 = vmul.f32 %v2836_v17, %v2821_v52 }
0x3491   :  { %v2840_v19 = vmul.f32 %v4310_v10, %v2837_v18  ;;  %v2839_v20 = vmul.f32 %v4304_v63, %v2837_v18  ;;  %v2838_v21 = vmul.f32 %v4298_v56, %v2837_v18 }
0x3493   :  { %v2847_v22 = vsel %vm26_vm0, %v2840_v19, 0.0  ;;  %v2844_v23 = vsel %vm26_vm0, %v2839_v20, 0.0  ;;  %v2841_v24 = vsel %vm26_vm0, %v2838_v21, 0.0 }
0x3494   :  { %2848 = vadd.xlane.f32.xlu2 %v2847_v22  ;;  %2845 = vadd.xlane.f32.xlu1 %v2844_v23 }
0x3495   :  { %2842 = vadd.xlane.f32.xlu0 %v2841_v24 }
0x3507   :  { %v2846_v25 = vpop.xlane.xlu1 %2845  ;;  %v2849_v26 = vpop.xlane.xlu2 %2848 }
0x3508   :  { %v2851_v27 = vmul.f32 %v2846_v25, %v2846_v25  ;;  %v2843_v28 = vpop.xlane.xlu0 %2842  ;;  %v2852_v30 = vmul.f32 %v2849_v26, %v2849_v26 }
0x3509   :  { %v2850_v29 = vmul.f32 %v2843_v28, %v2843_v28 }
0x350b   :  { %v2853_v31 = vadd.f32 %v2851_v27, %v2850_v29 }
0x350d   :  { %v2854_v32 = vadd.f32 %v2853_v31, %v2852_v30 }
0x350f   :  { %v2855_v33 = vrot.slane %v2854_v32, 4 }
0x3511   :  { %v2856_v34 = vadd.f32 %v2855_v33, %v2854_v32 }
0x3513   :  { %v2857_v35 = vrot.slane %v2856_v34, 2 }
0x3515   :  { %v2858_v36 = vadd.f32 %v2857_v35, %v2856_v34 }
0x3517   :  { %v2859_v37 = vrot.slane %v2858_v36, 1 }
0x3519   :  { %v2860_v38 = vadd.f32 %v2859_v37, %v2858_v36 }
0x351b   :  { %v2861_v39 = vmax.f32 %v2860_v38, 1e-30 }
0x351d   :  { %3601 = vrsqrt.f32 %v2861_v39  ;;  %vm2868_vm14 = vweird.f32 %v2861_v39 }
0x3523   :  { %v3602_v40 = vpop.eup %3601 }
0x3524   :  { %v2863_v41 = vmul.f32 %v3602_v40, %v2861_v39  ;;  %vm2869_vm13 = vweird.f32 %v3602_v40 }
0x3525   :  { %vm2870_vm15 = vmor %vm2868_vm14, %vm2869_vm13 }
0x3526   :  { %v2864_v42 = vmul.f32 %v3602_v40, %v2863_v41 }
0x3528   :  { %v2865_v43 = vmul.f32 0.5, %v2864_v42 }
0x352a   :  { %v2866_v44 = vsub.f32 1.5, %v2865_v43 }
0x352c   :  { %v2867_v45 = vmul.f32 %v3602_v40, %v2866_v44 }
0x352e   :  { %v2871_v46 = vsel %vm2870_vm15, %v3602_v40, %v2867_v45 }
0x352f   :  { %v2872_v47 = vmul.f32 %v2871_v46, %v2843_v28  ;;  %v2873_v48 = vmul.f32 %v2871_v46, %v2846_v25  ;;  %v2874_v2 = vmul.f32 %v2871_v46, %v2849_v26 }
0x3531   :  { %v2875_v60 = vmul.f32 %v4298_v56, %v2872_v47  ;;  %v2876_v55 = vmul.f32 %v4304_v63, %v2873_v48  ;;  %v2877_v49 = vmul.f32 %v4310_v10, %v2874_v2 }
0x3533   :  { %v2878_v57 = vsel %vm26_vm0, %v2875_v60, 0.0  ;;  %v2879_v62 = vsel %vm26_vm0, %v2876_v55, 0.0  ;;  %v2881_v5 = vsel %vm26_vm0, %v2877_v49, 0.0 }
0x3534   :  { %v2880_v59 = vadd.f32 %v2879_v62, %v2878_v57 }
0x3536   :  { %v2882_v1 = vadd.f32 %v2881_v5, %v2880_v59 }
0x3538   :  { %v2883_v50 = vrot.slane %v2882_v1, 4 }
0x353a   :  { %v2884_v61 = vadd.f32 %v2883_v50, %v2882_v1 }
0x353c   :  { %v2885_v4 = vrot.slane %v2884_v61, 2 }
0x353e   :  { %v2886_v9 = vadd.f32 %v2885_v4, %v2884_v61 }
0x3540   :  { %v2887_v0 = vrot.slane %v2886_v9, 1 }
0x3542   :  { %v2888_v51 = vadd.f32 %v2887_v0, %v2886_v9 }
0x3544   :  { %v2889_v3 = vmul.f32 %v2888_v51, %v2888_v51 }
0x3546   :  { %v2890_v6 = vsel %vm26_vm0, %v2889_v3, 0.0 }
0x3547   :  { %2891 = vadd.xlane.f32.xlu0 %v2890_v6 }
0x35ba   :  { %v2892_v8 = vpop.xlane.xlu0 %2891 }
0x35bb   :  { %v2893_v52 = vmax.f32 %v2892_v8, 1e-30 }
0x35bd   :  { %3603 = vrsqrt.f32 %v2893_v52  ;;  %vm2900_vm2 = vweird.f32 %v2893_v52 }
0x35c3   :  { %v3604_v53 = vpop.eup %3603 }
0x35c4   :  { %v2895_v54 = vmul.f32 %v3604_v53, %v2893_v52  ;;  %vm2901_vm1 = vweird.f32 %v3604_v53 }
0x35c5   :  { %vm2902_vm3 = vmor %vm2900_vm2, %vm2901_vm1 }
0x35c6   :  { %v2896_v58 = vmul.f32 %v3604_v53, %v2895_v54 }
0x35c8   :  { %v2897_v7 = vmul.f32 0.5, %v2896_v58 }
0x35ca   :  { %v2898_v11 = vsub.f32 1.5, %v2897_v7 }
0x35cc   :  { %v2899_v12 = vmul.f32 %v3604_v53, %v2898_v11 }
0x35ce   :  { %v2903_v13 = vsel %vm2902_vm3, %v3604_v53, %v2899_v12 }
0x35cf   :  { %v2904_v14 = vmul.f32 %v2903_v13, %v2888_v51 }
0x35d1   :  { %v2907_v15 = vmul.f32 %v4310_v10, %v2904_v14  ;;  %v2906_v16 = vmul.f32 %v4304_v63, %v2904_v14  ;;  %v2905_v17 = vmul.f32 %v4298_v56, %v2904_v14 }
0x35d3   :  { %v2914_v18 = vsel %vm26_vm0, %v2907_v15, 0.0  ;;  %v2911_v19 = vsel %vm26_vm0, %v2906_v16, 0.0  ;;  %v2908_v20 = vsel %vm26_vm0, %v2905_v17, 0.0 }
0x35d4   :  { %2915 = vadd.xlane.f32.xlu0 %v2914_v18  ;;  %2912 = vadd.xlane.f32.xlu2 %v2911_v19 }
0x35d5   :  { %2909 = vadd.xlane.f32.xlu1 %v2908_v20 }
0x3647   :  { %v2913_v21 = vpop.xlane.xlu2 %2912  ;;  %v2916_v22 = vpop.xlane.xlu0 %2915 }
0x3648   :  { %v2918_v23 = vmul.f32 %v2913_v21, %v2913_v21  ;;  %v2910_v24 = vpop.xlane.xlu1 %2909  ;;  %v2919_v26 = vmul.f32 %v2916_v22, %v2916_v22 }
0x3649   :  { %v2917_v25 = vmul.f32 %v2910_v24, %v2910_v24 }
0x364b   :  { %v2920_v27 = vadd.f32 %v2918_v23, %v2917_v25 }
0x364d   :  { %v2921_v28 = vadd.f32 %v2920_v27, %v2919_v26 }
0x364f   :  { %v2922_v29 = vrot.slane %v2921_v28, 4 }
0x3651   :  { %v2923_v30 = vadd.f32 %v2922_v29, %v2921_v28 }
0x3653   :  { %v2924_v31 = vrot.slane %v2923_v30, 2 }
0x3655   :  { %v2925_v32 = vadd.f32 %v2924_v31, %v2923_v30 }
0x3657   :  { %v2926_v33 = vrot.slane %v2925_v32, 1 }
0x3659   :  { %v2927_v34 = vadd.f32 %v2926_v33, %v2925_v32 }
0x365b   :  { %v2928_v35 = vmax.f32 %v2927_v34, 1e-30 }
0x365d   :  { %3605 = vrsqrt.f32 %v2928_v35  ;;  %vm2935_vm5 = vweird.f32 %v2928_v35 }
0x3663   :  { %v3606_v36 = vpop.eup %3605 }
0x3664   :  { %v2930_v37 = vmul.f32 %v3606_v36, %v2928_v35  ;;  %vm2936_vm4 = vweird.f32 %v3606_v36 }
0x3665   :  { %vm2937_vm6 = vmor %vm2935_vm5, %vm2936_vm4 }
0x3666   :  { %v2931_v38 = vmul.f32 %v3606_v36, %v2930_v37 }
0x3668   :  { %v2932_v39 = vmul.f32 0.5, %v2931_v38 }
0x366a   :  { %v2933_v40 = vsub.f32 1.5, %v2932_v39 }
0x366c   :  { %v2934_v41 = vmul.f32 %v3606_v36, %v2933_v40 }
0x366e   :  { %v2938_v42 = vsel %vm2937_vm6, %v3606_v36, %v2934_v41 }
0x366f   :  { %v2939_v43 = vmul.f32 %v2938_v42, %v2910_v24  ;;  %v2940_v44 = vmul.f32 %v2938_v42, %v2913_v21  ;;  %v2941_v45 = vmul.f32 %v2938_v42, %v2916_v22 }
0x3671   :  { %v2942_v46 = vmul.f32 %v4298_v56, %v2939_v43  ;;  %v2943_v47 = vmul.f32 %v4304_v63, %v2940_v44  ;;  %v2944_v48 = vmul.f32 %v4310_v10, %v2941_v45 }
0x3673   :  { %v2945_v2 = vsel %vm26_vm0, %v2942_v46, 0.0  ;;  %v2946_v60 = vsel %vm26_vm0, %v2943_v47, 0.0  ;;  %v2948_v49 = vsel %vm26_vm0, %v2944_v48, 0.0 }
0x3674   :  { %v2947_v55 = vadd.f32 %v2946_v60, %v2945_v2 }
0x3676   :  { %v2949_v57 = vadd.f32 %v2948_v49, %v2947_v55 }
0x3678   :  { %v2950_v62 = vrot.slane %v2949_v57, 4 }
0x367a   :  { %v2951_v59 = vadd.f32 %v2950_v62, %v2949_v57 }
0x367c   :  { %v2952_v5 = vrot.slane %v2951_v59, 2 }
0x367e   :  { %v2953_v1 = vadd.f32 %v2952_v5, %v2951_v59 }
0x3680   :  { %v2954_v50 = vrot.slane %v2953_v1, 1 }
0x3682   :  { %v2955_v61 = vadd.f32 %v2954_v50, %v2953_v1 }
0x3684   :  { %v2956_v4 = vmul.f32 %v2955_v61, %v2955_v61 }
0x3686   :  { %v2957_v9 = vsel %vm26_vm0, %v2956_v4, 0.0 }
0x3687   :  { %2958 = vadd.xlane.f32.xlu1 %v2957_v9 }
0x36fa   :  { %v2959_v0 = vpop.xlane.xlu1 %2958 }
0x36fb   :  { %v2960_v51 = vmax.f32 %v2959_v0, 1e-30 }
0x36fd   :  { %3607 = vrsqrt.f32 %v2960_v51  ;;  %vm2967_vm8 = vweird.f32 %v2960_v51 }
0x3703   :  { %v3608_v3 = vpop.eup %3607 }
0x3704   :  { %v2962_v6 = vmul.f32 %v3608_v3, %v2960_v51  ;;  %vm2968_vm7 = vweird.f32 %v3608_v3 }
0x3705   :  { %vm2969_vm9 = vmor %vm2967_vm8, %vm2968_vm7 }
0x3706   :  { %v2963_v8 = vmul.f32 %v3608_v3, %v2962_v6  ;;  %v4411_v6 = vld [vmem:[%s4503_s0 + $0x10] sm:$0xff] }
0x3708   :  { %v2964_v52 = vmul.f32 0.5, %v2963_v8 }
0x370a   :  { %v2965_v53 = vsub.f32 1.5, %v2964_v52  ;;  %v4417_v52 = vld [vmem:[%s4503_s0 + $0x8] sm:$0xff] }
0x370c   :  { %v2966_v54 = vmul.f32 %v3608_v3, %v2965_v53 }
0x370e   :  { %v2970_v58 = vsel %vm2969_vm9, %v3608_v3, %v2966_v54  ;;  %v4423_v54 = vld [vmem:[%s4503_s0] sm:$0xff] }
0x370f   :  { %v2971_v7 = vmul.f32 %v2970_v58, %v2955_v61 }
0x3711   :  { %v2974_v11 = vmul.f32 %v4310_v10, %v2971_v7  ;;  %v2973_v12 = vmul.f32 %v4304_v63, %v2971_v7  ;;  %v2972_v13 = vmul.f32 %v4298_v56, %v2971_v7 }
0x3713   :  { %v2981_v14 = vsel %vm26_vm0, %v2974_v11, 0.0  ;;  %v2978_v15 = vsel %vm26_vm0, %v2973_v12, 0.0  ;;  %v2975_v16 = vsel %vm26_vm0, %v2972_v13, 0.0 }
0x3714   :  { %2982 = vadd.xlane.f32.xlu1 %v2981_v14  ;;  %2979 = vadd.xlane.f32.xlu0 %v2978_v15 }
0x3715   :  { %2976 = vadd.xlane.f32.xlu2 %v2975_v16 }
0x3787   :  { %v2980_v17 = vpop.xlane.xlu0 %2979  ;;  %v2983_v18 = vpop.xlane.xlu1 %2982 }
0x3788   :  { %v2985_v19 = vmul.f32 %v2980_v17, %v2980_v17  ;;  %v2977_v20 = vpop.xlane.xlu2 %2976  ;;  %v2986_v22 = vmul.f32 %v2983_v18, %v2983_v18 }
0x3789   :  { %v2984_v21 = vmul.f32 %v2977_v20, %v2977_v20 }
0x378b   :  { %v2987_v23 = vadd.f32 %v2985_v19, %v2984_v21 }
0x378d   :  { %v2988_v24 = vadd.f32 %v2987_v23, %v2986_v22 }
0x378f   :  { %v2989_v25 = vrot.slane %v2988_v24, 4 }
0x3791   :  { %v2990_v26 = vadd.f32 %v2989_v25, %v2988_v24 }
0x3793   :  { %v2991_v27 = vrot.slane %v2990_v26, 2 }
0x3795   :  { %v2992_v28 = vadd.f32 %v2991_v27, %v2990_v26 }
0x3797   :  { %v2993_v29 = vrot.slane %v2992_v28, 1 }
0x3799   :  { %v2994_v30 = vadd.f32 %v2993_v29, %v2992_v28 }
0x379b   :  { %v2995_v31 = vmax.f32 %v2994_v30, 1e-30 }
0x379d   :  { %3609 = vrsqrt.f32 %v2995_v31  ;;  %vm3002_vm11 = vweird.f32 %v2995_v31 }
0x37a3   :  { %v3610_v32 = vpop.eup %3609 }
0x37a4   :  { %v2997_v33 = vmul.f32 %v3610_v32, %v2995_v31  ;;  %vm3003_vm10 = vweird.f32 %v3610_v32 }
0x37a5   :  { %vm3004_vm12 = vmor %vm3002_vm11, %vm3003_vm10 }
0x37a6   :  { %v2998_v34 = vmul.f32 %v3610_v32, %v2997_v33 }
0x37a8   :  { %v2999_v35 = vmul.f32 0.5, %v2998_v34 }
0x37aa   :  { %v3000_v36 = vsub.f32 1.5, %v2999_v35 }
0x37ac   :  { %v3001_v37 = vmul.f32 %v3610_v32, %v3000_v36 }
0x37ae   :  { %v3005_v38 = vsel %vm3004_vm12, %v3610_v32, %v3001_v37 }
0x37af   :  { %v3006_v39 = vmul.f32 %v3005_v38, %v2977_v20  ;;  %v3007_v40 = vmul.f32 %v3005_v38, %v2980_v17  ;;  %v3008_v41 = vmul.f32 %v3005_v38, %v2983_v18 }
0x37b1   :  { %v3009_v42 = vmul.f32 %v4298_v56, %v3006_v39  ;;  %v3010_v43 = vmul.f32 %v4304_v63, %v3007_v40  ;;  %v3011_v44 = vmul.f32 %v4310_v10, %v3008_v41 }
0x37b3   :  { %v3012_v45 = vsel %vm26_vm0, %v3009_v42, 0.0  ;;  %v3013_v46 = vsel %vm26_vm0, %v3010_v43, 0.0  ;;  %v3015_v48 = vsel %vm26_vm0, %v3011_v44, 0.0 }
0x37b4   :  { %v3014_v47 = vadd.f32 %v3013_v46, %v3012_v45 }
0x37b6   :  { %v3016_v2 = vadd.f32 %v3015_v48, %v3014_v47 }
0x37b8   :  { %v3017_v60 = vrot.slane %v3016_v2, 4 }
0x37ba   :  { %v3018_v55 = vadd.f32 %v3017_v60, %v3016_v2 }
0x37bc   :  { %v3019_v49 = vrot.slane %v3018_v55, 2 }
0x37be   :  { %v3020_v57 = vadd.f32 %v3019_v49, %v3018_v55 }
0x37c0   :  { %v3021_v62 = vrot.slane %v3020_v57, 1 }
0x37c2   :  { %v3022_v59 = vadd.f32 %v3021_v62, %v3020_v57 }
0x37c4   :  { %v3023_v5 = vmul.f32 %v3022_v59, %v3022_v59 }
0x37c6   :  { %v3024_v56 = vsel %vm26_vm0, %v3023_v5, 0.0 }
0x37c7   :  { %3025 = vadd.xlane.f32.xlu2 %v3024_v56 }
0x383a   :  { %v3026_v63 = vpop.xlane.xlu2 %3025 }
0x383b   :  { %v3027_v10 = vmax.f32 %v3026_v63, 1e-30 }
0x383d   :  { %3611 = vrsqrt.f32 %v3027_v10  ;;  %vm3034_vm14 = vweird.f32 %v3027_v10 }
0x3843   :  { %v3612_v1 = vpop.eup %3611 }
0x3844   :  { %v3029_v50 = vmul.f32 %v3612_v1, %v3027_v10  ;;  %vm3035_vm13 = vweird.f32 %v3612_v1 }
0x3845   :  { %vm3036_vm15 = vmor %vm3034_vm14, %vm3035_vm13 }
0x3846   :  { %v3030_v61 = vmul.f32 %v3612_v1, %v3029_v50 }
0x3848   :  { %v3031_v4 = vmul.f32 0.5, %v3030_v61 }
0x384a   :  { %v3032_v9 = vsub.f32 1.5, %v3031_v4 }
0x384c   :  { %v3033_v0 = vmul.f32 %v3612_v1, %v3032_v9 }
0x384e   :  { %v3037_v51 = vsel %vm3036_vm15, %v3612_v1, %v3033_v0 }
0x384f   :  { %v3038_v3 = vmul.f32 %v3037_v51, %v3022_v59 }
0x3851   :  { %v3041_v8 = vmul.f32 %v4411_v6, %v3038_v3  ;;  %v3040_v53 = vmul.f32 %v4417_v52, %v3038_v3  ;;  %v3039_v58 = vmul.f32 %v4423_v54, %v3038_v3 }
0x3853   :  { %v3048_v7 = vsel %vm26_vm0, %v3041_v8, 0.0  ;;  %v3045_v11 = vsel %vm26_vm0, %v3040_v53, 0.0  ;;  %v3042_v12 = vsel %vm26_vm0, %v3039_v58, 0.0 }
0x3854   :  { %3049 = vadd.xlane.f32.xlu2 %v3048_v7  ;;  %3046 = vadd.xlane.f32.xlu1 %v3045_v11 }
0x3855   :  { %3043 = vadd.xlane.f32.xlu0 %v3042_v12 }
0x38c7   :  { %v3047_v13 = vpop.xlane.xlu1 %3046  ;;  %v3050_v14 = vpop.xlane.xlu2 %3049 }
0x38c8   :  { %v3052_v15 = vmul.f32 %v3047_v13, %v3047_v13  ;;  %v3044_v16 = vpop.xlane.xlu0 %3043  ;;  %v3053_v18 = vmul.f32 %v3050_v14, %v3050_v14 }
0x38c9   :  { %v3051_v17 = vmul.f32 %v3044_v16, %v3044_v16 }
0x38cb   :  { %v3054_v19 = vadd.f32 %v3052_v15, %v3051_v17 }
0x38cd   :  { %v3055_v20 = vadd.f32 %v3054_v19, %v3053_v18 }
0x38cf   :  { %v3056_v21 = vrot.slane %v3055_v20, 4 }
0x38d1   :  { %v3057_v22 = vadd.f32 %v3056_v21, %v3055_v20 }
0x38d3   :  { %v3058_v23 = vrot.slane %v3057_v22, 2 }
0x38d5   :  { %v3059_v24 = vadd.f32 %v3058_v23, %v3057_v22 }
0x38d7   :  { %v3060_v25 = vrot.slane %v3059_v24, 1 }
0x38d9   :  { %v3061_v26 = vadd.f32 %v3060_v25, %v3059_v24 }
0x38db   :  { %v3062_v27 = vmax.f32 %v3061_v26, 1e-30 }
0x38dd   :  { %3613 = vrsqrt.f32 %v3062_v27  ;;  %vm3069_vm2 = vweird.f32 %v3062_v27 }
0x38e3   :  { %v3614_v28 = vpop.eup %3613 }
0x38e4   :  { %v3064_v29 = vmul.f32 %v3614_v28, %v3062_v27  ;;  %vm3070_vm1 = vweird.f32 %v3614_v28 }
0x38e5   :  { %vm3071_vm3 = vmor %vm3069_vm2, %vm3070_vm1 }
0x38e6   :  { %v3065_v30 = vmul.f32 %v3614_v28, %v3064_v29 }
0x38e8   :  { %v3066_v31 = vmul.f32 0.5, %v3065_v30 }
0x38ea   :  { %v3067_v32 = vsub.f32 1.5, %v3066_v31 }
0x38ec   :  { %v3068_v33 = vmul.f32 %v3614_v28, %v3067_v32 }
0x38ee   :  { %v3072_v34 = vsel %vm3071_vm3, %v3614_v28, %v3068_v33 }
0x38ef   :  { %v3073_v35 = vmul.f32 %v3072_v34, %v3044_v16  ;;  %v3074_v36 = vmul.f32 %v3072_v34, %v3047_v13  ;;  %v3075_v37 = vmul.f32 %v3072_v34, %v3050_v14 }
0x38f1   :  { %v3076_v38 = vmul.f32 %v4423_v54, %v3073_v35  ;;  %v3077_v39 = vmul.f32 %v4417_v52, %v3074_v36  ;;  %v3078_v40 = vmul.f32 %v4411_v6, %v3075_v37 }
0x38f3   :  { %v3079_v41 = vsel %vm26_vm0, %v3076_v38, 0.0  ;;  %v3080_v42 = vsel %vm26_vm0, %v3077_v39, 0.0  ;;  %v3082_v44 = vsel %vm26_vm0, %v3078_v40, 0.0 }
0x38f4   :  { %v3081_v43 = vadd.f32 %v3080_v42, %v3079_v41 }
0x38f6   :  { %v3083_v45 = vadd.f32 %v3082_v44, %v3081_v43 }
0x38f8   :  { %v3084_v46 = vrot.slane %v3083_v45, 4 }
0x38fa   :  { %v3085_v47 = vadd.f32 %v3084_v46, %v3083_v45 }
0x38fc   :  { %v3086_v48 = vrot.slane %v3085_v47, 2 }
0x38fe   :  { %v3087_v2 = vadd.f32 %v3086_v48, %v3085_v47 }
0x3900   :  { %v3088_v60 = vrot.slane %v3087_v2, 1 }
0x3902   :  { %v3089_v55 = vadd.f32 %v3088_v60, %v3087_v2 }
0x3904   :  { %v3090_v49 = vmul.f32 %v3089_v55, %v3089_v55 }
0x3906   :  { %v3091_v57 = vsel %vm26_vm0, %v3090_v49, 0.0 }
0x3907   :  { %3092 = vadd.xlane.f32.xlu0 %v3091_v57 }
0x397a   :  { %v3093_v62 = vpop.xlane.xlu0 %3092 }
0x397b   :  { %v3094_v59 = vmax.f32 %v3093_v62, 1e-30 }
0x397d   :  { %3615 = vrsqrt.f32 %v3094_v59  ;;  %vm3101_vm5 = vweird.f32 %v3094_v59 }
0x3983   :  { %v3616_v5 = vpop.eup %3615 }
0x3984   :  { %v3096_v56 = vmul.f32 %v3616_v5, %v3094_v59  ;;  %vm3102_vm4 = vweird.f32 %v3616_v5 }
0x3985   :  { %vm3103_vm6 = vmor %vm3101_vm5, %vm3102_vm4 }
0x3986   :  { %v3097_v63 = vmul.f32 %v3616_v5, %v3096_v56 }
0x3988   :  { %v3098_v10 = vmul.f32 0.5, %v3097_v63 }
0x398a   :  { %v3099_v1 = vsub.f32 1.5, %v3098_v10 }
0x398c   :  { %v3100_v50 = vmul.f32 %v3616_v5, %v3099_v1 }
0x398e   :  { %v3104_v61 = vsel %vm3103_vm6, %v3616_v5, %v3100_v50 }
0x398f   :  { %v3105_v4 = vmul.f32 %v3104_v61, %v3089_v55 }
0x3991   :  { %v3108_v9 = vmul.f32 %v4411_v6, %v3105_v4  ;;  %v3107_v0 = vmul.f32 %v4417_v52, %v3105_v4  ;;  %v3106_v51 = vmul.f32 %v4423_v54, %v3105_v4 }
0x3993   :  { %v3115_v3 = vsel %vm26_vm0, %v3108_v9, 0.0  ;;  %v3112_v8 = vsel %vm26_vm0, %v3107_v0, 0.0  ;;  %v3109_v53 = vsel %vm26_vm0, %v3106_v51, 0.0 }
0x3994   :  { %3116 = vadd.xlane.f32.xlu0 %v3115_v3  ;;  %3113 = vadd.xlane.f32.xlu2 %v3112_v8 }
0x3995   :  { %3110 = vadd.xlane.f32.xlu1 %v3109_v53 }
0x3a07   :  { %v3114_v58 = vpop.xlane.xlu2 %3113  ;;  %v3117_v7 = vpop.xlane.xlu0 %3116 }
0x3a08   :  { %v3119_v11 = vmul.f32 %v3114_v58, %v3114_v58  ;;  %v3111_v12 = vpop.xlane.xlu1 %3110  ;;  %v3120_v14 = vmul.f32 %v3117_v7, %v3117_v7 }
0x3a09   :  { %v3118_v13 = vmul.f32 %v3111_v12, %v3111_v12 }
0x3a0b   :  { %v3121_v15 = vadd.f32 %v3119_v11, %v3118_v13 }
0x3a0d   :  { %v3122_v16 = vadd.f32 %v3121_v15, %v3120_v14 }
0x3a0f   :  { %v3123_v17 = vrot.slane %v3122_v16, 4 }
0x3a11   :  { %v3124_v18 = vadd.f32 %v3123_v17, %v3122_v16 }
0x3a13   :  { %v3125_v19 = vrot.slane %v3124_v18, 2 }
0x3a15   :  { %v3126_v20 = vadd.f32 %v3125_v19, %v3124_v18 }
0x3a17   :  { %v3127_v21 = vrot.slane %v3126_v20, 1 }
0x3a19   :  { %v3128_v22 = vadd.f32 %v3127_v21, %v3126_v20 }
0x3a1b   :  { %v3129_v23 = vmax.f32 %v3128_v22, 1e-30 }
0x3a1d   :  { %3617 = vrsqrt.f32 %v3129_v23  ;;  %vm3136_vm8 = vweird.f32 %v3129_v23 }
0x3a23   :  { %v3618_v24 = vpop.eup %3617 }
0x3a24   :  { %v3131_v25 = vmul.f32 %v3618_v24, %v3129_v23  ;;  %vm3137_vm7 = vweird.f32 %v3618_v24 }
0x3a25   :  { %vm3138_vm9 = vmor %vm3136_vm8, %vm3137_vm7 }
0x3a26   :  { %v3132_v26 = vmul.f32 %v3618_v24, %v3131_v25 }
0x3a28   :  { %v3133_v27 = vmul.f32 0.5, %v3132_v26 }
0x3a2a   :  { %v3134_v28 = vsub.f32 1.5, %v3133_v27 }
0x3a2c   :  { %v3135_v29 = vmul.f32 %v3618_v24, %v3134_v28 }
0x3a2e   :  { %v3139_v30 = vsel %vm3138_vm9, %v3618_v24, %v3135_v29 }
0x3a2f   :  { %v3140_v31 = vmul.f32 %v3139_v30, %v3111_v12  ;;  %v3141_v32 = vmul.f32 %v3139_v30, %v3114_v58  ;;  %v3142_v33 = vmul.f32 %v3139_v30, %v3117_v7 }
0x3a31   :  { %v3143_v34 = vmul.f32 %v4423_v54, %v3140_v31  ;;  %v3144_v35 = vmul.f32 %v4417_v52, %v3141_v32  ;;  %v3145_v36 = vmul.f32 %v4411_v6, %v3142_v33 }
0x3a33   :  { %v3146_v37 = vsel %vm26_vm0, %v3143_v34, 0.0  ;;  %v3147_v38 = vsel %vm26_vm0, %v3144_v35, 0.0  ;;  %v3149_v40 = vsel %vm26_vm0, %v3145_v36, 0.0 }
0x3a34   :  { %v3148_v39 = vadd.f32 %v3147_v38, %v3146_v37 }
0x3a36   :  { %v3150_v41 = vadd.f32 %v3149_v40, %v3148_v39 }
0x3a38   :  { %v3151_v42 = vrot.slane %v3150_v41, 4 }
0x3a3a   :  { %v3152_v43 = vadd.f32 %v3151_v42, %v3150_v41 }
0x3a3c   :  { %v3153_v44 = vrot.slane %v3152_v43, 2 }
0x3a3e   :  { %v3154_v45 = vadd.f32 %v3153_v44, %v3152_v43 }
0x3a40   :  { %v3155_v46 = vrot.slane %v3154_v45, 1 }
0x3a42   :  { %v3156_v47 = vadd.f32 %v3155_v46, %v3154_v45 }
0x3a44   :  { %v3157_v48 = vmul.f32 %v3156_v47, %v3156_v47 }
0x3a46   :  { %v3158_v2 = vsel %vm26_vm0, %v3157_v48, 0.0 }
0x3a47   :  { %3159 = vadd.xlane.f32.xlu1 %v3158_v2 }
0x3aba   :  { %v3160_v60 = vpop.xlane.xlu1 %3159 }
0x3abb   :  { %v3161_v55 = vmax.f32 %v3160_v60, 1e-30 }
0x3abd   :  { %3619 = vrsqrt.f32 %v3161_v55  ;;  %vm3168_vm11 = vweird.f32 %v3161_v55 }
0x3ac3   :  { %v3620_v49 = vpop.eup %3619 }
0x3ac4   :  { %v3163_v57 = vmul.f32 %v3620_v49, %v3161_v55  ;;  %vm3169_vm10 = vweird.f32 %v3620_v49 }
0x3ac5   :  { %vm3170_vm12 = vmor %vm3168_vm11, %vm3169_vm10 }
0x3ac6   :  { %v3164_v62 = vmul.f32 %v3620_v49, %v3163_v57 }
0x3ac8   :  { %v3165_v59 = vmul.f32 0.5, %v3164_v62 }
0x3aca   :  { %v3166_v5 = vsub.f32 1.5, %v3165_v59 }
0x3acc   :  { %v3167_v56 = vmul.f32 %v3620_v49, %v3166_v5 }
0x3ace   :  { %v3171_v63 = vsel %vm3170_vm12, %v3620_v49, %v3167_v56 }
0x3acf   :  { %v3172_v10 = vmul.f32 %v3171_v63, %v3156_v47 }
0x3ad1   :  { %v3175_v1 = vmul.f32 %v4411_v6, %v3172_v10  ;;  %v3174_v50 = vmul.f32 %v4417_v52, %v3172_v10  ;;  %v3173_v61 = vmul.f32 %v4423_v54, %v3172_v10 }
0x3ad3   :  { %v3182_v4 = vsel %vm26_vm0, %v3175_v1, 0.0  ;;  %v3179_v9 = vsel %vm26_vm0, %v3174_v50, 0.0  ;;  %v3176_v0 = vsel %vm26_vm0, %v3173_v61, 0.0 }
0x3ad4   :  { %3183 = vadd.xlane.f32.xlu1 %v3182_v4  ;;  %3180 = vadd.xlane.f32.xlu0 %v3179_v9 }
0x3ad5   :  { %3177 = vadd.xlane.f32.xlu2 %v3176_v0 }
0x3b47   :  { %v3181_v51 = vpop.xlane.xlu0 %3180  ;;  %v3184_v3 = vpop.xlane.xlu1 %3183 }
0x3b48   :  { %v3186_v8 = vmul.f32 %v3181_v51, %v3181_v51  ;;  %v3178_v53 = vpop.xlane.xlu2 %3177  ;;  %v3187_v7 = vmul.f32 %v3184_v3, %v3184_v3 }
0x3b49   :  { %v3185_v58 = vmul.f32 %v3178_v53, %v3178_v53 }
0x3b4b   :  { %v3188_v11 = vadd.f32 %v3186_v8, %v3185_v58 }
0x3b4d   :  { %v3189_v12 = vadd.f32 %v3188_v11, %v3187_v7 }
0x3b4f   :  { %v3190_v13 = vrot.slane %v3189_v12, 4 }
0x3b51   :  { %v3191_v14 = vadd.f32 %v3190_v13, %v3189_v12 }
0x3b53   :  { %v3192_v15 = vrot.slane %v3191_v14, 2 }
0x3b55   :  { %v3193_v16 = vadd.f32 %v3192_v15, %v3191_v14 }
0x3b57   :  { %v3194_v17 = vrot.slane %v3193_v16, 1 }
0x3b59   :  { %v3195_v18 = vadd.f32 %v3194_v17, %v3193_v16 }
0x3b5b   :  { %v3196_v19 = vmax.f32 %v3195_v18, 1e-30 }
0x3b5d   :  { %3621 = vrsqrt.f32 %v3196_v19  ;;  %vm3203_vm14 = vweird.f32 %v3196_v19 }
0x3b63   :  { %v3622_v20 = vpop.eup %3621 }
0x3b64   :  { %v3198_v21 = vmul.f32 %v3622_v20, %v3196_v19  ;;  %vm3204_vm13 = vweird.f32 %v3622_v20 }
0x3b65   :  { %vm3205_vm15 = vmor %vm3203_vm14, %vm3204_vm13  ;;  %vm3390_vm13 = vcmask 7168  }
0x3b66   :  { %v3199_v22 = vmul.f32 %v3622_v20, %v3198_v21 }
0x3b68   :  { %v3200_v23 = vmul.f32 0.5, %v3199_v22 }
0x3b6a   :  { %v3201_v24 = vsub.f32 1.5, %v3200_v23 }
0x3b6c   :  { %v3202_v25 = vmul.f32 %v3622_v20, %v3201_v24 }
0x3b6e   :  { %v3206_v26 = vsel %vm3205_vm15, %v3622_v20, %v3202_v25 }
0x3b6f   :  { %v3207_v27 = vmul.f32 %v3206_v26, %v3178_v53  ;;  %v3208_v28 = vmul.f32 %v3206_v26, %v3181_v51  ;;  %v3209_v29 = vmul.f32 %v3206_v26, %v3184_v3 }
0x3b71   :  { %v3210_v30 = vmul.f32 %v4423_v54, %v3207_v27  ;;  %v3211_v31 = vmul.f32 %v4417_v52, %v3208_v28  ;;  %v3212_v32 = vmul.f32 %v4411_v6, %v3209_v29 }
0x3b73   :  { %v3213_v33 = vsel %vm26_vm0, %v3210_v30, 0.0  ;;  %v3214_v34 = vsel %vm26_vm0, %v3211_v31, 0.0  ;;  %v3216_v36 = vsel %vm26_vm0, %v3212_v32, 0.0 }
0x3b74   :  { %v3215_v35 = vadd.f32 %v3214_v34, %v3213_v33 }
0x3b76   :  { %v3217_v37 = vadd.f32 %v3216_v36, %v3215_v35 }
0x3b78   :  { %v3218_v38 = vrot.slane %v3217_v37, 4 }
0x3b7a   :  { %v3219_v39 = vadd.f32 %v3218_v38, %v3217_v37 }
0x3b7c   :  { %v3220_v40 = vrot.slane %v3219_v39, 2 }
0x3b7e   :  { %v3221_v41 = vadd.f32 %v3220_v40, %v3219_v39 }
0x3b80   :  { %v3222_v42 = vrot.slane %v3221_v41, 1 }
0x3b82   :  { %v3223_v43 = vadd.f32 %v3222_v42, %v3221_v41 }
0x3b84   :  { %v3224_v44 = vmul.f32 %v3223_v43, %v3223_v43 }
0x3b86   :  { %v3225_v45 = vsel %vm26_vm0, %v3224_v44, 0.0 }
0x3b87   :  { %3226 = vadd.xlane.f32.xlu2 %v3225_v45 }
0x3bfa   :  { %v3227_v46 = vpop.xlane.xlu2 %3226 }
0x3bfb   :  { %v3228_v47 = vmax.f32 %v3227_v46, 1e-30 }
0x3bfd   :  { %3623 = vrsqrt.f32 %v3228_v47  ;;  %vm3235_vm2 = vweird.f32 %v3228_v47 }
0x3c03   :  { %v3624_v48 = vpop.eup %3623 }
0x3c04   :  { %v3230_v2 = vmul.f32 %v3624_v48, %v3228_v47  ;;  %vm3236_vm1 = vweird.f32 %v3624_v48 }
0x3c05   :  { %vm3237_vm3 = vmor %vm3235_vm2, %vm3236_vm1  ;;  %vm3388_vm1 = vcmask 90112  }
0x3c06   :  { %v3231_v60 = vmul.f32 %v3624_v48, %v3230_v2 }
0x3c08   :  { %v3232_v55 = vmul.f32 0.5, %v3231_v60 }
0x3c0a   :  { %v3233_v49 = vsub.f32 1.5, %v3232_v55 }
0x3c0c   :  { %v3234_v57 = vmul.f32 %v3624_v48, %v3233_v49 }
0x3c0e   :  { %v3238_v62 = vsel %vm3237_vm3, %v3624_v48, %v3234_v57  ;;  %vm3386_vm3 = vcmask 0  }
0x3c0f   :  { %v3239_v59 = vmul.f32 %v3238_v62, %v3223_v43 }
0x3c11   :  { %v3242_v5 = vmul.f32 %v4411_v6, %v3239_v59  ;;  %v3241_v56 = vmul.f32 %v4417_v52, %v3239_v59  ;;  %v3240_v63 = vmul.f32 %v4423_v54, %v3239_v59 }
0x3c13   :  { %v3249_v10 = vsel %vm26_vm0, %v3242_v5, 0.0  ;;  %v3246_v1 = vsel %vm26_vm0, %v3241_v56, 0.0  ;;  %v3243_v50 = vsel %vm26_vm0, %v3240_v63, 0.0 }
0x3c14   :  { %3250 = vadd.xlane.f32.xlu2 %v3249_v10  ;;  %3247 = vadd.xlane.f32.xlu1 %v3246_v1 }
0x3c15   :  { %3244 = vadd.xlane.f32.xlu0 %v3243_v50 }
0x3c87   :  { %v3248_v61 = vpop.xlane.xlu1 %3247  ;;  %v3251_v4 = vpop.xlane.xlu2 %3250 }
0x3c88   :  { %v3253_v9 = vmul.f32 %v3248_v61, %v3248_v61  ;;  %v3245_v0 = vpop.xlane.xlu0 %3244  ;;  %v3254_v3 = vmul.f32 %v3251_v4, %v3251_v4 }
0x3c89   :  { %v3252_v51 = vmul.f32 %v3245_v0, %v3245_v0 }
0x3c8b   :  { %v3255_v8 = vadd.f32 %v3253_v9, %v3252_v51 }
0x3c8d   :  { %v3256_v53 = vadd.f32 %v3255_v8, %v3254_v3 }
0x3c8f   :  { %v3257_v58 = vrot.slane %v3256_v53, 4 }
0x3c91   :  { %v3258_v7 = vadd.f32 %v3257_v58, %v3256_v53 }
0x3c93   :  { %v3259_v11 = vrot.slane %v3258_v7, 2 }
0x3c95   :  { %v3260_v12 = vadd.f32 %v3259_v11, %v3258_v7 }
0x3c97   :  { %v3261_v13 = vrot.slane %v3260_v12, 1 }
0x3c99   :  { %v3262_v14 = vadd.f32 %v3261_v13, %v3260_v12 }
0x3c9b   :  { %v3263_v15 = vmax.f32 %v3262_v14, 1e-30 }
0x3c9d   :  { %3625 = vrsqrt.f32 %v3263_v15  ;;  %vm3270_vm5 = vweird.f32 %v3263_v15 }
0x3ca3   :  { %v3626_v16 = vpop.eup %3625 }
0x3ca4   :  { %v3265_v17 = vmul.f32 %v3626_v16, %v3263_v15  ;;  %vm3271_vm4 = vweird.f32 %v3626_v16 }
0x3ca5   :  { %vm3272_vm6 = vmor %vm3270_vm5, %vm3271_vm4 }
0x3ca6   :  { %v3266_v18 = vmul.f32 %v3626_v16, %v3265_v17 }
0x3ca8   :  { %v3267_v19 = vmul.f32 0.5, %v3266_v18 }
0x3caa   :  { %v3268_v20 = vsub.f32 1.5, %v3267_v19 }
0x3cac   :  { %v3269_v21 = vmul.f32 %v3626_v16, %v3268_v20 }
0x3cae   :  { %v3273_v22 = vsel %vm3272_vm6, %v3626_v16, %v3269_v21 }
0x3caf   :  { %v3274_v23 = vmul.f32 %v3273_v22, %v3245_v0  ;;  %v3275_v24 = vmul.f32 %v3273_v22, %v3248_v61  ;;  %v3276_v25 = vmul.f32 %v3273_v22, %v3251_v4 }
0x3cb1   :  { %v3277_v26 = vmul.f32 %v4423_v54, %v3274_v23  ;;  %v3278_v27 = vmul.f32 %v4417_v52, %v3275_v24  ;;  %v3279_v28 = vmul.f32 %v4411_v6, %v3276_v25 }
0x3cb3   :  { %v3280_v29 = vsel %vm26_vm0, %v3277_v26, 0.0  ;;  %v3281_v30 = vsel %vm26_vm0, %v3278_v27, 0.0  ;;  %v3283_v32 = vsel %vm26_vm0, %v3279_v28, 0.0 }
0x3cb4   :  { %v3282_v31 = vadd.f32 %v3281_v30, %v3280_v29 }
0x3cb6   :  { %v3284_v33 = vadd.f32 %v3283_v32, %v3282_v31 }
0x3cb8   :  { %v3285_v34 = vrot.slane %v3284_v33, 4 }
0x3cba   :  { %v3286_v35 = vadd.f32 %v3285_v34, %v3284_v33 }
0x3cbc   :  { %v3287_v36 = vrot.slane %v3286_v35, 2 }
0x3cbe   :  { %v3288_v37 = vadd.f32 %v3287_v36, %v3286_v35 }
0x3cc0   :  { %v3289_v38 = vrot.slane %v3288_v37, 1 }
0x3cc2   :  { %v3290_v39 = vadd.f32 %v3289_v38, %v3288_v37 }
0x3cc4   :  { %v3291_v40 = vmul.f32 %v3290_v39, %v3290_v39 }
0x3cc6   :  { %v3292_v41 = vsel %vm26_vm0, %v3291_v40, 0.0 }
0x3cc7   :  { %3293 = vadd.xlane.f32.xlu0 %v3292_v41 }
0x3d3a   :  { %v3294_v42 = vpop.xlane.xlu0 %3293 }
0x3d3b   :  { %v3295_v43 = vmax.f32 %v3294_v42, 1e-30 }
0x3d3d   :  { %3627 = vrsqrt.f32 %v3295_v43  ;;  %vm3302_vm8 = vweird.f32 %v3295_v43 }
0x3d43   :  { %v3628_v44 = vpop.eup %3627 }
0x3d44   :  { %v3297_v45 = vmul.f32 %v3628_v44, %v3295_v43  ;;  %vm3303_vm7 = vweird.f32 %v3628_v44 }
0x3d45   :  { %vm3304_vm9 = vmor %vm3302_vm8, %vm3303_vm7 }
0x3d46   :  { %v3298_v46 = vmul.f32 %v3628_v44, %v3297_v45 }
0x3d48   :  { %v3299_v47 = vmul.f32 0.5, %v3298_v46 }
0x3d4a   :  { %v3300_v48 = vsub.f32 1.5, %v3299_v47 }
0x3d4c   :  { %v3301_v2 = vmul.f32 %v3628_v44, %v3300_v48 }
0x3d4e   :  { %v3305_v60 = vsel %vm3304_vm9, %v3628_v44, %v3301_v2 }
0x3d4f   :  { %v3306_v55 = vmul.f32 %v3305_v60, %v3290_v39 }
0x3d51   :  { %v3309_v49 = vmul.f32 %v4411_v6, %v3306_v55  ;;  %v3308_v57 = vmul.f32 %v4417_v52, %v3306_v55  ;;  %v3307_v62 = vmul.f32 %v4423_v54, %v3306_v55 }
0x3d53   :  { %v3316_v59 = vsel %vm26_vm0, %v3309_v49, 0.0  ;;  %v3313_v5 = vsel %vm26_vm0, %v3308_v57, 0.0  ;;  %v3310_v56 = vsel %vm26_vm0, %v3307_v62, 0.0 }
0x3d54   :  { %3317 = vadd.xlane.f32.xlu0 %v3316_v59  ;;  %3314 = vadd.xlane.f32.xlu2 %v3313_v5 }
0x3d55   :  { %3311 = vadd.xlane.f32.xlu1 %v3310_v56 }
0x3dc7   :  { %v3315_v63 = vpop.xlane.xlu2 %3314  ;;  %v3318_v10 = vpop.xlane.xlu0 %3317 }
0x3dc8   :  { %v3320_v1 = vmul.f32 %v3315_v63, %v3315_v63  ;;  %v3312_v50 = vpop.xlane.xlu1 %3311  ;;  %v3321_v4 = vmul.f32 %v3318_v10, %v3318_v10 }
0x3dc9   :  { %v3319_v61 = vmul.f32 %v3312_v50, %v3312_v50 }
0x3dcb   :  { %v3322_v9 = vadd.f32 %v3320_v1, %v3319_v61 }
0x3dcd   :  { %v3323_v0 = vadd.f32 %v3322_v9, %v3321_v4 }
0x3dcf   :  { %v3324_v51 = vrot.slane %v3323_v0, 4 }
0x3dd1   :  { %v3325_v3 = vadd.f32 %v3324_v51, %v3323_v0 }
0x3dd3   :  { %v3326_v8 = vrot.slane %v3325_v3, 2 }
0x3dd5   :  { %v3327_v53 = vadd.f32 %v3326_v8, %v3325_v3 }
0x3dd7   :  { %v3328_v58 = vrot.slane %v3327_v53, 1 }
0x3dd9   :  { %v3329_v7 = vadd.f32 %v3328_v58, %v3327_v53 }
0x3ddb   :  { %v3330_v11 = vmax.f32 %v3329_v7, 1e-30 }
0x3ddd   :  { %3629 = vrsqrt.f32 %v3330_v11  ;;  %vm3337_vm11 = vweird.f32 %v3330_v11 }
0x3de3   :  { %v3630_v12 = vpop.eup %3629 }
0x3de4   :  { %v3332_v13 = vmul.f32 %v3630_v12, %v3330_v11  ;;  %vm3338_vm10 = vweird.f32 %v3630_v12 }
0x3de5   :  { %vm3339_vm12 = vmor %vm3337_vm11, %vm3338_vm10 }
0x3de6   :  { %v3333_v14 = vmul.f32 %v3630_v12, %v3332_v13 }
0x3de8   :  { %v3334_v15 = vmul.f32 0.5, %v3333_v14 }
0x3dea   :  { %v3335_v16 = vsub.f32 1.5, %v3334_v15 }
0x3dec   :  { %v3336_v17 = vmul.f32 %v3630_v12, %v3335_v16 }
0x3dee   :  { %v3340_v18 = vsel %vm3339_vm12, %v3630_v12, %v3336_v17 }
0x3def   :  { %v3341_v19 = vmul.f32 %v3340_v18, %v3312_v50  ;;  %v3342_v20 = vmul.f32 %v3340_v18, %v3315_v63  ;;  %v3343_v21 = vmul.f32 %v3340_v18, %v3318_v10 }
0x3df1   :  { %v3344_v22 = vmul.f32 %v4423_v54, %v3341_v19  ;;  %v3345_v23 = vmul.f32 %v4417_v52, %v3342_v20  ;;  %v3346_v24 = vmul.f32 %v4411_v6, %v3343_v21  ;;  %3391 = vst.msk [vmem:[%s4507_s4] sm:$0xff] %vm3390_vm13, %v3341_v19 }
0x3df2   :  { %3392 = vst.msk [vmem:[%s4507_s4 + $0x8] sm:$0xff] %vm3390_vm13, %v3342_v20 }
0x3df3   :  { %v3347_v25 = vsel %vm26_vm0, %v3344_v22, 0.0  ;;  %v3348_v26 = vsel %vm26_vm0, %v3345_v23, 0.0  ;;  %3393 = vst.msk [vmem:[%s4507_s4 + $0x10] sm:$0xff] %vm3390_vm13, %v3343_v21  ;;  %v3350_v52 = vsel %vm26_vm0, %v3346_v24, 0.0  ;;  %s3703_s4 = smov [#allocation4]  }
0x3df4   :  { %v3349_v54 = vadd.f32 %v3348_v26, %v3347_v25  ;;  %s3410_s10 = sshll.u32 %s3703_s4, 4  ;;  %s3411_s10 = int_to_ptr.vmem [resolvable:$true] %s3410_s10 }
0x3df6   :  { %v3351_v6 = vadd.f32 %v3350_v52, %v3349_v54 }
0x3df8   :  { %v3352_v27 = vrot.slane %v3351_v6, 4 }
0x3dfa   :  { %v3353_v28 = vadd.f32 %v3352_v27, %v3351_v6 }
0x3dfc   :  { %v3354_v29 = vrot.slane %v3353_v28, 2 }
0x3dfe   :  { %v3355_v30 = vadd.f32 %v3354_v29, %v3353_v28 }
0x3e00   :  { %v3356_v31 = vrot.slane %v3355_v30, 1 }
0x3e02   :  { %v3357_v32 = vadd.f32 %v3356_v31, %v3355_v30 }
0x3e04   :  { %v3358_v33 = vmul.f32 %v3357_v32, %v3357_v32 }
0x3e06   :  { %v3359_v34 = vsel %vm26_vm0, %v3358_v33, 0.0 }
0x3e07   :  { %3360 = vadd.xlane.f32.xlu1 %v3359_v34 }
0x3e7a   :  { %v3361_v35 = vpop.xlane.xlu1 %3360 }
0x3e7b   :  { %v3362_v36 = vmax.f32 %v3361_v35, 1e-30 }
0x3e7d   :  { %3631 = vrsqrt.f32 %v3362_v36  ;;  %vm3369_vm15 = vweird.f32 %v3362_v36  ;;  %vm3381_vm2 = vcmp.eq.f32.partialorder %v3362_v36, inf  ;;  %v3384_v45 = vand.u32 2147483648, %v3362_v36 }
0x3e7e   :  { %vm3383_vm4 = vcmp.eq.f32.partialorder %v3362_v36, 0.0 }
0x3e83   :  { %v3632_v37 = vpop.eup %3631 }
0x3e84   :  { %v3364_v38 = vmul.f32 %v3632_v37, %v3362_v36  ;;  %vm3370_vm14 = vweird.f32 %v3632_v37 }
0x3e85   :  { %vm3371_vm0 = vmor %vm3369_vm15, %vm3370_vm14 }
0x3e86   :  { %v3365_v39 = vmul.f32 %v3632_v37, %v3364_v38 }
0x3e88   :  { %v3366_v40 = vmul.f32 0.5, %v3365_v39 }
0x3e8a   :  { %v3367_v41 = vsub.f32 1.5, %v3366_v40 }
0x3e8c   :  { %v3368_v42 = vmul.f32 %v3632_v37, %v3367_v41 }
0x3e8e   :  { %v3380_v43 = vmul.f32 %v3368_v42, %v3362_v36  ;;  %v3372_v44 = vsel %vm3371_vm0, %v3632_v37, %v3368_v42 }
0x3e8f   :  { %v3373_v46 = vmul.f32 %v3372_v44, %v3357_v32 }
0x3e90   :  { %v3382_v47 = vsel %vm3381_vm2, %v3362_v36, %v3380_v43 }
0x3e91   :  { %v3385_v48 = vsel %vm3383_vm4, %v3384_v45, %v3382_v47  ;;  %3389 = vst.msk [vmem:[#allocation4] sm:$0x1] %vm3388_vm1, %v3373_v46 }
0x3e92   :  { %3387 = vst.msk [vmem:[#allocation2] sm:$0x1] %vm3386_vm3, %v3385_v48  ;;  %3415 = dma.vmem_to_hbm [thread:$0]  %s3411_s10, 16, %s3413_s13, [#allocation5]  }
0x3e93   :  { %3404 = dma.vmem_to_hbm [thread:$0]  %s3400_s15, 16, %s3402_s18, [#allocation3]  }
0x3e94   :  { %3699 = dma.done.wait [#allocation3], 16  }
0x3e95   :  { %3700 = vsyncadd [#allocation3], 4294967280 }
0x3e96   :  { %3701 = dma.done.wait [#allocation5], 16  }
0x3e97   :  { %3702 = vsyncadd [#allocation5], 4294967280 }
0x3e98   :  { %3428 = vsyncpa [#allocation3], 1 }
0x3e99   :  { %3429 = vsyncpa [#allocation5], 1 }

</bundles_post_ra>
